<compile_context>
chip_gen: v5e
topology: v5e:2x2
jax: 0.10.0
libtpu: 0.0.40
codegen_flags: <defaults>
</compile_context>

<pallas_src>
import functools
import numpy as np
import jax
import jax.numpy as jnp
from jax.experimental import pallas as pl
from jax.experimental.pallas import tpu as pltpu


_DOT = functools.partial(jnp.dot, preferred_element_type=jnp.float32,
                         precision=jax.lax.Precision.HIGHEST)


# ---------------------------------------------------------------------------
# BlockSpec helper: whole array as one VMEM block, replicated across the grid
# ---------------------------------------------------------------------------
def _full_block(shape):
    nd = len(shape)
    return pl.BlockSpec(shape, lambda i, _nd=nd: (0,) * _nd)


# ---------------------------------------------------------------------------
# Fused forward kernel
# ---------------------------------------------------------------------------
def _lenet_fused_kernel(x_ref, t1_ref, b1_ref, s1_ref, t2_ref, b2_ref, s2_ref,
                        wf1_ref, bf1_ref, wf2_ref, bf2_ref, wo_ref, bo_ref,
                        o_ref, p1_scr, p2_scr):
    f32 = jnp.float32
    bt = x_ref.shape[0]
    x = x_ref[...]                                        # (bt, 28, 28), W in lanes

    # ---- conv1 (1->6, k=5) as 5 Toeplitz GEMMs on the MXU + bias + ReLU ----
    # rows = (b, h_out), lanes = (w_out*6 + c)  -> 144 lanes
    acc1 = jnp.zeros((bt * 24, 24 * 6), f32)
    for dh in range(5):
        lhs = x[:, dh:dh + 24, :].reshape(bt * 24, 28)    # layout no-op reshape
        acc1 = acc1 + _DOT(lhs, t1_ref[dh])               # (bt*24, 144)
    y1 = jnp.maximum(acc1 + b1_ref[...], 0.0)

    # ---- maxpool1 2x2 -------------------------------------------------------
    # W-direction: exact even/odd column selection GEMMs + max  -> 72 lanes
    m1 = jnp.maximum(_DOT(y1, s1_ref[0]), _DOT(y1, s1_ref[1]))   # (bt*24, 72)
    # H-direction: stride-2 sublane reads from VMEM scratch
    p1_scr[...] = m1.reshape(bt, 24, 72)
    p1 = jnp.maximum(p1_scr[:, pl.ds(0, 12, stride=2), :],
                     p1_scr[:, pl.ds(1, 12, stride=2), :])       # (bt, 12, 72)

    # ---- conv2 (6->12, k=5) as 5 Toeplitz GEMMs (K=72: w_in x ci fused) -----
    # rows = (b, h_out), lanes = (w_out*12 + co) -> 96 lanes
    acc2 = jnp.zeros((bt * 8, 8 * 12), f32)
    for dh in range(5):
        lhs = p1[:, dh:dh + 8, :].reshape(bt * 8, 72)
        acc2 = acc2 + _DOT(lhs, t2_ref[dh])               # (bt*8, 96)
    y2 = jnp.maximum(acc2 + b2_ref[...], 0.0)

    # ---- maxpool2 2x2 + NCHW flatten (folded into weights) + fc1 ------------
    m2 = jnp.maximum(_DOT(y2, s2_ref[0]), _DOT(y2, s2_ref[1]))   # (bt*8, 48)
    p2_scr[...] = m2.reshape(bt, 8, 48)
    accf = jnp.zeros((bt, 120), f32)
    for hq in range(4):
        v = jnp.max(p2_scr[:, 2 * hq:2 * hq + 2, :], axis=1)     # (bt, 48) H-pool
        accf = accf + _DOT(v, wf1_ref[hq])                       # K=48 GEMM
    h1 = jnp.maximum(accf + bf1_ref[...], 0.0)            # (bt, 120)

    # ---- fc2 + ReLU, out -----------------------------------------------------
    h2 = jnp.maximum(_DOT(h1, wf2_ref[...]) + bf2_ref[...], 0.0)  # (bt, 60)
    logits = _DOT(h2, wo_ref[...]) + bo_ref[...]                  # (bt, 10)
    o_ref[...] = logits.astype(o_ref.dtype)


# ---------------------------------------------------------------------------
# One-time parameter layout preparation (hoisted out of the forward path)
# ---------------------------------------------------------------------------
def prepare_params(params):
    f32 = np.float32
    K1 = np.asarray(params["conv1_w"], f32)        # (6, 1, 5, 5)
    b1 = np.asarray(params["conv1_b"], f32)        # (6,)
    K2 = np.asarray(params["conv2_w"], f32)        # (12, 6, 5, 5)
    b2 = np.asarray(params["conv2_b"], f32)        # (12,)
    F1 = np.asarray(params["fc1_w"], f32)          # (120, 192)

    # conv1 Toeplitz: T1[dh][w_in, w_out*6 + c] = K1[c, 0, dh, w_in - w_out]
    T1 = np.zeros((5, 28, 24 * 6), f32)
    for dh in range(5):
        for dw in range(5):
            for w in range(24):
                T1[dh, w + dw, w * 6:(w + 1) * 6] = K1[:, 0, dh, dw]
    b1t = np.tile(b1, 24).reshape(1, 144)          # lane w*6+c -> b1[c]

    # conv2 Toeplitz: T2[dh][w_in*6 + ci, w_out*12 + co] = K2[co, ci, dh, w_in-w_out]
    T2 = np.zeros((5, 12 * 6, 8 * 12), f32)
    for dh in range(5):
        for dw in range(5):
            for w in range(8):
                T2[dh, (w + dw) * 6:(w + dw) * 6 + 6,
                   w * 12:(w + 1) * 12] = K2[:, :, dh, dw].T
    b2t = np.tile(b2, 8).reshape(1, 96)            # lane w*12+co -> b2[co]

    # W-pool one-hot selection matrices (even / odd columns)
    S1 = np.zeros((2, 144, 72), f32)
    for w2 in range(12):
        for c in range(6):
            S1[0, (2 * w2) * 6 + c, w2 * 6 + c] = 1.0
            S1[1, (2 * w2 + 1) * 6 + c, w2 * 6 + c] = 1.0
    S2 = np.zeros((2, 96, 48), f32)
    for w2 in range(4):
        for co in range(12):
            S2[0, (2 * w2) * 12 + co, w2 * 12 + co] = 1.0
            S2[1, (2 * w2 + 1) * 12 + co, w2 * 12 + co] = 1.0

    # fc1 with the PyTorch NCHW flatten (f = co*16 + h2*4 + w2) folded in:
    # W1[h2][w2*12 + co, n] = fc1_w[n, co*16 + h2*4 + w2]
    W1 = np.zeros((4, 48, 120), f32)
    for h2 in range(4):
        for w2 in range(4):
            for co in range(12):
                W1[h2, w2 * 12 + co, :] = F1[:, co * 16 + h2 * 4 + w2]
    bf1 = np.asarray(params["fc1_b"], f32).reshape(1, 120)

    Wf2 = np.asarray(params["fc2_w"], f32).T       # (120, 60)
    bf2 = np.asarray(params["fc2_b"], f32).reshape(1, 60)
    Wo = np.asarray(params["out_w"], f32).T        # (60, 10)
    bo = np.asarray(params["out_b"], f32).reshape(1, 10)

    prepped = (T1, b1t, S1, T2, b2t, S2, W1, bf1, Wf2, bf2, Wo, bo)
    return tuple(jnp.asarray(a, dtype=jnp.float32) for a in prepped)


# ---------------------------------------------------------------------------
# Forward pass: one fused pallas_call with a (parallel) batch grid
# ---------------------------------------------------------------------------
def network_forward(x_nchw, prepped, batch_tile=None):
    B = x_nchw.shape[0]
    bt = B if batch_tile is None else batch_tile
    assert B % bt == 0
    nb = B // bt

    x = x_nchw.astype(jnp.float32).reshape(B, 28, 28)     # drop C=1, W in lanes

    in_specs = [pl.BlockSpec((bt, 28, 28), lambda i: (i, 0, 0))]
    in_specs += [_full_block(a.shape) for a in prepped]
    out_spec = pl.BlockSpec((bt, 10), lambda i: (i, 0))

    return pl.pallas_call(
        _lenet_fused_kernel,
        out_shape=jax.ShapeDtypeStruct((B, 10), jnp.float32),
        grid=(nb,),
        in_specs=in_specs,
        out_specs=out_spec,
        scratch_shapes=[
            pltpu.VMEM((bt, 24, 72), jnp.float32),   # pool1 H-pool staging
            pltpu.VMEM((bt, 8, 48), jnp.float32),    # pool2 H-pool staging
        ],
        compiler_params=pltpu.CompilerParams(
            dimension_semantics=("parallel",),
            vmem_limit_bytes=8 * 1024 * 1024),
    )(x, *prepped)


# ---------------------------------------------------------------------------
# Pure-JAX reference (no Pallas) for correctness checking
# ---------------------------------------------------------------------------
def reference_forward(x_nchw, params):
    dn = ("NCHW", "OIHW", "NCHW")
    y = jax.lax.conv_general_dilated(x_nchw, params["conv1_w"], (1, 1), "VALID",
                                     dimension_numbers=dn)
    y = jax.nn.relu(y + params["conv1_b"][None, :, None, None])
    y = jax.lax.reduce_window(y, -jnp.inf, jax.lax.max,
                              (1, 1, 2, 2), (1, 1, 2, 2), "VALID")
    y = jax.lax.conv_general_dilated(y, params["conv2_w"], (1, 1), "VALID",
                                     dimension_numbers=dn)
    y = jax.nn.relu(y + params["conv2_b"][None, :, None, None])
    y = jax.lax.reduce_window(y, -jnp.inf, jax.lax.max,
                              (1, 1, 2, 2), (1, 1, 2, 2), "VALID")
    y = y.reshape(y.shape[0], -1)
    y = jax.nn.relu(y @ params["fc1_w"].T + params["fc1_b"])
    y = jax.nn.relu(y @ params["fc2_w"].T + params["fc2_b"])
    return y @ params["out_w"].T + params["out_b"]


# ---------------------------------------------------------------------------
# Deterministic parameter init + driver
# ---------------------------------------------------------------------------
def init_params(key):
    shapes = {
        "conv1_w": (6, 1, 5, 5),   "conv1_b": (6,),
        "conv2_w": (12, 6, 5, 5),  "conv2_b": (12,),
        "fc1_w":  (120, 192),      "fc1_b":  (120,),
        "fc2_w":  (60, 120),       "fc2_b":  (60,),
        "out_w":  (10, 60),        "out_b":  (10,),
    }
    params = {}
    keys = jax.random.split(key, len(shapes))
    for k, (name, shp) in zip(keys, sorted(shapes.items())):
        params[name] = (0.1 * jax.random.normal(k, shp)).astype(jnp.float32)
    return params


if __name__ == "__main__":
    key = jax.random.PRNGKey(0)
    pkey, xkey = jax.random.split(key)
    params = init_params(pkey)
    prepped = prepare_params(params)          # weight layout prep, done once

    # MNIST-like input: batch=4, 1 channel, 28x28 (required by fc1's 12*4*4)
    x = jax.random.normal(xkey, (4, 1, 28, 28), dtype=jnp.float32)

    fwd = jax.jit(network_forward)
    out = jax.block_until_ready(fwd(x, prepped))
    assert out.shape == (4, 10)

    ref = jax.block_until_ready(reference_forward(x, params))
    assert jnp.allclose(out, ref, atol=5e-3, rtol=5e-3), \
        float(jnp.max(jnp.abs(out - ref)))

    print("KERNEL_OK")
</pallas_src>

<mosaic_0001>
module attributes {stable_mosaic.version = 11 : i64} {
  func.func @_lenet_fused_kernel(%arg0: i32, %arg1: memref<4x28x28xf32, #tpu.memory_space<vmem>>, %arg2: memref<5x28x144xf32, #tpu.memory_space<vmem>>, %arg3: memref<1x144xf32, #tpu.memory_space<vmem>>, %arg4: memref<2x144x72xf32, #tpu.memory_space<vmem>>, %arg5: memref<5x72x96xf32, #tpu.memory_space<vmem>>, %arg6: memref<1x96xf32, #tpu.memory_space<vmem>>, %arg7: memref<2x96x48xf32, #tpu.memory_space<vmem>>, %arg8: memref<4x48x120xf32, #tpu.memory_space<vmem>>, %arg9: memref<1x120xf32, #tpu.memory_space<vmem>>, %arg10: memref<120x60xf32, #tpu.memory_space<vmem>>, %arg11: memref<1x60xf32, #tpu.memory_space<vmem>>, %arg12: memref<60x10xf32, #tpu.memory_space<vmem>>, %arg13: memref<1x10xf32, #tpu.memory_space<vmem>>, %arg14: memref<4x10xf32, #tpu.memory_space<vmem>>, %arg15: memref<4x24x72xf32, #tpu.memory_space<vmem>>, %arg16: memref<4x8x48xf32, #tpu.memory_space<vmem>>) attributes {dimension_semantics = [#tpu.dimension_semantics<parallel>], iteration_bounds = array<i64: 1>, scalar_prefetch = 0 : i64, scratch_operands = 2 : i64, tpu.core_type = #tpu.core_type<tc>, window_params = [{transform_indices = @transform_0, window_bounds = array<i64: 4, 28, 28>}, {pipeline_mode = #tpu.pipeline_mode<synchronous>, transform_indices = @transform_1, window_bounds = array<i64: 5, 28, 144>}, {pipeline_mode = #tpu.pipeline_mode<synchronous>, transform_indices = @transform_2, window_bounds = array<i64: 1, 144>}, {pipeline_mode = #tpu.pipeline_mode<synchronous>, transform_indices = @transform_3, window_bounds = array<i64: 2, 144, 72>}, {pipeline_mode = #tpu.pipeline_mode<synchronous>, transform_indices = @transform_4, window_bounds = array<i64: 5, 72, 96>}, {pipeline_mode = #tpu.pipeline_mode<synchronous>, transform_indices = @transform_5, window_bounds = array<i64: 1, 96>}, {pipeline_mode = #tpu.pipeline_mode<synchronous>, transform_indices = @transform_6, window_bounds = array<i64: 2, 96, 48>}, {pipeline_mode = #tpu.pipeline_mode<synchronous>, transform_indices = @transform_7, window_bounds = array<i64: 4, 48, 120>}, {pipeline_mode = #tpu.pipeline_mode<synchronous>, transform_indices = @transform_8, window_bounds = array<i64: 1, 120>}, {pipeline_mode = #tpu.pipeline_mode<synchronous>, transform_indices = @transform_9, window_bounds = array<i64: 120, 60>}, {pipeline_mode = #tpu.pipeline_mode<synchronous>, transform_indices = @transform_10, window_bounds = array<i64: 1, 60>}, {pipeline_mode = #tpu.pipeline_mode<synchronous>, transform_indices = @transform_11, window_bounds = array<i64: 60, 10>}, {pipeline_mode = #tpu.pipeline_mode<synchronous>, transform_indices = @transform_12, window_bounds = array<i64: 1, 10>}, {transform_indices = @transform_13, window_bounds = array<i64: 4, 10>}]} {
    %c0 = arith.constant 0 : index
    %c0_0 = arith.constant 0 : index
    %c0_1 = arith.constant 0 : index
    %0 = vector.load %arg1[%c0, %c0_0, %c0_1] : memref<4x28x28xf32, #tpu.memory_space<vmem>>, vector<4x28x28xf32>
    %cst = arith.constant 0.000000e+00 : f32
    %1 = vector.broadcast %cst : f32 to vector<96x144xf32>
    %2 = vector.extract_strided_slice %0 {offsets = [0, 0, 0], sizes = [4, 24, 28], strides = [1, 1, 1]} : vector<4x28x28xf32> to vector<4x24x28xf32>
    %3 = vector.shape_cast %2 : vector<4x24x28xf32> to vector<96x28xf32>
    %c0_2 = arith.constant 0 : index
    %c0_3 = arith.constant 0 : index
    %c0_4 = arith.constant 0 : index
    %4 = vector.load %arg2[%c0_2, %c0_3, %c0_4] : memref<5x28x144xf32, #tpu.memory_space<vmem>>, vector<1x28x144xf32>
    %5 = vector.shape_cast %4 : vector<1x28x144xf32> to vector<28x144xf32>
    %cst_5 = arith.constant dense<0.000000e+00> : vector<96x144xf32>
    %6 = tpu.matmul %3, %5, %cst_5 {dimension_numbers = #tpu.dot_dimension_numbers<[1], [0], [0], [1], [0, 0, 1, 1], [], []>, precision = #tpu.contract_precision<fp32>} : vector<96x28xf32>, vector<28x144xf32>, vector<96x144xf32> -> vector<96x144xf32>
    %7 = arith.addf %1, %6 : vector<96x144xf32>
    %8 = vector.extract_strided_slice %0 {offsets = [0, 1, 0], sizes = [4, 24, 28], strides = [1, 1, 1]} : vector<4x28x28xf32> to vector<4x24x28xf32>
    %9 = vector.shape_cast %8 : vector<4x24x28xf32> to vector<96x28xf32>
    %c1 = arith.constant 1 : index
    %c0_6 = arith.constant 0 : index
    %c0_7 = arith.constant 0 : index
    %10 = vector.load %arg2[%c1, %c0_6, %c0_7] : memref<5x28x144xf32, #tpu.memory_space<vmem>>, vector<1x28x144xf32>
    %11 = vector.shape_cast %10 : vector<1x28x144xf32> to vector<28x144xf32>
    %cst_8 = arith.constant dense<0.000000e+00> : vector<96x144xf32>
    %12 = tpu.matmul %9, %11, %cst_8 {dimension_numbers = #tpu.dot_dimension_numbers<[1], [0], [0], [1], [0, 0, 1, 1], [], []>, precision = #tpu.contract_precision<fp32>} : vector<96x28xf32>, vector<28x144xf32>, vector<96x144xf32> -> vector<96x144xf32>
    %13 = arith.addf %7, %12 : vector<96x144xf32>
    %14 = vector.extract_strided_slice %0 {offsets = [0, 2, 0], sizes = [4, 24, 28], strides = [1, 1, 1]} : vector<4x28x28xf32> to vector<4x24x28xf32>
    %15 = vector.shape_cast %14 : vector<4x24x28xf32> to vector<96x28xf32>
    %c2 = arith.constant 2 : index
    %c0_9 = arith.constant 0 : index
    %c0_10 = arith.constant 0 : index
    %16 = vector.load %arg2[%c2, %c0_9, %c0_10] : memref<5x28x144xf32, #tpu.memory_space<vmem>>, vector<1x28x144xf32>
    %17 = vector.shape_cast %16 : vector<1x28x144xf32> to vector<28x144xf32>
    %cst_11 = arith.constant dense<0.000000e+00> : vector<96x144xf32>
    %18 = tpu.matmul %15, %17, %cst_11 {dimension_numbers = #tpu.dot_dimension_numbers<[1], [0], [0], [1], [0, 0, 1, 1], [], []>, precision = #tpu.contract_precision<fp32>} : vector<96x28xf32>, vector<28x144xf32>, vector<96x144xf32> -> vector<96x144xf32>
    %19 = arith.addf %13, %18 : vector<96x144xf32>
    %20 = vector.extract_strided_slice %0 {offsets = [0, 3, 0], sizes = [4, 24, 28], strides = [1, 1, 1]} : vector<4x28x28xf32> to vector<4x24x28xf32>
    %21 = vector.shape_cast %20 : vector<4x24x28xf32> to vector<96x28xf32>
    %c3 = arith.constant 3 : index
    %c0_12 = arith.constant 0 : index
    %c0_13 = arith.constant 0 : index
    %22 = vector.load %arg2[%c3, %c0_12, %c0_13] : memref<5x28x144xf32, #tpu.memory_space<vmem>>, vector<1x28x144xf32>
    %23 = vector.shape_cast %22 : vector<1x28x144xf32> to vector<28x144xf32>
    %cst_14 = arith.constant dense<0.000000e+00> : vector<96x144xf32>
    %24 = tpu.matmul %21, %23, %cst_14 {dimension_numbers = #tpu.dot_dimension_numbers<[1], [0], [0], [1], [0, 0, 1, 1], [], []>, precision = #tpu.contract_precision<fp32>} : vector<96x28xf32>, vector<28x144xf32>, vector<96x144xf32> -> vector<96x144xf32>
    %25 = arith.addf %19, %24 : vector<96x144xf32>
    %26 = vector.extract_strided_slice %0 {offsets = [0, 4, 0], sizes = [4, 24, 28], strides = [1, 1, 1]} : vector<4x28x28xf32> to vector<4x24x28xf32>
    %27 = vector.shape_cast %26 : vector<4x24x28xf32> to vector<96x28xf32>
    %c4 = arith.constant 4 : index
    %c0_15 = arith.constant 0 : index
    %c0_16 = arith.constant 0 : index
    %28 = vector.load %arg2[%c4, %c0_15, %c0_16] : memref<5x28x144xf32, #tpu.memory_space<vmem>>, vector<1x28x144xf32>
    %29 = vector.shape_cast %28 : vector<1x28x144xf32> to vector<28x144xf32>
    %cst_17 = arith.constant dense<0.000000e+00> : vector<96x144xf32>
    %30 = tpu.matmul %27, %29, %cst_17 {dimension_numbers = #tpu.dot_dimension_numbers<[1], [0], [0], [1], [0, 0, 1, 1], [], []>, precision = #tpu.contract_precision<fp32>} : vector<96x28xf32>, vector<28x144xf32>, vector<96x144xf32> -> vector<96x144xf32>
    %31 = arith.addf %25, %30 : vector<96x144xf32>
    %c0_18 = arith.constant 0 : index
    %c0_19 = arith.constant 0 : index
    %32 = vector.load %arg3[%c0_18, %c0_19] : memref<1x144xf32, #tpu.memory_space<vmem>>, vector<1x144xf32>
    %33 = vector.broadcast %32 : vector<1x144xf32> to vector<96x144xf32>
    %34 = arith.addf %31, %33 : vector<96x144xf32>
    %cst_20 = arith.constant 0.000000e+00 : f32
    %35 = vector.broadcast %cst_20 : f32 to vector<96x144xf32>
    %36 = arith.maximumf %34, %35 : vector<96x144xf32>
    %c0_21 = arith.constant 0 : index
    %c0_22 = arith.constant 0 : index
    %c0_23 = arith.constant 0 : index
    %37 = vector.load %arg4[%c0_21, %c0_22, %c0_23] : memref<2x144x72xf32, #tpu.memory_space<vmem>>, vector<1x144x72xf32>
    %38 = vector.shape_cast %37 : vector<1x144x72xf32> to vector<144x72xf32>
    %cst_24 = arith.constant dense<0.000000e+00> : vector<96x72xf32>
    %39 = tpu.matmul %36, %38, %cst_24 {dimension_numbers = #tpu.dot_dimension_numbers<[1], [0], [0], [1], [0, 0, 1, 1], [], []>, precision = #tpu.contract_precision<fp32>} : vector<96x144xf32>, vector<144x72xf32>, vector<96x72xf32> -> vector<96x72xf32>
    %c1_25 = arith.constant 1 : index
    %c0_26 = arith.constant 0 : index
    %c0_27 = arith.constant 0 : index
    %40 = vector.load %arg4[%c1_25, %c0_26, %c0_27] : memref<2x144x72xf32, #tpu.memory_space<vmem>>, vector<1x144x72xf32>
    %41 = vector.shape_cast %40 : vector<1x144x72xf32> to vector<144x72xf32>
    %cst_28 = arith.constant dense<0.000000e+00> : vector<96x72xf32>
    %42 = tpu.matmul %36, %41, %cst_28 {dimension_numbers = #tpu.dot_dimension_numbers<[1], [0], [0], [1], [0, 0, 1, 1], [], []>, precision = #tpu.contract_precision<fp32>} : vector<96x144xf32>, vector<144x72xf32>, vector<96x72xf32> -> vector<96x72xf32>
    %43 = arith.maximumf %39, %42 : vector<96x72xf32>
    %44 = vector.shape_cast %43 : vector<96x72xf32> to vector<4x24x72xf32>
    %c0_29 = arith.constant 0 : index
    %c0_30 = arith.constant 0 : index
    %c0_31 = arith.constant 0 : index
    %45 = vector.load %arg15[%c0_29, %c0_30, %c0_31] : memref<4x24x72xf32, #tpu.memory_space<vmem>>, vector<4x24x72xf32>
    tpu.vector_store %arg15[%c0_29, %c0_30, %c0_31], %44 {strides = array<i32>} : memref<4x24x72xf32, #tpu.memory_space<vmem>>, vector<4x24x72xf32>,
    %c0_32 = arith.constant 0 : index
    %c0_33 = arith.constant 0 : index
    %c0_34 = arith.constant 0 : index
    %46 = tpu.strided_load %arg15[%c0_32, %c0_33, %c0_34] {strides = array<i32: 1, 2, 1>} : memref<4x24x72xf32, #tpu.memory_space<vmem>>, vector<4x12x72xf32>
    %c0_35 = arith.constant 0 : index
    %c1_36 = arith.constant 1 : index
    %c0_37 = arith.constant 0 : index
    %47 = tpu.strided_load %arg15[%c0_35, %c1_36, %c0_37] {strides = array<i32: 1, 2, 1>} : memref<4x24x72xf32, #tpu.memory_space<vmem>>, vector<4x12x72xf32>
    %48 = arith.maximumf %46, %47 : vector<4x12x72xf32>
    %cst_38 = arith.constant 0.000000e+00 : f32
    %49 = vector.broadcast %cst_38 : f32 to vector<32x96xf32>
    %50 = vector.extract_strided_slice %48 {offsets = [0, 0, 0], sizes = [4, 8, 72], strides = [1, 1, 1]} : vector<4x12x72xf32> to vector<4x8x72xf32>
    %51 = vector.shape_cast %50 : vector<4x8x72xf32> to vector<32x72xf32>
    %c0_39 = arith.constant 0 : index
    %c0_40 = arith.constant 0 : index
    %c0_41 = arith.constant 0 : index
    %52 = vector.load %arg5[%c0_39, %c0_40, %c0_41] : memref<5x72x96xf32, #tpu.memory_space<vmem>>, vector<1x72x96xf32>
    %53 = vector.shape_cast %52 : vector<1x72x96xf32> to vector<72x96xf32>
    %cst_42 = arith.constant dense<0.000000e+00> : vector<32x96xf32>
    %54 = tpu.matmul %51, %53, %cst_42 {dimension_numbers = #tpu.dot_dimension_numbers<[1], [0], [0], [1], [0, 0, 1, 1], [], []>, precision = #tpu.contract_precision<fp32>} : vector<32x72xf32>, vector<72x96xf32>, vector<32x96xf32> -> vector<32x96xf32>
    %55 = arith.addf %49, %54 : vector<32x96xf32>
    %56 = vector.extract_strided_slice %48 {offsets = [0, 1, 0], sizes = [4, 8, 72], strides = [1, 1, 1]} : vector<4x12x72xf32> to vector<4x8x72xf32>
    %57 = vector.shape_cast %56 : vector<4x8x72xf32> to vector<32x72xf32>
    %c1_43 = arith.constant 1 : index
    %c0_44 = arith.constant 0 : index
    %c0_45 = arith.constant 0 : index
    %58 = vector.load %arg5[%c1_43, %c0_44, %c0_45] : memref<5x72x96xf32, #tpu.memory_space<vmem>>, vector<1x72x96xf32>
    %59 = vector.shape_cast %58 : vector<1x72x96xf32> to vector<72x96xf32>
    %cst_46 = arith.constant dense<0.000000e+00> : vector<32x96xf32>
    %60 = tpu.matmul %57, %59, %cst_46 {dimension_numbers = #tpu.dot_dimension_numbers<[1], [0], [0], [1], [0, 0, 1, 1], [], []>, precision = #tpu.contract_precision<fp32>} : vector<32x72xf32>, vector<72x96xf32>, vector<32x96xf32> -> vector<32x96xf32>
    %61 = arith.addf %55, %60 : vector<32x96xf32>
    %62 = vector.extract_strided_slice %48 {offsets = [0, 2, 0], sizes = [4, 8, 72], strides = [1, 1, 1]} : vector<4x12x72xf32> to vector<4x8x72xf32>
    %63 = vector.shape_cast %62 : vector<4x8x72xf32> to vector<32x72xf32>
    %c2_47 = arith.constant 2 : index
    %c0_48 = arith.constant 0 : index
    %c0_49 = arith.constant 0 : index
    %64 = vector.load %arg5[%c2_47, %c0_48, %c0_49] : memref<5x72x96xf32, #tpu.memory_space<vmem>>, vector<1x72x96xf32>
    %65 = vector.shape_cast %64 : vector<1x72x96xf32> to vector<72x96xf32>
    %cst_50 = arith.constant dense<0.000000e+00> : vector<32x96xf32>
    %66 = tpu.matmul %63, %65, %cst_50 {dimension_numbers = #tpu.dot_dimension_numbers<[1], [0], [0], [1], [0, 0, 1, 1], [], []>, precision = #tpu.contract_precision<fp32>} : vector<32x72xf32>, vector<72x96xf32>, vector<32x96xf32> -> vector<32x96xf32>
    %67 = arith.addf %61, %66 : vector<32x96xf32>
    %68 = vector.extract_strided_slice %48 {offsets = [0, 3, 0], sizes = [4, 8, 72], strides = [1, 1, 1]} : vector<4x12x72xf32> to vector<4x8x72xf32>
    %69 = vector.shape_cast %68 : vector<4x8x72xf32> to vector<32x72xf32>
    %c3_51 = arith.constant 3 : index
    %c0_52 = arith.constant 0 : index
    %c0_53 = arith.constant 0 : index
    %70 = vector.load %arg5[%c3_51, %c0_52, %c0_53] : memref<5x72x96xf32, #tpu.memory_space<vmem>>, vector<1x72x96xf32>
    %71 = vector.shape_cast %70 : vector<1x72x96xf32> to vector<72x96xf32>
    %cst_54 = arith.constant dense<0.000000e+00> : vector<32x96xf32>
    %72 = tpu.matmul %69, %71, %cst_54 {dimension_numbers = #tpu.dot_dimension_numbers<[1], [0], [0], [1], [0, 0, 1, 1], [], []>, precision = #tpu.contract_precision<fp32>} : vector<32x72xf32>, vector<72x96xf32>, vector<32x96xf32> -> vector<32x96xf32>
    %73 = arith.addf %67, %72 : vector<32x96xf32>
    %74 = vector.extract_strided_slice %48 {offsets = [0, 4, 0], sizes = [4, 8, 72], strides = [1, 1, 1]} : vector<4x12x72xf32> to vector<4x8x72xf32>
    %75 = vector.shape_cast %74 : vector<4x8x72xf32> to vector<32x72xf32>
    %c4_55 = arith.constant 4 : index
    %c0_56 = arith.constant 0 : index
    %c0_57 = arith.constant 0 : index
    %76 = vector.load %arg5[%c4_55, %c0_56, %c0_57] : memref<5x72x96xf32, #tpu.memory_space<vmem>>, vector<1x72x96xf32>
    %77 = vector.shape_cast %76 : vector<1x72x96xf32> to vector<72x96xf32>
    %cst_58 = arith.constant dense<0.000000e+00> : vector<32x96xf32>
    %78 = tpu.matmul %75, %77, %cst_58 {dimension_numbers = #tpu.dot_dimension_numbers<[1], [0], [0], [1], [0, 0, 1, 1], [], []>, precision = #tpu.contract_precision<fp32>} : vector<32x72xf32>, vector<72x96xf32>, vector<32x96xf32> -> vector<32x96xf32>
    %79 = arith.addf %73, %78 : vector<32x96xf32>
    %c0_59 = arith.constant 0 : index
    %c0_60 = arith.constant 0 : index
    %80 = vector.load %arg6[%c0_59, %c0_60] : memref<1x96xf32, #tpu.memory_space<vmem>>, vector<1x96xf32>
    %81 = vector.broadcast %80 : vector<1x96xf32> to vector<32x96xf32>
    %82 = arith.addf %79, %81 : vector<32x96xf32>
    %cst_61 = arith.constant 0.000000e+00 : f32
    %83 = vector.broadcast %cst_61 : f32 to vector<32x96xf32>
    %84 = arith.maximumf %82, %83 : vector<32x96xf32>
    %c0_62 = arith.constant 0 : index
    %c0_63 = arith.constant 0 : index
    %c0_64 = arith.constant 0 : index
    %85 = vector.load %arg7[%c0_62, %c0_63, %c0_64] : memref<2x96x48xf32, #tpu.memory_space<vmem>>, vector<1x96x48xf32>
    %86 = vector.shape_cast %85 : vector<1x96x48xf32> to vector<96x48xf32>
    %cst_65 = arith.constant dense<0.000000e+00> : vector<32x48xf32>
    %87 = tpu.matmul %84, %86, %cst_65 {dimension_numbers = #tpu.dot_dimension_numbers<[1], [0], [0], [1], [0, 0, 1, 1], [], []>, precision = #tpu.contract_precision<fp32>} : vector<32x96xf32>, vector<96x48xf32>, vector<32x48xf32> -> vector<32x48xf32>
    %c1_66 = arith.constant 1 : index
    %c0_67 = arith.constant 0 : index
    %c0_68 = arith.constant 0 : index
    %88 = vector.load %arg7[%c1_66, %c0_67, %c0_68] : memref<2x96x48xf32, #tpu.memory_space<vmem>>, vector<1x96x48xf32>
    %89 = vector.shape_cast %88 : vector<1x96x48xf32> to vector<96x48xf32>
    %cst_69 = arith.constant dense<0.000000e+00> : vector<32x48xf32>
    %90 = tpu.matmul %84, %89, %cst_69 {dimension_numbers = #tpu.dot_dimension_numbers<[1], [0], [0], [1], [0, 0, 1, 1], [], []>, precision = #tpu.contract_precision<fp32>} : vector<32x96xf32>, vector<96x48xf32>, vector<32x48xf32> -> vector<32x48xf32>
    %91 = arith.maximumf %87, %90 : vector<32x48xf32>
    %92 = vector.shape_cast %91 : vector<32x48xf32> to vector<4x8x48xf32>
    %c0_70 = arith.constant 0 : index
    %c0_71 = arith.constant 0 : index
    %c0_72 = arith.constant 0 : index
    %93 = vector.load %arg16[%c0_70, %c0_71, %c0_72] : memref<4x8x48xf32, #tpu.memory_space<vmem>>, vector<4x8x48xf32>
    tpu.vector_store %arg16[%c0_70, %c0_71, %c0_72], %92 {strides = array<i32>} : memref<4x8x48xf32, #tpu.memory_space<vmem>>, vector<4x8x48xf32>,
    %cst_73 = arith.constant 0.000000e+00 : f32
    %94 = vector.broadcast %cst_73 : f32 to vector<4x120xf32>
    %c0_74 = arith.constant 0 : index
    %c0_75 = arith.constant 0 : index
    %c0_76 = arith.constant 0 : index
    %95 = vector.load %arg16[%c0_74, %c0_75, %c0_76] : memref<4x8x48xf32, #tpu.memory_space<vmem>>, vector<4x2x48xf32>
    %cst_77 = arith.constant dense<0xFF800000> : vector<4x48xf32>
    %96 = vector.multi_reduction <maximumf>, %95, %cst_77 [1] : vector<4x2x48xf32> to vector<4x48xf32>
    %c0_78 = arith.constant 0 : index
    %c0_79 = arith.constant 0 : index
    %c0_80 = arith.constant 0 : index
    %97 = vector.load %arg8[%c0_78, %c0_79, %c0_80] : memref<4x48x120xf32, #tpu.memory_space<vmem>>, vector<1x48x120xf32>
    %98 = vector.shape_cast %97 : vector<1x48x120xf32> to vector<48x120xf32>
    %cst_81 = arith.constant dense<0.000000e+00> : vector<4x120xf32>
    %99 = tpu.matmul %96, %98, %cst_81 {dimension_numbers = #tpu.dot_dimension_numbers<[1], [0], [0], [1], [0, 0, 1, 1], [], []>, precision = #tpu.contract_precision<fp32>} : vector<4x48xf32>, vector<48x120xf32>, vector<4x120xf32> -> vector<4x120xf32>
    %100 = arith.addf %94, %99 : vector<4x120xf32>
    %c0_82 = arith.constant 0 : index
    %c2_83 = arith.constant 2 : index
    %c0_84 = arith.constant 0 : index
    %101 = vector.load %arg16[%c0_82, %c2_83, %c0_84] : memref<4x8x48xf32, #tpu.memory_space<vmem>>, vector<4x2x48xf32>
    %cst_85 = arith.constant dense<0xFF800000> : vector<4x48xf32>
    %102 = vector.multi_reduction <maximumf>, %101, %cst_85 [1] : vector<4x2x48xf32> to vector<4x48xf32>
    %c1_86 = arith.constant 1 : index
    %c0_87 = arith.constant 0 : index
    %c0_88 = arith.constant 0 : index
    %103 = vector.load %arg8[%c1_86, %c0_87, %c0_88] : memref<4x48x120xf32, #tpu.memory_space<vmem>>, vector<1x48x120xf32>
    %104 = vector.shape_cast %103 : vector<1x48x120xf32> to vector<48x120xf32>
    %cst_89 = arith.constant dense<0.000000e+00> : vector<4x120xf32>
    %105 = tpu.matmul %102, %104, %cst_89 {dimension_numbers = #tpu.dot_dimension_numbers<[1], [0], [0], [1], [0, 0, 1, 1], [], []>, precision = #tpu.contract_precision<fp32>} : vector<4x48xf32>, vector<48x120xf32>, vector<4x120xf32> -> vector<4x120xf32>
    %106 = arith.addf %100, %105 : vector<4x120xf32>
    %c0_90 = arith.constant 0 : index
    %c4_91 = arith.constant 4 : index
    %c0_92 = arith.constant 0 : index
    %107 = vector.load %arg16[%c0_90, %c4_91, %c0_92] : memref<4x8x48xf32, #tpu.memory_space<vmem>>, vector<4x2x48xf32>
    %cst_93 = arith.constant dense<0xFF800000> : vector<4x48xf32>
    %108 = vector.multi_reduction <maximumf>, %107, %cst_93 [1] : vector<4x2x48xf32> to vector<4x48xf32>
    %c2_94 = arith.constant 2 : index
    %c0_95 = arith.constant 0 : index
    %c0_96 = arith.constant 0 : index
    %109 = vector.load %arg8[%c2_94, %c0_95, %c0_96] : memref<4x48x120xf32, #tpu.memory_space<vmem>>, vector<1x48x120xf32>
    %110 = vector.shape_cast %109 : vector<1x48x120xf32> to vector<48x120xf32>
    %cst_97 = arith.constant dense<0.000000e+00> : vector<4x120xf32>
    %111 = tpu.matmul %108, %110, %cst_97 {dimension_numbers = #tpu.dot_dimension_numbers<[1], [0], [0], [1], [0, 0, 1, 1], [], []>, precision = #tpu.contract_precision<fp32>} : vector<4x48xf32>, vector<48x120xf32>, vector<4x120xf32> -> vector<4x120xf32>
    %112 = arith.addf %106, %111 : vector<4x120xf32>
    %c0_98 = arith.constant 0 : index
    %c6 = arith.constant 6 : index
    %c0_99 = arith.constant 0 : index
    %113 = vector.load %arg16[%c0_98, %c6, %c0_99] : memref<4x8x48xf32, #tpu.memory_space<vmem>>, vector<4x2x48xf32>
    %cst_100 = arith.constant dense<0xFF800000> : vector<4x48xf32>
    %114 = vector.multi_reduction <maximumf>, %113, %cst_100 [1] : vector<4x2x48xf32> to vector<4x48xf32>
    %c3_101 = arith.constant 3 : index
    %c0_102 = arith.constant 0 : index
    %c0_103 = arith.constant 0 : index
    %115 = vector.load %arg8[%c3_101, %c0_102, %c0_103] : memref<4x48x120xf32, #tpu.memory_space<vmem>>, vector<1x48x120xf32>
    %116 = vector.shape_cast %115 : vector<1x48x120xf32> to vector<48x120xf32>
    %cst_104 = arith.constant dense<0.000000e+00> : vector<4x120xf32>
    %117 = tpu.matmul %114, %116, %cst_104 {dimension_numbers = #tpu.dot_dimension_numbers<[1], [0], [0], [1], [0, 0, 1, 1], [], []>, precision = #tpu.contract_precision<fp32>} : vector<4x48xf32>, vector<48x120xf32>, vector<4x120xf32> -> vector<4x120xf32>
    %118 = arith.addf %112, %117 : vector<4x120xf32>
    %c0_105 = arith.constant 0 : index
    %c0_106 = arith.constant 0 : index
    %119 = vector.load %arg9[%c0_105, %c0_106] : memref<1x120xf32, #tpu.memory_space<vmem>>, vector<1x120xf32>
    %120 = vector.broadcast %119 : vector<1x120xf32> to vector<4x120xf32>
    %121 = arith.addf %118, %120 : vector<4x120xf32>
    %cst_107 = arith.constant 0.000000e+00 : f32
    %122 = vector.broadcast %cst_107 : f32 to vector<4x120xf32>
    %123 = arith.maximumf %121, %122 : vector<4x120xf32>
    %c0_108 = arith.constant 0 : index
    %c0_109 = arith.constant 0 : index
    %124 = vector.load %arg10[%c0_108, %c0_109] : memref<120x60xf32, #tpu.memory_space<vmem>>, vector<120x60xf32>
    %cst_110 = arith.constant dense<0.000000e+00> : vector<4x60xf32>
    %125 = tpu.matmul %123, %124, %cst_110 {dimension_numbers = #tpu.dot_dimension_numbers<[1], [0], [0], [1], [0, 0, 1, 1], [], []>, precision = #tpu.contract_precision<fp32>} : vector<4x120xf32>, vector<120x60xf32>, vector<4x60xf32> -> vector<4x60xf32>
    %c0_111 = arith.constant 0 : index
    %c0_112 = arith.constant 0 : index
    %126 = vector.load %arg11[%c0_111, %c0_112] : memref<1x60xf32, #tpu.memory_space<vmem>>, vector<1x60xf32>
    %127 = vector.broadcast %126 : vector<1x60xf32> to vector<4x60xf32>
    %128 = arith.addf %125, %127 : vector<4x60xf32>
    %cst_113 = arith.constant 0.000000e+00 : f32
    %129 = vector.broadcast %cst_113 : f32 to vector<4x60xf32>
    %130 = arith.maximumf %128, %129 : vector<4x60xf32>
    %c0_114 = arith.constant 0 : index
    %c0_115 = arith.constant 0 : index
    %131 = vector.load %arg12[%c0_114, %c0_115] : memref<60x10xf32, #tpu.memory_space<vmem>>, vector<60x10xf32>
    %cst_116 = arith.constant dense<0.000000e+00> : vector<4x10xf32>
    %132 = tpu.matmul %130, %131, %cst_116 {dimension_numbers = #tpu.dot_dimension_numbers<[1], [0], [0], [1], [0, 0, 1, 1], [], []>, precision = #tpu.contract_precision<fp32>} : vector<4x60xf32>, vector<60x10xf32>, vector<4x10xf32> -> vector<4x10xf32>
    %c0_117 = arith.constant 0 : index
    %c0_118 = arith.constant 0 : index
    %133 = vector.load %arg13[%c0_117, %c0_118] : memref<1x10xf32, #tpu.memory_space<vmem>>, vector<1x10xf32>
    %134 = vector.broadcast %133 : vector<1x10xf32> to vector<4x10xf32>
    %135 = arith.addf %132, %134 : vector<4x10xf32>
    %c0_119 = arith.constant 0 : index
    %c0_120 = arith.constant 0 : index
    %136 = vector.load %arg14[%c0_119, %c0_120] : memref<4x10xf32, #tpu.memory_space<vmem>>, vector<4x10xf32>
    tpu.vector_store %arg14[%c0_119, %c0_120], %135 {strides = array<i32>} : memref<4x10xf32, #tpu.memory_space<vmem>>, vector<4x10xf32>,
    return
  }
  func.func @transform_0(%arg0: i32) -> (i32, i32, i32) {
    %c0_i32 = arith.constant 0 : i32
    %c0_i32_0 = arith.constant 0 : i32
    %c0_i32_1 = arith.constant 0 : i32
    return %arg0, %c0_i32, %c0_i32_0 : i32, i32, i32
  }
  func.func @transform_1(%arg0: i32) -> (i32, i32, i32) {
    %c0_i32 = arith.constant 0 : i32
    %c0_i32_0 = arith.constant 0 : i32
    %c0_i32_1 = arith.constant 0 : i32
    %c0_i32_2 = arith.constant 0 : i32
    return %c0_i32, %c0_i32_0, %c0_i32_1 : i32, i32, i32
  }
  func.func @transform_2(%arg0: i32) -> (i32, i32) {
    %c0_i32 = arith.constant 0 : i32
    %c0_i32_0 = arith.constant 0 : i32
    %c0_i32_1 = arith.constant 0 : i32
    return %c0_i32, %c0_i32_0 : i32, i32
  }
  func.func @transform_3(%arg0: i32) -> (i32, i32, i32) {
    %c0_i32 = arith.constant 0 : i32
    %c0_i32_0 = arith.constant 0 : i32
    %c0_i32_1 = arith.constant 0 : i32
    %c0_i32_2 = arith.constant 0 : i32
    return %c0_i32, %c0_i32_0, %c0_i32_1 : i32, i32, i32
  }
  func.func @transform_4(%arg0: i32) -> (i32, i32, i32) {
    %c0_i32 = arith.constant 0 : i32
    %c0_i32_0 = arith.constant 0 : i32
    %c0_i32_1 = arith.constant 0 : i32
    %c0_i32_2 = arith.constant 0 : i32
    return %c0_i32, %c0_i32_0, %c0_i32_1 : i32, i32, i32
  }
  func.func @transform_5(%arg0: i32) -> (i32, i32) {
    %c0_i32 = arith.constant 0 : i32
    %c0_i32_0 = arith.constant 0 : i32
    %c0_i32_1 = arith.constant 0 : i32
    return %c0_i32, %c0_i32_0 : i32, i32
  }
  func.func @transform_6(%arg0: i32) -> (i32, i32, i32) {
    %c0_i32 = arith.constant 0 : i32
    %c0_i32_0 = arith.constant 0 : i32
    %c0_i32_1 = arith.constant 0 : i32
    %c0_i32_2 = arith.constant 0 : i32
    return %c0_i32, %c0_i32_0, %c0_i32_1 : i32, i32, i32
  }
  func.func @transform_7(%arg0: i32) -> (i32, i32, i32) {
    %c0_i32 = arith.constant 0 : i32
    %c0_i32_0 = arith.constant 0 : i32
    %c0_i32_1 = arith.constant 0 : i32
    %c0_i32_2 = arith.constant 0 : i32
    return %c0_i32, %c0_i32_0, %c0_i32_1 : i32, i32, i32
  }
  func.func @transform_8(%arg0: i32) -> (i32, i32) {
    %c0_i32 = arith.constant 0 : i32
    %c0_i32_0 = arith.constant 0 : i32
    %c0_i32_1 = arith.constant 0 : i32
    return %c0_i32, %c0_i32_0 : i32, i32
  }
  func.func @transform_9(%arg0: i32) -> (i32, i32) {
    %c0_i32 = arith.constant 0 : i32
    %c0_i32_0 = arith.constant 0 : i32
    %c0_i32_1 = arith.constant 0 : i32
    return %c0_i32, %c0_i32_0 : i32, i32
  }
  func.func @transform_10(%arg0: i32) -> (i32, i32) {
    %c0_i32 = arith.constant 0 : i32
    %c0_i32_0 = arith.constant 0 : i32
    %c0_i32_1 = arith.constant 0 : i32
    return %c0_i32, %c0_i32_0 : i32, i32
  }
  func.func @transform_11(%arg0: i32) -> (i32, i32) {
    %c0_i32 = arith.constant 0 : i32
    %c0_i32_0 = arith.constant 0 : i32
    %c0_i32_1 = arith.constant 0 : i32
    return %c0_i32, %c0_i32_0 : i32, i32
  }
  func.func @transform_12(%arg0: i32) -> (i32, i32) {
    %c0_i32 = arith.constant 0 : i32
    %c0_i32_0 = arith.constant 0 : i32
    %c0_i32_1 = arith.constant 0 : i32
    return %c0_i32, %c0_i32_0 : i32, i32
  }
  func.func @transform_13(%arg0: i32) -> (i32, i32) {
    %c0_i32 = arith.constant 0 : i32
    %c0_i32_0 = arith.constant 0 : i32
    return %arg0, %c0_i32 : i32, i32
  }
}

</mosaic_0001>

<bundles_post_ra>
// kernel: network_forward.1
= control target key start
LH: loop header
LB: loop body
LE: loop exit
PB: predicated region body
PF: predicated region fallthrough
CT: control target
= control target key end

     0   :  { %18 = vsyncpa [#allocation5], 0  ;;  %s20360_s0 = inlined_call_operand.vmem [shape: f32[4,28,28], index: 0, kind: input, shape index: {}]   ;;  %s20361_s1 = inlined_call_operand.vmem [shape: f32[5,28,144], index: 1, kind: input, shape index: {}]   ;;  %s20362_s2 = inlined_call_operand.vmem [shape: f32[1,144], index: 2, kind: input, shape index: {}]   ;;  %s20363_s3 = inlined_call_operand.hbm [shape: f32[2,144,72], index: 3, kind: input, shape index: {}]   ;;  %s20364_s4 = inlined_call_operand.vmem [shape: f32[5,72,96], index: 4, kind: input, shape index: {}]   ;;  %s20365_s5 = inlined_call_operand.vmem [shape: f32[1,96], index: 5, kind: input, shape index: {}]   ;;  %s20366_s6 = inlined_call_operand.vmem [shape: f32[2,96,48], index: 6, kind: input, shape index: {}]   ;;  %s20367_s7 = inlined_call_operand.hbm [shape: f32[4,48,120], index: 7, kind: input, shape index: {}]   ;;  %s20368_s8 = inlined_call_operand.vmem [shape: f32[1,120], index: 8, kind: input, shape index: {}]   ;;  %s20369_s9 = inlined_call_operand.vmem [shape: f32[120,60], index: 9, kind: input, shape index: {}]   ;;  %s20370_s10 = inlined_call_operand.vmem [shape: f32[1,60], index: 10, kind: input, shape index: {}]   ;;  %s20371_s11 = inlined_call_operand.vmem [shape: f32[60,10], index: 11, kind: input, shape index: {}]   ;;  %s20372_s12 = inlined_call_operand.vmem [shape: f32[1,10], index: 12, kind: input, shape index: {}]   ;;  %s20373_s13 = inlined_call_operand.hbm [shape: f32[4,10], index: 13, kind: output, shape index: {}]  }
   0x1   :  { %19 = vsyncpa [#allocation8], 0 }
   0x2   :  { %20 = vsyncpa [#allocation6], 0  ;;  %s31_s27 = sshll.u32 %s20363_s3, 4  ;;  %s12902_s28 = smov [#allocation4]   ;;  %s32_s27 = int_to_ptr.hbm [resolvable:$true] %s31_s27 }
   0x3   :  { %s33_s29 = sshll.u32 %s12902_s28, 4  ;;  %s50_s15 = sshll.u32 %s20367_s7, 4  ;;  %s34_s29 = int_to_ptr.vmem [resolvable:$true] %s33_s29  ;;  %s51_s15 = int_to_ptr.hbm [resolvable:$true] %s50_s15 }
   0x4   :  { %s12903_s16 = smov 128   ;;  %s12904_s17 = smov 8  }
   0x5   :  { %39 = dma.hbm_to_vmem [thread:$0]  %s32_s27, 4608, %s34_s29, [#allocation5], %s12903_s16, %s12903_s16, %s12904_s17  }
   0x6   :  { %s12905_s18 = smov [#allocation7]  }
   0x7   :  { %s52_s19 = sshll.u32 %s12905_s18, 4  ;;  %s53_s19 = int_to_ptr.vmem [resolvable:$true] %s52_s19 }
   0x8   :  { %58 = dma.hbm_to_vmem [thread:$0]  %s51_s15, 3072, %s53_s19, [#allocation8], %s12903_s16, %s12903_s16, %s12904_s17  }
   0x9   :  { %12896 = dma.done.wait [#allocation5], 4608  }
   0xa   :  { %12897 = vsyncadd [#allocation5], 4294962688 }
   0xb   :  { %12898 = dma.done.wait [#allocation8], 3072  }
   0xc   :  { %12899 = vsyncadd [#allocation8], 4294964224  ;;  %vm180_vm0 = vcmask 1043456   ;;  %v12684_v0 = vld [vmem:[%s20361_s1 + $0x70] sm:$0xf]  ;;  %v12682_v1 = vld [vmem:[%s20361_s1 + $0x60] sm:$0xff] }
   0xd   :  { %v12680_v2 = vld [vmem:[%s20361_s1 + $0x50] sm:$0xff]  ;;  %vm117_vm1 = vcmask 1046528   ;;  %vm155_vm2 = vcmask 228352   ;;  %v182_v3 = vsel %vm180_vm0, %v12684_v0, 0  ;;  %v12993_v4 = vand.u32 4294901760, %v12682_v1  ;;  %v12678_v6 = vld [vmem:[%s20361_s1 + $0x40] sm:$0xff] }
   0xe   :  { %v12995_v5 = vand.u32 4294901760, %v12680_v2  ;;  %v13003_v7 = vld [vmem:[%s20360_s0] sm:$0xff]  ;;  %v78_v8 = vld [vmem:[%s20360_s0 + $0x8] sm:$0xff]  ;;  %v13008_v9 = vand.u32 4294901760, %v182_v3  ;;  %v13010_v10 = vand.u32 4294901760, %v12678_v6  ;;  %v79_v13 = vld [vmem:[%s20360_s0 + $0x10] sm:$0xff] }
   0xf   :  { %v118_v11 = vrot.slane %v13003_v7, 1  ;;  %v119_v12 = vrot.slane %v78_v8, 1  ;;  %v13017_v14 = vsub.f32 %v12682_v1, %v12993_v4  ;;  %v121_v16 = vrot.slane %v79_v13, 1  ;;  %v12685_v17 = vld [vmem:[%s20361_s1 + $0x78] sm:$0xf]  ;;  %v81_v38 = vld [vmem:[%s20360_s0 + $0x20] sm:$0xff] }
  0x10   :  { %v13020_v15 = vsub.f32 %v12680_v2, %v12995_v5  ;;  %v80_v18 = vld [vmem:[%s20360_s0 + $0x18] sm:$0xf]  ;;  %487 = vmatpush.msra.mxu3 %v13008_v9  ;;  %v317_v19 = vsub.f32 %v182_v3, %v13008_v9  ;;  %200 = vmatpush.msra.mxu0 %v13008_v9  ;;  %v13033_v21 = vsub.f32 %v12678_v6, %v13010_v10  ;;  %v185_v22 = vsel %vm180_vm0, %v12685_v17, 0  ;;  %v82_v42 = vld [vmem:[%s20360_s0 + $0x28] sm:$0xff]  ;;  %v83_v61 = vld [vmem:[%s20360_s0 + $0x30] sm:$0xff]  ;;  %s12906_s19 = smov [#allocation9]  }
  0x11   :  { %v120_v20 = vsel %vm117_vm1, %v118_v11, %v119_v12  ;;  %v324_v24 = vand.u32 4294901760, %v13017_v14  ;;  %v122_v26 = vsel %vm117_vm1, %v119_v12, %v121_v16  ;;  %v13050_v34 = vand.u32 4294901760, %v185_v22  ;;  %v12683_v59 = vld [vmem:[%s20361_s1 + $0x68] sm:$0xff]  ;;  %s12665_s3 = sshll.u32 %s12906_s19, 4  ;;  %s12667_s21 = sshll.u32 %s20373_s13, 4  ;;  %s12666_s3 = int_to_ptr.vmem [resolvable:$true] %s12665_s3  ;;  %s12668_s21 = int_to_ptr.hbm [resolvable:$true] %s12667_s21 }
  0x12   :  { %v156_v23 = vsel %vm155_vm2, %v120_v20, 0  ;;  %v330_v25 = vand.u32 4294901760, %v13020_v15  ;;  %403 = vmatpush.msra.mxu2 %v317_v19  ;;  %489 = vmatpush.msra.mxu3 %v12993_v4  ;;  %v318_v28 = vand.u32 4294901760, %v317_v19  ;;  %v336_v29 = vand.u32 4294901760, %v13033_v21 }
  0x13   :  { %v13041_v27 = vand.u32 4294901760, %v156_v23  ;;  %v158_v30 = vsel %vm155_vm2, %v122_v26, 0  ;;  %202 = vmatpush.msra.mxu0 %v12993_v4  ;;  %v325_v31 = vsub.f32 %v13017_v14, %v324_v24  ;;  %v123_v37 = vrot.slane %v80_v18, 1 }
  0x14   :  { %v331_v32 = vsub.f32 %v13020_v15, %v330_v25  ;;  %v13048_v33 = vand.u32 4294901760, %v158_v30  ;;  %406 = vmatpush.msra.mxu2 %v13017_v14  ;;  %491 = vmatpush.msra.mxu3 %v12995_v5  ;;  %v319_v36 = vsub.f32 %v317_v19, %v318_v28  ;;  %v337_v39 = vsub.f32 %v13033_v21, %v336_v29 }
  0x15   :  { %v13055_v35 = vsub.f32 %v156_v23, %v13041_v27  ;;  %204 = vmatpush.msra.mxu0 %v12995_v5  ;;  %v13066_v41 = vsub.f32 %v185_v22, %v13050_v34  ;;  %v326_v45 = vand.u32 4294901760, %v325_v31  ;;  %v124_v46 = vsel %vm117_vm1, %v121_v16, %v123_v37  ;;  %v86_v22 = vld [vmem:[%s20360_s0 + $0x48] sm:$0xff]  ;;  %v87_v37 = vld [vmem:[%s20360_s0 + $0x50] sm:$0xff] }
  0x16   :  { %v13063_v40 = vsub.f32 %v158_v30, %v13048_v33  ;;  %409 = vmatpush.msra.mxu2 %v13020_v15  ;;  %493 = vmatpush.msra.mxu3 %v13010_v10  ;;  %v320_v44 = vand.u32 4294901760, %v319_v36  ;;  %v332_v47 = vand.u32 4294901760, %v331_v32  ;;  %v160_v49 = vsel %vm155_vm2, %v124_v46, 0  ;;  %v12681_v36 = vld [vmem:[%s20361_s1 + $0x58] sm:$0xff] }
  0x17   :  { %v13074_v43 = vand.u32 4294901760, %v13055_v35  ;;  %206 = vmatpush.msra.mxu0 %v13010_v10  ;;  %v844_v48 = vand.u32 4294901760, %v13066_v41  ;;  %v125_v50 = vrot.slane %v81_v38, 1  ;;  %v13086_v53 = vand.u32 4294901760, %v160_v49 }
  0x18   :  { %321 = vmatpush.msra.mxu1 %v320_v44  ;;  %v13084_v52 = vand.u32 4294901760, %v13063_v40  ;;  %v126_v54 = vrot.slane %v82_v42, 1  ;;  %412 = vmatpush.msra.mxu2 %v13033_v21  ;;  %v338_v57 = vand.u32 4294901760, %v337_v39  ;;  %v13109_v0 = vand.u32 4294901760, %v12683_v59 }
  0x19   :  { %497 = vmatmul.f32.vlgmr.msra.gmra.mxu3 %v13074_v43  ;;  %v210_v51 = vsub.f32 %v13055_v35, %v13074_v43  ;;  %582 = vmatpush.msrb.mxu0 %v318_v28  ;;  %v845_v55 = vsub.f32 %v13066_v41, %v844_v48  ;;  %v13107_v63 = vsub.f32 %v160_v49, %v13086_v53  ;;  %v128_v2 = vrot.slane %v83_v61, 1 }
  0x1a   :  { %415 = vmatmul.f32.vlgmr.msra.gmra.mxu2 %v13055_v35  ;;  %327 = vmatpush.msra.mxu1 %v326_v45  ;;  %v127_v58 = vsel %vm117_vm1, %v125_v50, %v126_v54  ;;  %v218_v62 = vsub.f32 %v13063_v40, %v13084_v52  ;;  %v13115_v3 = vsub.f32 %v12683_v59, %v13109_v0  ;;  %v133_v28 = vrot.slane %v86_v22, 1 }
  0x1b   :  { %v13093_v56 = vand.u32 4294901760, %v210_v51  ;;  %726 = vmatpush.msrb.mxu2 %v13050_v34  ;;  %v846_v60 = vand.u32 4294901760, %v845_v55  ;;  %586 = vmatpush.msrb.mxu0 %v324_v24  ;;  %v162_v1 = vsel %vm155_vm2, %v127_v58, 0  ;;  %v13122_v8 = vand.u32 4294901760, %v13107_v63  ;;  %v88_v58 = vld [vmem:[%s20360_s0 + $0x58] sm:$0xf] }
  0x1c   :  { %333 = vmatpush.msra.mxu1 %v332_v47  ;;  %v13118_v6 = vand.u32 4294901760, %v218_v62  ;;  %v13124_v11 = vand.u32 4294901760, %v162_v1  ;;  %v850_v12 = vand.u32 4294901760, %v13115_v3  ;;  %v129_v13 = vsel %vm117_vm1, %v126_v54, %v128_v2 }
  0x1d   :  { %212 = vmatmul.f32.vlgmr.msra.gmra.mxu0 %v13093_v56  ;;  %847 = vmatpush.msrb.mxu3 %v846_v60  ;;  %v226_v15 = vsub.f32 %v13107_v63, %v13122_v8  ;;  %v13193_v38 = vand.u32 4294901760, %v12681_v36  ;;  %v135_v46 = vrot.slane %v87_v37, 1  ;;  %v137_v62 = vrot.slane %v88_v58, 1 }
  0x1e   :  { %590 = vmatpush.msrb.mxu0 %v330_v25  ;;  %339 = vmatpush.msra.mxu1 %v338_v57  ;;  %v851_v14 = vsub.f32 %v13115_v3, %v850_v12  ;;  %v13142_v16 = vsub.f32 %v162_v1, %v13124_v11  ;;  %vm2321_vm3 = vcmask 1045504   ;;  %vm3465_vm4 = vcmask 1044480  }
  0x1f   :  { %728 = vmatpush.msrb.mxu2 %v13109_v0  ;;  %341 = vmatmul.f32.vlgmr.msra.gmra.mxu1 %v13041_v27  ;;  %v13149_v19 = vand.u32 4294901760, %v226_v15  ;;  %v13204_v45 = vsub.f32 %v12681_v36, %v13193_v38  ;;  %v136_v55 = vsel %vm117_vm1, %v133_v28, %v135_v46  ;;  %v90_v15 = vld [vmem:[%s20360_s0 + $0x68] sm:$0xff]  ;;  %v91_v36 = vld [vmem:[%s20360_s0 + $0x70] sm:$0xff]  ;;  %vm5824_vm5 = vcmask 130048  }
  0x20   :  { %594 = vmatpush.msrb.mxu0 %v336_v29  ;;  %657 = vmatpush.msrb.mxu1 %v13008_v9  ;;  %v84_v9 = vld [vmem:[%s20360_s0 + $0x38] sm:$0xf]  ;;  %v852_v17 = vand.u32 4294901760, %v851_v14  ;;  %v13152_v20 = vand.u32 4294901760, %v13142_v16  ;;  %v170_v61 = vsel %vm155_vm2, %v136_v55, 0  ;;  %v138_v14 = vsel %vm117_vm1, %v135_v46, %v137_v62 }
  0x21   :  { %503 = vmatmul.f32.gmra.mxu3 %v13084_v52  ;;  %v130_v18 = vrot.slane %v84_v9, 1  ;;  %730 = vmatpush.msrb.mxu2 %v13193_v38  ;;  %v856_v47 = vand.u32 4294901760, %v13204_v45  ;;  %v13247_v9 = vld [vmem:[%s20360_s0 + $0x60] sm:$0xff]  ;;  %v140_v22 = vrot.slane %v90_v15, 1  ;;  %v142_v55 = vrot.slane %v91_v36, 1 }
  0x22   :  { %929 = vmatpush.msra.mxu0 %v13066_v41  ;;  %420 = vmatmul.f32.gmra.mxu2 %v13063_v40  ;;  %v234_v23 = vsub.f32 %v13142_v16, %v13152_v20  ;;  %vm8256_vm6 = vcmask 588800   ;;  %vm10204_vm7 = vcmask 785408   ;;  %vm10998_vm8 = vcmask 392192  }
  0x23   :  { %659 = vmatpush.msrb.mxu1 %v12993_v4  ;;  %v164_v4 = vsel %vm155_vm2, %v129_v13, 0  ;;  %853 = vmatpush.msrb.mxu3 %v852_v17  ;;  %v857_v54 = vsub.f32 %v13204_v45, %v856_v47  ;;  %v13240_v13 = vand.u32 4294901760, %v170_v61  ;;  %v143_v41 = vsel %vm117_vm1, %v140_v22, %v142_v55 }
  0x24   :  { %932 = vmatpush.msra.mxu0 %v13115_v3  ;;  %v13154_v21 = vand.u32 4294901760, %v164_v4  ;;  %v13178_v29 = vand.u32 4294901760, %v234_v23  ;;  %vm11007_vm9 = vcmask 386048   ;;  %vm11085_vm10 = vcmask 1041409  }
  0x25   :  { %220 = vmatmul.f32.gmra.mxu0 %v13118_v6  ;;  %661 = vmatpush.msrb.mxu1 %v12995_v5  ;;  %v131_v5 = vsel %vm117_vm1, %v128_v2, %v130_v18  ;;  %v858_v57 = vand.u32 4294901760, %v857_v54  ;;  %v13256_v17 = vsub.f32 %v170_v61, %v13240_v13  ;;  %v172_v18 = vsel %vm155_vm2, %v138_v14, 0  ;;  %v92_v14 = vld [vmem:[%s20360_s0 + $0x78] sm:$0xf] }
  0x26   :  { %v13172_v24 = vsub.f32 %v164_v4, %v13154_v21  ;;  %v166_v25 = vsel %vm155_vm2, %v131_v5, 0  ;;  %935 = vmatpush.msra.mxu0 %v13204_v45  ;;  %v139_v5 = vrot.slane %v13247_v9, 1  ;;  %vm11087_vm11 = vcmask 1042434  }
  0x27   :  { %663 = vmatpush.msrb.mxu1 %v13010_v10  ;;  %v13163_v10 = vld [vmem:[%s20360_s0 + $0x40] sm:$0xff]  ;;  %v13183_v31 = vand.u32 4294901760, %v166_v25  ;;  %859 = vmatpush.msrb.mxu3 %v858_v57  ;;  %vm11089_vm12 = vcmask 1043459   ;;  %vm12069_vm13 = vcmask 982016   ;;  %vm12414_vm14 = vcmask 490496  }
  0x28   :  { %345 = vmatmul.f32.gmra.mxu1 %v13048_v33  ;;  %v132_v26 = vrot.slane %v13163_v10, 1  ;;  %v13181_v30 = vand.u32 4294901760, %v13172_v24  ;;  %vm12658_vm15 = vcmask 76800  }
  0x29   :  { %509 = vmatmul.f32.gmra.mxu3 %v13122_v8  ;;  %1013 = vmatpush.msra.mxu1 %v13050_v34  ;;  %v13199_v42 = vsub.f32 %v166_v25, %v13183_v31  ;;  %v13265_v25 = vand.u32 4294901760, %v13256_v17 }
  0x2a   :  { %425 = vmatmul.f32.gmra.mxu2 %v13107_v63  ;;  %v134_v32 = vsel %vm117_vm1, %v132_v26, %v133_v28  ;;  %v242_v39 = vsub.f32 %v13172_v24, %v13181_v30  ;;  %v13267_v26 = vand.u32 4294901760, %v172_v18  ;;  %v141_v28 = vsel %vm117_vm1, %v139_v5, %v140_v22 }
  0x2b   :  { %1015 = vmatpush.msra.mxu1 %v13109_v0  ;;  %v168_v44 = vsel %vm155_vm2, %v134_v32, 0  ;;  %v13214_v50 = vand.u32 4294901760, %v13199_v42  ;;  %v12679_v32 = vld [vmem:[%s20361_s1 + $0x48] sm:$0xff]  ;;  %v174_v46 = vsel %vm155_vm2, %v141_v28, 0 }
  0x2c   :  { %v13211_v49 = vand.u32 4294901760, %v242_v39  ;;  %v13216_v51 = vand.u32 4294901760, %v168_v44  ;;  %v731_v37 = vand.u32 4294901760, %v12679_v32  ;;  %v266_v39 = vsub.f32 %v13256_v17, %v13265_v25 }
  0x2d   :  { %228 = vmatmul.f32.gmra.mxu0 %v13149_v19  ;;  %1017 = vmatpush.msra.mxu1 %v13193_v38  ;;  %v250_v59 = vsub.f32 %v13199_v42, %v13214_v50  ;;  %v13293_v61 = vand.u32 4294901760, %v174_v46 }
  0x2e   :  { %v13230_v60 = vsub.f32 %v168_v44, %v13216_v51  ;;  %v13281_v44 = vsub.f32 %v172_v18, %v13267_v26  ;;  %732 = vmatpush.msrb.mxu2 %v731_v37  ;;  %v861_v54 = vsub.f32 %v12679_v32, %v731_v37  ;;  %v13288_v58 = vand.u32 4294901760, %v266_v39 }
  0x2f   :  { %v13235_v1 = vand.u32 4294901760, %v250_v59  ;;  %1019 = vmatpush.msra.mxu1 %v731_v37  ;;  %v13308_v3 = vsub.f32 %v174_v46, %v13293_v61 }
  0x30   :  { %349 = vmatmul.f32.gmra.mxu1 %v13086_v53  ;;  %v13238_v2 = vand.u32 4294901760, %v13230_v60  ;;  %1108 = vmatpush.msra.mxu2 %v844_v48  ;;  %v862_v57 = vand.u32 4294901760, %v861_v54  ;;  %v13291_v59 = vand.u32 4294901760, %v13281_v44 }
  0x31   :  { %515 = vmatmul.f32.gmra.mxu3 %v13152_v20  ;;  %938 = vmatpush.msra.mxu0 %v861_v54 }
  0x32   :  { %430 = vmatmul.f32.gmra.mxu2 %v13142_v16  ;;  %v258_v4 = vsub.f32 %v13230_v60, %v13238_v2  ;;  %v863_v62 = vsub.f32 %v861_v54, %v862_v57  ;;  %v274_v15 = vsub.f32 %v13281_v44, %v13291_v59 }
  0x33   :  { %1112 = vmatpush.msra.mxu2 %v850_v12  ;;  %v176_v12 = vsel %vm155_vm2, %v143_v41, 0 }
  0x34   :  { %v13262_v23 = vand.u32 4294901760, %v258_v4  ;;  %v864_v48 = vand.u32 4294901760, %v863_v62  ;;  %v144_v4 = vrot.slane %v92_v14, 1  ;;  %v13314_v45 = vand.u32 4294901760, %v274_v15 }
  0x35   :  { %236 = vmatmul.f32.gmra.mxu0 %v13178_v29  ;;  %1116 = vmatpush.msra.mxu2 %v856_v47  ;;  %v13317_v47 = vand.u32 4294901760, %v13308_v3  ;;  %v13319_v18 = vand.u32 4294901760, %v176_v12 }
  0x36   :  { %865 = vmatpush.msrb.mxu3 %v864_v48  ;;  %v145_v5 = vsel %vm117_vm1, %v142_v55, %v144_v4 }
  0x37   :  { %1120 = vmatpush.msra.mxu2 %v862_v57  ;;  %v13329_v22 = vsub.f32 %v176_v12, %v13319_v18  ;;  %v178_v28 = vsel %vm155_vm2, %v145_v5, 0 }
  0x38   :  { %353 = vmatmul.f32.gmra.mxu1 %v13124_v11  ;;  %1183 = vmatpush.msra.mxu3 %v13050_v34  ;;  %v282_v34 = vsub.f32 %v13308_v3, %v13317_v47 }
  0x39   :  { %521 = vmatmul.f32.gmra.mxu3 %v13181_v30  ;;  %v13337_v32 = vand.u32 4294901760, %v13329_v22 }
  0x3a   :  { %435 = vmatmul.f32.gmra.mxu2 %v13172_v24  ;;  %1185 = vmatpush.msra.mxu3 %v13109_v0  ;;  %v13334_v0 = vand.u32 4294901760, %v282_v34 }
  0x3b   :  { %v290_v36 = vsub.f32 %v13329_v22, %v13337_v32 }
  0x3c   :  { %1187 = vmatpush.msra.mxu3 %v13193_v38  ;;  %v13339_v38 = vand.u32 4294901760, %v178_v28 }
  0x3d   :  { %244 = vmatmul.f32.gmra.mxu0 %v13211_v49  ;;  %v13350_v39 = vand.u32 4294901760, %v290_v36 }
  0x3e   :  { %1189 = vmatpush.msra.mxu3 %v731_v37  ;;  %v13346_v37 = vsub.f32 %v178_v28, %v13339_v38 }
  0x40   :  { %357 = vmatmul.f32.gmra.mxu1 %v13154_v21  ;;  %v13353_v46 = vand.u32 4294901760, %v13346_v37 }
  0x41   :  { %527 = vmatmul.f32.gmra.mxu3 %v13214_v50 }
  0x42   :  { %440 = vmatmul.f32.gmra.mxu2 %v13199_v42  ;;  %v298_v54 = vsub.f32 %v13346_v37, %v13353_v46 }
  0x44   :  { %v13361_v55 = vand.u32 4294901760, %v298_v54 }
  0x45   :  { %252 = vmatmul.f32.gmra.mxu0 %v13235_v1 }
  0x48   :  { %361 = vmatmul.f32.gmra.mxu1 %v13183_v31 }
  0x49   :  { %533 = vmatmul.f32.gmra.mxu3 %v13238_v2 }
  0x4a   :  { %445 = vmatmul.f32.gmra.mxu2 %v13230_v60 }
  0x4d   :  { %260 = vmatmul.f32.gmra.mxu0 %v13262_v23 }
  0x50   :  { %365 = vmatmul.f32.gmra.mxu1 %v13216_v51 }
  0x51   :  { %539 = vmatmul.f32.gmra.mxu3 %v13265_v25 }
  0x52   :  { %450 = vmatmul.f32.gmra.mxu2 %v13256_v17 }
  0x55   :  { %268 = vmatmul.f32.gmra.mxu0 %v13288_v58 }
  0x58   :  { %369 = vmatmul.f32.gmra.mxu1 %v13240_v13 }
  0x59   :  { %545 = vmatmul.f32.gmra.mxu3 %v13291_v59 }
  0x5a   :  { %455 = vmatmul.f32.gmra.mxu2 %v13281_v44 }
  0x5d   :  { %276 = vmatmul.f32.gmra.mxu0 %v13314_v45 }
  0x60   :  { %373 = vmatmul.f32.gmra.mxu1 %v13267_v26 }
  0x61   :  { %551 = vmatmul.f32.gmra.mxu3 %v13317_v47 }
  0x62   :  { %460 = vmatmul.f32.gmra.mxu2 %v13308_v3 }
  0x65   :  { %284 = vmatmul.f32.gmra.mxu0 %v13334_v0 }
  0x68   :  { %377 = vmatmul.f32.gmra.mxu1 %v13293_v61 }
  0x69   :  { %557 = vmatmul.f32.gmra.mxu3 %v13337_v32 }
  0x6a   :  { %465 = vmatmul.f32.gmra.mxu2 %v13329_v22 }
  0x6d   :  { %292 = vmatmul.f32.gmra.mxu0 %v13350_v39 }
  0x70   :  { %381 = vmatmul.f32.gmra.mxu1 %v13319_v18 }
  0x71   :  { %563 = vmatmul.f32.gmra.mxu3 %v13353_v46 }
  0x72   :  { %470 = vmatmul.f32.gmra.mxu2 %v13346_v37 }
  0x75   :  { %300 = vmatmul.f32.gmra.mxu0 %v13361_v55 }
  0x78   :  { %385 = vmatmul.f32.gmra.mxu1 %v13339_v38 }
  0x79   :  { %867 = vmatmul.f32.vlgmr.msrb.gmra.mxu3 %v13041_v27 }
  0x7a   :  { %738 = vmatmul.f32.vlgmr.msrb.gmra.mxu2 %v13093_v56 }
  0x7d   :  { %596 = vmatmul.f32.vlgmr.msrb.gmra.mxu0 %v13041_v27 }
  0x80   :  { %665 = vmatmul.f32.vlgmr.msrb.gmra.mxu1 %v13041_v27 }
  0x81   :  { %871 = vmatmul.f32.gmra.mxu3 %v13048_v33 }
  0x82   :  { %746 = vmatmul.f32.gmra.mxu2 %v13118_v6 }
  0x85   :  { %600 = vmatmul.f32.gmra.mxu0 %v13048_v33 }
  0x88   :  { %669 = vmatmul.f32.gmra.mxu1 %v13048_v33 }
  0x89   :  { %875 = vmatmul.f32.gmra.mxu3 %v13086_v53 }
  0x8a   :  { %754 = vmatmul.f32.gmra.mxu2 %v13149_v19 }
  0x8d   :  { %604 = vmatmul.f32.gmra.mxu0 %v13086_v53 }
  0x90   :  { %673 = vmatmul.f32.gmra.mxu1 %v13086_v53 }
  0x91   :  { %879 = vmatmul.f32.gmra.mxu3 %v13124_v11 }
  0x92   :  { %762 = vmatmul.f32.gmra.mxu2 %v13178_v29 }
  0x95   :  { %608 = vmatmul.f32.gmra.mxu0 %v13124_v11 }
  0x98   :  { %677 = vmatmul.f32.gmra.mxu1 %v13124_v11 }
  0x99   :  { %883 = vmatmul.f32.gmra.mxu3 %v13154_v21 }
  0x9a   :  { %v213_v56 = vpop.f32.mrf.mxu0  ;;  %770 = vmatmul.f32.gmra.mxu2 %v13211_v49 }
  0x9c   :  { %v498_v6 = vpop.f32.mrf.mxu3  ;;  %v342_v19 = vpop.f32.mrf.mxu1 }
  0x9d   :  { %612 = vmatmul.f32.gmra.mxu0 %v13154_v21  ;;  %v343_v57 = vadd.f32 %v342_v19, %v213_v56  ;;  %v416_v62 = vpop.f32.mrf.mxu2 }
  0x9f   :  { %v417_v41 = vadd.f32 %v416_v62, %v343_v57 }
  0xa0   :  { %681 = vmatmul.f32.gmra.mxu1 %v13154_v21 }
  0xa1   :  { %887 = vmatmul.f32.gmra.mxu3 %v13183_v31  ;;  %v13387_v48 = vadd.f32 %v498_v6, %v417_v41 }
  0xa2   :  { %v221_v29 = vpop.f32.mrf.mxu0  ;;  %778 = vmatmul.f32.gmra.mxu2 %v13235_v1 }
  0xa4   :  { %v504_v14 = vpop.f32.mrf.mxu3 }
  0xa5   :  { %616 = vmatmul.f32.gmra.mxu0 %v13183_v31  ;;  %v346_v49 = vpop.f32.mrf.mxu1  ;;  %v421_v12 = vpop.f32.mrf.mxu2 }
  0xa6   :  { %v347_v15 = vadd.f32 %v346_v49, %v221_v29 }
  0xa8   :  { %v422_v4 = vadd.f32 %v421_v12, %v347_v15  ;;  %685 = vmatmul.f32.gmra.mxu1 %v13183_v31 }
  0xa9   :  { %891 = vmatmul.f32.gmra.mxu3 %v13216_v51 }
  0xaa   :  { %v229_v5 = vpop.f32.mrf.mxu0  ;;  %v13393_v34 = vadd.f32 %v504_v14, %v422_v4  ;;  %786 = vmatmul.f32.gmra.mxu2 %v13262_v23 }
  0xac   :  { %v510_v28 = vpop.f32.mrf.mxu3 }
  0xad   :  { %620 = vmatmul.f32.gmra.mxu0 %v13216_v51  ;;  %v350_v1 = vpop.f32.mrf.mxu1  ;;  %v426_v54 = vpop.f32.mrf.mxu2 }
  0xae   :  { %v351_v36 = vadd.f32 %v350_v1, %v229_v5 }
  0xb0   :  { %v427_v56 = vadd.f32 %v426_v54, %v351_v36  ;;  %689 = vmatmul.f32.gmra.mxu1 %v13216_v51 }
  0xb1   :  { %895 = vmatmul.f32.gmra.mxu3 %v13240_v13 }
  0xb2   :  { %v237_v6 = vpop.f32.mrf.mxu0  ;;  %v13399_v19 = vadd.f32 %v510_v28, %v427_v56  ;;  %794 = vmatmul.f32.gmra.mxu2 %v13288_v58 }
  0xb4   :  { %v516_v57 = vpop.f32.mrf.mxu3 }
  0xb5   :  { %624 = vmatmul.f32.gmra.mxu0 %v13240_v13  ;;  %v354_v23 = vpop.f32.mrf.mxu1  ;;  %v431_v41 = vpop.f32.mrf.mxu2 }
  0xb6   :  { %v355_v62 = vadd.f32 %v354_v23, %v237_v6 }
  0xb8   :  { %v432_v29 = vadd.f32 %v431_v41, %v355_v62  ;;  %693 = vmatmul.f32.gmra.mxu1 %v13240_v13 }
  0xb9   :  { %899 = vmatmul.f32.gmra.mxu3 %v13267_v26 }
  0xba   :  { %v245_v14 = vpop.f32.mrf.mxu0  ;;  %v13405_v49 = vadd.f32 %v516_v57, %v432_v29  ;;  %802 = vmatmul.f32.gmra.mxu2 %v13314_v45  ;;  %v99_v45 = vld [vmem:[%s20361_s1 + $0x30] sm:$0xf] }
  0xbb   :  { %v1264_v56 = vsel %vm180_vm0, %v99_v45, 0 }
  0xbc   :  { %v522_v15 = vpop.f32.mrf.mxu3  ;;  %v13419_v23 = vand.u32 4294901760, %v1264_v56 }
  0xbd   :  { %628 = vmatmul.f32.gmra.mxu0 %v13267_v26  ;;  %v358_v58 = vpop.f32.mrf.mxu1  ;;  %v436_v4 = vpop.f32.mrf.mxu2 }
  0xbe   :  { %v359_v12 = vadd.f32 %v358_v58, %v245_v14  ;;  %v13423_v41 = vsub.f32 %v1264_v56, %v13419_v23  ;;  %1282 = vmatpush.msrb.mxu0 %v13419_v23  ;;  %1569 = vmatpush.msrb.mxu3 %v13419_v23 }
  0xc0   :  { %v437_v5 = vadd.f32 %v436_v4, %v359_v12  ;;  %697 = vmatmul.f32.gmra.mxu1 %v13267_v26  ;;  %1485 = vmatpush.msrb.mxu2 %v13423_v41  ;;  %v1400_v29 = vand.u32 4294901760, %v13423_v41 }
  0xc1   :  { %903 = vmatmul.f32.gmra.mxu3 %v13293_v61 }
  0xc2   :  { %v253_v28 = vpop.f32.mrf.mxu0  ;;  %v13411_v1 = vadd.f32 %v522_v15, %v437_v5  ;;  %810 = vmatmul.f32.gmra.mxu2 %v13334_v0  ;;  %v1401_v58 = vsub.f32 %v13423_v41, %v1400_v29 }
  0xc4   :  { %v528_v36 = vpop.f32.mrf.mxu3 }
  0xc5   :  { %632 = vmatmul.f32.gmra.mxu0 %v13293_v61  ;;  %v362_v54 = vpop.f32.mrf.mxu1  ;;  %v441_v57 = vpop.f32.mrf.mxu2 }
  0xc6   :  { %v363_v6 = vadd.f32 %v362_v54, %v253_v28  ;;  %v1402_v28 = vand.u32 4294901760, %v1401_v58 }
  0xc8   :  { %v442_v62 = vadd.f32 %v441_v57, %v363_v6  ;;  %701 = vmatmul.f32.gmra.mxu1 %v13293_v61 }
  0xc9   :  { %907 = vmatmul.f32.gmra.mxu3 %v13319_v18  ;;  %1403 = vmatpush.msrb.mxu1 %v1402_v28 }
  0xca   :  { %v261_v0 = vpop.f32.mrf.mxu0  ;;  %v13430_v14 = vadd.f32 %v528_v36, %v442_v62  ;;  %818 = vmatmul.f32.gmra.mxu2 %v13350_v39 }
  0xcc   :  { %20612 = vst [vmem:[#allocation13_spill] sm:$0xff] %v13430_v14  ;;  %v534_v15 = vpop.f32.mrf.mxu3 }
  0xcd   :  { %636 = vmatmul.f32.gmra.mxu0 %v13319_v18  ;;  %v366_v12 = vpop.f32.mrf.mxu1  ;;  %v446_v5 = vpop.f32.mrf.mxu2 }
  0xce   :  { %v367_v4 = vadd.f32 %v366_v12, %v261_v0 }
  0xd0   :  { %v447_v45 = vadd.f32 %v446_v5, %v367_v4  ;;  %705 = vmatmul.f32.gmra.mxu1 %v13319_v18 }
  0xd1   :  { %911 = vmatmul.f32.gmra.mxu3 %v13339_v38 }
  0xd2   :  { %v269_v36 = vpop.f32.mrf.mxu0  ;;  %v13439_v54 = vadd.f32 %v534_v15, %v447_v45  ;;  %826 = vmatmul.f32.gmra.mxu2 %v13361_v55  ;;  %v97_v55 = vld [vmem:[%s20361_s1 + $0x20] sm:$0xff] }
  0xd3   :  { %v13452_v4 = vand.u32 4294901760, %v97_v55 }
  0xd4   :  { %20613 = vst [vmem:[#allocation14_spill] sm:$0xff] %v13439_v54  ;;  %v540_v39 = vpop.f32.mrf.mxu3 }
  0xd5   :  { %640 = vmatmul.f32.gmra.mxu0 %v13339_v38  ;;  %v370_v56 = vpop.f32.mrf.mxu1  ;;  %v451_v57 = vpop.f32.mrf.mxu2  ;;  %v13455_v45 = vsub.f32 %v97_v55, %v13452_v4  ;;  %1571 = vmatpush.msrb.mxu3 %v13452_v4 }
  0xd6   :  { %v371_v6 = vadd.f32 %v370_v56, %v269_v36  ;;  %1284 = vmatpush.msrb.mxu0 %v13452_v4 }
  0xd7   :  { %1488 = vmatpush.msrb.mxu2 %v13455_v45 }
  0xd8   :  { %v452_v62 = vadd.f32 %v451_v57, %v371_v6  ;;  %709 = vmatmul.f32.gmra.mxu1 %v13339_v38 }
  0xd9   :  { %1191 = vmatmul.f32.vlgmr.msra.gmra.mxu3 %v13041_v27 }
  0xda   :  { %v277_v0 = vpop.f32.mrf.mxu0  ;;  %v13445_v58 = vadd.f32 %v540_v39, %v452_v62  ;;  %1122 = vmatmul.f32.vlgmr.msra.gmra.mxu2 %v13041_v27 }
  0xdc   :  { %20614 = vst [vmem:[#allocation15_spill] sm:$0xff] %v13445_v58  ;;  %v546_v15 = vpop.f32.mrf.mxu3 }
  0xdd   :  { %941 = vmatmul.f32.vlgmr.msra.gmra.mxu0 %v13055_v35  ;;  %v374_v12 = vpop.f32.mrf.mxu1  ;;  %v456_v28 = vpop.f32.mrf.mxu2  ;;  %v1406_v35 = vand.u32 4294901760, %v13455_v45 }
  0xde   :  { %v375_v5 = vadd.f32 %v374_v12, %v277_v0 }
  0xdf   :  { %v1407_v56 = vsub.f32 %v13455_v45, %v1406_v35 }
  0xe0   :  { %v457_v27 = vadd.f32 %v456_v28, %v375_v5  ;;  %1023 = vmatmul.f32.vlgmr.msra.gmra.mxu1 %v13074_v43 }
  0xe1   :  { %1195 = vmatmul.f32.gmra.mxu3 %v13048_v33  ;;  %v1408_v43 = vand.u32 4294901760, %v1407_v56 }
  0xe2   :  { %v285_v36 = vpop.f32.mrf.mxu0  ;;  %v13463_v39 = vadd.f32 %v546_v15, %v457_v27  ;;  %1126 = vmatmul.f32.gmra.mxu2 %v13048_v33 }
  0xe3   :  { %1409 = vmatpush.msrb.mxu1 %v1408_v43 }
  0xe4   :  { %20615 = vst [vmem:[#allocation16_spill] sm:$0xff] %v13463_v39  ;;  %v552_v6 = vpop.f32.mrf.mxu3 }
  0xe5   :  { %946 = vmatmul.f32.gmra.mxu0 %v13063_v40  ;;  %v378_v57 = vpop.f32.mrf.mxu1  ;;  %v461_v0 = vpop.f32.mrf.mxu2 }
  0xe6   :  { %v379_v62 = vadd.f32 %v378_v57, %v285_v36 }
  0xe8   :  { %v462_v55 = vadd.f32 %v461_v0, %v379_v62  ;;  %1029 = vmatmul.f32.gmra.mxu1 %v13084_v52 }
  0xe9   :  { %1199 = vmatmul.f32.gmra.mxu3 %v13086_v53 }
  0xea   :  { %v293_v15 = vpop.f32.mrf.mxu0  ;;  %v13472_v12 = vadd.f32 %v552_v6, %v462_v55  ;;  %1130 = vmatmul.f32.gmra.mxu2 %v13086_v53  ;;  %v95_v53 = vld [vmem:[%s20361_s1 + $0x10] sm:$0xff] }
  0xeb   :  { %v13485_v6 = vand.u32 4294901760, %v95_v53 }
  0xec   :  { %20616 = vst [vmem:[#allocation17_spill] sm:$0xff] %v13472_v12  ;;  %v558_v33 = vpop.f32.mrf.mxu3 }
  0xed   :  { %951 = vmatmul.f32.gmra.mxu0 %v13107_v63  ;;  %v382_v5 = vpop.f32.mrf.mxu1  ;;  %v466_v28 = vpop.f32.mrf.mxu2  ;;  %1573 = vmatpush.msrb.mxu3 %v13485_v6 }
  0xee   :  { %v383_v40 = vadd.f32 %v382_v5, %v293_v15  ;;  %1286 = vmatpush.msrb.mxu0 %v13485_v6 }
  0xf0   :  { %v467_v27 = vadd.f32 %v466_v28, %v383_v40  ;;  %1035 = vmatmul.f32.gmra.mxu1 %v13122_v8  ;;  %v1411_v8 = vsub.f32 %v95_v53, %v13485_v6 }
  0xf1   :  { %1203 = vmatmul.f32.gmra.mxu3 %v13124_v11 }
  0xf2   :  { %v301_v36 = vpop.f32.mrf.mxu0  ;;  %v13478_v52 = vadd.f32 %v558_v33, %v467_v27  ;;  %1134 = vmatmul.f32.gmra.mxu2 %v13124_v11  ;;  %v1412_v11 = vand.u32 4294901760, %v1411_v8 }
  0xf3   :  { %1491 = vmatpush.msrb.mxu2 %v1411_v8 }
  0xf4   :  { %20617 = vst [vmem:[#allocation18_spill] sm:$0xff] %v13478_v52  ;;  %v564_v56 = vpop.f32.mrf.mxu3  ;;  %v1413_v55 = vsub.f32 %v1411_v8, %v1412_v11  ;;  %v12770_v52 = vld [vmem:[%s20360_s0 + $0x28] sm:$0xff] }
  0xf5   :  { %956 = vmatmul.f32.gmra.mxu0 %v13142_v16  ;;  %v386_v63 = vpop.f32.mrf.mxu1  ;;  %v471_v43 = vpop.f32.mrf.mxu2 }
  0xf6   :  { %v387_v57 = vadd.f32 %v386_v63, %v301_v36  ;;  %v1414_v5 = vand.u32 4294901760, %v1413_v55 }
  0xf8   :  { %v472_v62 = vadd.f32 %v471_v43, %v387_v57  ;;  %1041 = vmatmul.f32.gmra.mxu1 %v13152_v20 }
  0xf9   :  { %1207 = vmatmul.f32.gmra.mxu3 %v13154_v21  ;;  %1415 = vmatpush.msrb.mxu1 %v1414_v5 }
  0xfa   :  { %v13492_v0 = vpop.f32.mrf.mxu0  ;;  %v13494_v16 = vadd.f32 %v564_v56, %v472_v62  ;;  %1138 = vmatmul.f32.gmra.mxu2 %v13154_v21 }
  0xfc   :  { %20618 = vst [vmem:[#allocation19_spill] sm:$0xff] %v13494_v16  ;;  %v868_v15 = vpop.f32.mrf.mxu3 }
  0xfd   :  { %961 = vmatmul.f32.gmra.mxu0 %v13172_v24  ;;  %v13498_v33 = vpop.f32.mrf.mxu1  ;;  %v739_v40 = vpop.f32.mrf.mxu2 }
  0xfe   :  { %v13500_v28 = vadd.f32 %v868_v15, %v739_v40 }
 0x100   :  { %1047 = vmatmul.f32.gmra.mxu1 %v13181_v30 }
 0x101   :  { %1211 = vmatmul.f32.gmra.mxu3 %v13183_v31 }
 0x102   :  { %v13504_v20 = vpop.f32.mrf.mxu0  ;;  %1142 = vmatmul.f32.gmra.mxu2 %v13183_v31  ;;  %v93_v31 = vld [vmem:[%s20361_s1] sm:$0xff] }
 0x103   :  { %v1287_v53 = vand.u32 4294901760, %v93_v31 }
 0x104   :  { %v872_v21 = vpop.f32.mrf.mxu3 }
 0x105   :  { %966 = vmatmul.f32.gmra.mxu0 %v13199_v42  ;;  %v13508_v27 = vpop.f32.mrf.mxu1  ;;  %v747_v24 = vpop.f32.mrf.mxu2  ;;  %1575 = vmatpush.msrb.mxu3 %v1287_v53 }
 0x106   :  { %v13510_v36 = vadd.f32 %v872_v21, %v747_v24  ;;  %1288 = vmatpush.msrb.mxu0 %v1287_v53 }
 0x108   :  { %1053 = vmatmul.f32.gmra.mxu1 %v13214_v50  ;;  %v1417_v50 = vsub.f32 %v93_v31, %v1287_v53  ;;  %1664 = vmatpush.msra.mxu0 %v1400_v29  ;;  %v12767_v31 = vld [vmem:[%s20360_s0 + $0x8] sm:$0xff] }
 0x109   :  { %1215 = vmatmul.f32.gmra.mxu3 %v13216_v51 }
 0x10a   :  { %v13514_v56 = vpop.f32.mrf.mxu0  ;;  %1146 = vmatmul.f32.gmra.mxu2 %v13216_v51  ;;  %v1418_v51 = vand.u32 4294901760, %v1417_v50  ;;  %1668 = vmatpush.msra.mxu0 %v1406_v35 }
 0x10b   :  { %1494 = vmatpush.msrb.mxu2 %v1417_v50 }
 0x10c   :  { %v876_v30 = vpop.f32.mrf.mxu3  ;;  %1672 = vmatpush.msra.mxu0 %v1412_v11 }
 0x10d   :  { %971 = vmatmul.f32.gmra.mxu0 %v13230_v60  ;;  %v13521_v42 = vpop.f32.mrf.mxu1  ;;  %v755_v63 = vpop.f32.mrf.mxu2  ;;  %v1419_v60 = vsub.f32 %v1417_v50, %v1418_v51 }
 0x10e   :  { %v13523_v57 = vadd.f32 %v876_v30, %v755_v63  ;;  %1676 = vmatpush.msra.mxu0 %v1418_v51 }
 0x10f   :  { %v1420_v41 = vand.u32 4294901760, %v1419_v60 }
 0x110   :  { %1059 = vmatmul.f32.gmra.mxu1 %v13238_v2 }
 0x111   :  { %1219 = vmatmul.f32.gmra.mxu3 %v13240_v13  ;;  %1421 = vmatpush.msrb.mxu1 %v1420_v41 }
 0x112   :  { %v13529_v43 = vpop.f32.mrf.mxu0  ;;  %1150 = vmatmul.f32.gmra.mxu2 %v13240_v13 }
 0x113   :  { %1739 = vmatpush.msra.mxu1 %v13419_v23 }
 0x114   :  { %v880_v8 = vpop.f32.mrf.mxu3 }
 0x115   :  { %976 = vmatmul.f32.gmra.mxu0 %v13256_v17  ;;  %v13535_v2 = vpop.f32.mrf.mxu1  ;;  %v763_v29 = vpop.f32.mrf.mxu2  ;;  %1741 = vmatpush.msra.mxu1 %v13452_v4 }
 0x116   :  { %v13537_v62 = vadd.f32 %v880_v8, %v763_v29 }
 0x117   :  { %1743 = vmatpush.msra.mxu1 %v13485_v6 }
 0x118   :  { %1065 = vmatmul.f32.gmra.mxu1 %v13265_v25 }
 0x119   :  { %1223 = vmatmul.f32.gmra.mxu3 %v13267_v26  ;;  %1745 = vmatpush.msra.mxu1 %v1287_v53  ;;  %v1241_v53 = vsel %vm155_vm2, %v12767_v31, 0 }
 0x11a   :  { %v13542_v13 = vpop.f32.mrf.mxu0  ;;  %1154 = vmatmul.f32.gmra.mxu2 %v13267_v26  ;;  %v13602_v50 = vand.u32 4294901760, %v1241_v53 }
 0x11c   :  { %v884_v17 = vpop.f32.mrf.mxu3  ;;  %v13613_v41 = vsub.f32 %v1241_v53, %v13602_v50  ;;  %v12769_v53 = vld [vmem:[%s20360_s0 + $0x20] sm:$0xff] }
 0x11d   :  { %981 = vmatmul.f32.gmra.mxu0 %v13281_v44  ;;  %v13547_v45 = vpop.f32.mrf.mxu1  ;;  %v771_v35 = vpop.f32.mrf.mxu2  ;;  %v100_v44 = vld [vmem:[%s20361_s1 + $0x38] sm:$0xf] }
 0x11e   :  { %20619 = vst [vmem:[#allocation20_spill] sm:$0xff] %v13547_v45  ;;  %v13550_v11 = vadd.f32 %v884_v17, %v771_v35  ;;  %v1267_v4 = vsel %vm180_vm0, %v100_v44, 0  ;;  %v12768_v17 = vld [vmem:[%s20360_s0 + $0x10] sm:$0xff] }
 0x11f   :  { %v13566_v55 = vand.u32 4294901760, %v1267_v4  ;;  %20628 = vst [vmem:[#allocation29_spill] sm:$0xff] %v13613_v41  ;;  %v1243_v35 = vsel %vm155_vm2, %v12768_v17, 0 }
 0x120   :  { %1071 = vmatmul.f32.gmra.mxu1 %v13291_v59  ;;  %v1239_v59 = vsel %vm155_vm2, %v13003_v7, 0  ;;  %v13628_v44 = vand.u32 4294901760, %v1243_v35 }
 0x121   :  { %1227 = vmatmul.f32.gmra.mxu3 %v13293_v61  ;;  %1808 = vmatpush.msra.mxu2 %v13566_v55 }
 0x122   :  { %v13554_v25 = vpop.f32.mrf.mxu0  ;;  %1158 = vmatmul.f32.gmra.mxu2 %v13293_v61  ;;  %v13573_v61 = vsub.f32 %v1267_v4, %v13566_v55 }
 0x123   :  { %20620 = vst [vmem:[#allocation21_spill] sm:$0xff] %v13554_v25 }
 0x124   :  { %v888_v26 = vpop.f32.mrf.mxu3  ;;  %v20374_v40 = vand.u32 4294901760, %v13573_v61  ;;  %v20651_v25 = vand.u32 4294901760, %v13573_v61 }
 0x125   :  { %986 = vmatmul.f32.gmra.mxu0 %v13308_v3  ;;  %v13561_v23 = vpop.f32.mrf.mxu1  ;;  %v779_v6 = vpop.f32.mrf.mxu2  ;;  %v13576_v3 = vand.u32 4294901760, %v1239_v59 }
 0x126   :  { %20621 = vst [vmem:[#allocation22_spill] sm:$0xff] %v13561_v23  ;;  %v13568_v15 = vadd.f32 %v888_v26, %v779_v6 }
 0x127   :  { %v13589_v24 = vsub.f32 %v1239_v59, %v13576_v3  ;;  %v98_v59 = vld [vmem:[%s20361_s1 + $0x28] sm:$0xff] }
 0x128   :  { %1077 = vmatmul.f32.gmra.mxu1 %v13317_v47  ;;  %v1927_v47 = vsub.f32 %v13573_v61, %v20374_v40 }
 0x129   :  { %1231 = vmatmul.f32.gmra.mxu3 %v13319_v18  ;;  %20624 = vst [vmem:[#allocation25_spill] sm:$0xff] %v13589_v24 }
 0x12a   :  { %v13578_v5 = vpop.f32.mrf.mxu0  ;;  %1162 = vmatmul.f32.gmra.mxu2 %v13319_v18  ;;  %v1928_v18 = vand.u32 4294901760, %v1927_v47  ;;  %v13642_v47 = vsub.f32 %v1243_v35, %v13628_v44 }
 0x12b   :  { %20622 = vst [vmem:[#allocation23_spill] sm:$0xff] %v13578_v5 }
 0x12c   :  { %v892_v7 = vpop.f32.mrf.mxu3  ;;  %1929 = vmatpush.msra.mxu3 %v1928_v18  ;;  %20632 = vst [vmem:[#allocation33_spill] sm:$0xff] %v13642_v47  ;;  %v1245_v18 = vsel %vm155_vm2, %v12769_v53, 0  ;;  %v13662_v17 = vand.u32 4294901760, %v13642_v47 }
 0x12d   :  { %991 = vmatmul.f32.gmra.mxu0 %v13329_v22  ;;  %v13586_v21 = vpop.f32.mrf.mxu1  ;;  %v787_v30 = vpop.f32.mrf.mxu2  ;;  %v13600_v22 = vand.u32 4294901760, %v13589_v24  ;;  %v13664_v35 = vand.u32 4294901760, %v1245_v18 }
 0x12e   :  { %20623 = vst [vmem:[#allocation24_spill] sm:$0xff] %v13586_v21  ;;  %v13595_v63 = vadd.f32 %v892_v7, %v787_v30  ;;  %v13644_v30 = vand.u32 4294901760, %v98_v59  ;;  %v1308_v40 = vsub.f32 %v13642_v47, %v13662_v17 }
 0x12f   :  { %20625 = vst [vmem:[#allocation26_spill] sm:$0xff] %v13600_v22  ;;  %v13682_v16 = vsub.f32 %v1245_v18, %v13664_v35 }
 0x130   :  { %1083 = vmatmul.f32.gmra.mxu1 %v13337_v32  ;;  %v1292_v32 = vsub.f32 %v13589_v24, %v13600_v22  ;;  %1810 = vmatpush.msra.mxu2 %v13644_v30  ;;  %20633 = vst [vmem:[#allocation34_spill] sm:$0xff] %v13662_v17 }
 0x131   :  { %1235 = vmatmul.f32.gmra.mxu3 %v13339_v38  ;;  %20636 = vst [vmem:[#allocation37_spill] sm:$0xff] %v13682_v16  ;;  %v13695_v18 = vand.u32 4294901760, %v13682_v16 }
 0x132   :  { %v13604_v51 = vpop.f32.mrf.mxu0  ;;  %1166 = vmatmul.f32.gmra.mxu2 %v13339_v38  ;;  %v13623_v38 = vand.u32 4294901760, %v1292_v32  ;;  %v13656_v32 = vsub.f32 %v98_v59, %v13644_v30 }
 0x133   :  { %20626 = vst [vmem:[#allocation27_spill] sm:$0xff] %v13604_v51 }
 0x134   :  { %v896_v60 = vpop.f32.mrf.mxu3  ;;  %20637 = vst [vmem:[#allocation38_spill] sm:$0xff] %v13695_v18  ;;  %v20652_v45 = vand.u32 4294901760, %v13656_v32 }
 0x135   :  { %996 = vmatmul.f32.gmra.mxu0 %v13346_v37  ;;  %v13608_v8 = vpop.f32.mrf.mxu1  ;;  %v795_v29 = vpop.f32.mrf.mxu2  ;;  %v13626_v37 = vand.u32 4294901760, %v13613_v41 }
 0x136   :  { %20627 = vst [vmem:[#allocation28_spill] sm:$0xff] %v13608_v8  ;;  %v13619_v26 = vadd.f32 %v896_v60, %v795_v29 }
 0x137   :  { %20629 = vst [vmem:[#allocation30_spill] sm:$0xff] %v13626_v37  ;;  %v1300_v7 = vsub.f32 %v13613_v41, %v13626_v37 }
 0x138   :  { %1089 = vmatmul.f32.gmra.mxu1 %v13353_v46 }
 0x139   :  { %1579 = vmatmul.f32.vlgmr.msrb.gmra.mxu3 %v13600_v22  ;;  %v13659_v29 = vand.u32 4294901760, %v1300_v7 }
 0x13a   :  { %v13630_v4 = vpop.f32.mrf.mxu0  ;;  %1497 = vmatmul.f32.vlgmr.msrb.gmra.mxu2 %v13589_v24 }
 0x13b   :  { %20630 = vst [vmem:[#allocation31_spill] sm:$0xff] %v13630_v4 }
 0x13c   :  { %v900_v6 = vpop.f32.mrf.mxu3 }
 0x13d   :  { %1294 = vmatmul.f32.vlgmr.msrb.gmra.mxu0 %v13623_v38  ;;  %v13637_v46 = vpop.f32.mrf.mxu1  ;;  %v803_v31 = vpop.f32.mrf.mxu2 }
 0x13e   :  { %20631 = vst [vmem:[#allocation32_spill] sm:$0xff] %v13637_v46  ;;  %2011 = vmatpush.msrb.mxu0 %v13573_v61  ;;  %v13651_v60 = vadd.f32 %v900_v6, %v803_v31  ;;  %v20378_v31 = vand.u32 4294901760, %v13656_v32 }
 0x140   :  { %1423 = vmatmul.f32.vlgmr.msrb.gmra.mxu1 %v13576_v3  ;;  %2014 = vmatpush.msrb.mxu0 %v13656_v32  ;;  %v1933_v7 = vsub.f32 %v13656_v32, %v20378_v31  ;;  %v13692_v31 = vand.u32 4294901760, %v1308_v40 }
 0x141   :  { %1585 = vmatmul.f32.gmra.mxu3 %v13626_v37  ;;  %2095 = vmatpush.msrb.mxu1 %v13566_v55 }
 0x142   :  { %v13667_v6 = vpop.f32.mrf.mxu0  ;;  %1502 = vmatmul.f32.gmra.mxu2 %v13613_v41  ;;  %v1247_v41 = vsel %vm155_vm2, %v12770_v52, 0  ;;  %v1934_v22 = vand.u32 4294901760, %v1933_v7  ;;  %v12771_v7 = vld [vmem:[%s20360_s0 + $0x30] sm:$0xff] }
 0x143   :  { %20634 = vst [vmem:[#allocation35_spill] sm:$0xff] %v13667_v6  ;;  %2097 = vmatpush.msrb.mxu1 %v13644_v30 }
 0x144   :  { %v904_v59 = vpop.f32.mrf.mxu3  ;;  %1935 = vmatpush.msra.mxu3 %v1934_v22  ;;  %v1316_v22 = vsub.f32 %v13682_v16, %v13695_v18 }
 0x145   :  { %1302 = vmatmul.f32.gmra.mxu0 %v13659_v29  ;;  %v13677_v53 = vpop.f32.mrf.mxu1  ;;  %v811_v37 = vpop.f32.mrf.mxu2 }
 0x146   :  { %20635 = vst [vmem:[#allocation36_spill] sm:$0xff] %v13677_v53  ;;  %v13688_v6 = vadd.f32 %v904_v59, %v811_v37  ;;  %v13697_v53 = vand.u32 4294901760, %v1247_v41 }
 0x148   :  { %1427 = vmatmul.f32.gmra.mxu1 %v13602_v50  ;;  %v13708_v40 = vsub.f32 %v1247_v41, %v13697_v53 }
 0x149   :  { %1591 = vmatmul.f32.gmra.mxu3 %v13662_v17  ;;  %v1249_v17 = vsel %vm155_vm2, %v12771_v7, 0 }
 0x14a   :  { %v13699_v12 = vpop.f32.mrf.mxu0  ;;  %1507 = vmatmul.f32.gmra.mxu2 %v13642_v47  ;;  %20640 = vst [vmem:[#allocation41_spill] sm:$0xff] %v13708_v40  ;;  %v13718_v47 = vand.u32 4294901760, %v1316_v22  ;;  %v13723_v41 = vand.u32 4294901760, %v1249_v17 }
 0x14b   :  { %20638 = vst [vmem:[#allocation39_spill] sm:$0xff] %v13699_v12 }
 0x14c   :  { %v908_v52 = vpop.f32.mrf.mxu3  ;;  %v13737_v7 = vsub.f32 %v1249_v17, %v13723_v41 }
 0x14d   :  { %1310 = vmatmul.f32.gmra.mxu0 %v13692_v31  ;;  %v13703_v37 = vpop.f32.mrf.mxu1  ;;  %v819_v59 = vpop.f32.mrf.mxu2 }
 0x14e   :  { %20639 = vst [vmem:[#allocation40_spill] sm:$0xff] %v13703_v37  ;;  %v13714_v12 = vadd.f32 %v908_v52, %v819_v59  ;;  %v13721_v37 = vand.u32 4294901760, %v13708_v40  ;;  %v96_v52 = vld [vmem:[%s20361_s1 + $0x18] sm:$0xff]  ;;  %v13755_v39 = vand.u32 4294901760, %v13737_v7 }
 0x14f   :  { %20644 = vst [vmem:[#allocation45_spill] sm:$0xff] %v13737_v7 }
 0x150   :  { %1431 = vmatmul.f32.gmra.mxu1 %v13628_v44  ;;  %20641 = vst [vmem:[#allocation42_spill] sm:$0xff] %v13721_v37  ;;  %v1324_v22 = vsub.f32 %v13708_v40, %v13721_v37  ;;  %v1332_v51 = vsub.f32 %v13737_v7, %v13755_v39 }
 0x151   :  { %1597 = vmatmul.f32.gmra.mxu3 %v13695_v18  ;;  %v13739_v18 = vand.u32 4294901760, %v96_v52  ;;  %20645 = vst [vmem:[#allocation46_spill] sm:$0xff] %v13755_v39 }
 0x152   :  { %v13725_v24 = vpop.f32.mrf.mxu0  ;;  %1512 = vmatmul.f32.gmra.mxu2 %v13682_v16  ;;  %v1251_v16 = vsel %vm155_vm2, %v13163_v10, 0  ;;  %v13752_v17 = vand.u32 4294901760, %v1324_v22 }
 0x153   :  { %20642 = vst [vmem:[#allocation43_spill] sm:$0xff] %v13725_v24  ;;  %1812 = vmatpush.msra.mxu2 %v13739_v18  ;;  %2099 = vmatpush.msrb.mxu1 %v13739_v18  ;;  %v13757_v8 = vand.u32 4294901760, %v1251_v16 }
 0x154   :  { %v912_v46 = vpop.f32.mrf.mxu3 }
 0x155   :  { %1318 = vmatmul.f32.gmra.mxu0 %v13718_v47  ;;  %v13732_v59 = vpop.f32.mrf.mxu1  ;;  %v827_v24 = vpop.f32.mrf.mxu2  ;;  %v13770_v58 = vsub.f32 %v1251_v16, %v13757_v8 }
 0x156   :  { %20643 = vst [vmem:[#allocation44_spill] sm:$0xff] %v13732_v59  ;;  %v13743_v4 = vadd.f32 %v912_v46, %v827_v24  ;;  %v13749_v59 = vsub.f32 %v96_v52, %v13739_v18 }
 0x157   :  { %20646 = vst [vmem:[#allocation47_spill] sm:$0xff] %v13770_v58  ;;  %v13781_v16 = vand.u32 4294901760, %v13770_v58 }
 0x158   :  { %1435 = vmatmul.f32.gmra.mxu1 %v13664_v35  ;;  %v20386_v24 = vand.u32 4294901760, %v13749_v59  ;;  %2017 = vmatpush.msrb.mxu0 %v13749_v59 }
 0x159   :  { %1603 = vmatmul.f32.gmra.mxu3 %v13721_v37  ;;  %20647 = vst [vmem:[#allocation48_spill] sm:$0xff] %v13781_v16 }
 0x15a   :  { %v942_v10 = vpop.f32.mrf.mxu0  ;;  %1517 = vmatmul.f32.gmra.mxu2 %v13708_v40  ;;  %v1939_v22 = vsub.f32 %v13749_v59, %v20386_v24  ;;  %v13778_v24 = vand.u32 4294901760, %v1332_v51  ;;  %v1340_v51 = vsub.f32 %v13770_v58, %v13781_v16 }
 0x15b   :  { %v943_v46 = vadd.f32 %v942_v10, %v13500_v28  ;;  %v12772_v28 = vld [vmem:[%s20360_s0 + $0x48] sm:$0xff] }
 0x15c   :  { %v1192_v52 = vpop.f32.mrf.mxu3  ;;  %v1253_v10 = vsel %vm155_vm2, %v12772_v28, 0  ;;  %v1940_v40 = vand.u32 4294901760, %v1939_v22 }
 0x15d   :  { %1326 = vmatmul.f32.gmra.mxu0 %v13752_v17  ;;  %v1024_v37 = vpop.f32.mrf.mxu1  ;;  %v1123_v5 = vpop.f32.mrf.mxu2 }
 0x15e   :  { %v1025_v21 = vadd.f32 %v1024_v37, %v943_v46  ;;  %1941 = vmatpush.msra.mxu3 %v1940_v40  ;;  %v13783_v37 = vand.u32 4294901760, %v1253_v10 }
 0x160   :  { %v1124_v54 = vadd.f32 %v1123_v5, %v1025_v21  ;;  %1439 = vmatmul.f32.gmra.mxu1 %v13697_v53  ;;  %v13793_v40 = vsub.f32 %v1253_v10, %v13783_v37 }
 0x161   :  { %1609 = vmatmul.f32.gmra.mxu3 %v13755_v39 }
 0x162   :  { %v947_v46 = vpop.f32.mrf.mxu0  ;;  %v13785_v23 = vadd.f32 %v1192_v52, %v1124_v54  ;;  %1522 = vmatmul.f32.gmra.mxu2 %v13737_v7  ;;  %v12773_v54 = vld [vmem:[%s20360_s0 + $0x50] sm:$0xff] }
 0x163   :  { %v948_v22 = vadd.f32 %v947_v46, %v13510_v36  ;;  %v1255_v52 = vsel %vm155_vm2, %v12773_v54, 0  ;;  %v13801_v36 = vand.u32 4294901760, %v1340_v51  ;;  %v13804_v46 = vand.u32 4294901760, %v13793_v40 }
 0x164   :  { %20648 = vst [vmem:[#allocation49_spill] sm:$0xff] %v13785_v23  ;;  %v1196_v5 = vpop.f32.mrf.mxu3  ;;  %v13806_v10 = vand.u32 4294901760, %v1255_v52 }
 0x165   :  { %1334 = vmatmul.f32.gmra.mxu0 %v13778_v24  ;;  %v1030_v21 = vpop.f32.mrf.mxu1  ;;  %v1127_v39 = vpop.f32.mrf.mxu2  ;;  %20649 = vst [vmem:[#allocation50_spill] sm:$0xff] %v13804_v46 }
 0x166   :  { %v1031_v28 = vadd.f32 %v1030_v21, %v948_v22 }
 0x168   :  { %v1128_v7 = vadd.f32 %v1127_v39, %v1031_v28  ;;  %1443 = vmatmul.f32.gmra.mxu1 %v13723_v41  ;;  %v94_v39 = vld [vmem:[%s20361_s1 + $0x8] sm:$0xff]  ;;  %v1348_v28 = vsub.f32 %v13793_v40, %v13804_v46 }
 0x169   :  { %1615 = vmatmul.f32.gmra.mxu3 %v13781_v16  ;;  %v13819_v16 = vsub.f32 %v1255_v52, %v13806_v10 }
 0x16a   :  { %v952_v22 = vpop.f32.mrf.mxu0  ;;  %v13808_v21 = vadd.f32 %v1196_v5, %v1128_v7  ;;  %1527 = vmatmul.f32.gmra.mxu2 %v13770_v58  ;;  %v1813_v7 = vand.u32 4294901760, %v94_v39  ;;  %v13827_v14 = vand.u32 4294901760, %v1348_v28  ;;  %v20653_v28 = vand.u32 4294901760, %v13749_v59 }
 0x16b   :  { %v953_v23 = vadd.f32 %v952_v22, %v13523_v57  ;;  %v1257_v57 = vsel %vm155_vm2, %v13247_v9, 0  ;;  %v13830_v52 = vand.u32 4294901760, %v13819_v16 }
 0x16c   :  { %20650 = vst [vmem:[#allocation51_spill] sm:$0xff] %v13808_v21  ;;  %v1200_v54 = vpop.f32.mrf.mxu3  ;;  %1814 = vmatpush.msra.mxu2 %v1813_v7  ;;  %2101 = vmatpush.msrb.mxu1 %v1813_v7  ;;  %v1943_v58 = vsub.f32 %v94_v39, %v1813_v7 }
 0x16d   :  { %1342 = vmatmul.f32.gmra.mxu0 %v13801_v36  ;;  %v1036_v51 = vpop.f32.mrf.mxu1  ;;  %v1131_v21 = vpop.f32.mrf.mxu2 }
 0x16e   :  { %v1037_v5 = vadd.f32 %v1036_v51, %v953_v23  ;;  %2190 = vmatpush.msrb.mxu2 %v20651_v25  ;;  %v13832_v23 = vand.u32 4294901760, %v1257_v57  ;;  %v1944_v9 = vand.u32 4294901760, %v1943_v58  ;;  %2020 = vmatpush.msrb.mxu0 %v1943_v58 }
 0x170   :  { %v1132_v22 = vadd.f32 %v1131_v21, %v1037_v5  ;;  %1447 = vmatmul.f32.gmra.mxu1 %v13757_v8  ;;  %2194 = vmatpush.msrb.mxu2 %v20652_v45  ;;  %v1945_v39 = vsub.f32 %v1943_v58, %v1944_v9  ;;  %v13846_v45 = vsub.f32 %v1257_v57, %v13832_v23 }
 0x171   :  { %1621 = vmatmul.f32.gmra.mxu3 %v13804_v46  ;;  %v1356_v46 = vsub.f32 %v13819_v16, %v13830_v52 }
 0x172   :  { %v957_v51 = vpop.f32.mrf.mxu0  ;;  %v13836_v21 = vadd.f32 %v1200_v54, %v1132_v22  ;;  %1532 = vmatmul.f32.gmra.mxu2 %v13793_v40  ;;  %20654 = vst [vmem:[#allocation52_spill] sm:$0xff] %v13846_v45  ;;  %v1946_v22 = vand.u32 4294901760, %v1945_v39  ;;  %v13857_v57 = vand.u32 4294901760, %v13846_v45 }
 0x173   :  { %v958_v25 = vadd.f32 %v957_v51, %v13537_v62  ;;  %2198 = vmatpush.msrb.mxu2 %v20653_v28  ;;  %v12774_v62 = vld [vmem:[%s20360_s0 + $0x68] sm:$0xff]  ;;  %v13854_v51 = vand.u32 4294901760, %v1356_v46 }
 0x174   :  { %v1204_v61 = vpop.f32.mrf.mxu3  ;;  %v1259_v58 = vsel %vm155_vm2, %v12774_v62, 0  ;;  %1947 = vmatpush.msra.mxu3 %v1946_v22  ;;  %20655 = vst [vmem:[#allocation53_spill] sm:$0xff] %v13857_v57 }
 0x175   :  { %1350 = vmatmul.f32.gmra.mxu0 %v13827_v14  ;;  %v1042_v5 = vpop.f32.mrf.mxu1  ;;  %v1135_v54 = vpop.f32.mrf.mxu2  ;;  %2202 = vmatpush.msrb.mxu2 %v1944_v9 }
 0x176   :  { %v1043_v32 = vadd.f32 %v1042_v5, %v958_v25  ;;  %v13859_v25 = vand.u32 4294901760, %v1259_v58  ;;  %2265 = vmatpush.msrb.mxu3 %v13566_v55 }
 0x178   :  { %v1136_v59 = vadd.f32 %v1135_v54, %v1043_v32  ;;  %1451 = vmatmul.f32.gmra.mxu1 %v13783_v37  ;;  %2267 = vmatpush.msrb.mxu3 %v13644_v30  ;;  %v1364_v32 = vsub.f32 %v13846_v45, %v13857_v57  ;;  %v13871_v54 = vsub.f32 %v1259_v58, %v13859_v25 }
 0x179   :  { %1627 = vmatmul.f32.gmra.mxu3 %v13830_v52 }
 0x17a   :  { %v962_v28 = vpop.f32.mrf.mxu0  ;;  %v13862_v5 = vadd.f32 %v1204_v61, %v1136_v59  ;;  %1537 = vmatmul.f32.gmra.mxu2 %v13819_v16  ;;  %20656 = vst [vmem:[#allocation54_spill] sm:$0xff] %v13871_v54  ;;  %v12775_v61 = vld [vmem:[%s20360_s0 + $0x70] sm:$0xff]  ;;  %2269 = vmatpush.msrb.mxu3 %v13739_v18  ;;  %v13880_v22 = vand.u32 4294901760, %v1364_v32  ;;  %v13883_v58 = vand.u32 4294901760, %v13871_v54 }
 0x17b   :  { %v963_v9 = vadd.f32 %v962_v28, %v13550_v11  ;;  %v1261_v11 = vsel %vm155_vm2, %v12775_v61, 0 }
 0x17c   :  { %v1208_v39 = vpop.f32.mrf.mxu3  ;;  %2271 = vmatpush.msrb.mxu3 %v1813_v7  ;;  %20657 = vst [vmem:[#allocation55_spill] sm:$0xff] %v13883_v58  ;;  %v13885_v59 = vand.u32 4294901760, %v1261_v11  ;;  %v1372_v32 = vsub.f32 %v13871_v54, %v13883_v58 }
 0x17d   :  { %1358 = vmatmul.f32.gmra.mxu0 %v13854_v51  ;;  %v1048_v46 = vpop.f32.mrf.mxu1  ;;  %v1139_v55 = vpop.f32.mrf.mxu2 }
 0x17e   :  { %v1049_v62 = vadd.f32 %v1048_v46, %v963_v9 }
 0x180   :  { %v1140_v30 = vadd.f32 %v1139_v55, %v1049_v62  ;;  %1455 = vmatmul.f32.gmra.mxu1 %v13806_v10  ;;  %v13895_v62 = vsub.f32 %v1261_v11, %v13885_v59 }
 0x181   :  { %1633 = vmatmul.f32.gmra.mxu3 %v13857_v57 }
 0x182   :  { %v967_v28 = vpop.f32.mrf.mxu0  ;;  %v13887_v9 = vadd.f32 %v1208_v39, %v1140_v30  ;;  %1542 = vmatmul.f32.gmra.mxu2 %v13846_v45  ;;  %v13899_v39 = vand.u32 4294901760, %v1372_v32 }
 0x183   :  { %v968_v18 = vadd.f32 %v967_v28, %v13568_v15  ;;  %v13902_v15 = vand.u32 4294901760, %v13895_v62 }
 0x184   :  { %v1212_v46 = vpop.f32.mrf.mxu3 }
 0x185   :  { %1366 = vmatmul.f32.gmra.mxu0 %v13880_v22  ;;  %v1054_v7 = vpop.f32.mrf.mxu1  ;;  %v1143_v61 = vpop.f32.mrf.mxu2  ;;  %20658 = vst [vmem:[#allocation56_spill] sm:$0xff] %v13902_v15 }
 0x186   :  { %v1055_v55 = vadd.f32 %v1054_v7, %v968_v18  ;;  %v1380_v7 = vsub.f32 %v13895_v62, %v13902_v15 }
 0x188   :  { %v1144_v57 = vadd.f32 %v1143_v61, %v1055_v55  ;;  %1459 = vmatmul.f32.gmra.mxu1 %v13832_v23 }
 0x189   :  { %1639 = vmatmul.f32.gmra.mxu3 %v13883_v58 }
 0x18a   :  { %v972_v30 = vpop.f32.mrf.mxu0  ;;  %v13904_v28 = vadd.f32 %v1212_v46, %v1144_v57  ;;  %1547 = vmatmul.f32.gmra.mxu2 %v13871_v54  ;;  %v13913_v57 = vand.u32 4294901760, %v1380_v7 }
 0x18b   :  { %v973_v11 = vadd.f32 %v972_v30, %v13595_v63 }
 0x18c   :  { %v1216_v45 = vpop.f32.mrf.mxu3 }
 0x18d   :  { %1374 = vmatmul.f32.gmra.mxu0 %v13899_v39  ;;  %v1060_v18 = vpop.f32.mrf.mxu1  ;;  %v1147_v32 = vpop.f32.mrf.mxu2 }
 0x18e   :  { %v1061_v55 = vadd.f32 %v1060_v18, %v973_v11 }
 0x190   :  { %v1148_v61 = vadd.f32 %v1147_v32, %v1061_v55  ;;  %1463 = vmatmul.f32.gmra.mxu1 %v13859_v25 }
 0x191   :  { %1645 = vmatmul.f32.gmra.mxu3 %v13902_v15 }
 0x192   :  { %v977_v46 = vpop.f32.mrf.mxu0  ;;  %v13915_v58 = vadd.f32 %v1216_v45, %v1148_v61  ;;  %1552 = vmatmul.f32.gmra.mxu2 %v13895_v62 }
 0x193   :  { %v978_v63 = vadd.f32 %v977_v46, %v13619_v26 }
 0x194   :  { %v1220_v30 = vpop.f32.mrf.mxu3 }
 0x195   :  { %1382 = vmatmul.f32.gmra.mxu0 %v13913_v57  ;;  %v1066_v54 = vpop.f32.mrf.mxu1  ;;  %v1151_v18 = vpop.f32.mrf.mxu2 }
 0x196   :  { %v1067_v11 = vadd.f32 %v1066_v54, %v978_v63 }
 0x198   :  { %v1152_v55 = vadd.f32 %v1151_v18, %v1067_v11  ;;  %1467 = vmatmul.f32.gmra.mxu1 %v13885_v59 }
 0x199   :  { %1949 = vmatmul.f32.vlgmr.msra.gmra.mxu3 %v13576_v3 }
 0x19a   :  { %v982_v7 = vpop.f32.mrf.mxu0  ;;  %v13922_v32 = vadd.f32 %v1220_v30, %v1152_v55  ;;  %1820 = vmatmul.f32.vlgmr.msra.gmra.mxu2 %v13623_v38 }
 0x19b   :  { %v983_v45 = vadd.f32 %v982_v7, %v13651_v60 }
 0x19c   :  { %v1224_v61 = vpop.f32.mrf.mxu3 }
 0x19d   :  { %1678 = vmatmul.f32.vlgmr.msra.gmra.mxu0 %v13576_v3  ;;  %v1072_v26 = vpop.f32.mrf.mxu1  ;;  %v1155_v15 = vpop.f32.mrf.mxu2 }
 0x19e   :  { %v1073_v46 = vadd.f32 %v1072_v26, %v983_v45 }
 0x1a0   :  { %v1156_v54 = vadd.f32 %v1155_v15, %v1073_v46  ;;  %1747 = vmatmul.f32.vlgmr.msra.gmra.mxu1 %v13576_v3 }
 0x1a1   :  { %1953 = vmatmul.f32.gmra.mxu3 %v13602_v50 }
 0x1a2   :  { %v987_v63 = vpop.f32.mrf.mxu0  ;;  %v13929_v11 = vadd.f32 %v1224_v61, %v1156_v54  ;;  %1828 = vmatmul.f32.gmra.mxu2 %v13659_v29 }
 0x1a3   :  { %v988_v38 = vadd.f32 %v987_v63, %v13688_v6 }
 0x1a4   :  { %v1228_v30 = vpop.f32.mrf.mxu3 }
 0x1a5   :  { %1682 = vmatmul.f32.gmra.mxu0 %v13602_v50  ;;  %v1078_v60 = vpop.f32.mrf.mxu1  ;;  %v1159_v55 = vpop.f32.mrf.mxu2 }
 0x1a6   :  { %v1079_v18 = vadd.f32 %v1078_v60, %v988_v38 }
 0x1a8   :  { %v1160_v7 = vadd.f32 %v1159_v55, %v1079_v18  ;;  %1751 = vmatmul.f32.gmra.mxu1 %v13602_v50  ;;  %v598_v55 = vadd.f32 %v13492_v0, %v13387_v48  ;;  %v602_v48 = vadd.f32 %v13504_v20, %v13393_v34  ;;  %v606_v34 = vadd.f32 %v13514_v56, %v13399_v19 }
 0x1a9   :  { %1957 = vmatmul.f32.gmra.mxu3 %v13628_v44  ;;  %v610_v19 = vadd.f32 %v13529_v43, %v13405_v49  ;;  %v614_v49 = vadd.f32 %v13542_v13, %v13411_v1  ;;  %v20663_v1 = vld [vmem:[#allocation13_spill] sm:$0xff] }
 0x1aa   :  { %v992_v15 = vpop.f32.mrf.mxu0  ;;  %v13936_v45 = vadd.f32 %v1228_v30, %v1160_v7  ;;  %1836 = vmatmul.f32.gmra.mxu2 %v13692_v31  ;;  %v20664_v13 = vld [vmem:[#allocation21_spill] sm:$0xff] }
 0x1ab   :  { %v993_v29 = vadd.f32 %v992_v15, %v13714_v12  ;;  %v667_v15 = vadd.f32 %v13498_v33, %v598_v55  ;;  %v671_v33 = vadd.f32 %v13508_v27, %v602_v48  ;;  %v675_v27 = vadd.f32 %v13521_v42, %v606_v34 }
 0x1ac   :  { %v1232_v61 = vpop.f32.mrf.mxu3  ;;  %v679_v42 = vadd.f32 %v13535_v2, %v610_v19  ;;  %v20661_v2 = vld [vmem:[#allocation20_spill] sm:$0xff]  ;;  %v618_v34 = vadd.f32 %v20664_v13, %v20663_v1  ;;  %v20671_v13 = vld [vmem:[#allocation15_spill] sm:$0xff] }
 0x1ad   :  { %1686 = vmatmul.f32.gmra.mxu0 %v13628_v44  ;;  %v1084_v6 = vpop.f32.mrf.mxu1  ;;  %v1163_v46 = vpop.f32.mrf.mxu2 }
 0x1ae   :  { %v1085_v26 = vadd.f32 %v1084_v6, %v993_v29 }
 0x1b0   :  { %v1164_v54 = vadd.f32 %v1163_v46, %v1085_v26  ;;  %1755 = vmatmul.f32.gmra.mxu1 %v13628_v44 }
 0x1b1   :  { %1961 = vmatmul.f32.gmra.mxu3 %v13664_v35 }
 0x1b2   :  { %v997_v63 = vpop.f32.mrf.mxu0  ;;  %v13943_v38 = vadd.f32 %v1232_v61, %v1164_v54  ;;  %1844 = vmatmul.f32.gmra.mxu2 %v13718_v47 }
 0x1b3   :  { %v998_v31 = vadd.f32 %v997_v63, %v13743_v4 }
 0x1b4   :  { %v1236_v30 = vpop.f32.mrf.mxu3 }
 0x1b5   :  { %1690 = vmatmul.f32.gmra.mxu0 %v13664_v35  ;;  %v1090_v12 = vpop.f32.mrf.mxu1  ;;  %v1167_v18 = vpop.f32.mrf.mxu2 }
 0x1b6   :  { %v1091_v60 = vadd.f32 %v1090_v12, %v998_v31 }
 0x1b8   :  { %v1168_v7 = vadd.f32 %v1167_v18, %v1091_v60  ;;  %1759 = vmatmul.f32.gmra.mxu1 %v13664_v35 }
 0x1b9   :  { %1965 = vmatmul.f32.gmra.mxu3 %v13697_v53 }
 0x1ba   :  { %v1295_v29 = vpop.f32.mrf.mxu0  ;;  %v13953_v47 = vadd.f32 %v1236_v30, %v1168_v7  ;;  %1852 = vmatmul.f32.gmra.mxu2 %v13752_v17 }
 0x1bb   :  { %v1296_v4 = vadd.f32 %v1295_v29, %v667_v15 }
 0x1bc   :  { %v1580_v61 = vpop.f32.mrf.mxu3 }
 0x1bd   :  { %1694 = vmatmul.f32.gmra.mxu0 %v13697_v53  ;;  %v1424_v6 = vpop.f32.mrf.mxu1  ;;  %v1498_v46 = vpop.f32.mrf.mxu2 }
 0x1be   :  { %v1425_v26 = vadd.f32 %v1424_v6, %v1296_v4 }
 0x1c0   :  { %v1499_v0 = vadd.f32 %v1498_v46, %v1425_v26  ;;  %1763 = vmatmul.f32.gmra.mxu1 %v13697_v53 }
 0x1c1   :  { %1969 = vmatmul.f32.gmra.mxu3 %v13723_v41 }
 0x1c2   :  { %v1303_v54 = vpop.f32.mrf.mxu0  ;;  %v13962_v63 = vadd.f32 %v1580_v61, %v1499_v0  ;;  %1860 = vmatmul.f32.gmra.mxu2 %v13778_v24 }
 0x1c3   :  { %v1304_v17 = vadd.f32 %v1303_v54, %v671_v33  ;;  %v683_v33 = vadd.f32 %v20661_v2, %v614_v49 }
 0x1c4   :  { %v1586_v31 = vpop.f32.mrf.mxu3 }
 0x1c5   :  { %1698 = vmatmul.f32.gmra.mxu0 %v13723_v41  ;;  %v1428_v30 = vpop.f32.mrf.mxu1  ;;  %v1503_v60 = vpop.f32.mrf.mxu2 }
 0x1c6   :  { %v1429_v12 = vadd.f32 %v1428_v30, %v1304_v17 }
 0x1c8   :  { %v1504_v20 = vadd.f32 %v1503_v60, %v1429_v12  ;;  %1767 = vmatmul.f32.gmra.mxu1 %v13723_v41 }
 0x1c9   :  { %1973 = vmatmul.f32.gmra.mxu3 %v13757_v8 }
 0x1ca   :  { %v1311_v18 = vpop.f32.mrf.mxu0  ;;  %v13971_v55 = vadd.f32 %v1586_v31, %v1504_v20  ;;  %1868 = vmatmul.f32.gmra.mxu2 %v13801_v36 }
 0x1cb   :  { %v1312_v24 = vadd.f32 %v1311_v18, %v675_v27  ;;  %v20665_v27 = vld [vmem:[#allocation22_spill] sm:$0xff] }
 0x1cc   :  { %20659 = vst [vmem:[#allocation57_spill] sm:$0xff] %v13971_v55  ;;  %v1592_v7 = vpop.f32.mrf.mxu3  ;;  %v687_v18 = vadd.f32 %v20665_v27, %v618_v34  ;;  %v20672_v34 = vld [vmem:[#allocation27_spill] sm:$0xff] }
 0x1cd   :  { %1702 = vmatmul.f32.gmra.mxu0 %v13757_v8  ;;  %v1432_v15 = vpop.f32.mrf.mxu1  ;;  %v1508_v4 = vpop.f32.mrf.mxu2 }
 0x1ce   :  { %v1433_v29 = vadd.f32 %v1432_v15, %v1312_v24 }
 0x1d0   :  { %v1509_v56 = vadd.f32 %v1508_v4, %v1433_v29  ;;  %1771 = vmatmul.f32.gmra.mxu1 %v13757_v8  ;;  %v12692_v29 = vld [vmem:[%s20361_s1 + $0xb0] sm:$0xf] }
 0x1d1   :  { %1977 = vmatmul.f32.gmra.mxu3 %v13783_v37  ;;  %v2384_v19 = vsel %vm180_vm0, %v12692_v29, 0 }
 0x1d2   :  { %v1319_v61 = vpop.f32.mrf.mxu0  ;;  %v13980_v6 = vadd.f32 %v1592_v7, %v1509_v56  ;;  %1876 = vmatmul.f32.gmra.mxu2 %v13827_v14 }
 0x1d3   :  { %v1320_v36 = vadd.f32 %v1319_v61, %v679_v42  ;;  %v14006_v61 = vand.u32 4294901760, %v2384_v19 }
 0x1d4   :  { %20660 = vst [vmem:[#allocation58_spill] sm:$0xff] %v13980_v6  ;;  %v1598_v26 = vpop.f32.mrf.mxu3 }
 0x1d5   :  { %1706 = vmatmul.f32.gmra.mxu0 %v13783_v37  ;;  %v1436_v46 = vpop.f32.mrf.mxu1  ;;  %v1513_v0 = vpop.f32.mrf.mxu2  ;;  %2689 = vmatpush.msra.mxu3 %v14006_v61 }
 0x1d6   :  { %v1437_v48 = vadd.f32 %v1436_v46, %v1320_v36  ;;  %v20667_v36 = vld [vmem:[#allocation14_spill] sm:$0xff]  ;;  %2402 = vmatpush.msra.mxu0 %v14006_v61 }
 0x1d8   :  { %v1514_v43 = vadd.f32 %v1513_v0, %v1437_v48  ;;  %1775 = vmatmul.f32.gmra.mxu1 %v13783_v37  ;;  %v20669_v0 = vld [vmem:[#allocation24_spill] sm:$0xff] }
 0x1d9   :  { %1981 = vmatmul.f32.gmra.mxu3 %v13806_v10 }
 0x1da   :  { %v1327_v54 = vpop.f32.mrf.mxu0  ;;  %v13989_v17 = vadd.f32 %v1598_v26, %v1514_v43  ;;  %1884 = vmatmul.f32.gmra.mxu2 %v13854_v51  ;;  %v20668_v26 = vld [vmem:[#allocation23_spill] sm:$0xff] }
 0x1db   :  { %v1328_v14 = vadd.f32 %v1327_v54, %v683_v33  ;;  %v622_v46 = vadd.f32 %v20668_v26, %v20667_v36  ;;  %v20676_v36 = vld [vmem:[#allocation31_spill] sm:$0xff] }
 0x1dc   :  { %20662 = vst [vmem:[#allocation20_spill] sm:$0xff] %v13989_v17  ;;  %v1604_v31 = vpop.f32.mrf.mxu3 }
 0x1dd   :  { %1710 = vmatmul.f32.gmra.mxu0 %v13806_v10  ;;  %v1440_v30 = vpop.f32.mrf.mxu1  ;;  %v1518_v60 = vpop.f32.mrf.mxu2  ;;  %v691_v49 = vadd.f32 %v20669_v0, %v622_v46 }
 0x1de   :  { %v1441_v12 = vadd.f32 %v1440_v30, %v1328_v14 }
 0x1e0   :  { %v1519_v20 = vadd.f32 %v1518_v60, %v1441_v12  ;;  %1779 = vmatmul.f32.gmra.mxu1 %v13806_v10 }
 0x1e1   :  { %1985 = vmatmul.f32.gmra.mxu3 %v13832_v23 }
 0x1e2   :  { %v1335_v24 = vpop.f32.mrf.mxu0  ;;  %v13998_v7 = vadd.f32 %v1604_v31, %v1519_v20  ;;  %1892 = vmatmul.f32.gmra.mxu2 %v13880_v22  ;;  %v14012_v22 = vsub.f32 %v2384_v19, %v14006_v61  ;;  %v626_v20 = vadd.f32 %v20672_v34, %v20671_v13  ;;  %v20681_v34 = vld [vmem:[#allocation35_spill] sm:$0xff] }
 0x1e3   :  { %v1336_v51 = vadd.f32 %v1335_v24, %v687_v18 }
 0x1e4   :  { %20666 = vst [vmem:[#allocation13_spill] sm:$0xff] %v13998_v7  ;;  %v1610_v15 = vpop.f32.mrf.mxu3  ;;  %2605 = vmatpush.msra.mxu2 %v14012_v22  ;;  %v2520_v2 = vand.u32 4294901760, %v14012_v22 }
 0x1e5   :  { %1714 = vmatmul.f32.gmra.mxu0 %v13832_v23  ;;  %v1444_v4 = vpop.f32.mrf.mxu1  ;;  %v1523_v42 = vpop.f32.mrf.mxu2 }
 0x1e6   :  { %v1445_v56 = vadd.f32 %v1444_v4, %v1336_v51  ;;  %v2521_v31 = vsub.f32 %v14012_v22, %v2520_v2 }
 0x1e8   :  { %v1524_v48 = vadd.f32 %v1523_v42, %v1445_v56  ;;  %1783 = vmatmul.f32.gmra.mxu1 %v13832_v23  ;;  %v2522_v1 = vand.u32 4294901760, %v2521_v31  ;;  %v20675_v42 = vld [vmem:[#allocation16_spill] sm:$0xff]  ;;  %v20679_v31 = vld [vmem:[#allocation25_spill] sm:$0xff] }
 0x1e9   :  { %1989 = vmatmul.f32.gmra.mxu3 %v13859_v25  ;;  %v630_v26 = vadd.f32 %v20676_v36, %v20675_v42  ;;  %v20685_v36 = vld [vmem:[#allocation29_spill] sm:$0xff] }
 0x1ea   :  { %v1343_v43 = vpop.f32.mrf.mxu0  ;;  %v14020_v33 = vadd.f32 %v1610_v15, %v1524_v48  ;;  %1900 = vmatmul.f32.gmra.mxu2 %v13899_v39  ;;  %2523 = vmatpush.msra.mxu1 %v2522_v1  ;;  %v20673_v39 = vld [vmem:[#allocation28_spill] sm:$0xff] }
 0x1eb   :  { %v1344_v54 = vadd.f32 %v1343_v43, %v691_v49  ;;  %v695_v18 = vadd.f32 %v20673_v39, %v626_v20  ;;  %v20677_v48 = vld [vmem:[#allocation32_spill] sm:$0xff]  ;;  %v20682_v39 = vld [vmem:[#allocation26_spill] sm:$0xff] }
 0x1ec   :  { %20670 = vst [vmem:[#allocation21_spill] sm:$0xff] %v14020_v33  ;;  %v1616_v14 = vpop.f32.mrf.mxu3  ;;  %v699_v0 = vadd.f32 %v20677_v48, %v630_v26  ;;  %v12786_v33 = vld [vmem:[%s20360_s0 + $0x50] sm:$0xff] }
 0x1ed   :  { %1718 = vmatmul.f32.gmra.mxu0 %v13859_v25  ;;  %v1448_v30 = vpop.f32.mrf.mxu1  ;;  %v1528_v60 = vpop.f32.mrf.mxu2 }
 0x1ee   :  { %v1449_v12 = vadd.f32 %v1448_v30, %v1344_v54 }
 0x1f0   :  { %v1529_v27 = vadd.f32 %v1528_v60, %v1449_v12  ;;  %1787 = vmatmul.f32.gmra.mxu1 %v13859_v25 }
 0x1f1   :  { %1993 = vmatmul.f32.gmra.mxu3 %v13885_v59 }
 0x1f2   :  { %v1351_v24 = vpop.f32.mrf.mxu0  ;;  %v14032_v51 = vadd.f32 %v1616_v14, %v1529_v27  ;;  %1908 = vmatmul.f32.gmra.mxu2 %v13913_v57  ;;  %v12690_v14 = vld [vmem:[%s20361_s1 + $0xa0] sm:$0xff] }
 0x1f3   :  { %v1352_v15 = vadd.f32 %v1351_v24, %v695_v18  ;;  %v14048_v12 = vand.u32 4294901760, %v12690_v14  ;;  %v20683_v24 = vld [vmem:[#allocation36_spill] sm:$0xff] }
 0x1f4   :  { %20674 = vst [vmem:[#allocation22_spill] sm:$0xff] %v14032_v51  ;;  %v1622_v29 = vpop.f32.mrf.mxu3  ;;  %v12689_v51 = vld [vmem:[%s20361_s1 + $0x98] sm:$0xff] }
 0x1f5   :  { %1722 = vmatmul.f32.gmra.mxu0 %v13885_v59  ;;  %v1452_v4 = vpop.f32.mrf.mxu1  ;;  %v1533_v56 = vpop.f32.mrf.mxu2  ;;  %v14051_v13 = vsub.f32 %v12690_v14, %v14048_v12  ;;  %2691 = vmatpush.msra.mxu3 %v14048_v12 }
 0x1f6   :  { %v1453_v19 = vadd.f32 %v1452_v4, %v1352_v15  ;;  %2404 = vmatpush.msra.mxu0 %v14048_v12 }
 0x1f7   :  { %2608 = vmatpush.msra.mxu2 %v14051_v13  ;;  %v2526_v18 = vand.u32 4294901760, %v14051_v13 }
 0x1f8   :  { %v1534_v46 = vadd.f32 %v1533_v56, %v1453_v19  ;;  %1791 = vmatmul.f32.gmra.mxu1 %v13885_v59 }
 0x1f9   :  { %2273 = vmatmul.f32.vlgmr.msrb.gmra.mxu3 %v13576_v3  ;;  %v2527_v19 = vsub.f32 %v14051_v13, %v2526_v18 }
 0x1fa   :  { %v1359_v49 = vpop.f32.mrf.mxu0  ;;  %v14041_v43 = vadd.f32 %v1622_v29, %v1534_v46  ;;  %2204 = vmatmul.f32.vlgmr.msrb.gmra.mxu2 %v13576_v3  ;;  %v20680_v3 = vld [vmem:[#allocation17_spill] sm:$0xff] }
 0x1fb   :  { %v1360_v57 = vadd.f32 %v1359_v49, %v699_v0  ;;  %v634_v20 = vadd.f32 %v20681_v34, %v20680_v3  ;;  %v2528_v46 = vand.u32 4294901760, %v2527_v19  ;;  %v20686_v49 = vld [vmem:[#allocation18_spill] sm:$0xff] }
 0x1fc   :  { %20678 = vst [vmem:[#allocation14_spill] sm:$0xff] %v14041_v43  ;;  %v1628_v54 = vpop.f32.mrf.mxu3 }
 0x1fd   :  { %2023 = vmatmul.f32.vlgmr.msrb.gmra.mxu0 %v20679_v31  ;;  %v1456_v30 = vpop.f32.mrf.mxu1  ;;  %v1538_v1 = vpop.f32.mrf.mxu2  ;;  %v703_v15 = vadd.f32 %v20683_v24, %v634_v20  ;;  %2529 = vmatpush.msra.mxu1 %v2528_v46  ;;  %v20688_v31 = vld [vmem:[#allocation30_spill] sm:$0xff]  ;;  %v20691_v20 = vld [vmem:[#allocation33_spill] sm:$0xff] }
 0x1fe   :  { %v1457_v60 = vadd.f32 %v1456_v30, %v1360_v57  ;;  %v20687_v57 = vld [vmem:[#allocation39_spill] sm:$0xff] }
 0x1ff   :  { %v638_v14 = vadd.f32 %v20687_v57, %v20686_v49  ;;  %v12688_v49 = vld [vmem:[%s20361_s1 + $0x90] sm:$0xff]  ;;  %v20697_v57 = vld [vmem:[#allocation37_spill] sm:$0xff] }
 0x200   :  { %v1539_v27 = vadd.f32 %v1538_v1, %v1457_v60  ;;  %2105 = vmatmul.f32.vlgmr.msrb.gmra.mxu1 %v20682_v39 }
 0x201   :  { %2277 = vmatmul.f32.gmra.mxu3 %v13602_v50 }
 0x202   :  { %v1367_v29 = vpop.f32.mrf.mxu0  ;;  %v14062_v4 = vadd.f32 %v1628_v54, %v1539_v27  ;;  %2208 = vmatmul.f32.gmra.mxu2 %v13602_v50  ;;  %v20689_v50 = vld [vmem:[#allocation40_spill] sm:$0xff] }
 0x203   :  { %v1368_v56 = vadd.f32 %v1367_v29, %v703_v15  ;;  %v707_v30 = vadd.f32 %v20689_v50, %v638_v14  ;;  %v20692_v15 = vld [vmem:[#allocation19_spill] sm:$0xff] }
 0x204   :  { %20684 = vst [vmem:[#allocation23_spill] sm:$0xff] %v14062_v4  ;;  %v1634_v42 = vpop.f32.mrf.mxu3  ;;  %v20693_v29 = vld [vmem:[#allocation43_spill] sm:$0xff] }
 0x205   :  { %2028 = vmatmul.f32.gmra.mxu0 %v20685_v36  ;;  %v1460_v26 = vpop.f32.mrf.mxu1  ;;  %v1543_v0 = vpop.f32.mrf.mxu2  ;;  %v642_v19 = vadd.f32 %v20693_v29, %v20692_v15  ;;  %v20694_v36 = vld [vmem:[#allocation34_spill] sm:$0xff] }
 0x206   :  { %v1461_v48 = vadd.f32 %v1460_v26, %v1368_v56  ;;  %v20695_v26 = vld [vmem:[#allocation44_spill] sm:$0xff] }
 0x208   :  { %v1544_v54 = vadd.f32 %v1543_v0, %v1461_v48  ;;  %2111 = vmatmul.f32.gmra.mxu1 %v20688_v31 }
 0x209   :  { %2281 = vmatmul.f32.gmra.mxu3 %v13628_v44 }
 0x20a   :  { %v1375_v60 = vpop.f32.mrf.mxu0  ;;  %v14074_v1 = vadd.f32 %v1634_v42, %v1544_v54  ;;  %2212 = vmatmul.f32.gmra.mxu2 %v13628_v44  ;;  %v711_v42 = vadd.f32 %v20695_v26, %v642_v19  ;;  %v14090_v54 = vand.u32 4294901760, %v12688_v49  ;;  %v20702_v26 = vld [vmem:[#allocation42_spill] sm:$0xff] }
 0x20b   :  { %v1376_v3 = vadd.f32 %v1375_v60, %v707_v30  ;;  %v20698_v60 = vld [vmem:[#allocation38_spill] sm:$0xff] }
 0x20c   :  { %20690 = vst [vmem:[#allocation24_spill] sm:$0xff] %v14074_v1  ;;  %v1640_v34 = vpop.f32.mrf.mxu3  ;;  %v2531_v30 = vsub.f32 %v12688_v49, %v14090_v54  ;;  %2406 = vmatpush.msra.mxu0 %v14090_v54  ;;  %2693 = vmatpush.msra.mxu3 %v14090_v54 }
 0x20d   :  { %2033 = vmatmul.f32.gmra.mxu0 %v20691_v20  ;;  %v1464_v27 = vpop.f32.mrf.mxu1  ;;  %v1548_v24 = vpop.f32.mrf.mxu2 }
 0x20e   :  { %v1465_v39 = vadd.f32 %v1464_v27, %v1376_v3  ;;  %2611 = vmatpush.msra.mxu2 %v2531_v30  ;;  %v2532_v3 = vand.u32 4294901760, %v2531_v30 }
 0x210   :  { %v1549_v56 = vadd.f32 %v1548_v24, %v1465_v39  ;;  %2117 = vmatmul.f32.gmra.mxu1 %v20694_v36  ;;  %v2533_v27 = vsub.f32 %v2531_v30, %v2532_v3  ;;  %v20700_v24 = vld [vmem:[#allocation41_spill] sm:$0xff] }
 0x211   :  { %2285 = vmatmul.f32.gmra.mxu3 %v13664_v35 }
 0x212   :  { %v1383_v46 = vpop.f32.mrf.mxu0  ;;  %v14083_v48 = vadd.f32 %v1640_v34, %v1549_v56  ;;  %2216 = vmatmul.f32.gmra.mxu2 %v13664_v35  ;;  %v2534_v29 = vand.u32 4294901760, %v2533_v27  ;;  %v20701_v56 = vld [vmem:[#allocation49_spill] sm:$0xff] }
 0x213   :  { %v1384_v44 = vadd.f32 %v1383_v46, %v711_v42 }
 0x214   :  { %20696 = vst [vmem:[#allocation15_spill] sm:$0xff] %v14083_v48  ;;  %v1646_v0 = vpop.f32.mrf.mxu3  ;;  %2535 = vmatpush.msra.mxu1 %v2534_v29 }
 0x215   :  { %2038 = vmatmul.f32.gmra.mxu0 %v20697_v57  ;;  %v1468_v14 = vpop.f32.mrf.mxu1  ;;  %v1553_v50 = vpop.f32.mrf.mxu2  ;;  %v20706_v57 = vld [vmem:[#allocation51_spill] sm:$0xff] }
 0x216   :  { %v1469_v31 = vadd.f32 %v1468_v14, %v1384_v44  ;;  %v20704_v44 = vld [vmem:[#allocation45_spill] sm:$0xff] }
 0x218   :  { %v1554_v35 = vadd.f32 %v1553_v50, %v1469_v31  ;;  %2123 = vmatmul.f32.gmra.mxu1 %v20698_v60  ;;  %v20707_v31 = vld [vmem:[#allocation46_spill] sm:$0xff]  ;;  %v20709_v60 = vld [vmem:[#allocation47_spill] sm:$0xff] }
 0x219   :  { %2289 = vmatmul.f32.gmra.mxu3 %v13697_v53 }
 0x21a   :  { %v14097_v34 = vpop.f32.mrf.mxu0  ;;  %v14099_v20 = vadd.f32 %v1646_v0, %v1554_v35  ;;  %2220 = vmatmul.f32.gmra.mxu2 %v13697_v53 }
 0x21c   :  { %20699 = vst [vmem:[#allocation27_spill] sm:$0xff] %v14099_v20  ;;  %v1950_v39 = vpop.f32.mrf.mxu3 }
 0x21d   :  { %2043 = vmatmul.f32.gmra.mxu0 %v20700_v24  ;;  %v14103_v15 = vpop.f32.mrf.mxu1  ;;  %v1821_v19 = vpop.f32.mrf.mxu2 }
 0x21e   :  { %v1822_v36 = vadd.f32 %v1821_v19, %v20701_v56  ;;  %v20711_v56 = vld [vmem:[#allocation48_spill] sm:$0xff] }
 0x220   :  { %2129 = vmatmul.f32.gmra.mxu1 %v20702_v26  ;;  %v14108_v42 = vadd.f32 %v1950_v39, %v1822_v36 }
 0x221   :  { %2293 = vmatmul.f32.gmra.mxu3 %v13723_v41 }
 0x222   :  { %v14110_v46 = vpop.f32.mrf.mxu0  ;;  %2224 = vmatmul.f32.gmra.mxu2 %v13723_v41  ;;  %v12686_v41 = vld [vmem:[%s20361_s1 + $0x80] sm:$0xff] }
 0x223   :  { %20703 = vst [vmem:[#allocation28_spill] sm:$0xff] %v14110_v46  ;;  %v2407_v39 = vand.u32 4294901760, %v12686_v41 }
 0x224   :  { %v1954_v53 = vpop.f32.mrf.mxu3 }
 0x225   :  { %2048 = vmatmul.f32.gmra.mxu0 %v20704_v44  ;;  %v14114_v0 = vpop.f32.mrf.mxu1  ;;  %v1829_v49 = vpop.f32.mrf.mxu2  ;;  %v2537_v19 = vsub.f32 %v12686_v41, %v2407_v39  ;;  %2695 = vmatpush.msra.mxu3 %v2407_v39  ;;  %v20718_v41 = vld [vmem:[#allocation52_spill] sm:$0xff] }
 0x226   :  { %20705 = vst [vmem:[#allocation16_spill] sm:$0xff] %v14114_v0  ;;  %v1830_v14 = vadd.f32 %v1829_v49, %v20706_v57  ;;  %2408 = vmatpush.msra.mxu0 %v2407_v39  ;;  %v20714_v57 = vld [vmem:[#allocation50_spill] sm:$0xff] }
 0x227   :  { %2614 = vmatpush.msra.mxu2 %v2537_v19 }
 0x228   :  { %2135 = vmatmul.f32.gmra.mxu1 %v20707_v31  ;;  %v14119_v50 = vadd.f32 %v1954_v53, %v1830_v14  ;;  %2784 = vmatpush.msrb.mxu0 %v2520_v2 }
 0x229   :  { %2297 = vmatmul.f32.gmra.mxu3 %v13757_v8 }
 0x22a   :  { %v14121_v30 = vpop.f32.mrf.mxu0  ;;  %2228 = vmatmul.f32.gmra.mxu2 %v13757_v8  ;;  %v2538_v8 = vand.u32 4294901760, %v2537_v19  ;;  %2788 = vmatpush.msrb.mxu0 %v2526_v18 }
 0x22b   :  { %20708 = vst [vmem:[#allocation31_spill] sm:$0xff] %v14121_v30 }
 0x22c   :  { %v1958_v35 = vpop.f32.mrf.mxu3  ;;  %2792 = vmatpush.msrb.mxu0 %v2532_v3 }
 0x22d   :  { %2053 = vmatmul.f32.gmra.mxu0 %v20709_v60  ;;  %v14128_v27 = vpop.f32.mrf.mxu1  ;;  %v1837_v24 = vpop.f32.mrf.mxu2 }
 0x22e   :  { %20710 = vst [vmem:[#allocation32_spill] sm:$0xff] %v14128_v27  ;;  %v1838_v29 = vadd.f32 %v1837_v24, %v13836_v21  ;;  %v2539_v21 = vsub.f32 %v2537_v19, %v2538_v8  ;;  %2796 = vmatpush.msrb.mxu0 %v2538_v8  ;;  %v12778_v19 = vld [vmem:[%s20360_s0 + $0x10] sm:$0xff]  ;;  %v20720_v8 = vld [vmem:[#allocation53_spill] sm:$0xff] }
 0x230   :  { %2141 = vmatmul.f32.gmra.mxu1 %v20711_v56  ;;  %v14135_v36 = vadd.f32 %v1958_v35, %v1838_v29  ;;  %v2540_v2 = vand.u32 4294901760, %v2539_v21  ;;  %v12693_v35 = vld [vmem:[%s20361_s1 + $0xb8] sm:$0xf]  ;;  %v2325_v56 = vrot.slane %v12778_v19, 2 }
 0x231   :  { %2301 = vmatmul.f32.gmra.mxu3 %v13783_v37 }
 0x232   :  { %v14137_v26 = vpop.f32.mrf.mxu0  ;;  %2232 = vmatmul.f32.gmra.mxu2 %v13783_v37  ;;  %2541 = vmatpush.msra.mxu1 %v2540_v2 }
 0x233   :  { %20712 = vst [vmem:[#allocation25_spill] sm:$0xff] %v14137_v26 }
 0x234   :  { %v1962_v53 = vpop.f32.mrf.mxu3  ;;  %2859 = vmatpush.msrb.mxu1 %v14006_v61  ;;  %v12776_v61 = vld [vmem:[%s20360_s0] sm:$0xff] }
 0x235   :  { %2058 = vmatmul.f32.gmra.mxu0 %v13793_v40  ;;  %v14143_v22 = vpop.f32.mrf.mxu1  ;;  %v1845_v44 = vpop.f32.mrf.mxu2  ;;  %v2322_v14 = vrot.slane %v12776_v61, 2 }
 0x236   :  { %20713 = vst [vmem:[#allocation17_spill] sm:$0xff] %v14143_v22  ;;  %v1846_v49 = vadd.f32 %v1845_v44, %v13862_v5  ;;  %2861 = vmatpush.msrb.mxu1 %v14048_v12 }
 0x238   :  { %2147 = vmatmul.f32.gmra.mxu1 %v20714_v57  ;;  %v14149_v37 = vadd.f32 %v1962_v53, %v1846_v49 }
 0x239   :  { %2305 = vmatmul.f32.gmra.mxu3 %v13806_v10  ;;  %2863 = vmatpush.msrb.mxu1 %v14090_v54 }
 0x23a   :  { %v14151_v13 = vpop.f32.mrf.mxu0  ;;  %2236 = vmatmul.f32.gmra.mxu2 %v13806_v10  ;;  %v12777_v10 = vld [vmem:[%s20360_s0 + $0x8] sm:$0xff] }
 0x23b   :  { %20715 = vst [vmem:[#allocation35_spill] sm:$0xff] %v14151_v13  ;;  %v2323_v12 = vrot.slane %v12777_v10, 2  ;;  %2865 = vmatpush.msrb.mxu1 %v2407_v39 }
 0x23c   :  { %v1966_v40 = vpop.f32.mrf.mxu3 }
 0x23d   :  { %2063 = vmatmul.f32.gmra.mxu0 %v13819_v16  ;;  %v14156_v18 = vpop.f32.mrf.mxu1  ;;  %v1853_v5 = vpop.f32.mrf.mxu2  ;;  %v2326_v49 = vsel %vm2321_vm3, %v2323_v12, %v2325_v56 }
 0x23e   :  { %20716 = vst [vmem:[#allocation26_spill] sm:$0xff] %v14156_v18  ;;  %v1854_v3 = vadd.f32 %v1853_v5, %v13887_v9  ;;  %v2324_v9 = vsel %vm2321_vm3, %v2322_v14, %v2323_v12  ;;  %v20722_v5 = vld [vmem:[#allocation54_spill] sm:$0xff]  ;;  %v2361_v10 = vsel %vm155_vm2, %v2326_v49, 0  ;;  %v12779_v12 = vld [vmem:[%s20360_s0 + $0x18] sm:$0xf]  ;;  %v2339_v18 = vrot.slane %v12786_v33, 2 }
 0x23f   :  { %v2359_v24 = vsel %vm155_vm2, %v2324_v9, 0 }
 0x240   :  { %2153 = vmatmul.f32.gmra.mxu1 %v13830_v52  ;;  %v14168_v16 = vadd.f32 %v1966_v40, %v1854_v3  ;;  %v2387_v52 = vsel %vm180_vm0, %v12693_v35, 0  ;;  %v14194_v53 = vand.u32 4294901760, %v2359_v24  ;;  %v20724_v35 = vld [vmem:[#allocation55_spill] sm:$0xff] }
 0x241   :  { %2309 = vmatmul.f32.gmra.mxu3 %v13832_v23  ;;  %v14182_v29 = vand.u32 4294901760, %v2387_v52 }
 0x242   :  { %v14170_v54 = vpop.f32.mrf.mxu0  ;;  %2240 = vmatmul.f32.gmra.mxu2 %v13832_v23  ;;  %v14210_v61 = vsub.f32 %v2359_v24, %v14194_v53 }
 0x243   :  { %20717 = vst [vmem:[#allocation36_spill] sm:$0xff] %v14170_v54  ;;  %2928 = vmatpush.msrb.mxu2 %v14182_v29  ;;  %v14191_v21 = vsub.f32 %v2387_v52, %v14182_v29  ;;  %v14222_v52 = vand.u32 4294901760, %v2361_v10 }
 0x244   :  { %v1970_v31 = vpop.f32.mrf.mxu3 }
 0x245   :  { %2068 = vmatmul.f32.gmra.mxu0 %v20718_v41  ;;  %v14178_v60 = vpop.f32.mrf.mxu1  ;;  %v1861_v39 = vpop.f32.mrf.mxu2  ;;  %v14220_v41 = vand.u32 4294901760, %v14210_v61  ;;  %v14236_v49 = vsub.f32 %v2361_v10, %v14222_v52  ;;  %v20744_v55 = vand.u32 4294901760, %v14191_v21 }
 0x246   :  { %20719 = vst [vmem:[#allocation29_spill] sm:$0xff] %v14178_v60  ;;  %v1862_v23 = vadd.f32 %v1861_v39, %v13904_v28  ;;  %v20397_v28 = vand.u32 4294901760, %v14191_v21 }
 0x248   :  { %2159 = vmatmul.f32.gmra.mxu1 %v20720_v8  ;;  %v14196_v2 = vadd.f32 %v1970_v31, %v1862_v23  ;;  %v3047_v40 = vsub.f32 %v14191_v21, %v20397_v28  ;;  %v2327_v31 = vrot.slane %v12779_v12, 2  ;;  %v2412_v8 = vsub.f32 %v14210_v61, %v14220_v41  ;;  %v12782_v28 = vld [vmem:[%s20360_s0 + $0x30] sm:$0xff] }
 0x249   :  { %2313 = vmatmul.f32.gmra.mxu3 %v13859_v25  ;;  %v2332_v20 = vrot.slane %v12782_v28, 2 }
 0x24a   :  { %v14198_v44 = vpop.f32.mrf.mxu0  ;;  %2244 = vmatmul.f32.gmra.mxu2 %v13859_v25  ;;  %v3048_v9 = vand.u32 4294901760, %v3047_v40  ;;  %v14248_v10 = vand.u32 4294901760, %v2412_v8 }
 0x24b   :  { %20721 = vst [vmem:[#allocation18_spill] sm:$0xff] %v14198_v44 }
 0x24c   :  { %v1974_v57 = vpop.f32.mrf.mxu3  ;;  %3049 = vmatpush.msrb.mxu3 %v3048_v9  ;;  %v20727_v9 = vld [vmem:[#allocation56_spill] sm:$0xff] }
 0x24d   :  { %2073 = vmatmul.f32.gmra.mxu0 %v20722_v5  ;;  %v14207_v3 = vpop.f32.mrf.mxu1  ;;  %v1869_v14 = vpop.f32.mrf.mxu2 }
 0x24e   :  { %20723 = vst [vmem:[#allocation39_spill] sm:$0xff] %v14207_v3  ;;  %v1870_v25 = vadd.f32 %v1869_v14, %v13915_v58  ;;  %v2328_v58 = vsel %vm2321_vm3, %v2325_v56, %v2327_v31 }
 0x250   :  { %2165 = vmatmul.f32.gmra.mxu1 %v20724_v35  ;;  %v14224_v39 = vadd.f32 %v1974_v57, %v1870_v25  ;;  %v2363_v57 = vsel %vm155_vm2, %v2328_v58, 0  ;;  %v14251_v25 = vand.u32 4294901760, %v14236_v49 }
 0x251   :  { %2317 = vmatmul.f32.gmra.mxu3 %v13885_v59 }
 0x252   :  { %v14226_v24 = vpop.f32.mrf.mxu0  ;;  %2248 = vmatmul.f32.gmra.mxu2 %v13885_v59  ;;  %v12780_v59 = vld [vmem:[%s20360_s0 + $0x20] sm:$0xff] }
 0x253   :  { %20725 = vst [vmem:[#allocation30_spill] sm:$0xff] %v14226_v24  ;;  %v2329_v56 = vrot.slane %v12780_v59, 2  ;;  %v2420_v59 = vsub.f32 %v14236_v49, %v14251_v25 }
 0x254   :  { %v1978_v23 = vpop.f32.mrf.mxu3 }
 0x255   :  { %2078 = vmatmul.f32.gmra.mxu0 %v13895_v62  ;;  %v14231_v19 = vpop.f32.mrf.mxu1  ;;  %v1877_v40 = vpop.f32.mrf.mxu2  ;;  %v12781_v62 = vld [vmem:[%s20360_s0 + $0x28] sm:$0xff] }
 0x256   :  { %20726 = vst [vmem:[#allocation40_spill] sm:$0xff] %v14231_v19  ;;  %v1878_v5 = vadd.f32 %v1877_v40, %v13922_v32  ;;  %v2330_v14 = vrot.slane %v12781_v62, 2  ;;  %v14253_v32 = vand.u32 4294901760, %v2363_v57  ;;  %v12691_v40 = vld [vmem:[%s20361_s1 + $0xa8] sm:$0xff]  ;;  %v12783_v19 = vld [vmem:[%s20360_s0 + $0x38] sm:$0xf] }
 0x258   :  { %2171 = vmatmul.f32.gmra.mxu1 %v20727_v9  ;;  %v14255_v12 = vadd.f32 %v1978_v23, %v1878_v5  ;;  %v2331_v35 = vsel %vm2321_vm3, %v2329_v56, %v2330_v14  ;;  %v14270_v23 = vsub.f32 %v2363_v57, %v14253_v32  ;;  %v14272_v5 = vand.u32 4294901760, %v12691_v40 }
 0x259   :  { %2699 = vmatmul.f32.vlgmr.msra.gmra.mxu3 %v14220_v41  ;;  %v2365_v56 = vsel %vm155_vm2, %v2331_v35, 0  ;;  %v14283_v57 = vand.u32 4294901760, %v2420_v59 }
 0x25a   :  { %v14257_v31 = vpop.f32.mrf.mxu0  ;;  %2617 = vmatmul.f32.vlgmr.msra.gmra.mxu2 %v14210_v61  ;;  %v14286_v48 = vand.u32 4294901760, %v14270_v23  ;;  %v14288_v35 = vand.u32 4294901760, %v2365_v56  ;;  %v14296_v28 = vsub.f32 %v12691_v40, %v14272_v5 }
 0x25b   :  { %20728 = vst [vmem:[#allocation33_spill] sm:$0xff] %v14257_v31  ;;  %2930 = vmatpush.msrb.mxu2 %v14272_v5 }
 0x25c   :  { %v1982_v58 = vpop.f32.mrf.mxu3  ;;  %v14309_v40 = vsub.f32 %v2365_v56, %v14288_v35 }
 0x25d   :  { %2414 = vmatmul.f32.vlgmr.msra.gmra.mxu0 %v14248_v10  ;;  %v14265_v8 = vpop.f32.mrf.mxu1  ;;  %v1885_v62 = vpop.f32.mrf.mxu2 }
 0x25e   :  { %20729 = vst [vmem:[#allocation19_spill] sm:$0xff] %v14265_v8  ;;  %3131 = vmatpush.msra.mxu0 %v14191_v21  ;;  %v1886_v9 = vadd.f32 %v1885_v62, %v13929_v11  ;;  %v2333_v62 = vsel %vm2321_vm3, %v2330_v14, %v2332_v20  ;;  %v20398_v8 = vand.u32 4294901760, %v14296_v28 }
 0x25f   :  { %v2367_v14 = vsel %vm155_vm2, %v2333_v62, 0  ;;  %v14324_v62 = vand.u32 4294901760, %v14309_v40 }
 0x260   :  { %2543 = vmatmul.f32.vlgmr.msra.gmra.mxu1 %v14194_v53  ;;  %v14290_v1 = vadd.f32 %v1982_v58, %v1886_v9  ;;  %3134 = vmatpush.msra.mxu0 %v14296_v28  ;;  %v2428_v9 = vsub.f32 %v14270_v23, %v14286_v48  ;;  %v3053_v31 = vsub.f32 %v14296_v28, %v20398_v8  ;;  %v14326_v43 = vand.u32 4294901760, %v2367_v14 }
 0x261   :  { %2705 = vmatmul.f32.gmra.mxu3 %v14251_v25  ;;  %3215 = vmatpush.msra.mxu1 %v14182_v29 }
 0x262   :  { %v14293_v11 = vpop.f32.mrf.mxu0  ;;  %2622 = vmatmul.f32.gmra.mxu2 %v14236_v49  ;;  %v3054_v24 = vand.u32 4294901760, %v3053_v31  ;;  %v14321_v56 = vand.u32 4294901760, %v2428_v9  ;;  %v2436_v9 = vsub.f32 %v14309_v40, %v14324_v62  ;;  %v14340_v3 = vsub.f32 %v2367_v14, %v14326_v43 }
 0x263   :  { %20730 = vst [vmem:[#allocation43_spill] sm:$0xff] %v14293_v11  ;;  %3217 = vmatpush.msra.mxu1 %v14272_v5 }
 0x264   :  { %v1986_v59 = vpop.f32.mrf.mxu3  ;;  %3055 = vmatpush.msrb.mxu3 %v3054_v24  ;;  %v14352_v14 = vand.u32 4294901760, %v2436_v9 }
 0x265   :  { %2422 = vmatmul.f32.gmra.mxu0 %v14283_v57  ;;  %v14304_v58 = vpop.f32.mrf.mxu1  ;;  %v1893_v11 = vpop.f32.mrf.mxu2 }
 0x266   :  { %20731 = vst [vmem:[#allocation34_spill] sm:$0xff] %v14304_v58  ;;  %v1894_v4 = vadd.f32 %v1893_v11, %v13936_v45  ;;  %v2334_v58 = vrot.slane %v12783_v19, 2 }
 0x268   :  { %2547 = vmatmul.f32.gmra.mxu1 %v14222_v52  ;;  %v14328_v8 = vadd.f32 %v1986_v59, %v1894_v4  ;;  %v2335_v19 = vsel %vm2321_vm3, %v2332_v20, %v2334_v58  ;;  %v12784_v20 = vld [vmem:[%s20360_s0 + $0x40] sm:$0xff] }
 0x269   :  { %2711 = vmatmul.f32.gmra.mxu3 %v14286_v48  ;;  %v2369_v59 = vsel %vm155_vm2, %v2335_v19, 0  ;;  %v2336_v58 = vrot.slane %v12784_v20, 2  ;;  %v14355_v19 = vand.u32 4294901760, %v14340_v3 }
 0x26a   :  { %v14330_v45 = vpop.f32.mrf.mxu0  ;;  %2627 = vmatmul.f32.gmra.mxu2 %v14270_v23 }
 0x26b   :  { %20732 = vst [vmem:[#allocation44_spill] sm:$0xff] %v14330_v45  ;;  %v2444_v60 = vsub.f32 %v14340_v3, %v14355_v19 }
 0x26c   :  { %v1990_v11 = vpop.f32.mrf.mxu3  ;;  %20734 = vst [vmem:[#allocation38_spill] sm:$0xff] %v14355_v19 }
 0x26d   :  { %2430 = vmatmul.f32.gmra.mxu0 %v14321_v56  ;;  %v14335_v31 = vpop.f32.mrf.mxu1  ;;  %v1901_v4 = vpop.f32.mrf.mxu2 }
 0x26e   :  { %20733 = vst [vmem:[#allocation37_spill] sm:$0xff] %v14335_v31  ;;  %v1902_v24 = vadd.f32 %v1901_v4, %v13943_v38  ;;  %v12785_v31 = vld [vmem:[%s20360_s0 + $0x48] sm:$0xff]  ;;  %v14357_v38 = vand.u32 4294901760, %v2369_v59 }
 0x26f   :  { %v2337_v45 = vrot.slane %v12785_v31, 2 }
 0x270   :  { %2551 = vmatmul.f32.gmra.mxu1 %v14253_v32  ;;  %v14359_v4 = vadd.f32 %v1990_v11, %v1902_v24  ;;  %v14374_v11 = vsub.f32 %v2369_v59, %v14357_v38  ;;  %v14376_v24 = vand.u32 4294901760, %v12689_v51  ;;  %v14387_v59 = vand.u32 4294901760, %v2444_v60 }
 0x271   :  { %2717 = vmatmul.f32.gmra.mxu3 %v14324_v62  ;;  %v2338_v20 = vsel %vm2321_vm3, %v2336_v58, %v2337_v45  ;;  %v2340_v13 = vsel %vm2321_vm3, %v2337_v45, %v2339_v18 }
 0x272   :  { %v14361_v44 = vpop.f32.mrf.mxu0  ;;  %2632 = vmatmul.f32.gmra.mxu2 %v14309_v40  ;;  %20737 = vst [vmem:[#allocation42_spill] sm:$0xff] %v14374_v11  ;;  %v2371_v58 = vsel %vm155_vm2, %v2338_v20, 0  ;;  %3219 = vmatpush.msra.mxu1 %v14376_v24  ;;  %v14397_v33 = vsub.f32 %v12689_v51, %v14376_v24  ;;  %v2373_v45 = vsel %vm155_vm2, %v2340_v13, 0 }
 0x273   :  { %20735 = vst [vmem:[#allocation41_spill] sm:$0xff] %v14361_v44  ;;  %2932 = vmatpush.msrb.mxu2 %v14376_v24  ;;  %v14392_v20 = vand.u32 4294901760, %v2371_v58 }
 0x274   :  { %v1994_v31 = vpop.f32.mrf.mxu3  ;;  %v20399_v60 = vand.u32 4294901760, %v14397_v33  ;;  %3137 = vmatpush.msra.mxu0 %v14397_v33 }
 0x275   :  { %2438 = vmatmul.f32.gmra.mxu0 %v14352_v14  ;;  %v14369_v9 = vpop.f32.mrf.mxu1  ;;  %v1909_v44 = vpop.f32.mrf.mxu2  ;;  %v14408_v51 = vsub.f32 %v2371_v58, %v14392_v20 }
 0x276   :  { %20736 = vst [vmem:[#allocation49_spill] sm:$0xff] %v14369_v9  ;;  %v1910_v54 = vadd.f32 %v1909_v44, %v13953_v47  ;;  %v14390_v9 = vand.u32 4294901760, %v14374_v11 }
 0x277   :  { %20739 = vst [vmem:[#allocation51_spill] sm:$0xff] %v14408_v51 }
 0x278   :  { %2555 = vmatmul.f32.gmra.mxu1 %v14288_v35  ;;  %20738 = vst [vmem:[#allocation45_spill] sm:$0xff] %v14390_v9  ;;  %v14394_v47 = vadd.f32 %v1994_v31, %v1910_v54  ;;  %v2452_v54 = vsub.f32 %v14374_v11, %v14390_v9 }
 0x279   :  { %2723 = vmatmul.f32.gmra.mxu3 %v14355_v19 }
 0x27a   :  { %v2024_v44 = vpop.f32.mrf.mxu0  ;;  %2637 = vmatmul.f32.gmra.mxu2 %v14340_v3  ;;  %v14419_v58 = vand.u32 4294901760, %v2452_v54 }
 0x27b   :  { %v2025_v7 = vadd.f32 %v2024_v44, %v14108_v42  ;;  %v3059_v42 = vsub.f32 %v14397_v33, %v20399_v60  ;;  %v12787_v44 = vld [vmem:[%s20360_s0 + $0x58] sm:$0xf] }
 0x27c   :  { %v2274_v22 = vpop.f32.mrf.mxu3  ;;  %v2341_v27 = vrot.slane %v12787_v44, 2 }
 0x27d   :  { %2446 = vmatmul.f32.gmra.mxu0 %v14387_v59  ;;  %v2106_v26 = vpop.f32.mrf.mxu1  ;;  %v2205_v17 = vpop.f32.mrf.mxu2  ;;  %v3060_v6 = vand.u32 4294901760, %v3059_v42 }
 0x27e   :  { %v2107_v31 = vadd.f32 %v2106_v26, %v2025_v7  ;;  %v14422_v7 = vand.u32 4294901760, %v14408_v51  ;;  %v14424_v26 = vand.u32 4294901760, %v2373_v45 }
 0x27f   :  { %3061 = vmatpush.msrb.mxu3 %v3060_v6 }
 0x280   :  { %v2206_v30 = vadd.f32 %v2205_v17, %v2107_v31  ;;  %2559 = vmatmul.f32.gmra.mxu1 %v14326_v43  ;;  %20740 = vst [vmem:[#allocation46_spill] sm:$0xff] %v14422_v7  ;;  %v2342_v17 = vsel %vm2321_vm3, %v2339_v18, %v2341_v27  ;;  %v2460_v44 = vsub.f32 %v14408_v51, %v14422_v7  ;;  %v12788_v27 = vld [vmem:[%s20360_s0 + $0x60] sm:$0xff] }
 0x281   :  { %2729 = vmatmul.f32.gmra.mxu3 %v14390_v9  ;;  %v14435_v9 = vsub.f32 %v2373_v45, %v14424_v26  ;;  %v2375_v6 = vsel %vm155_vm2, %v2342_v17, 0  ;;  %v2343_v18 = vrot.slane %v12788_v27, 2 }
 0x282   :  { %v14426_v13 = vadd.f32 %v2274_v22, %v2206_v30  ;;  %v2029_v60 = vpop.f32.mrf.mxu0  ;;  %2642 = vmatmul.f32.gmra.mxu2 %v14374_v11  ;;  %v14446_v45 = vand.u32 4294901760, %v2460_v44  ;;  %v14451_v17 = vand.u32 4294901760, %v2375_v6  ;;  %v12687_v44 = vld [vmem:[%s20361_s1 + $0x88] sm:$0xff] }
 0x283   :  { %v2030_v31 = vadd.f32 %v2029_v60, %v14119_v50  ;;  %v12789_v50 = vld [vmem:[%s20360_s0 + $0x68] sm:$0xff] }
 0x284   :  { %20741 = vst [vmem:[#allocation47_spill] sm:$0xff] %v14426_v13  ;;  %v2278_v42 = vpop.f32.mrf.mxu3  ;;  %v2344_v60 = vrot.slane %v12789_v50, 2 }
 0x285   :  { %2454 = vmatmul.f32.gmra.mxu0 %v14419_v58  ;;  %v2112_v54 = vpop.f32.mrf.mxu1  ;;  %v2209_v22 = vpop.f32.mrf.mxu2 }
 0x286   :  { %v2113_v30 = vadd.f32 %v2112_v54, %v2030_v31  ;;  %v14449_v31 = vand.u32 4294901760, %v14435_v9  ;;  %v2345_v0 = vsel %vm2321_vm3, %v2343_v18, %v2344_v60 }
 0x287   :  { %v2377_v18 = vsel %vm155_vm2, %v2345_v0, 0 }
 0x288   :  { %v2210_v13 = vadd.f32 %v2209_v22, %v2113_v30  ;;  %2563 = vmatmul.f32.gmra.mxu1 %v14357_v38  ;;  %20742 = vst [vmem:[#allocation48_spill] sm:$0xff] %v14449_v31 }
 0x289   :  { %2735 = vmatmul.f32.gmra.mxu3 %v14422_v7  ;;  %v2468_v7 = vsub.f32 %v14435_v9, %v14449_v31 }
 0x28a   :  { %v14453_v54 = vadd.f32 %v2278_v42, %v2210_v13  ;;  %v2034_v27 = vpop.f32.mrf.mxu0  ;;  %2647 = vmatmul.f32.gmra.mxu2 %v14408_v51  ;;  %v14465_v13 = vsub.f32 %v2375_v6, %v14451_v17  ;;  %v2933_v42 = vand.u32 4294901760, %v12687_v44 }
 0x28b   :  { %v2035_v30 = vadd.f32 %v2034_v27, %v14135_v36  ;;  %v12790_v36 = vld [vmem:[%s20360_s0 + $0x70] sm:$0xff]  ;;  %v14475_v6 = vand.u32 4294901760, %v2468_v7 }
 0x28c   :  { %20743 = vst [vmem:[#allocation50_spill] sm:$0xff] %v14453_v54  ;;  %v2282_v22 = vpop.f32.mrf.mxu3  ;;  %v2346_v27 = vrot.slane %v12790_v36, 2  ;;  %2934 = vmatpush.msrb.mxu2 %v2933_v42  ;;  %3221 = vmatpush.msra.mxu1 %v2933_v42  ;;  %v3063_v46 = vsub.f32 %v12687_v44, %v2933_v42  ;;  %v14478_v0 = vand.u32 4294901760, %v14465_v13  ;;  %v20747_v44 = vand.u32 4294901760, %v14397_v33 }
 0x28d   :  { %2462 = vmatmul.f32.gmra.mxu0 %v14446_v45  ;;  %v2118_v50 = vpop.f32.mrf.mxu1  ;;  %v2213_v51 = vpop.f32.mrf.mxu2 }
 0x28e   :  { %v2119_v54 = vadd.f32 %v2118_v50, %v2035_v30  ;;  %3310 = vmatpush.msra.mxu2 %v20744_v55  ;;  %v14480_v30 = vand.u32 4294901760, %v2377_v18  ;;  %v3064_v19 = vand.u32 4294901760, %v3063_v46  ;;  %3140 = vmatpush.msra.mxu0 %v3063_v46  ;;  %v2347_v55 = vsel %vm2321_vm3, %v2344_v60, %v2346_v27 }
 0x28f   :  { %v2379_v60 = vsel %vm155_vm2, %v2347_v55, 0 }
 0x290   :  { %v2214_v11 = vadd.f32 %v2213_v51, %v2119_v54  ;;  %2567 = vmatmul.f32.gmra.mxu1 %v14392_v20  ;;  %v20746_v51 = vand.u32 4294901760, %v14296_v28  ;;  %v3065_v54 = vsub.f32 %v3063_v46, %v3064_v19  ;;  %v14495_v28 = vsub.f32 %v2377_v18, %v14480_v30  ;;  %v12791_v46 = vld [vmem:[%s20360_s0 + $0x78] sm:$0xf] }
 0x291   :  { %2741 = vmatmul.f32.gmra.mxu3 %v14449_v31 }
 0x292   :  { %v14482_v50 = vadd.f32 %v2282_v22, %v2214_v11  ;;  %v2039_v36 = vpop.f32.mrf.mxu0  ;;  %3314 = vmatpush.msra.mxu2 %v20746_v51  ;;  %v2476_v22 = vsub.f32 %v14465_v13, %v14478_v0  ;;  %v3066_v31 = vand.u32 4294901760, %v3065_v54  ;;  %v14506_v18 = vand.u32 4294901760, %v14495_v28 }
 0x293   :  { %2652 = vmatmul.f32.gmra.mxu2 %v14435_v9  ;;  %v2040_v21 = vadd.f32 %v2039_v36, %v14149_v37  ;;  %v2348_v37 = vrot.slane %v12791_v46, 2 }
 0x294   :  { %20745 = vst [vmem:[#allocation52_spill] sm:$0xff] %v14482_v50  ;;  %v2286_v7 = vpop.f32.mrf.mxu3  ;;  %3318 = vmatpush.msra.mxu2 %v20747_v44  ;;  %3067 = vmatpush.msrb.mxu3 %v3066_v31  ;;  %v14503_v36 = vand.u32 4294901760, %v2476_v22 }
 0x295   :  { %2470 = vmatmul.f32.gmra.mxu0 %v14475_v6  ;;  %v2124_v11 = vpop.f32.mrf.mxu1  ;;  %v2217_v50 = vpop.f32.mrf.mxu2 }
 0x296   :  { %v2125_v51 = vadd.f32 %v2124_v11, %v2040_v21  ;;  %3322 = vmatpush.msra.mxu2 %v3064_v19  ;;  %v14508_v21 = vand.u32 4294901760, %v2379_v60  ;;  %3385 = vmatpush.msra.mxu3 %v14182_v29  ;;  %v2484_v11 = vsub.f32 %v14495_v28, %v14506_v18 }
 0x298   :  { %v2218_v33 = vadd.f32 %v2217_v50, %v2125_v51  ;;  %2571 = vmatmul.f32.gmra.mxu1 %v14424_v26  ;;  %v2349_v50 = vsel %vm2321_vm3, %v2346_v27, %v2348_v37  ;;  %3387 = vmatpush.msra.mxu3 %v14272_v5 }
 0x299   :  { %2747 = vmatmul.f32.gmra.mxu3 %v14478_v0  ;;  %v2381_v51 = vsel %vm155_vm2, %v2349_v50, 0 }
 0x29a   :  { %v14510_v55 = vadd.f32 %v2286_v7, %v2218_v33  ;;  %v2044_v19 = vpop.f32.mrf.mxu0  ;;  %v14521_v7 = vsub.f32 %v2379_v60, %v14508_v21  ;;  %3389 = vmatpush.msra.mxu3 %v14376_v24  ;;  %v14532_v46 = vand.u32 4294901760, %v2381_v51 }
 0x29b   :  { %2657 = vmatmul.f32.gmra.mxu2 %v14465_v13  ;;  %v2045_v31 = vadd.f32 %v2044_v19, %v14168_v16  ;;  %v14527_v16 = vand.u32 4294901760, %v2484_v11 }
 0x29c   :  { %v2290_v54 = vpop.f32.mrf.mxu3  ;;  %3391 = vmatpush.msra.mxu3 %v2933_v42  ;;  %v14530_v5 = vand.u32 4294901760, %v14521_v7  ;;  %v14542_v50 = vsub.f32 %v2381_v51, %v14532_v46 }
 0x29d   :  { %2478 = vmatmul.f32.gmra.mxu0 %v14503_v36  ;;  %v2130_v44 = vpop.f32.mrf.mxu1  ;;  %v2221_v29 = vpop.f32.mrf.mxu2 }
 0x29e   :  { %v2131_v22 = vadd.f32 %v2130_v44, %v2045_v31  ;;  %v2492_v19 = vsub.f32 %v14521_v7, %v14530_v5 }
 0x2a0   :  { %v2222_v27 = vadd.f32 %v2221_v29, %v2131_v22  ;;  %2575 = vmatmul.f32.gmra.mxu1 %v14451_v17 }
 0x2a1   :  { %2753 = vmatmul.f32.gmra.mxu3 %v14506_v18 }
 0x2a2   :  { %v14534_v60 = vadd.f32 %v2290_v54, %v2222_v27  ;;  %v2049_v37 = vpop.f32.mrf.mxu0  ;;  %v14546_v54 = vand.u32 4294901760, %v2492_v19 }
 0x2a3   :  { %2662 = vmatmul.f32.gmra.mxu2 %v14495_v28  ;;  %v2050_v24 = vadd.f32 %v2049_v37, %v14196_v2  ;;  %v14549_v2 = vand.u32 4294901760, %v14542_v50 }
 0x2a4   :  { %v2294_v33 = vpop.f32.mrf.mxu3 }
 0x2a5   :  { %2486 = vmatmul.f32.gmra.mxu0 %v14527_v16  ;;  %v2136_v42 = vpop.f32.mrf.mxu1  ;;  %v2225_v44 = vpop.f32.mrf.mxu2 }
 0x2a6   :  { %v2137_v31 = vadd.f32 %v2136_v42, %v2050_v24  ;;  %v2500_v24 = vsub.f32 %v14542_v50, %v14549_v2 }
 0x2a8   :  { %v2226_v11 = vadd.f32 %v2225_v44, %v2137_v31  ;;  %2579 = vmatmul.f32.gmra.mxu1 %v14480_v30 }
 0x2a9   :  { %2759 = vmatmul.f32.gmra.mxu3 %v14530_v5 }
 0x2aa   :  { %v14551_v22 = vadd.f32 %v2294_v33, %v2226_v11  ;;  %v2054_v29 = vpop.f32.mrf.mxu0  ;;  %v14560_v33 = vand.u32 4294901760, %v2500_v24 }
 0x2ab   :  { %2667 = vmatmul.f32.gmra.mxu2 %v14521_v7  ;;  %v2055_v51 = vadd.f32 %v2054_v29, %v14224_v39 }
 0x2ac   :  { %20748 = vst [vmem:[#allocation53_spill] sm:$0xff] %v14551_v22  ;;  %v2298_v27 = vpop.f32.mrf.mxu3 }
 0x2ad   :  { %2494 = vmatmul.f32.gmra.mxu0 %v14546_v54  ;;  %v2142_v37 = vpop.f32.mrf.mxu1  ;;  %v2229_v19 = vpop.f32.mrf.mxu2 }
 0x2ae   :  { %v2143_v42 = vadd.f32 %v2142_v37, %v2055_v51 }
 0x2b0   :  { %v2230_v31 = vadd.f32 %v2229_v19, %v2143_v42  ;;  %2583 = vmatmul.f32.gmra.mxu1 %v14508_v21 }
 0x2b1   :  { %2765 = vmatmul.f32.gmra.mxu3 %v14549_v2 }
 0x2b2   :  { %v14562_v44 = vadd.f32 %v2298_v27, %v2230_v31  ;;  %v2059_v11 = vpop.f32.mrf.mxu0 }
 0x2b3   :  { %2672 = vmatmul.f32.gmra.mxu2 %v14542_v50  ;;  %v2060_v39 = vadd.f32 %v2059_v11, %v14255_v12 }
 0x2b4   :  { %20749 = vst [vmem:[#allocation54_spill] sm:$0xff] %v14562_v44  ;;  %v2302_v29 = vpop.f32.mrf.mxu3 }
 0x2b5   :  { %2502 = vmatmul.f32.gmra.mxu0 %v14560_v33  ;;  %v2148_v22 = vpop.f32.mrf.mxu1  ;;  %v2233_v37 = vpop.f32.mrf.mxu2 }
 0x2b6   :  { %v2149_v51 = vadd.f32 %v2148_v22, %v2060_v39 }
 0x2b8   :  { %v2234_v42 = vadd.f32 %v2233_v37, %v2149_v51  ;;  %2587 = vmatmul.f32.gmra.mxu1 %v14532_v46 }
 0x2b9   :  { %3069 = vmatmul.f32.vlgmr.msrb.gmra.mxu3 %v14194_v53 }
 0x2ba   :  { %v14569_v24 = vadd.f32 %v2302_v29, %v2234_v42  ;;  %v2064_v27 = vpop.f32.mrf.mxu0 }
 0x2bb   :  { %2940 = vmatmul.f32.vlgmr.msrb.gmra.mxu2 %v14248_v10  ;;  %v2065_v19 = vadd.f32 %v2064_v27, %v14290_v1 }
 0x2bc   :  { %v2306_v31 = vpop.f32.mrf.mxu3 }
 0x2bd   :  { %2798 = vmatmul.f32.vlgmr.msrb.gmra.mxu0 %v14194_v53  ;;  %v2154_v12 = vpop.f32.mrf.mxu1  ;;  %v2237_v44 = vpop.f32.mrf.mxu2 }
 0x2be   :  { %v2155_v11 = vadd.f32 %v2154_v12, %v2065_v19 }
 0x2c0   :  { %v2238_v22 = vadd.f32 %v2237_v44, %v2155_v11  ;;  %2867 = vmatmul.f32.vlgmr.msrb.gmra.mxu1 %v14194_v53 }
 0x2c1   :  { %3073 = vmatmul.f32.gmra.mxu3 %v14222_v52 }
 0x2c2   :  { %v14576_v39 = vadd.f32 %v2306_v31, %v2238_v22  ;;  %v2069_v29 = vpop.f32.mrf.mxu0 }
 0x2c3   :  { %2948 = vmatmul.f32.gmra.mxu2 %v14283_v57  ;;  %v2070_v10 = vadd.f32 %v2069_v29, %v14328_v8 }
 0x2c4   :  { %v2310_v51 = vpop.f32.mrf.mxu3 }
 0x2c5   :  { %2802 = vmatmul.f32.gmra.mxu0 %v14222_v52  ;;  %v2160_v1 = vpop.f32.mrf.mxu1  ;;  %v2241_v42 = vpop.f32.mrf.mxu2 }
 0x2c6   :  { %v2161_v37 = vadd.f32 %v2160_v1, %v2070_v10 }
 0x2c8   :  { %v2242_v27 = vadd.f32 %v2241_v42, %v2161_v37  ;;  %2871 = vmatmul.f32.gmra.mxu1 %v14222_v52 }
 0x2c9   :  { %3077 = vmatmul.f32.gmra.mxu3 %v14253_v32 }
 0x2ca   :  { %v14583_v44 = vadd.f32 %v2310_v51, %v2242_v27  ;;  %v2074_v19 = vpop.f32.mrf.mxu0 }
 0x2cb   :  { %2956 = vmatmul.f32.gmra.mxu2 %v14321_v56  ;;  %v2075_v57 = vadd.f32 %v2074_v19, %v14359_v4 }
 0x2cc   :  { %v2314_v31 = vpop.f32.mrf.mxu3 }
 0x2cd   :  { %2806 = vmatmul.f32.gmra.mxu0 %v14253_v32  ;;  %v2166_v8 = vpop.f32.mrf.mxu1  ;;  %v2245_v11 = vpop.f32.mrf.mxu2 }
 0x2ce   :  { %v2167_v12 = vadd.f32 %v2166_v8, %v2075_v57 }
 0x2d0   :  { %v2246_v22 = vadd.f32 %v2245_v11, %v2167_v12  ;;  %2875 = vmatmul.f32.gmra.mxu1 %v14253_v32 }
 0x2d1   :  { %3081 = vmatmul.f32.gmra.mxu3 %v14288_v35 }
 0x2d2   :  { %v14590_v29 = vadd.f32 %v2314_v31, %v2246_v22  ;;  %v2079_v10 = vpop.f32.mrf.mxu0 }
 0x2d3   :  { %2964 = vmatmul.f32.gmra.mxu2 %v14352_v14  ;;  %v2080_v56 = vadd.f32 %v2079_v10, %v14394_v47 }
 0x2d4   :  { %v2318_v51 = vpop.f32.mrf.mxu3 }
 0x2d5   :  { %2810 = vmatmul.f32.gmra.mxu0 %v14288_v35  ;;  %v2172_v4 = vpop.f32.mrf.mxu1  ;;  %v2249_v37 = vpop.f32.mrf.mxu2 }
 0x2d6   :  { %v2173_v1 = vadd.f32 %v2172_v4, %v2080_v56 }
 0x2d8   :  { %v2250_v42 = vadd.f32 %v2249_v37, %v2173_v1  ;;  %2879 = vmatmul.f32.gmra.mxu1 %v14288_v35 }
 0x2d9   :  { %3085 = vmatmul.f32.gmra.mxu3 %v14326_v43 }
 0x2da   :  { %v14597_v27 = vadd.f32 %v2318_v51, %v2250_v42  ;;  %v2415_v19 = vpop.f32.mrf.mxu0 }
 0x2db   :  { %2972 = vmatmul.f32.gmra.mxu2 %v14387_v59 }
 0x2dc   :  { %v2700_v57 = vpop.f32.mrf.mxu3 }
 0x2dd   :  { %2814 = vmatmul.f32.gmra.mxu0 %v14326_v43  ;;  %v2544_v14 = vpop.f32.mrf.mxu1  ;;  %v2618_v31 = vpop.f32.mrf.mxu2 }
 0x2de   :  { %v2545_v47 = vadd.f32 %v2544_v14, %v2415_v19 }
 0x2e0   :  { %v2619_v8 = vadd.f32 %v2618_v31, %v2545_v47  ;;  %2883 = vmatmul.f32.gmra.mxu1 %v14326_v43 }
 0x2e1   :  { %3089 = vmatmul.f32.gmra.mxu3 %v14357_v38 }
 0x2e2   :  { %v2423_v12 = vpop.f32.mrf.mxu0  ;;  %v14603_v11 = vadd.f32 %v2700_v57, %v2619_v8 }
 0x2e3   :  { %2980 = vmatmul.f32.gmra.mxu2 %v14419_v58 }
 0x2e4   :  { %v2706_v22 = vpop.f32.mrf.mxu3 }
 0x2e5   :  { %2818 = vmatmul.f32.gmra.mxu0 %v14357_v38  ;;  %v2548_v59 = vpop.f32.mrf.mxu1  ;;  %v2623_v56 = vpop.f32.mrf.mxu2 }
 0x2e6   :  { %v2549_v10 = vadd.f32 %v2548_v59, %v2423_v12 }
 0x2e8   :  { %v2624_v51 = vadd.f32 %v2623_v56, %v2549_v10  ;;  %2887 = vmatmul.f32.gmra.mxu1 %v14357_v38 }
 0x2e9   :  { %3093 = vmatmul.f32.gmra.mxu3 %v14392_v20 }
 0x2ea   :  { %v2431_v4 = vpop.f32.mrf.mxu0  ;;  %v14609_v1 = vadd.f32 %v2706_v22, %v2624_v51 }
 0x2eb   :  { %2988 = vmatmul.f32.gmra.mxu2 %v14446_v45 }
 0x2ec   :  { %v2712_v37 = vpop.f32.mrf.mxu3 }
 0x2ed   :  { %2822 = vmatmul.f32.gmra.mxu0 %v14392_v20  ;;  %v2552_v58 = vpop.f32.mrf.mxu1  ;;  %v2628_v19 = vpop.f32.mrf.mxu2 }
 0x2ee   :  { %v2553_v42 = vadd.f32 %v2552_v58, %v2431_v4 }
 0x2f0   :  { %v2629_v57 = vadd.f32 %v2628_v19, %v2553_v42  ;;  %2891 = vmatmul.f32.gmra.mxu1 %v14392_v20 }
 0x2f1   :  { %3097 = vmatmul.f32.gmra.mxu3 %v14424_v26 }
 0x2f2   :  { %v2439_v14 = vpop.f32.mrf.mxu0  ;;  %v14615_v47 = vadd.f32 %v2712_v37, %v2629_v57 }
 0x2f3   :  { %2996 = vmatmul.f32.gmra.mxu2 %v14475_v6 }
 0x2f4   :  { %v2718_v31 = vpop.f32.mrf.mxu3 }
 0x2f5   :  { %2826 = vmatmul.f32.gmra.mxu0 %v14424_v26  ;;  %v2556_v45 = vpop.f32.mrf.mxu1  ;;  %v2633_v12 = vpop.f32.mrf.mxu2 }
 0x2f6   :  { %v2557_v8 = vadd.f32 %v2556_v45, %v2439_v14 }
 0x2f8   :  { %v2634_v22 = vadd.f32 %v2633_v12, %v2557_v8  ;;  %2895 = vmatmul.f32.gmra.mxu1 %v14424_v26 }
 0x2f9   :  { %3101 = vmatmul.f32.gmra.mxu3 %v14451_v17 }
 0x2fa   :  { %v2447_v59 = vpop.f32.mrf.mxu0  ;;  %v14621_v10 = vadd.f32 %v2718_v31, %v2634_v22 }
 0x2fb   :  { %3004 = vmatmul.f32.gmra.mxu2 %v14503_v36  ;;  %v12700_v36 = vld [vmem:[%s20361_s1 + $0xf0] sm:$0xf] }
 0x2fc   :  { %v2724_v56 = vpop.f32.mrf.mxu3  ;;  %v3528_v14 = vsel %vm180_vm0, %v12700_v36, 0 }
 0x2fd   :  { %2830 = vmatmul.f32.gmra.mxu0 %v14451_v17  ;;  %v2560_v6 = vpop.f32.mrf.mxu1  ;;  %v2638_v4 = vpop.f32.mrf.mxu2  ;;  %v14635_v8 = vand.u32 4294901760, %v3528_v14 }
 0x2fe   :  { %v2561_v51 = vadd.f32 %v2560_v6, %v2447_v59 }
 0x2ff   :  { %v14639_v22 = vsub.f32 %v3528_v14, %v14635_v8  ;;  %3546 = vmatpush.msrb.mxu0 %v14635_v8  ;;  %3833 = vmatpush.msrb.mxu3 %v14635_v8 }
 0x300   :  { %v2639_v37 = vadd.f32 %v2638_v4, %v2561_v51  ;;  %2899 = vmatmul.f32.gmra.mxu1 %v14451_v17 }
 0x301   :  { %3105 = vmatmul.f32.gmra.mxu3 %v14480_v30  ;;  %3749 = vmatpush.msrb.mxu2 %v14639_v22  ;;  %v3664_v59 = vand.u32 4294901760, %v14639_v22 }
 0x302   :  { %v2455_v58 = vpop.f32.mrf.mxu0  ;;  %v14627_v42 = vadd.f32 %v2724_v56, %v2639_v37 }
 0x303   :  { %3012 = vmatmul.f32.gmra.mxu2 %v14527_v16  ;;  %v3665_v51 = vsub.f32 %v14639_v22, %v3664_v59 }
 0x304   :  { %v2730_v19 = vpop.f32.mrf.mxu3 }
 0x305   :  { %2834 = vmatmul.f32.gmra.mxu0 %v14480_v30  ;;  %v2564_v57 = vpop.f32.mrf.mxu1  ;;  %v2643_v45 = vpop.f32.mrf.mxu2  ;;  %v3666_v36 = vand.u32 4294901760, %v3665_v51 }
 0x306   :  { %v2565_v31 = vadd.f32 %v2564_v57, %v2455_v58 }
 0x307   :  { %3667 = vmatpush.msrb.mxu1 %v3666_v36 }
 0x308   :  { %v2644_v12 = vadd.f32 %v2643_v45, %v2565_v31  ;;  %2903 = vmatmul.f32.gmra.mxu1 %v14480_v30 }
 0x309   :  { %3109 = vmatmul.f32.gmra.mxu3 %v14508_v21 }
 0x30a   :  { %v2463_v16 = vpop.f32.mrf.mxu0  ;;  %v14646_v56 = vadd.f32 %v2730_v19, %v2644_v12 }
 0x30b   :  { %3020 = vmatmul.f32.gmra.mxu2 %v14546_v54 }
 0x30c   :  { %v2736_v6 = vpop.f32.mrf.mxu3 }
 0x30d   :  { %2838 = vmatmul.f32.gmra.mxu0 %v14508_v21  ;;  %v2568_v4 = vpop.f32.mrf.mxu1  ;;  %v2648_v58 = vpop.f32.mrf.mxu2 }
 0x30e   :  { %v2569_v37 = vadd.f32 %v2568_v4, %v2463_v16 }
 0x310   :  { %v2649_v57 = vadd.f32 %v2648_v58, %v2569_v37  ;;  %2907 = vmatmul.f32.gmra.mxu1 %v14508_v21 }
 0x311   :  { %3113 = vmatmul.f32.gmra.mxu3 %v14532_v46 }
 0x312   :  { %v2471_v19 = vpop.f32.mrf.mxu0  ;;  %v14655_v14 = vadd.f32 %v2736_v6, %v2649_v57 }
 0x313   :  { %3028 = vmatmul.f32.gmra.mxu2 %v14560_v33  ;;  %v12698_v33 = vld [vmem:[%s20361_s1 + $0xe0] sm:$0xff] }
 0x314   :  { %v2742_v54 = vpop.f32.mrf.mxu3  ;;  %v14668_v58 = vand.u32 4294901760, %v12698_v33 }
 0x315   :  { %2842 = vmatmul.f32.gmra.mxu0 %v14532_v46  ;;  %v2572_v31 = vpop.f32.mrf.mxu1 }
 0x316   :  { %v2573_v45 = vadd.f32 %v2572_v31, %v2471_v19  ;;  %v2653_v12 = vpop.f32.mrf.mxu2  ;;  %v14671_v19 = vsub.f32 %v12698_v33, %v14668_v58  ;;  %3548 = vmatpush.msrb.mxu0 %v14668_v58  ;;  %3835 = vmatpush.msrb.mxu3 %v14668_v58 }
 0x318   :  { %v2654_v16 = vadd.f32 %v2653_v12, %v2573_v45  ;;  %2911 = vmatmul.f32.gmra.mxu1 %v14532_v46  ;;  %3752 = vmatpush.msrb.mxu2 %v14671_v19 }
 0x319   :  { %3393 = vmatmul.f32.vlgmr.msra.gmra.mxu3 %v14194_v53 }
 0x31a   :  { %v2479_v51 = vpop.f32.mrf.mxu0  ;;  %v14661_v4 = vadd.f32 %v2742_v54, %v2654_v16 }
 0x31b   :  { %3324 = vmatmul.f32.vlgmr.msra.gmra.mxu2 %v14194_v53 }
 0x31c   :  { %v2748_v6 = vpop.f32.mrf.mxu3 }
 0x31d   :  { %3143 = vmatmul.f32.vlgmr.msra.gmra.mxu0 %v14210_v61  ;;  %v2576_v37 = vpop.f32.mrf.mxu1  ;;  %v3670_v61 = vand.u32 4294901760, %v14671_v19 }
 0x31e   :  { %v2577_v36 = vadd.f32 %v2576_v37, %v2479_v51  ;;  %v2658_v57 = vpop.f32.mrf.mxu2 }
 0x31f   :  { %v3671_v45 = vsub.f32 %v14671_v19, %v3670_v61 }
 0x320   :  { %v2659_v53 = vadd.f32 %v2658_v57, %v2577_v36  ;;  %3225 = vmatmul.f32.vlgmr.msra.gmra.mxu1 %v14220_v41 }
 0x321   :  { %3397 = vmatmul.f32.gmra.mxu3 %v14222_v52  ;;  %v3672_v41 = vand.u32 4294901760, %v3671_v45 }
 0x322   :  { %v2487_v54 = vpop.f32.mrf.mxu0  ;;  %v14679_v31 = vadd.f32 %v2748_v6, %v2659_v53 }
 0x323   :  { %3328 = vmatmul.f32.gmra.mxu2 %v14222_v52  ;;  %3673 = vmatpush.msrb.mxu1 %v3672_v41 }
 0x324   :  { %v2754_v12 = vpop.f32.mrf.mxu3 }
 0x325   :  { %3148 = vmatmul.f32.gmra.mxu0 %v14236_v49  ;;  %v2580_v16 = vpop.f32.mrf.mxu1 }
 0x326   :  { %v2581_v51 = vadd.f32 %v2580_v16, %v2487_v54  ;;  %v2663_v33 = vpop.f32.mrf.mxu2 }
 0x328   :  { %v2664_v37 = vadd.f32 %v2663_v33, %v2581_v51  ;;  %3231 = vmatmul.f32.gmra.mxu1 %v14251_v25 }
 0x329   :  { %3401 = vmatmul.f32.gmra.mxu3 %v14253_v32 }
 0x32a   :  { %v2495_v6 = vpop.f32.mrf.mxu0  ;;  %v14688_v36 = vadd.f32 %v2754_v12, %v2664_v37 }
 0x32b   :  { %3332 = vmatmul.f32.gmra.mxu2 %v14253_v32  ;;  %v12696_v32 = vld [vmem:[%s20361_s1 + $0xd0] sm:$0xff] }
 0x32c   :  { %v2760_v52 = vpop.f32.mrf.mxu3  ;;  %v14701_v16 = vand.u32 4294901760, %v12696_v32 }
 0x32d   :  { %3153 = vmatmul.f32.gmra.mxu0 %v14270_v23  ;;  %v2584_v57 = vpop.f32.mrf.mxu1 }
 0x32e   :  { %v2585_v49 = vadd.f32 %v2584_v57, %v2495_v6  ;;  %v2668_v53 = vpop.f32.mrf.mxu2  ;;  %3550 = vmatpush.msrb.mxu0 %v14701_v16  ;;  %3837 = vmatpush.msrb.mxu3 %v14701_v16 }
 0x330   :  { %v2669_v45 = vadd.f32 %v2668_v53, %v2585_v49  ;;  %3237 = vmatmul.f32.gmra.mxu1 %v14286_v48  ;;  %v14704_v48 = vsub.f32 %v12696_v32, %v14701_v16 }
 0x331   :  { %3405 = vmatmul.f32.gmra.mxu3 %v14288_v35 }
 0x332   :  { %v2503_v54 = vpop.f32.mrf.mxu0  ;;  %v14694_v25 = vadd.f32 %v2760_v52, %v2669_v45  ;;  %3755 = vmatpush.msrb.mxu2 %v14704_v48  ;;  %v1680_v52 = vadd.f32 %v14097_v34, %v13962_v63  ;;  %v20752_v34 = vld [vmem:[#allocation57_spill] sm:$0xff] }
 0x333   :  { %3336 = vmatmul.f32.gmra.mxu2 %v14288_v35 }
 0x334   :  { %v2766_v12 = vpop.f32.mrf.mxu3  ;;  %v1749_v45 = vadd.f32 %v14103_v15, %v1680_v52 }
 0x335   :  { %3158 = vmatmul.f32.gmra.mxu0 %v14309_v40  ;;  %v2588_v23 = vpop.f32.mrf.mxu1  ;;  %v3676_v40 = vand.u32 4294901760, %v14704_v48 }
 0x336   :  { %v2589_v41 = vadd.f32 %v2588_v23, %v2503_v54  ;;  %v2673_v51 = vpop.f32.mrf.mxu2  ;;  %v20751_v23 = vld [vmem:[#allocation38_spill] sm:$0xff] }
 0x337   :  { %v3677_v6 = vsub.f32 %v14704_v48, %v3676_v40 }
 0x338   :  { %v2674_v35 = vadd.f32 %v2673_v51, %v2589_v41  ;;  %3243 = vmatmul.f32.gmra.mxu1 %v14324_v62  ;;  %v20754_v51 = vld [vmem:[#allocation42_spill] sm:$0xff] }
 0x339   :  { %3409 = vmatmul.f32.gmra.mxu3 %v14326_v43  ;;  %v3678_v53 = vand.u32 4294901760, %v3677_v6 }
 0x33a   :  { %v2799_v33 = vpop.f32.mrf.mxu0  ;;  %v14712_v37 = vadd.f32 %v2766_v12, %v2674_v35  ;;  %v20755_v35 = vld [vmem:[#allocation16_spill] sm:$0xff] }
 0x33b   :  { %3340 = vmatmul.f32.gmra.mxu2 %v14326_v43  ;;  %v2800_v57 = vadd.f32 %v2799_v33, %v14603_v11  ;;  %3679 = vmatpush.msrb.mxu1 %v3678_v53  ;;  %v20759_v53 = vld [vmem:[#allocation31_spill] sm:$0xff] }
 0x33c   :  { %v3070_v49 = vpop.f32.mrf.mxu3 }
 0x33d   :  { %3163 = vmatmul.f32.gmra.mxu0 %v14340_v3  ;;  %v2868_v62 = vpop.f32.mrf.mxu1  ;;  %v20753_v3 = vld [vmem:[#allocation28_spill] sm:$0xff] }
 0x33e   :  { %v2869_v54 = vadd.f32 %v2868_v62, %v2800_v57  ;;  %v2941_v32 = vpop.f32.mrf.mxu2  ;;  %v1684_v11 = vadd.f32 %v20753_v3, %v20752_v34  ;;  %v20757_v62 = vld [vmem:[#allocation45_spill] sm:$0xff] }
 0x33f   :  { %v14721_v12 = vadd.f32 %v3070_v49, %v2941_v32 }
 0x340   :  { %v14723_v43 = vadd.f32 %v2869_v54, %v1749_v45  ;;  %3249 = vmatmul.f32.gmra.mxu1 %v20751_v23  ;;  %v1753_v33 = vadd.f32 %v20755_v35, %v1684_v11  ;;  %v12694_v23 = vld [vmem:[%s20361_s1 + $0xc0] sm:$0xff] }
 0x341   :  { %3413 = vmatmul.f32.gmra.mxu3 %v14357_v38  ;;  %v3551_v3 = vand.u32 4294901760, %v12694_v23  ;;  %v20761_v11 = vld [vmem:[#allocation32_spill] sm:$0xff] }
 0x342   :  { %20750 = vst [vmem:[#allocation55_spill] sm:$0xff] %v14723_v43  ;;  %v2803_v63 = vpop.f32.mrf.mxu0 }
 0x343   :  { %3344 = vmatmul.f32.gmra.mxu2 %v14357_v38  ;;  %v2804_v41 = vadd.f32 %v2803_v63, %v14609_v1  ;;  %v20758_v1 = vld [vmem:[#allocation58_spill] sm:$0xff]  ;;  %v20760_v63 = vld [vmem:[#allocation51_spill] sm:$0xff]  ;;  %3552 = vmatpush.msrb.mxu0 %v3551_v3 }
 0x344   :  { %v3074_v15 = vpop.f32.mrf.mxu3  ;;  %v1688_v45 = vadd.f32 %v20759_v53, %v20758_v1  ;;  %3839 = vmatpush.msrb.mxu3 %v3551_v3 }
 0x345   :  { %3168 = vmatmul.f32.gmra.mxu0 %v20754_v51  ;;  %v2872_v48 = vpop.f32.mrf.mxu1 }
 0x346   :  { %v2873_v6 = vadd.f32 %v2872_v48, %v2804_v41  ;;  %v2949_v52 = vpop.f32.mrf.mxu2  ;;  %v1757_v41 = vadd.f32 %v20761_v11, %v1688_v45  ;;  %3928 = vmatpush.msra.mxu0 %v3664_v59 }
 0x347   :  { %v14733_v57 = vadd.f32 %v3074_v15, %v2949_v52 }
 0x348   :  { %v14735_v49 = vadd.f32 %v2873_v6, %v1753_v33  ;;  %3255 = vmatmul.f32.gmra.mxu1 %v20757_v62  ;;  %3932 = vmatpush.msra.mxu0 %v3670_v61  ;;  %v20764_v62 = vld [vmem:[#allocation20_spill] sm:$0xff] }
 0x349   :  { %3417 = vmatmul.f32.gmra.mxu3 %v14392_v20  ;;  %v20768_v61 = vld [vmem:[#allocation48_spill] sm:$0xff] }
 0x34a   :  { %20756 = vst [vmem:[#allocation56_spill] sm:$0xff] %v14735_v49  ;;  %v2807_v38 = vpop.f32.mrf.mxu0  ;;  %3936 = vmatpush.msra.mxu0 %v3676_v40  ;;  %v20770_v40 = vld [vmem:[#allocation35_spill] sm:$0xff] }
 0x34b   :  { %3348 = vmatmul.f32.gmra.mxu2 %v14392_v20  ;;  %v2808_v54 = vadd.f32 %v2807_v38, %v14615_v47  ;;  %v3681_v20 = vsub.f32 %v12694_v23, %v3551_v3  ;;  %v20763_v47 = vld [vmem:[#allocation46_spill] sm:$0xff]  ;;  %v20765_v38 = vld [vmem:[#allocation25_spill] sm:$0xff] }
 0x34c   :  { %v3078_v32 = vpop.f32.mrf.mxu3  ;;  %v1692_v1 = vadd.f32 %v20765_v38, %v20764_v62  ;;  %v20773_v62 = vld [vmem:[#allocation21_spill] sm:$0xff]  ;;  %v20774_v38 = vld [vmem:[#allocation36_spill] sm:$0xff] }
 0x34d   :  { %3173 = vmatmul.f32.gmra.mxu0 %v20760_v63  ;;  %v2876_v34 = vpop.f32.mrf.mxu1  ;;  %3758 = vmatpush.msrb.mxu2 %v3681_v20  ;;  %v3682_v33 = vand.u32 4294901760, %v3681_v20 }
 0x34e   :  { %v2877_v15 = vadd.f32 %v2876_v34, %v2808_v54  ;;  %v2957_v51 = vpop.f32.mrf.mxu2  ;;  %v20766_v54 = vld [vmem:[#allocation17_spill] sm:$0xff] }
 0x34f   :  { %v14748_v48 = vadd.f32 %v3078_v32, %v2957_v51  ;;  %v3683_v52 = vsub.f32 %v3681_v20, %v3682_v33  ;;  %v1761_v32 = vadd.f32 %v20766_v54, %v1692_v1  ;;  %3940 = vmatpush.msra.mxu0 %v3682_v33  ;;  %v20771_v51 = vld [vmem:[#allocation26_spill] sm:$0xff]  ;;  %v1700_v1 = vadd.f32 %v20774_v38, %v20773_v62 }
 0x350   :  { %v14750_v35 = vadd.f32 %v2877_v15, %v1757_v41  ;;  %3261 = vmatmul.f32.gmra.mxu1 %v20763_v47 }
 0x351   :  { %3421 = vmatmul.f32.gmra.mxu3 %v14424_v26  ;;  %v3684_v59 = vand.u32 4294901760, %v3683_v52 }
 0x352   :  { %20762 = vst [vmem:[#allocation38_spill] sm:$0xff] %v14750_v35  ;;  %v2811_v6 = vpop.f32.mrf.mxu0 }
 0x353   :  { %3352 = vmatmul.f32.gmra.mxu2 %v14424_v26  ;;  %v2812_v53 = vadd.f32 %v2811_v6, %v14621_v10  ;;  %3685 = vmatpush.msrb.mxu1 %v3684_v59  ;;  %v20775_v59 = vld [vmem:[#allocation29_spill] sm:$0xff] }
 0x354   :  { %v3082_v45 = vpop.f32.mrf.mxu3  ;;  %v1769_v54 = vadd.f32 %v20775_v59, %v1700_v1  ;;  %v20782_v59 = vld [vmem:[#allocation30_spill] sm:$0xff] }
 0x355   :  { %3178 = vmatmul.f32.gmra.mxu0 %v14435_v9  ;;  %v2880_v22 = vpop.f32.mrf.mxu1  ;;  %4003 = vmatpush.msra.mxu1 %v14635_v8  ;;  %v20769_v9 = vld [vmem:[#allocation13_spill] sm:$0xff] }
 0x356   :  { %v2881_v23 = vadd.f32 %v2880_v22, %v2812_v53  ;;  %v2965_v63 = vpop.f32.mrf.mxu2  ;;  %v1696_v34 = vadd.f32 %v20770_v40, %v20769_v9 }
 0x357   :  { %v14764_v19 = vadd.f32 %v3082_v45, %v2965_v63  ;;  %4005 = vmatpush.msra.mxu1 %v14668_v58 }
 0x358   :  { %v14766_v26 = vadd.f32 %v2881_v23, %v1761_v32  ;;  %3267 = vmatmul.f32.gmra.mxu1 %v20768_v61  ;;  %v1765_v20 = vadd.f32 %v20771_v51, %v1696_v34  ;;  %v20778_v51 = vld [vmem:[#allocation18_spill] sm:$0xff] }
 0x359   :  { %3425 = vmatmul.f32.gmra.mxu3 %v14451_v17  ;;  %4007 = vmatpush.msra.mxu1 %v14701_v16 }
 0x35a   :  { %20767 = vst [vmem:[#allocation57_spill] sm:$0xff] %v14766_v26  ;;  %v2815_v10 = vpop.f32.mrf.mxu0 }
 0x35b   :  { %3356 = vmatmul.f32.gmra.mxu2 %v14451_v17  ;;  %v2816_v11 = vadd.f32 %v2815_v10, %v14627_v42  ;;  %v12792_v17 = vld [vmem:[%s20360_s0] sm:$0xff]  ;;  %v12793_v42 = vld [vmem:[%s20360_s0 + $0x8] sm:$0xff]  ;;  %4009 = vmatpush.msra.mxu1 %v3551_v3  ;;  %v12701_v3 = vld [vmem:[%s20361_s1 + $0xf8] sm:$0xf] }
 0x35c   :  { %v3086_v41 = vpop.f32.mrf.mxu3  ;;  %v3466_v58 = vrot.slane %v12792_v17, 3  ;;  %v3467_v6 = vrot.slane %v12793_v42, 3  ;;  %v3531_v22 = vsel %vm180_vm0, %v12701_v3, 0  ;;  %v20779_v42 = vld [vmem:[#allocation39_spill] sm:$0xff] }
 0x35d   :  { %3183 = vmatmul.f32.gmra.mxu0 %v14465_v13  ;;  %v2884_v15 = vpop.f32.mrf.mxu1  ;;  %v14803_v63 = vand.u32 4294901760, %v3531_v22 }
 0x35e   :  { %v2885_v47 = vadd.f32 %v2884_v15, %v2816_v11  ;;  %v2973_v8 = vpop.f32.mrf.mxu2  ;;  %v3468_v52 = vsel %vm3465_vm4, %v3466_v58, %v3467_v6  ;;  %v20777_v15 = vld [vmem:[#allocation22_spill] sm:$0xff] }
 0x35f   :  { %v14779_v33 = vadd.f32 %v3086_v41, %v2973_v8  ;;  %v3503_v23 = vsel %vm155_vm2, %v3468_v52, 0  ;;  %4072 = vmatpush.msra.mxu2 %v14803_v63 }
 0x360   :  { %v14787_v13 = vadd.f32 %v2885_v47, %v1765_v20  ;;  %3273 = vmatmul.f32.gmra.mxu1 %v14478_v0  ;;  %v14818_v40 = vand.u32 4294901760, %v3503_v23  ;;  %v1704_v20 = vadd.f32 %v20778_v51, %v20777_v15 }
 0x361   :  { %3429 = vmatmul.f32.gmra.mxu3 %v14480_v30 }
 0x362   :  { %20772 = vst [vmem:[#allocation28_spill] sm:$0xff] %v14787_v13  ;;  %v2819_v16 = vpop.f32.mrf.mxu0  ;;  %v14831_v58 = vsub.f32 %v3503_v23, %v14818_v40  ;;  %v12802_v13 = vld [vmem:[%s20360_s0 + $0x50] sm:$0xff] }
 0x363   :  { %3360 = vmatmul.f32.gmra.mxu2 %v14480_v30  ;;  %v2820_v53 = vadd.f32 %v2819_v16, %v14646_v56  ;;  %v12794_v56 = vld [vmem:[%s20360_s0 + $0x10] sm:$0xff]  ;;  %v3483_v26 = vrot.slane %v12802_v13, 3 }
 0x364   :  { %v3090_v45 = vpop.f32.mrf.mxu3  ;;  %v3469_v10 = vrot.slane %v12794_v56, 3 }
 0x365   :  { %3188 = vmatmul.f32.gmra.mxu0 %v14495_v28  ;;  %v2888_v0 = vpop.f32.mrf.mxu1  ;;  %v14815_v28 = vsub.f32 %v3531_v22, %v14803_v63  ;;  %v20781_v22 = vld [vmem:[#allocation14_spill] sm:$0xff] }
 0x366   :  { %v2889_v30 = vadd.f32 %v2888_v0, %v2820_v53  ;;  %v2981_v32 = vpop.f32.mrf.mxu2  ;;  %v3470_v41 = vsel %vm3465_vm4, %v3467_v6, %v3469_v10 }
 0x367   :  { %v14805_v61 = vadd.f32 %v3090_v45, %v2981_v32  ;;  %v20407_v11 = vand.u32 4294901760, %v14815_v28  ;;  %v3505_v52 = vsel %vm155_vm2, %v3470_v41, 0 }
 0x368   :  { %v14810_v9 = vadd.f32 %v2889_v30, %v1769_v54  ;;  %3279 = vmatmul.f32.gmra.mxu1 %v14506_v18  ;;  %v14847_v45 = vand.u32 4294901760, %v3505_v52  ;;  %v1708_v54 = vadd.f32 %v20782_v59, %v20781_v22 }
 0x369   :  { %3433 = vmatmul.f32.gmra.mxu3 %v14508_v21  ;;  %v4191_v8 = vsub.f32 %v14815_v28, %v20407_v11 }
 0x36a   :  { %20776 = vst [vmem:[#allocation42_spill] sm:$0xff] %v14810_v9  ;;  %v2823_v34 = vpop.f32.mrf.mxu0  ;;  %v14858_v56 = vsub.f32 %v3505_v52, %v14847_v45  ;;  %v20786_v52 = vld [vmem:[#allocation33_spill] sm:$0xff] }
 0x36b   :  { %3364 = vmatmul.f32.gmra.mxu2 %v14508_v21  ;;  %v2824_v18 = vadd.f32 %v2823_v34, %v14655_v14  ;;  %v1773_v21 = vadd.f32 %v20779_v42, %v1704_v20  ;;  %v4192_v62 = vand.u32 4294901760, %v4191_v8  ;;  %v12795_v14 = vld [vmem:[%s20360_s0 + $0x18] sm:$0xf]  ;;  %v20783_v34 = vld [vmem:[#allocation40_spill] sm:$0xff]  ;;  %v12797_v20 = vld [vmem:[%s20360_s0 + $0x28] sm:$0xff] }
 0x36c   :  { %v3094_v47 = vpop.f32.mrf.mxu3  ;;  %v3471_v1 = vrot.slane %v12795_v14, 3  ;;  %v1777_v41 = vadd.f32 %v20783_v34, %v1708_v54  ;;  %v20788_v54 = vld [vmem:[#allocation19_spill] sm:$0xff] }
 0x36d   :  { %3193 = vmatmul.f32.gmra.mxu0 %v14521_v7  ;;  %v2892_v17 = vpop.f32.mrf.mxu1  ;;  %4193 = vmatpush.msra.mxu3 %v4192_v62  ;;  %v14845_v7 = vand.u32 4294901760, %v14831_v58  ;;  %v12798_v34 = vld [vmem:[%s20360_s0 + $0x30] sm:$0xff] }
 0x36e   :  { %v2893_v16 = vadd.f32 %v2892_v17, %v2824_v18  ;;  %v2989_v6 = vpop.f32.mrf.mxu2  ;;  %v3472_v0 = vsel %vm3465_vm4, %v3469_v10, %v3471_v1  ;;  %v3474_v18 = vrot.slane %v12797_v20, 3  ;;  %v14877_v17 = vand.u32 4294901760, %v14858_v56  ;;  %v12699_v1 = vld [vmem:[%s20361_s1 + $0xe8] sm:$0xff] }
 0x36f   :  { %v14835_v38 = vadd.f32 %v3094_v47, %v2989_v6  ;;  %v3556_v23 = vsub.f32 %v14831_v58, %v14845_v7  ;;  %v3507_v10 = vsel %vm155_vm2, %v3472_v0, 0  ;;  %v20785_v6 = vld [vmem:[#allocation23_spill] sm:$0xff]  ;;  %v14895_v59 = vand.u32 4294901760, %v12699_v1 }
 0x370   :  { %v14840_v53 = vadd.f32 %v2893_v16, %v1773_v21  ;;  %3285 = vmatmul.f32.gmra.mxu1 %v14530_v5  ;;  %v14879_v42 = vand.u32 4294901760, %v3507_v10  ;;  %v1712_v62 = vadd.f32 %v20786_v52, %v20785_v6  ;;  %v3564_v0 = vsub.f32 %v14858_v56, %v14877_v17 }
 0x371   :  { %3437 = vmatmul.f32.gmra.mxu3 %v14532_v46  ;;  %v14874_v8 = vand.u32 4294901760, %v3556_v23  ;;  %4074 = vmatpush.msra.mxu2 %v14895_v59 }
 0x372   :  { %20780 = vst [vmem:[#allocation16_spill] sm:$0xff] %v14840_v53  ;;  %v2827_v3 = vpop.f32.mrf.mxu0  ;;  %v14893_v22 = vsub.f32 %v3507_v10, %v14879_v42  ;;  %v20806_v53 = vld [vmem:[#allocation49_spill] sm:$0xff] }
 0x373   :  { %3368 = vmatmul.f32.gmra.mxu2 %v14532_v46  ;;  %v2828_v30 = vadd.f32 %v2827_v3, %v14661_v4  ;;  %v12796_v4 = vld [vmem:[%s20360_s0 + $0x20] sm:$0xff] }
 0x374   :  { %v3098_v32 = vpop.f32.mrf.mxu3  ;;  %20787 = vst [vmem:[#allocation58_spill] sm:$0xff] %v14893_v22  ;;  %v14913_v10 = vand.u32 4294901760, %v14893_v22 }
 0x375   :  { %3198 = vmatmul.f32.gmra.mxu0 %v14542_v50  ;;  %v2896_v5 = vpop.f32.mrf.mxu1  ;;  %v3473_v50 = vrot.slane %v12796_v4, 3 }
 0x376   :  { %v2897_v46 = vadd.f32 %v2896_v5, %v2828_v30  ;;  %v2997_v15 = vpop.f32.mrf.mxu2  ;;  %v1781_v30 = vadd.f32 %v20788_v54, %v1712_v62  ;;  %20790 = vst [vmem:[#allocation51_spill] sm:$0xff] %v14913_v10 }
 0x377   :  { %v14862_v51 = vadd.f32 %v3098_v32, %v2997_v15  ;;  %v3475_v16 = vsel %vm3465_vm4, %v3473_v50, %v3474_v18  ;;  %v14910_v15 = vand.u32 4294901760, %v3564_v0 }
 0x378   :  { %v14870_v47 = vadd.f32 %v2897_v46, %v1777_v41  ;;  %3291 = vmatmul.f32.gmra.mxu1 %v14549_v2  ;;  %v3509_v5 = vsel %vm155_vm2, %v3475_v16, 0  ;;  %v3476_v41 = vrot.slane %v12798_v34, 3  ;;  %v20792_v16 = vld [vmem:[#allocation43_spill] sm:$0xff] }
 0x379   :  { %3843 = vmatmul.f32.vlgmr.msrb.gmra.mxu3 %v14845_v7  ;;  %v14915_v4 = vand.u32 4294901760, %v3509_v5  ;;  %v12799_v34 = vld [vmem:[%s20360_s0 + $0x38] sm:$0xf] }
 0x37a   :  { %20784 = vst [vmem:[#allocation45_spill] sm:$0xff] %v14870_v47  ;;  %v2831_v21 = vpop.f32.mrf.mxu0  ;;  %v3477_v20 = vsel %vm3465_vm4, %v3474_v18, %v3476_v41  ;;  %v20794_v18 = vld [vmem:[#allocation34_spill] sm:$0xff] }
 0x37b   :  { %3761 = vmatmul.f32.vlgmr.msrb.gmra.mxu2 %v14831_v58  ;;  %v2832_v14 = vadd.f32 %v2831_v21, %v14679_v31  ;;  %v20791_v21 = vld [vmem:[#allocation24_spill] sm:$0xff]  ;;  %v14931_v0 = vsub.f32 %v3509_v5, %v14915_v4 }
 0x37c   :  { %v3102_v2 = vpop.f32.mrf.mxu3  ;;  %v1716_v6 = vadd.f32 %v20792_v16, %v20791_v21 }
 0x37d   :  { %3558 = vmatmul.f32.vlgmr.msrb.gmra.mxu0 %v14874_v8  ;;  %v2900_v3 = vpop.f32.mrf.mxu1  ;;  %20793 = vst [vmem:[#allocation32_spill] sm:$0xff] %v14931_v0  ;;  %v14952_v16 = vand.u32 4294901760, %v14931_v0 }
 0x37e   :  { %v2901_v32 = vadd.f32 %v2900_v3, %v2832_v14  ;;  %v3005_v31 = vpop.f32.mrf.mxu2  ;;  %4275 = vmatpush.msrb.mxu0 %v14815_v28  ;;  %v14925_v14 = vsub.f32 %v12699_v1, %v14895_v59  ;;  %v3572_v3 = vsub.f32 %v14893_v22, %v14913_v10  ;;  %v1785_v54 = vadd.f32 %v20794_v18, %v1716_v6  ;;  %v20797_v18 = vld [vmem:[#allocation15_spill] sm:$0xff] }
 0x37f   :  { %v14900_v23 = vadd.f32 %v3102_v2, %v3005_v31  ;;  %v3511_v31 = vsel %vm155_vm2, %v3477_v20, 0  ;;  %20796 = vst [vmem:[#allocation20_spill] sm:$0xff] %v14952_v16 }
 0x380   :  { %v14906_v46 = vadd.f32 %v2901_v32, %v1781_v30  ;;  %3687 = vmatmul.f32.vlgmr.msrb.gmra.mxu1 %v14818_v40  ;;  %4278 = vmatpush.msrb.mxu0 %v14925_v14  ;;  %v14949_v20 = vand.u32 4294901760, %v3572_v3  ;;  %v14954_v6 = vand.u32 4294901760, %v3511_v31 }
 0x381   :  { %3849 = vmatmul.f32.gmra.mxu3 %v14877_v17  ;;  %4359 = vmatpush.msrb.mxu1 %v14803_v63 }
 0x382   :  { %20789 = vst [vmem:[#allocation31_spill] sm:$0xff] %v14906_v46  ;;  %v2835_v50 = vpop.f32.mrf.mxu0  ;;  %v14965_v11 = vsub.f32 %v3511_v31, %v14954_v6 }
 0x383   :  { %3766 = vmatmul.f32.gmra.mxu2 %v14858_v56  ;;  %4361 = vmatpush.msrb.mxu1 %v14895_v59  ;;  %v2836_v52 = vadd.f32 %v2835_v50, %v14688_v36  ;;  %v20406_v36 = vand.u32 4294901760, %v14925_v14  ;;  %v3478_v50 = vrot.slane %v12799_v34, 3 }
 0x384   :  { %v3106_v62 = vpop.f32.mrf.mxu3  ;;  %20799 = vst [vmem:[#allocation25_spill] sm:$0xff] %v14965_v11 }
 0x385   :  { %3566 = vmatmul.f32.gmra.mxu0 %v14910_v15  ;;  %v2904_v2 = vpop.f32.mrf.mxu1  ;;  %v4197_v5 = vsub.f32 %v14925_v14, %v20406_v36  ;;  %v3580_v36 = vsub.f32 %v14931_v0, %v14952_v16 }
 0x386   :  { %v2905_v30 = vadd.f32 %v2904_v2, %v2836_v52  ;;  %v3013_v32 = vpop.f32.mrf.mxu2  ;;  %v3479_v2 = vsel %vm3465_vm4, %v3476_v41, %v3478_v50 }
 0x387   :  { %v14937_v1 = vadd.f32 %v3106_v62, %v3013_v32  ;;  %v4198_v62 = vand.u32 4294901760, %v4197_v5  ;;  %v20800_v5 = vld [vmem:[#allocation37_spill] sm:$0xff]  ;;  %v3513_v50 = vsel %vm155_vm2, %v3479_v2, 0  ;;  %v14984_v2 = vand.u32 4294901760, %v14965_v11 }
 0x388   :  { %v14942_v21 = vadd.f32 %v2905_v30, %v1785_v54  ;;  %3691 = vmatmul.f32.gmra.mxu1 %v14847_v45  ;;  %v20798_v54 = vld [vmem:[#allocation44_spill] sm:$0xff] }
 0x389   :  { %3855 = vmatmul.f32.gmra.mxu3 %v14913_v10  ;;  %v1720_v30 = vadd.f32 %v20798_v54, %v20797_v18  ;;  %20802 = vst [vmem:[#allocation48_spill] sm:$0xff] %v14984_v2 }
 0x38a   :  { %20795 = vst [vmem:[#allocation46_spill] sm:$0xff] %v14942_v21  ;;  %v2839_v52 = vpop.f32.mrf.mxu0  ;;  %4199 = vmatpush.msra.mxu3 %v4198_v62  ;;  %v12801_v62 = vld [vmem:[%s20360_s0 + $0x48] sm:$0xff] }
 0x38b   :  { %3771 = vmatmul.f32.gmra.mxu2 %v14893_v22  ;;  %v2840_v32 = vadd.f32 %v2839_v52, %v14694_v25  ;;  %v1789_v21 = vadd.f32 %v20800_v5, %v1720_v30  ;;  %v12800_v25 = vld [vmem:[%s20360_s0 + $0x40] sm:$0xff]  ;;  %v3481_v54 = vrot.slane %v12801_v62, 3  ;;  %v14981_v30 = vand.u32 4294901760, %v3580_v36  ;;  %v20803_v5 = vld [vmem:[#allocation27_spill] sm:$0xff] }
 0x38c   :  { %v3110_v34 = vpop.f32.mrf.mxu3  ;;  %v3480_v52 = vrot.slane %v12800_v25, 3  ;;  %v12697_v36 = vld [vmem:[%s20361_s1 + $0xd8] sm:$0xff] }
 0x38d   :  { %3574 = vmatmul.f32.gmra.mxu0 %v14949_v20  ;;  %v2908_v3 = vpop.f32.mrf.mxu1  ;;  %v3484_v13 = vsel %vm3465_vm4, %v3481_v54, %v3483_v26 }
 0x38e   :  { %v2909_v46 = vadd.f32 %v2908_v3, %v2840_v32  ;;  %v3021_v41 = vpop.f32.mrf.mxu2  ;;  %v14986_v32 = vand.u32 4294901760, %v3513_v50  ;;  %v3482_v3 = vsel %vm3465_vm4, %v3480_v52, %v3481_v54  ;;  %v15002_v52 = vand.u32 4294901760, %v12697_v36 }
 0x38f   :  { %v14969_v18 = vadd.f32 %v3110_v34, %v3021_v41  ;;  %v20804_v41 = vld [vmem:[#allocation41_spill] sm:$0xff]  ;;  %v3517_v49 = vsel %vm155_vm2, %v3484_v13, 0 }
 0x390   :  { %v14977_v31 = vadd.f32 %v2909_v46, %v1789_v21  ;;  %3695 = vmatmul.f32.gmra.mxu1 %v14879_v42  ;;  %v1724_v46 = vadd.f32 %v20804_v41, %v20803_v5  ;;  %v15000_v47 = vsub.f32 %v3513_v50, %v14986_v32  ;;  %4076 = vmatpush.msra.mxu2 %v15002_v52 }
 0x391   :  { %3861 = vmatmul.f32.gmra.mxu3 %v14952_v16  ;;  %4363 = vmatpush.msrb.mxu1 %v15002_v52 }
 0x392   :  { %20801 = vst [vmem:[#allocation17_spill] sm:$0xff] %v14977_v31  ;;  %v2843_v34 = vpop.f32.mrf.mxu0  ;;  %v3588_v31 = vsub.f32 %v14965_v11, %v14984_v2  ;;  %v1793_v5 = vadd.f32 %v20806_v53, %v1724_v46 }
 0x393   :  { %3776 = vmatmul.f32.gmra.mxu2 %v14931_v0  ;;  %v2844_v21 = vadd.f32 %v2843_v34, %v14712_v37  ;;  %20805 = vst [vmem:[#allocation13_spill] sm:$0xff] %v15000_v47  ;;  %v3515_v34 = vsel %vm155_vm2, %v3482_v3, 0  ;;  %v15020_v3 = vand.u32 4294901760, %v15000_v47 }
 0x394   :  { %v3114_v25 = vpop.f32.mrf.mxu3  ;;  %v15017_v53 = vand.u32 4294901760, %v3588_v31  ;;  %v15022_v46 = vand.u32 4294901760, %v3515_v34 }
 0x395   :  { %3582 = vmatmul.f32.gmra.mxu0 %v14981_v30  ;;  %v2912_v62 = vpop.f32.mrf.mxu1  ;;  %20808 = vst [vmem:[#allocation26_spill] sm:$0xff] %v15020_v3 }
 0x396   :  { %v2913_v41 = vadd.f32 %v2912_v62, %v2844_v21  ;;  %v3029_v37 = vpop.f32.mrf.mxu2 }
 0x397   :  { %v15006_v9 = vadd.f32 %v3114_v25, %v3029_v37  ;;  %v15034_v37 = vsub.f32 %v3515_v34, %v15022_v46 }
 0x398   :  { %v15013_v50 = vadd.f32 %v2913_v41, %v1793_v5  ;;  %3699 = vmatmul.f32.gmra.mxu1 %v14915_v4  ;;  %v15028_v5 = vsub.f32 %v12697_v36, %v15002_v52  ;;  %v3596_v41 = vsub.f32 %v15000_v47, %v15020_v3 }
 0x399   :  { %3867 = vmatmul.f32.gmra.mxu3 %v14984_v2  ;;  %20809 = vst [vmem:[#allocation21_spill] sm:$0xff] %v15034_v37  ;;  %v15050_v13 = vand.u32 4294901760, %v15034_v37 }
 0x39a   :  { %20807 = vst [vmem:[#allocation35_spill] sm:$0xff] %v15013_v50  ;;  %v3144_v21 = vpop.f32.mrf.mxu0  ;;  %v20410_v54 = vand.u32 4294901760, %v15028_v5  ;;  %4281 = vmatpush.msrb.mxu0 %v15028_v5  ;;  %v20819_v22 = vand.u32 4294901760, %v15028_v5 }
 0x39b   :  { %3781 = vmatmul.f32.gmra.mxu2 %v14965_v11  ;;  %v3145_v25 = vadd.f32 %v3144_v21, %v14721_v12  ;;  %v12803_v12 = vld [vmem:[%s20360_s0 + $0x58] sm:$0xf]  ;;  %20810 = vst [vmem:[#allocation36_spill] sm:$0xff] %v15050_v13  ;;  %v3604_v16 = vsub.f32 %v15034_v37, %v15050_v13 }
 0x39c   :  { %v3394_v62 = vpop.f32.mrf.mxu3  ;;  %v3485_v36 = vrot.slane %v12803_v12, 3  ;;  %v4203_v34 = vsub.f32 %v15028_v5, %v20410_v54 }
 0x39d   :  { %3590 = vmatmul.f32.gmra.mxu0 %v15017_v53  ;;  %v3226_v31 = vpop.f32.mrf.mxu1 }
 0x39e   :  { %v3227_v50 = vadd.f32 %v3226_v31, %v3145_v25  ;;  %v3325_v35 = vpop.f32.mrf.mxu2  ;;  %v15047_v25 = vand.u32 4294901760, %v3596_v41  ;;  %v15052_v31 = vand.u32 4294901760, %v3517_v49  ;;  %v4204_v11 = vand.u32 4294901760, %v4203_v34 }
 0x3a0   :  { %v3326_v21 = vadd.f32 %v3325_v35, %v3227_v50  ;;  %3703 = vmatmul.f32.gmra.mxu1 %v14954_v6  ;;  %v3486_v35 = vsel %vm3465_vm4, %v3483_v26, %v3485_v36  ;;  %v20811_v50 = vld [vmem:[#allocation47_spill] sm:$0xff]  ;;  %4205 = vmatpush.msra.mxu3 %v4204_v11 }
 0x3a1   :  { %3873 = vmatmul.f32.gmra.mxu3 %v15020_v3  ;;  %v3519_v26 = vsel %vm155_vm2, %v3486_v35, 0 }
 0x3a2   :  { %v3395_v2 = vadd.f32 %v3394_v62, %v3326_v21  ;;  %v3149_v43 = vpop.f32.mrf.mxu0  ;;  %v15064_v62 = vsub.f32 %v3517_v49, %v15052_v31  ;;  %v15075_v49 = vand.u32 4294901760, %v3604_v16  ;;  %v15080_v35 = vand.u32 4294901760, %v3519_v26  ;;  %v12695_v16 = vld [vmem:[%s20361_s1 + $0xc8] sm:$0xff] }
 0x3a3   :  { %3786 = vmatmul.f32.gmra.mxu2 %v15000_v47  ;;  %v3150_v54 = vadd.f32 %v3149_v43, %v14733_v57  ;;  %v12805_v57 = vld [vmem:[%s20360_s0 + $0x68] sm:$0xff]  ;;  %v20816_v47 = vand.u32 4294901760, %v14815_v28 }
 0x3a4   :  { %v15057_v12 = vadd.f32 %v3395_v2, %v20811_v50  ;;  %v3398_v3 = vpop.f32.mrf.mxu3  ;;  %v12804_v2 = vld [vmem:[%s20360_s0 + $0x60] sm:$0xff]  ;;  %v3488_v11 = vrot.slane %v12805_v57, 3 }
 0x3a5   :  { %3598 = vmatmul.f32.gmra.mxu0 %v15047_v25  ;;  %v3232_v41 = vpop.f32.mrf.mxu1  ;;  %v3487_v43 = vrot.slane %v12804_v2, 3 }
 0x3a6   :  { %20812 = vst [vmem:[#allocation29_spill] sm:$0xff] %v15057_v12  ;;  %v3233_v21 = vadd.f32 %v3232_v41, %v3150_v54  ;;  %v3329_v34 = vpop.f32.mrf.mxu2  ;;  %v15078_v54 = vand.u32 4294901760, %v15064_v62  ;;  %v20814_v12 = vld [vmem:[#allocation50_spill] sm:$0xff] }
 0x3a7   :  { %v3489_v2 = vsel %vm3465_vm4, %v3487_v43, %v3488_v11  ;;  %v15097_v43 = vand.u32 4294901760, %v12695_v16 }
 0x3a8   :  { %v3330_v36 = vadd.f32 %v3329_v34, %v3233_v21  ;;  %3707 = vmatmul.f32.gmra.mxu1 %v14986_v32  ;;  %20813 = vst [vmem:[#allocation22_spill] sm:$0xff] %v15078_v54 }
 0x3a9   :  { %3879 = vmatmul.f32.gmra.mxu3 %v15050_v13  ;;  %4078 = vmatpush.msra.mxu2 %v15097_v43 }
 0x3aa   :  { %v3399_v50 = vadd.f32 %v3398_v3, %v3330_v36  ;;  %v3154_v41 = vpop.f32.mrf.mxu0  ;;  %v3612_v3 = vsub.f32 %v15064_v62, %v15078_v54  ;;  %v15095_v36 = vsub.f32 %v3519_v26, %v15080_v35  ;;  %4365 = vmatpush.msrb.mxu1 %v15097_v43  ;;  %v4207_v26 = vsub.f32 %v12695_v16, %v15097_v43 }
 0x3ab   :  { %3791 = vmatmul.f32.gmra.mxu2 %v15034_v37  ;;  %v3155_v21 = vadd.f32 %v3154_v41, %v14748_v48  ;;  %v3521_v48 = vsel %vm155_vm2, %v3489_v2, 0  ;;  %v12806_v41 = vld [vmem:[%s20360_s0 + $0x70] sm:$0xff] }
 0x3ac   :  { %v15085_v57 = vadd.f32 %v3399_v50, %v20814_v12  ;;  %v3402_v34 = vpop.f32.mrf.mxu3  ;;  %4454 = vmatpush.msrb.mxu2 %v20816_v47  ;;  %v15113_v2 = vand.u32 4294901760, %v15095_v36  ;;  %v4208_v10 = vand.u32 4294901760, %v4207_v26  ;;  %4284 = vmatpush.msrb.mxu0 %v4207_v26  ;;  %v20818_v47 = vld [vmem:[#allocation52_spill] sm:$0xff] }
 0x3ad   :  { %3606 = vmatmul.f32.gmra.mxu0 %v15075_v49  ;;  %v3238_v13 = vpop.f32.mrf.mxu1 }
 0x3ae   :  { %20815 = vst [vmem:[#allocation18_spill] sm:$0xff] %v15085_v57  ;;  %v3239_v12 = vadd.f32 %v3238_v13, %v3155_v21  ;;  %v3333_v50 = vpop.f32.mrf.mxu2  ;;  %v3490_v57 = vrot.slane %v12806_v41, 3  ;;  %v15110_v13 = vand.u32 4294901760, %v3612_v3  ;;  %v15115_v21 = vand.u32 4294901760, %v3521_v48 }
 0x3b0   :  { %v3334_v37 = vadd.f32 %v3333_v50, %v3239_v12  ;;  %3711 = vmatmul.f32.gmra.mxu1 %v15022_v46  ;;  %v20817_v12 = vand.u32 4294901760, %v14925_v14  ;;  %v3491_v28 = vsel %vm3465_vm4, %v3488_v11, %v3490_v57  ;;  %v3620_v14 = vsub.f32 %v15095_v36, %v15113_v2 }
 0x3b1   :  { %3885 = vmatmul.f32.gmra.mxu3 %v15078_v54  ;;  %v4209_v54 = vsub.f32 %v4207_v26, %v4208_v10 }
 0x3b2   :  { %v3403_v41 = vadd.f32 %v3402_v34, %v3334_v37  ;;  %v3159_v0 = vpop.f32.mrf.mxu0  ;;  %4458 = vmatpush.msrb.mxu2 %v20817_v12  ;;  %v15131_v34 = vsub.f32 %v3521_v48, %v15115_v21  ;;  %v15139_v5 = vand.u32 4294901760, %v3620_v14 }
 0x3b3   :  { %3796 = vmatmul.f32.gmra.mxu2 %v15064_v62  ;;  %v3160_v3 = vadd.f32 %v3159_v0, %v14764_v19  ;;  %v12807_v19 = vld [vmem:[%s20360_s0 + $0x78] sm:$0xf] }
 0x3b4   :  { %v15122_v16 = vadd.f32 %v3403_v41, %v20818_v47  ;;  %v3406_v50 = vpop.f32.mrf.mxu3  ;;  %4462 = vmatpush.msrb.mxu2 %v20819_v22  ;;  %v3523_v41 = vsel %vm155_vm2, %v3491_v28, 0  ;;  %v4210_v47 = vand.u32 4294901760, %v4209_v54  ;;  %v3492_v22 = vrot.slane %v12807_v19, 3 }
 0x3b5   :  { %3614 = vmatmul.f32.gmra.mxu0 %v15110_v13  ;;  %v3244_v37 = vpop.f32.mrf.mxu1  ;;  %v15142_v48 = vand.u32 4294901760, %v15131_v34  ;;  %v15144_v26 = vand.u32 4294901760, %v3523_v41 }
 0x3b6   :  { %v3245_v11 = vadd.f32 %v3244_v37, %v3160_v3  ;;  %v3337_v12 = vpop.f32.mrf.mxu2  ;;  %4466 = vmatpush.msrb.mxu2 %v4208_v10  ;;  %4211 = vmatpush.msra.mxu3 %v4210_v47  ;;  %v3493_v28 = vsel %vm3465_vm4, %v3490_v57, %v3492_v22 }
 0x3b7   :  { %v3525_v57 = vsel %vm155_vm2, %v3493_v28, 0 }
 0x3b8   :  { %v3338_v0 = vadd.f32 %v3337_v12, %v3245_v11  ;;  %3715 = vmatmul.f32.gmra.mxu1 %v15052_v31  ;;  %4529 = vmatpush.msrb.mxu3 %v14803_v63  ;;  %v15158_v63 = vsub.f32 %v3523_v41, %v15144_v26  ;;  %v15170_v41 = vand.u32 4294901760, %v3525_v57 }
 0x3b9   :  { %3891 = vmatmul.f32.gmra.mxu3 %v15113_v2 }
 0x3ba   :  { %v3407_v54 = vadd.f32 %v3406_v50, %v3338_v0  ;;  %v3164_v10 = vpop.f32.mrf.mxu0  ;;  %4531 = vmatpush.msrb.mxu3 %v14895_v59  ;;  %v3628_v50 = vsub.f32 %v15131_v34, %v15142_v48  ;;  %v15168_v59 = vand.u32 4294901760, %v15158_v63  ;;  %v15181_v28 = vsub.f32 %v3525_v57, %v15170_v41 }
 0x3bb   :  { %3801 = vmatmul.f32.gmra.mxu2 %v15095_v36  ;;  %v3165_v37 = vadd.f32 %v3164_v10, %v14779_v33 }
 0x3bc   :  { %v15150_v3 = vadd.f32 %v3407_v54, %v14510_v55  ;;  %v3410_v14 = vpop.f32.mrf.mxu3  ;;  %4533 = vmatpush.msrb.mxu3 %v15002_v52  ;;  %v15165_v33 = vand.u32 4294901760, %v3628_v50  ;;  %v3636_v10 = vsub.f32 %v15158_v63, %v15168_v59 }
 0x3bd   :  { %3622 = vmatmul.f32.gmra.mxu0 %v15139_v5  ;;  %v3250_v11 = vpop.f32.mrf.mxu1 }
 0x3be   :  { %v3251_v12 = vadd.f32 %v3250_v11, %v3165_v37  ;;  %v3341_v47 = vpop.f32.mrf.mxu2  ;;  %4535 = vmatpush.msrb.mxu3 %v15097_v43 }
 0x3c0   :  { %v3342_v55 = vadd.f32 %v3341_v47, %v3251_v12  ;;  %3719 = vmatmul.f32.gmra.mxu1 %v15080_v35  ;;  %v20820_v47 = vld [vmem:[#allocation53_spill] sm:$0xff] }
 0x3c1   :  { %3897 = vmatmul.f32.gmra.mxu3 %v15142_v48 }
 0x3c2   :  { %v3411_v19 = vadd.f32 %v3410_v14, %v3342_v55  ;;  %v3169_v22 = vpop.f32.mrf.mxu0 }
 0x3c3   :  { %3806 = vmatmul.f32.gmra.mxu2 %v15131_v34  ;;  %v3170_v0 = vadd.f32 %v3169_v22, %v14805_v61  ;;  %v15188_v61 = vand.u32 4294901760, %v15181_v28 }
 0x3c4   :  { %v15174_v52 = vadd.f32 %v3411_v19, %v14534_v60  ;;  %v3414_v54 = vpop.f32.mrf.mxu3  ;;  %v15185_v60 = vand.u32 4294901760, %v3636_v10 }
 0x3c5   :  { %3630 = vmatmul.f32.gmra.mxu0 %v15165_v33  ;;  %v3256_v43 = vpop.f32.mrf.mxu1 }
 0x3c6   :  { %v3257_v37 = vadd.f32 %v3256_v43, %v3170_v0  ;;  %v3345_v14 = vpop.f32.mrf.mxu2  ;;  %v3644_v0 = vsub.f32 %v15181_v28, %v15188_v61 }
 0x3c8   :  { %v3346_v11 = vadd.f32 %v3345_v14, %v3257_v37  ;;  %3723 = vmatmul.f32.gmra.mxu1 %v15115_v21 }
 0x3c9   :  { %3903 = vmatmul.f32.gmra.mxu3 %v15168_v59 }
 0x3ca   :  { %v3415_v50 = vadd.f32 %v3414_v54, %v3346_v11  ;;  %v3174_v12 = vpop.f32.mrf.mxu0  ;;  %v15200_v54 = vand.u32 4294901760, %v3644_v0 }
 0x3cb   :  { %3811 = vmatmul.f32.gmra.mxu2 %v15158_v63  ;;  %v3175_v57 = vadd.f32 %v3174_v12, %v14835_v38  ;;  %v20821_v38 = vld [vmem:[#allocation54_spill] sm:$0xff] }
 0x3cc   :  { %v15192_v55 = vadd.f32 %v3415_v50, %v20820_v47  ;;  %v3418_v19 = vpop.f32.mrf.mxu3 }
 0x3cd   :  { %3638 = vmatmul.f32.gmra.mxu0 %v15185_v60  ;;  %v3262_v22 = vpop.f32.mrf.mxu1 }
 0x3ce   :  { %v3263_v43 = vadd.f32 %v3262_v22, %v3175_v57  ;;  %v3349_v10 = vpop.f32.mrf.mxu2 }
 0x3d0   :  { %v3350_v37 = vadd.f32 %v3349_v10, %v3263_v43  ;;  %3727 = vmatmul.f32.gmra.mxu1 %v15144_v26 }
 0x3d1   :  { %3909 = vmatmul.f32.gmra.mxu3 %v15188_v61 }
 0x3d2   :  { %v3419_v14 = vadd.f32 %v3418_v19, %v3350_v37  ;;  %v3179_v11 = vpop.f32.mrf.mxu0 }
 0x3d3   :  { %3816 = vmatmul.f32.gmra.mxu2 %v15181_v28  ;;  %v3180_v12 = vadd.f32 %v3179_v11, %v14862_v51 }
 0x3d4   :  { %v15204_v50 = vadd.f32 %v3419_v14, %v20821_v38  ;;  %v3422_v47 = vpop.f32.mrf.mxu3 }
 0x3d5   :  { %3646 = vmatmul.f32.gmra.mxu0 %v15200_v54  ;;  %v3268_v57 = vpop.f32.mrf.mxu1 }
 0x3d6   :  { %v3269_v22 = vadd.f32 %v3268_v57, %v3180_v12  ;;  %v3353_v43 = vpop.f32.mrf.mxu2 }
 0x3d8   :  { %v3354_v10 = vadd.f32 %v3353_v43, %v3269_v22  ;;  %3731 = vmatmul.f32.gmra.mxu1 %v15170_v41 }
 0x3d9   :  { %4213 = vmatmul.f32.vlgmr.msra.gmra.mxu3 %v14818_v40 }
 0x3da   :  { %v3423_v19 = vadd.f32 %v3422_v47, %v3354_v10  ;;  %v3184_v0 = vpop.f32.mrf.mxu0 }
 0x3db   :  { %4084 = vmatmul.f32.vlgmr.msra.gmra.mxu2 %v14874_v8  ;;  %v3185_v51 = vadd.f32 %v3184_v0, %v14900_v23 }
 0x3dc   :  { %v15212_v37 = vadd.f32 %v3423_v19, %v14569_v24  ;;  %v3426_v14 = vpop.f32.mrf.mxu3 }
 0x3dd   :  { %3942 = vmatmul.f32.vlgmr.msra.gmra.mxu0 %v14818_v40  ;;  %v3274_v11 = vpop.f32.mrf.mxu1 }
 0x3de   :  { %v3275_v38 = vadd.f32 %v3274_v11, %v3185_v51  ;;  %v3357_v12 = vpop.f32.mrf.mxu2 }
 0x3e0   :  { %v3358_v57 = vadd.f32 %v3357_v12, %v3275_v38  ;;  %4011 = vmatmul.f32.vlgmr.msra.gmra.mxu1 %v14818_v40 }
 0x3e1   :  { %4217 = vmatmul.f32.gmra.mxu3 %v14847_v45 }
 0x3e2   :  { %v3427_v47 = vadd.f32 %v3426_v14, %v3358_v57  ;;  %v3189_v22 = vpop.f32.mrf.mxu0 }
 0x3e3   :  { %4092 = vmatmul.f32.gmra.mxu2 %v14910_v15  ;;  %v3190_v8 = vadd.f32 %v3189_v22, %v14937_v1 }
 0x3e4   :  { %v15220_v24 = vadd.f32 %v3427_v47, %v14576_v39  ;;  %v3430_v23 = vpop.f32.mrf.mxu3 }
 0x3e5   :  { %3946 = vmatmul.f32.gmra.mxu0 %v14847_v45  ;;  %v3280_v43 = vpop.f32.mrf.mxu1 }
 0x3e6   :  { %v3281_v10 = vadd.f32 %v3280_v43, %v3190_v8  ;;  %v3361_v19 = vpop.f32.mrf.mxu2 }
 0x3e8   :  { %v3362_v0 = vadd.f32 %v3361_v19, %v3281_v10  ;;  %4015 = vmatmul.f32.gmra.mxu1 %v14847_v45 }
 0x3e9   :  { %4221 = vmatmul.f32.gmra.mxu3 %v14879_v42 }
 0x3ea   :  { %v3431_v51 = vadd.f32 %v3430_v23, %v3362_v0  ;;  %v3194_v14 = vpop.f32.mrf.mxu0 }
 0x3eb   :  { %4100 = vmatmul.f32.gmra.mxu2 %v14949_v20  ;;  %v3195_v15 = vadd.f32 %v3194_v14, %v14969_v18 }
 0x3ec   :  { %v15228_v39 = vadd.f32 %v3431_v51, %v14583_v44  ;;  %v3434_v1 = vpop.f32.mrf.mxu3 }
 0x3ed   :  { %3950 = vmatmul.f32.gmra.mxu0 %v14879_v42  ;;  %v3286_v11 = vpop.f32.mrf.mxu1 }
 0x3ee   :  { %v3287_v38 = vadd.f32 %v3286_v11, %v3195_v15  ;;  %v3365_v12 = vpop.f32.mrf.mxu2 }
 0x3f0   :  { %v3366_v57 = vadd.f32 %v3365_v12, %v3287_v38  ;;  %4019 = vmatmul.f32.gmra.mxu1 %v14879_v42 }
 0x3f1   :  { %4225 = vmatmul.f32.gmra.mxu3 %v14915_v4 }
 0x3f2   :  { %v3435_v47 = vadd.f32 %v3434_v1, %v3366_v57  ;;  %v3199_v22 = vpop.f32.mrf.mxu0 }
 0x3f3   :  { %4108 = vmatmul.f32.gmra.mxu2 %v14981_v30  ;;  %v3200_v20 = vadd.f32 %v3199_v22, %v15006_v9 }
 0x3f4   :  { %v15236_v44 = vadd.f32 %v3435_v47, %v14590_v29  ;;  %v3438_v18 = vpop.f32.mrf.mxu3 }
 0x3f5   :  { %3954 = vmatmul.f32.gmra.mxu0 %v14915_v4  ;;  %v3292_v8 = vpop.f32.mrf.mxu1 }
 0x3f6   :  { %v3293_v23 = vadd.f32 %v3292_v8, %v3200_v20  ;;  %v3369_v43 = vpop.f32.mrf.mxu2 }
 0x3f8   :  { %v3370_v10 = vadd.f32 %v3369_v43, %v3293_v23  ;;  %4023 = vmatmul.f32.gmra.mxu1 %v14915_v4 }
 0x3f9   :  { %4229 = vmatmul.f32.gmra.mxu3 %v14954_v6 }
 0x3fa   :  { %v3439_v19 = vadd.f32 %v3438_v18, %v3370_v10  ;;  %v3559_v0 = vpop.f32.mrf.mxu0 }
 0x3fb   :  { %4116 = vmatmul.f32.gmra.mxu2 %v15017_v53 }
 0x3fc   :  { %v15244_v29 = vadd.f32 %v3439_v19, %v14597_v27  ;;  %v3844_v30 = vpop.f32.mrf.mxu3 }
 0x3fd   :  { %3958 = vmatmul.f32.gmra.mxu0 %v14954_v6  ;;  %v3688_v9 = vpop.f32.mrf.mxu1 }
 0x3fe   :  { %v3689_v51 = vadd.f32 %v3688_v9, %v3559_v0  ;;  %v3762_v14 = vpop.f32.mrf.mxu2 }
 0x400   :  { %v3763_v15 = vadd.f32 %v3762_v14, %v3689_v51  ;;  %4027 = vmatmul.f32.gmra.mxu1 %v14954_v6 }
 0x401   :  { %4233 = vmatmul.f32.gmra.mxu3 %v14986_v32 }
 0x402   :  { %v3567_v1 = vpop.f32.mrf.mxu0  ;;  %v15249_v11 = vadd.f32 %v3844_v30, %v3763_v15 }
 0x403   :  { %4124 = vmatmul.f32.gmra.mxu2 %v15047_v25 }
 0x404   :  { %v3850_v53 = vpop.f32.mrf.mxu3 }
 0x405   :  { %3962 = vmatmul.f32.gmra.mxu0 %v14986_v32  ;;  %v3692_v27 = vpop.f32.mrf.mxu1 }
 0x406   :  { %v3693_v38 = vadd.f32 %v3692_v27, %v3567_v1  ;;  %v3767_v12 = vpop.f32.mrf.mxu2 }
 0x408   :  { %v3768_v57 = vadd.f32 %v3767_v12, %v3693_v38  ;;  %4031 = vmatmul.f32.gmra.mxu1 %v14986_v32 }
 0x409   :  { %4237 = vmatmul.f32.gmra.mxu3 %v15022_v46 }
 0x40a   :  { %v3575_v47 = vpop.f32.mrf.mxu0  ;;  %v15255_v22 = vadd.f32 %v3850_v53, %v3768_v57 }
 0x40b   :  { %4132 = vmatmul.f32.gmra.mxu2 %v15075_v49 }
 0x40c   :  { %v3856_v20 = vpop.f32.mrf.mxu3 }
 0x40d   :  { %3966 = vmatmul.f32.gmra.mxu0 %v15022_v46  ;;  %v3696_v25 = vpop.f32.mrf.mxu1 }
 0x40e   :  { %v3697_v18 = vadd.f32 %v3696_v25, %v3575_v47  ;;  %v3772_v8 = vpop.f32.mrf.mxu2 }
 0x410   :  { %v3773_v23 = vadd.f32 %v3772_v8, %v3697_v18  ;;  %4035 = vmatmul.f32.gmra.mxu1 %v15022_v46 }
 0x411   :  { %4241 = vmatmul.f32.gmra.mxu3 %v15052_v31 }
 0x412   :  { %v3583_v43 = vpop.f32.mrf.mxu0  ;;  %v15261_v10 = vadd.f32 %v3856_v20, %v3773_v23 }
 0x413   :  { %4140 = vmatmul.f32.gmra.mxu2 %v15110_v13 }
 0x414   :  { %v3862_v19 = vpop.f32.mrf.mxu3 }
 0x415   :  { %3970 = vmatmul.f32.gmra.mxu0 %v15052_v31  ;;  %v3700_v49 = vpop.f32.mrf.mxu1 }
 0x416   :  { %v3701_v0 = vadd.f32 %v3700_v49, %v3583_v43  ;;  %v3777_v30 = vpop.f32.mrf.mxu2 }
 0x418   :  { %v3778_v9 = vadd.f32 %v3777_v30, %v3701_v0  ;;  %4039 = vmatmul.f32.gmra.mxu1 %v15052_v31 }
 0x419   :  { %4245 = vmatmul.f32.gmra.mxu3 %v15080_v35 }
 0x41a   :  { %v3591_v51 = vpop.f32.mrf.mxu0  ;;  %v15267_v14 = vadd.f32 %v3862_v19, %v3778_v9 }
 0x41b   :  { %4148 = vmatmul.f32.gmra.mxu2 %v15139_v5  ;;  %v12708_v5 = vld [vmem:[%s20361_s1 + $0x130] sm:$0xf] }
 0x41c   :  { %v3868_v15 = vpop.f32.mrf.mxu3  ;;  %v4671_v20 = vsel %vm180_vm0, %v12708_v5, 0 }
 0x41d   :  { %3974 = vmatmul.f32.gmra.mxu0 %v15080_v35  ;;  %v3704_v13 = vpop.f32.mrf.mxu1  ;;  %v15281_v8 = vand.u32 4294901760, %v4671_v20 }
 0x41e   :  { %v3705_v1 = vadd.f32 %v3704_v13, %v3591_v51  ;;  %v3782_v53 = vpop.f32.mrf.mxu2 }
 0x41f   :  { %v15285_v43 = vsub.f32 %v4671_v20, %v15281_v8  ;;  %4689 = vmatpush.msra.mxu0 %v15281_v8  ;;  %4976 = vmatpush.msra.mxu3 %v15281_v8 }
 0x420   :  { %v3783_v27 = vadd.f32 %v3782_v53, %v3705_v1  ;;  %4043 = vmatmul.f32.gmra.mxu1 %v15080_v35 }
 0x421   :  { %4249 = vmatmul.f32.gmra.mxu3 %v15115_v21  ;;  %4892 = vmatpush.msra.mxu2 %v15285_v43  ;;  %v4807_v19 = vand.u32 4294901760, %v15285_v43 }
 0x422   :  { %v3599_v38 = vpop.f32.mrf.mxu0  ;;  %v15273_v12 = vadd.f32 %v3868_v15, %v3783_v27 }
 0x423   :  { %4156 = vmatmul.f32.gmra.mxu2 %v15165_v33  ;;  %v4808_v30 = vsub.f32 %v15285_v43, %v4807_v19 }
 0x424   :  { %v3874_v57 = vpop.f32.mrf.mxu3 }
 0x425   :  { %3978 = vmatmul.f32.gmra.mxu0 %v15115_v21  ;;  %v3708_v47 = vpop.f32.mrf.mxu1  ;;  %v4809_v13 = vand.u32 4294901760, %v4808_v30 }
 0x426   :  { %v3709_v25 = vadd.f32 %v3708_v47, %v3599_v38  ;;  %v3787_v18 = vpop.f32.mrf.mxu2 }
 0x427   :  { %4810 = vmatpush.msra.mxu1 %v4809_v13 }
 0x428   :  { %v3788_v23 = vadd.f32 %v3787_v18, %v3709_v25  ;;  %4047 = vmatmul.f32.gmra.mxu1 %v15115_v21 }
 0x429   :  { %4253 = vmatmul.f32.gmra.mxu3 %v15144_v26 }
 0x42a   :  { %v3607_v33 = vpop.f32.mrf.mxu0  ;;  %v15292_v49 = vadd.f32 %v3874_v57, %v3788_v23 }
 0x42b   :  { %4164 = vmatmul.f32.gmra.mxu2 %v15185_v60 }
 0x42c   :  { %v3880_v0 = vpop.f32.mrf.mxu3 }
 0x42d   :  { %3982 = vmatmul.f32.gmra.mxu0 %v15144_v26  ;;  %v3712_v9 = vpop.f32.mrf.mxu1 }
 0x42e   :  { %v3713_v51 = vadd.f32 %v3712_v9, %v3607_v33  ;;  %v3792_v15 = vpop.f32.mrf.mxu2 }
 0x430   :  { %v3793_v1 = vadd.f32 %v3792_v15, %v3713_v51  ;;  %4051 = vmatmul.f32.gmra.mxu1 %v15144_v26 }
 0x431   :  { %4257 = vmatmul.f32.gmra.mxu3 %v15170_v41 }
 0x432   :  { %v3615_v53 = vpop.f32.mrf.mxu0  ;;  %v15301_v27 = vadd.f32 %v3880_v0, %v3793_v1 }
 0x433   :  { %4172 = vmatmul.f32.gmra.mxu2 %v15200_v54  ;;  %v12706_v54 = vld [vmem:[%s20361_s1 + $0x120] sm:$0xff] }
 0x434   :  { %v3886_v60 = vpop.f32.mrf.mxu3  ;;  %v15314_v33 = vand.u32 4294901760, %v12706_v54 }
 0x435   :  { %3986 = vmatmul.f32.gmra.mxu0 %v15170_v41  ;;  %v3716_v38 = vpop.f32.mrf.mxu1 }
 0x436   :  { %v3717_v57 = vadd.f32 %v3716_v38, %v3615_v53  ;;  %v3797_v5 = vpop.f32.mrf.mxu2  ;;  %v15317_v9 = vsub.f32 %v12706_v54, %v15314_v33  ;;  %4691 = vmatpush.msra.mxu0 %v15314_v33  ;;  %4978 = vmatpush.msra.mxu3 %v15314_v33 }
 0x438   :  { %v3798_v47 = vadd.f32 %v3797_v5, %v3717_v57  ;;  %4055 = vmatmul.f32.gmra.mxu1 %v15170_v41  ;;  %4895 = vmatpush.msra.mxu2 %v15317_v9 }
 0x439   :  { %4537 = vmatmul.f32.vlgmr.msrb.gmra.mxu3 %v14818_v40 }
 0x43a   :  { %v3623_v20 = vpop.f32.mrf.mxu0  ;;  %v15307_v25 = vadd.f32 %v3886_v60, %v3798_v47 }
 0x43b   :  { %4468 = vmatmul.f32.vlgmr.msrb.gmra.mxu2 %v14818_v40 }
 0x43c   :  { %v3892_v18 = vpop.f32.mrf.mxu3 }
 0x43d   :  { %4287 = vmatmul.f32.vlgmr.msrb.gmra.mxu0 %v14831_v58  ;;  %v3720_v23 = vpop.f32.mrf.mxu1  ;;  %v4813_v58 = vand.u32 4294901760, %v15317_v9 }
 0x43e   :  { %v3721_v0 = vadd.f32 %v3720_v23, %v3623_v20  ;;  %v3802_v30 = vpop.f32.mrf.mxu2  ;;  %v20822_v20 = vld [vmem:[#allocation58_spill] sm:$0xff] }
 0x43f   :  { %v4814_v13 = vsub.f32 %v15317_v9, %v4813_v58 }
 0x440   :  { %v3803_v40 = vadd.f32 %v3802_v30, %v3721_v0  ;;  %4369 = vmatmul.f32.vlgmr.msrb.gmra.mxu1 %v14845_v7  ;;  %v20823_v0 = vld [vmem:[#allocation51_spill] sm:$0xff] }
 0x441   :  { %4541 = vmatmul.f32.gmra.mxu3 %v14847_v45  ;;  %v4815_v7 = vand.u32 4294901760, %v4814_v13 }
 0x442   :  { %v3631_v51 = vpop.f32.mrf.mxu0  ;;  %v15325_v15 = vadd.f32 %v3892_v18, %v3803_v40 }
 0x443   :  { %4472 = vmatmul.f32.gmra.mxu2 %v14847_v45  ;;  %4816 = vmatpush.msra.mxu1 %v4815_v7 }
 0x444   :  { %v3898_v1 = vpop.f32.mrf.mxu3 }
 0x445   :  { %4292 = vmatmul.f32.gmra.mxu0 %v14858_v56  ;;  %v3724_v53 = vpop.f32.mrf.mxu1 }
 0x446   :  { %v3725_v60 = vadd.f32 %v3724_v53, %v3631_v51  ;;  %v3807_v38 = vpop.f32.mrf.mxu2  ;;  %v20824_v51 = vld [vmem:[#allocation32_spill] sm:$0xff] }
 0x448   :  { %v3808_v57 = vadd.f32 %v3807_v38, %v3725_v60  ;;  %4375 = vmatmul.f32.gmra.mxu1 %v14877_v17 }
 0x449   :  { %4545 = vmatmul.f32.gmra.mxu3 %v14879_v42 }
 0x44a   :  { %v3639_v5 = vpop.f32.mrf.mxu0  ;;  %v15334_v47 = vadd.f32 %v3898_v1, %v3808_v57 }
 0x44b   :  { %4476 = vmatmul.f32.gmra.mxu2 %v14879_v42  ;;  %v12704_v42 = vld [vmem:[%s20361_s1 + $0x110] sm:$0xff] }
 0x44c   :  { %v3904_v45 = vpop.f32.mrf.mxu3  ;;  %v15347_v1 = vand.u32 4294901760, %v12704_v42 }
 0x44d   :  { %4297 = vmatmul.f32.gmra.mxu0 %v20822_v20  ;;  %v3728_v18 = vpop.f32.mrf.mxu1 }
 0x44e   :  { %v3729_v56 = vadd.f32 %v3728_v18, %v3639_v5  ;;  %v3812_v54 = vpop.f32.mrf.mxu2  ;;  %v4818_v60 = vsub.f32 %v12704_v42, %v15347_v1  ;;  %4693 = vmatpush.msra.mxu0 %v15347_v1  ;;  %4980 = vmatpush.msra.mxu3 %v15347_v1 }
 0x450   :  { %v3813_v23 = vadd.f32 %v3812_v54, %v3729_v56  ;;  %4381 = vmatmul.f32.gmra.mxu1 %v20823_v0  ;;  %4898 = vmatpush.msra.mxu2 %v4818_v60  ;;  %v4819_v57 = vand.u32 4294901760, %v4818_v60  ;;  %v20826_v54 = vld [vmem:[#allocation25_spill] sm:$0xff] }
 0x451   :  { %4549 = vmatmul.f32.gmra.mxu3 %v14915_v4 }
 0x452   :  { %v3647_v30 = vpop.f32.mrf.mxu0  ;;  %v15340_v17 = vadd.f32 %v3904_v45, %v3813_v23  ;;  %v4820_v20 = vsub.f32 %v4818_v60, %v4819_v57  ;;  %v20830_v60 = vld [vmem:[#allocation13_spill] sm:$0xff] }
 0x453   :  { %4480 = vmatmul.f32.gmra.mxu2 %v14915_v4  ;;  %v20825_v4 = vld [vmem:[#allocation20_spill] sm:$0xff] }
 0x454   :  { %v3910_v40 = vpop.f32.mrf.mxu3  ;;  %v4821_v0 = vand.u32 4294901760, %v4820_v20 }
 0x455   :  { %4302 = vmatmul.f32.gmra.mxu0 %v20824_v51  ;;  %v3732_v13 = vpop.f32.mrf.mxu1 }
 0x456   :  { %v3733_v53 = vadd.f32 %v3732_v13, %v3647_v30  ;;  %v3817_v7 = vpop.f32.mrf.mxu2  ;;  %4822 = vmatpush.msra.mxu1 %v4821_v0  ;;  %v20827_v13 = vld [vmem:[#allocation55_spill] sm:$0xff]  ;;  %v12702_v0 = vld [vmem:[%s20361_s1 + $0x100] sm:$0xff] }
 0x458   :  { %v3818_v38 = vadd.f32 %v3817_v7, %v3733_v53  ;;  %4387 = vmatmul.f32.gmra.mxu1 %v20825_v4 }
 0x459   :  { %4553 = vmatmul.f32.gmra.mxu3 %v14954_v6 }
 0x45a   :  { %v3943_v5 = vpop.f32.mrf.mxu0  ;;  %v15354_v45 = vadd.f32 %v3910_v40, %v3818_v38  ;;  %v20829_v40 = vld [vmem:[#allocation48_spill] sm:$0xff] }
 0x45b   :  { %4484 = vmatmul.f32.gmra.mxu2 %v14954_v6  ;;  %v3944_v18 = vadd.f32 %v3943_v5, %v15249_v11 }
 0x45c   :  { %v4214_v56 = vpop.f32.mrf.mxu3 }
 0x45d   :  { %4307 = vmatmul.f32.gmra.mxu0 %v20826_v54  ;;  %v4012_v23 = vpop.f32.mrf.mxu1  ;;  %v20833_v54 = vld [vmem:[#allocation26_spill] sm:$0xff] }
 0x45e   :  { %v4013_v30 = vadd.f32 %v4012_v23, %v3944_v18  ;;  %v4085_v42 = vpop.f32.mrf.mxu2  ;;  %v20831_v18 = vld [vmem:[#allocation56_spill] sm:$0xff] }
 0x45f   :  { %v15359_v51 = vadd.f32 %v4214_v56, %v4085_v42 }
 0x460   :  { %v15362_v53 = vadd.f32 %v4013_v30, %v20827_v13  ;;  %4393 = vmatmul.f32.gmra.mxu1 %v20829_v40  ;;  %v20834_v30 = vld [vmem:[#allocation21_spill] sm:$0xff]  ;;  %v4694_v13 = vand.u32 4294901760, %v12702_v0 }
 0x461   :  { %4557 = vmatmul.f32.gmra.mxu3 %v14986_v32 }
 0x462   :  { %20828 = vst [vmem:[#allocation39_spill] sm:$0xff] %v15362_v53  ;;  %v3947_v6 = vpop.f32.mrf.mxu0  ;;  %4695 = vmatpush.msra.mxu0 %v4694_v13  ;;  %4982 = vmatpush.msra.mxu3 %v4694_v13 }
 0x463   :  { %4488 = vmatmul.f32.gmra.mxu2 %v14986_v32  ;;  %v3948_v11 = vadd.f32 %v3947_v6, %v15255_v22 }
 0x464   :  { %v4218_v7 = vpop.f32.mrf.mxu3  ;;  %5071 = vmatpush.msrb.mxu0 %v4807_v19 }
 0x465   :  { %4312 = vmatmul.f32.gmra.mxu0 %v20830_v60  ;;  %v4016_v38 = vpop.f32.mrf.mxu1  ;;  %v20835_v60 = vld [vmem:[#allocation38_spill] sm:$0xff] }
 0x466   :  { %v4017_v4 = vadd.f32 %v4016_v38, %v3948_v11  ;;  %v4093_v5 = vpop.f32.mrf.mxu2  ;;  %5075 = vmatpush.msrb.mxu0 %v4813_v58  ;;  %v20840_v58 = vld [vmem:[#allocation22_spill] sm:$0xff] }
 0x467   :  { %v15369_v20 = vadd.f32 %v4218_v7, %v4093_v5  ;;  %v4824_v7 = vsub.f32 %v12702_v0, %v4694_v13  ;;  %v20838_v0 = vld [vmem:[#allocation57_spill] sm:$0xff] }
 0x468   :  { %v15372_v56 = vadd.f32 %v4017_v4, %v20831_v18  ;;  %4399 = vmatmul.f32.gmra.mxu1 %v20833_v54  ;;  %5079 = vmatpush.msrb.mxu0 %v4819_v57 }
 0x469   :  { %4561 = vmatmul.f32.gmra.mxu3 %v15022_v46  ;;  %4901 = vmatpush.msra.mxu2 %v4824_v7  ;;  %v4825_v38 = vand.u32 4294901760, %v4824_v7 }
 0x46a   :  { %20832 = vst [vmem:[#allocation14_spill] sm:$0xff] %v15372_v56  ;;  %v3951_v23 = vpop.f32.mrf.mxu0 }
 0x46b   :  { %4492 = vmatmul.f32.gmra.mxu2 %v15022_v46  ;;  %v3952_v32 = vadd.f32 %v3951_v23, %v15261_v10  ;;  %v20837_v10 = vld [vmem:[#allocation36_spill] sm:$0xff]  ;;  %v4826_v5 = vsub.f32 %v4824_v7, %v4825_v38  ;;  %5083 = vmatpush.msrb.mxu0 %v4825_v38  ;;  %v12709_v38 = vld [vmem:[%s20361_s1 + $0x138] sm:$0xf] }
 0x46c   :  { %v4222_v22 = vpop.f32.mrf.mxu3 }
 0x46d   :  { %4317 = vmatmul.f32.gmra.mxu0 %v20834_v30  ;;  %v4020_v42 = vpop.f32.mrf.mxu1  ;;  %v4827_v43 = vand.u32 4294901760, %v4826_v5 }
 0x46e   :  { %v4021_v40 = vadd.f32 %v4020_v42, %v3952_v32  ;;  %v4101_v6 = vpop.f32.mrf.mxu2 }
 0x46f   :  { %v15382_v11 = vadd.f32 %v4222_v22, %v4101_v6  ;;  %4828 = vmatpush.msra.mxu1 %v4827_v43  ;;  %v20843_v43 = vld [vmem:[#allocation42_spill] sm:$0xff] }
 0x470   :  { %v15385_v46 = vadd.f32 %v4021_v40, %v20835_v60  ;;  %4405 = vmatmul.f32.gmra.mxu1 %v20837_v10 }
 0x471   :  { %4565 = vmatmul.f32.gmra.mxu3 %v15052_v31  ;;  %5146 = vmatpush.msrb.mxu1 %v15281_v8  ;;  %v12808_v8 = vld [vmem:[%s20360_s0] sm:$0xff] }
 0x472   :  { %20836 = vst [vmem:[#allocation30_spill] sm:$0xff] %v15385_v46  ;;  %v3955_v4 = vpop.f32.mrf.mxu0  ;;  %v4609_v6 = vrot.slane %v12808_v8, 4  ;;  %v20864_v46 = vld [vmem:[#allocation35_spill] sm:$0xff] }
 0x473   :  { %4496 = vmatmul.f32.gmra.mxu2 %v15052_v31  ;;  %v3956_v18 = vadd.f32 %v3955_v4, %v15267_v14  ;;  %5148 = vmatpush.msrb.mxu1 %v15314_v33  ;;  %v20841_v33 = vld [vmem:[#allocation28_spill] sm:$0xff]  ;;  %v4674_v4 = vsel %vm180_vm0, %v12709_v38, 0 }
 0x474   :  { %v4226_v54 = vpop.f32.mrf.mxu3 }
 0x475   :  { %4322 = vmatmul.f32.gmra.mxu0 %v15064_v62  ;;  %v4024_v23 = vpop.f32.mrf.mxu1  ;;  %5150 = vmatpush.msrb.mxu1 %v15347_v1 }
 0x476   :  { %v4025_v19 = vadd.f32 %v4024_v23, %v3956_v18  ;;  %v4109_v32 = vpop.f32.mrf.mxu2 }
 0x477   :  { %v15396_v22 = vadd.f32 %v4226_v54, %v4109_v32  ;;  %5152 = vmatpush.msrb.mxu1 %v4694_v13  ;;  %v15431_v54 = vand.u32 4294901760, %v4674_v4 }
 0x478   :  { %v15399_v9 = vadd.f32 %v4025_v19, %v20838_v0  ;;  %4411 = vmatmul.f32.gmra.mxu1 %v20840_v58 }
 0x479   :  { %4569 = vmatmul.f32.gmra.mxu3 %v15080_v35  ;;  %5215 = vmatpush.msrb.mxu2 %v15431_v54 }
 0x47a   :  { %20839 = vst [vmem:[#allocation40_spill] sm:$0xff] %v15399_v9  ;;  %v3959_v31 = vpop.f32.mrf.mxu0 }
 0x47b   :  { %4500 = vmatmul.f32.gmra.mxu2 %v15080_v35  ;;  %v3960_v62 = vadd.f32 %v3959_v31, %v15273_v12  ;;  %v12809_v35 = vld [vmem:[%s20360_s0 + $0x8] sm:$0xff] }
 0x47c   :  { %v4230_v14 = vpop.f32.mrf.mxu3  ;;  %v4610_v12 = vrot.slane %v12809_v35, 4 }
 0x47d   :  { %4327 = vmatmul.f32.gmra.mxu0 %v15095_v36  ;;  %v4028_v57 = vpop.f32.mrf.mxu1 }
 0x47e   :  { %v4029_v30 = vadd.f32 %v4028_v57, %v3960_v62  ;;  %v4117_v42 = vpop.f32.mrf.mxu2  ;;  %v4611_v7 = vsel %vm180_vm0, %v4609_v6, %v4610_v12 }
 0x47f   :  { %v15409_v40 = vadd.f32 %v4230_v14, %v4117_v42  ;;  %v4646_v18 = vsel %vm155_vm2, %v4611_v7, 0 }
 0x480   :  { %v15418_v36 = vadd.f32 %v4029_v30, %v20841_v33  ;;  %4417 = vmatmul.f32.gmra.mxu1 %v15113_v2  ;;  %v15447_v32 = vand.u32 4294901760, %v4646_v18  ;;  %v20845_v33 = vld [vmem:[#allocation16_spill] sm:$0xff] }
 0x481   :  { %4573 = vmatmul.f32.gmra.mxu3 %v15115_v21 }
 0x482   :  { %20842 = vst [vmem:[#allocation23_spill] sm:$0xff] %v15418_v36  ;;  %v3963_v1 = vpop.f32.mrf.mxu0  ;;  %v15458_v30 = vsub.f32 %v4646_v18, %v15447_v32  ;;  %v12818_v36 = vld [vmem:[%s20360_s0 + $0x50] sm:$0xff] }
 0x483   :  { %4504 = vmatmul.f32.gmra.mxu2 %v15115_v21  ;;  %v3964_v60 = vadd.f32 %v3963_v1, %v15292_v49  ;;  %v12810_v49 = vld [vmem:[%s20360_s0 + $0x10] sm:$0xff]  ;;  %v4626_v9 = vrot.slane %v12818_v36, 4 }
 0x484   :  { %v4234_v10 = vpop.f32.mrf.mxu3  ;;  %v4612_v23 = vrot.slane %v12810_v49, 4 }
 0x485   :  { %4332 = vmatmul.f32.gmra.mxu0 %v15131_v34  ;;  %v4032_v13 = vpop.f32.mrf.mxu1  ;;  %v15444_v34 = vsub.f32 %v4674_v4, %v15431_v54 }
 0x486   :  { %v4033_v2 = vadd.f32 %v4032_v13, %v3964_v60  ;;  %v4125_v5 = vpop.f32.mrf.mxu2  ;;  %v4613_v31 = vsel %vm180_vm0, %v4610_v12, %v4612_v23 }
 0x487   :  { %v15433_v21 = vadd.f32 %v4234_v10, %v4125_v5  ;;  %v20421_v58 = vand.u32 4294901760, %v15444_v34  ;;  %v4648_v6 = vsel %vm155_vm2, %v4613_v31, 0 }
 0x488   :  { %v15439_v19 = vadd.f32 %v4033_v2, %v20843_v43  ;;  %4423 = vmatmul.f32.gmra.mxu1 %v15142_v48  ;;  %v15474_v7 = vand.u32 4294901760, %v4648_v6 }
 0x489   :  { %4577 = vmatmul.f32.gmra.mxu3 %v15144_v26  ;;  %v5334_v48 = vsub.f32 %v15444_v34, %v20421_v58 }
 0x48a   :  { %20844 = vst [vmem:[#allocation33_spill] sm:$0xff] %v15439_v19  ;;  %v3967_v0 = vpop.f32.mrf.mxu0  ;;  %v15483_v2 = vsub.f32 %v4648_v6, %v15474_v7 }
 0x48b   :  { %4508 = vmatmul.f32.gmra.mxu2 %v15144_v26  ;;  %v3968_v62 = vadd.f32 %v3967_v0, %v15301_v27  ;;  %v5335_v26 = vand.u32 4294901760, %v5334_v48  ;;  %v12811_v27 = vld [vmem:[%s20360_s0 + $0x18] sm:$0xf]  ;;  %v20848_v0 = vld [vmem:[#allocation45_spill] sm:$0xff] }
 0x48c   :  { %v4238_v14 = vpop.f32.mrf.mxu3  ;;  %v4614_v12 = vrot.slane %v12811_v27, 4  ;;  %20847 = vst [vmem:[#allocation24_spill] sm:$0xff] %v15483_v2 }
 0x48d   :  { %4337 = vmatmul.f32.gmra.mxu0 %v15158_v63  ;;  %v4036_v57 = vpop.f32.mrf.mxu1  ;;  %5336 = vmatpush.msrb.mxu3 %v5335_v26  ;;  %v15472_v63 = vand.u32 4294901760, %v15458_v30 }
 0x48e   :  { %v4037_v42 = vadd.f32 %v4036_v57, %v3968_v62  ;;  %v4133_v8 = vpop.f32.mrf.mxu2  ;;  %v4615_v10 = vsel %vm180_vm0, %v4612_v23, %v4614_v12 }
 0x48f   :  { %v15461_v35 = vadd.f32 %v4238_v14, %v4133_v8  ;;  %v4650_v49 = vsel %vm155_vm2, %v4615_v10, 0  ;;  %v15502_v14 = vand.u32 4294901760, %v15483_v2 }
 0x490   :  { %v15467_v1 = vadd.f32 %v4037_v42, %v20845_v33  ;;  %4429 = vmatmul.f32.gmra.mxu1 %v15168_v59  ;;  %v4699_v59 = vsub.f32 %v15458_v30, %v15472_v63  ;;  %v15504_v48 = vand.u32 4294901760, %v4650_v49 }
 0x491   :  { %4581 = vmatmul.f32.gmra.mxu3 %v15170_v41  ;;  %20850 = vst [vmem:[#allocation34_spill] sm:$0xff] %v15502_v14  ;;  %v4707_v27 = vsub.f32 %v15483_v2, %v15502_v14 }
 0x492   :  { %20846 = vst [vmem:[#allocation19_spill] sm:$0xff] %v15467_v1  ;;  %v3971_v60 = vpop.f32.mrf.mxu0  ;;  %v15499_v62 = vand.u32 4294901760, %v4699_v59  ;;  %v15516_v12 = vsub.f32 %v4650_v49, %v15504_v48  ;;  %v20852_v59 = vld [vmem:[#allocation31_spill] sm:$0xff] }
 0x493   :  { %4512 = vmatmul.f32.gmra.mxu2 %v15170_v41  ;;  %v3972_v38 = vadd.f32 %v3971_v60, %v15307_v25  ;;  %v12812_v41 = vld [vmem:[%s20360_s0 + $0x20] sm:$0xff] }
 0x494   :  { %v4242_v13 = vpop.f32.mrf.mxu3  ;;  %v4616_v25 = vrot.slane %v12812_v41, 4  ;;  %20851 = vst [vmem:[#allocation15_spill] sm:$0xff] %v15516_v12  ;;  %v15536_v49 = vand.u32 4294901760, %v15516_v12 }
 0x495   :  { %4342 = vmatmul.f32.gmra.mxu0 %v15181_v28  ;;  %v4040_v4 = vpop.f32.mrf.mxu1  ;;  %v12813_v28 = vld [vmem:[%s20360_s0 + $0x28] sm:$0xff] }
 0x496   :  { %v4041_v5 = vadd.f32 %v4040_v4, %v3972_v38  ;;  %v4141_v18 = vpop.f32.mrf.mxu2  ;;  %v4617_v23 = vrot.slane %v12813_v28, 4  ;;  %20854 = vst [vmem:[#allocation37_spill] sm:$0xff] %v15536_v49 }
 0x497   :  { %v15486_v43 = vadd.f32 %v4242_v13, %v4141_v18  ;;  %v12814_v13 = vld [vmem:[%s20360_s0 + $0x30] sm:$0xff]  ;;  %v15533_v18 = vand.u32 4294901760, %v4707_v27 }
 0x498   :  { %v15495_v31 = vadd.f32 %v4041_v5, %v20848_v0  ;;  %4435 = vmatmul.f32.gmra.mxu1 %v15188_v61  ;;  %v4618_v42 = vsel %vm180_vm0, %v4616_v25, %v4617_v23  ;;  %v12707_v61 = vld [vmem:[%s20361_s1 + $0x128] sm:$0xff]  ;;  %v4619_v4 = vrot.slane %v12814_v13, 4 }
 0x499   :  { %4986 = vmatmul.f32.vlgmr.msra.gmra.mxu3 %v15472_v63  ;;  %v15518_v33 = vand.u32 4294901760, %v12707_v61 }
 0x49a   :  { %20849 = vst [vmem:[#allocation43_spill] sm:$0xff] %v15495_v31  ;;  %v3975_v57 = vpop.f32.mrf.mxu0  ;;  %v4620_v28 = vsel %vm180_vm0, %v4617_v23, %v4619_v4 }
 0x49b   :  { %4904 = vmatmul.f32.vlgmr.msra.gmra.mxu2 %v15458_v30  ;;  %v3976_v8 = vadd.f32 %v3975_v57, %v15325_v15  ;;  %v4652_v15 = vsel %vm155_vm2, %v4618_v42, 0  ;;  %v15546_v42 = vsub.f32 %v12707_v61, %v15518_v33  ;;  %v4654_v23 = vsel %vm155_vm2, %v4620_v28, 0  ;;  %v12815_v61 = vld [vmem:[%s20360_s0 + $0x38] sm:$0xf] }
 0x49c   :  { %v4246_v6 = vpop.f32.mrf.mxu3  ;;  %5217 = vmatpush.msrb.mxu2 %v15518_v33  ;;  %v15538_v41 = vand.u32 4294901760, %v4652_v15  ;;  %v4621_v13 = vrot.slane %v12815_v61, 4 }
 0x49d   :  { %4701 = vmatmul.f32.vlgmr.msra.gmra.mxu0 %v15499_v62  ;;  %v4044_v26 = vpop.f32.mrf.mxu1 }
 0x49e   :  { %v4045_v60 = vadd.f32 %v4044_v26, %v3976_v8  ;;  %v4149_v10 = vpop.f32.mrf.mxu2  ;;  %5418 = vmatpush.msra.mxu0 %v15444_v34  ;;  %v15552_v26 = vsub.f32 %v4652_v15, %v15538_v41 }
 0x49f   :  { %v15522_v38 = vadd.f32 %v4246_v6, %v4149_v10  ;;  %v4715_v6 = vsub.f32 %v15516_v12, %v15536_v49  ;;  %v20420_v10 = vand.u32 4294901760, %v15546_v42 }
 0x4a0   :  { %v15529_v5 = vadd.f32 %v4045_v60, %v20852_v59  ;;  %4830 = vmatmul.f32.vlgmr.msra.gmra.mxu1 %v15447_v32  ;;  %20855 = vst [vmem:[#allocation27_spill] sm:$0xff] %v15552_v26  ;;  %5421 = vmatpush.msra.mxu0 %v15546_v42  ;;  %v20856_v59 = vld [vmem:[#allocation46_spill] sm:$0xff] }
 0x4a1   :  { %4992 = vmatmul.f32.gmra.mxu3 %v15502_v14  ;;  %5502 = vmatpush.msra.mxu1 %v15431_v54  ;;  %v5340_v15 = vsub.f32 %v15546_v42, %v20420_v10  ;;  %v15570_v28 = vand.u32 4294901760, %v4715_v6 }
 0x4a2   :  { %20853 = vst [vmem:[#allocation44_spill] sm:$0xff] %v15529_v5  ;;  %v3979_v25 = vpop.f32.mrf.mxu0 }
 0x4a3   :  { %4909 = vmatmul.f32.gmra.mxu2 %v15483_v2  ;;  %5504 = vmatpush.msra.mxu1 %v15518_v33  ;;  %v3980_v0 = vadd.f32 %v3979_v25, %v15334_v47 }
 0x4a4   :  { %v4250_v57 = vpop.f32.mrf.mxu3 }
 0x4a5   :  { %4709 = vmatmul.f32.gmra.mxu0 %v15533_v18  ;;  %v4048_v8 = vpop.f32.mrf.mxu1 }
 0x4a6   :  { %v4049_v27 = vadd.f32 %v4048_v8, %v3980_v0  ;;  %v4157_v60 = vpop.f32.mrf.mxu2  ;;  %v15573_v0 = vand.u32 4294901760, %v15552_v26 }
 0x4a7   :  { %v15557_v47 = vadd.f32 %v4250_v57, %v4157_v60  ;;  %v15575_v57 = vand.u32 4294901760, %v4654_v23  ;;  %v5341_v60 = vand.u32 4294901760, %v5340_v15 }
 0x4a8   :  { %v15563_v25 = vadd.f32 %v4049_v27, %v20856_v59  ;;  %4834 = vmatmul.f32.gmra.mxu1 %v15474_v7  ;;  %20858 = vst [vmem:[#allocation49_spill] sm:$0xff] %v15573_v0  ;;  %v4622_v27 = vsel %vm180_vm0, %v4619_v4, %v4621_v13  ;;  %v4723_v6 = vsub.f32 %v15552_v26, %v15573_v0  ;;  %v12817_v13 = vld [vmem:[%s20360_s0 + $0x48] sm:$0xff] }
 0x4a9   :  { %4998 = vmatmul.f32.gmra.mxu3 %v15536_v49  ;;  %v15584_v58 = vsub.f32 %v4654_v23, %v15575_v57  ;;  %v4656_v15 = vsel %vm155_vm2, %v4622_v27, 0 }
 0x4aa   :  { %20857 = vst [vmem:[#allocation41_spill] sm:$0xff] %v15563_v25  ;;  %v3983_v8 = vpop.f32.mrf.mxu0  ;;  %5342 = vmatpush.msrb.mxu3 %v5341_v60  ;;  %v20860_v60 = vld [vmem:[#allocation17_spill] sm:$0xff]  ;;  %v15600_v23 = vand.u32 4294901760, %v4723_v6 }
 0x4ab   :  { %4914 = vmatmul.f32.gmra.mxu2 %v15516_v12  ;;  %v3984_v61 = vadd.f32 %v3983_v8, %v15340_v17  ;;  %20859 = vst [vmem:[#allocation47_spill] sm:$0xff] %v15584_v58  ;;  %v12816_v17 = vld [vmem:[%s20360_s0 + $0x40] sm:$0xff]  ;;  %v4624_v8 = vrot.slane %v12817_v13, 4 }
 0x4ac   :  { %v4254_v59 = vpop.f32.mrf.mxu3  ;;  %v4623_v4 = vrot.slane %v12816_v17, 4  ;;  %v12705_v17 = vld [vmem:[%s20361_s1 + $0x118] sm:$0xff] }
 0x4ad   :  { %4717 = vmatmul.f32.gmra.mxu0 %v15570_v28  ;;  %v4052_v10 = vpop.f32.mrf.mxu1  ;;  %v4627_v36 = vsel %vm180_vm0, %v4624_v8, %v4626_v9 }
 0x4ae   :  { %v4053_v25 = vadd.f32 %v4052_v10, %v3984_v61  ;;  %v4165_v5 = vpop.f32.mrf.mxu2  ;;  %v15605_v10 = vand.u32 4294901760, %v4656_v15  ;;  %v4625_v61 = vsel %vm180_vm0, %v4623_v4, %v4624_v8 }
 0x4af   :  { %v15587_v31 = vadd.f32 %v4254_v59, %v4165_v5  ;;  %v15603_v5 = vand.u32 4294901760, %v15584_v58 }
 0x4b0   :  { %v15596_v1 = vadd.f32 %v4053_v25, %v20860_v60  ;;  %4838 = vmatmul.f32.gmra.mxu1 %v15504_v48  ;;  %v15617_v60 = vsub.f32 %v4656_v15, %v15605_v10 }
 0x4b1   :  { %5004 = vmatmul.f32.gmra.mxu3 %v15573_v0  ;;  %20862 = vst [vmem:[#allocation52_spill] sm:$0xff] %v15603_v5  ;;  %v4731_v13 = vsub.f32 %v15584_v58, %v15603_v5 }
 0x4b2   :  { %20861 = vst [vmem:[#allocation50_spill] sm:$0xff] %v15596_v1  ;;  %v3987_v27 = vpop.f32.mrf.mxu0  ;;  %v15619_v1 = vand.u32 4294901760, %v12705_v17 }
 0x4b3   :  { %4919 = vmatmul.f32.gmra.mxu2 %v15552_v26  ;;  %v3988_v59 = vadd.f32 %v3987_v27, %v15354_v45  ;;  %20863 = vst [vmem:[#allocation53_spill] sm:$0xff] %v15617_v60  ;;  %v4658_v45 = vsel %vm155_vm2, %v4625_v61, 0  ;;  %v15637_v61 = vand.u32 4294901760, %v15617_v60 }
 0x4b4   :  { %v4258_v25 = vpop.f32.mrf.mxu3  ;;  %5219 = vmatpush.msrb.mxu2 %v15619_v1  ;;  %5506 = vmatpush.msra.mxu1 %v15619_v1 }
 0x4b5   :  { %4725 = vmatmul.f32.gmra.mxu0 %v15600_v23  ;;  %v4056_v6 = vpop.f32.mrf.mxu1  ;;  %20866 = vst [vmem:[#allocation58_spill] sm:$0xff] %v15637_v61 }
 0x4b6   :  { %v4057_v19 = vadd.f32 %v4056_v6, %v3988_v59  ;;  %v4173_v4 = vpop.f32.mrf.mxu2  ;;  %v15634_v59 = vand.u32 4294901760, %v4731_v13 }
 0x4b7   :  { %v15622_v27 = vadd.f32 %v4258_v25, %v4173_v4  ;;  %v15639_v25 = vand.u32 4294901760, %v4658_v45 }
 0x4b8   :  { %v15630_v15 = vadd.f32 %v4057_v19, %v20864_v46  ;;  %4842 = vmatmul.f32.gmra.mxu1 %v15538_v41  ;;  %v15645_v19 = vsub.f32 %v12705_v17, %v15619_v1 }
 0x4b9   :  { %5010 = vmatmul.f32.gmra.mxu3 %v15603_v5  ;;  %v15651_v56 = vsub.f32 %v4658_v45, %v15639_v25 }
 0x4ba   :  { %20865 = vst [vmem:[#allocation54_spill] sm:$0xff] %v15630_v15  ;;  %v4288_v6 = vpop.f32.mrf.mxu0  ;;  %v4739_v15 = vsub.f32 %v15617_v60, %v15637_v61  ;;  %v20427_v8 = vand.u32 4294901760, %v15645_v19  ;;  %5424 = vmatpush.msra.mxu0 %v15645_v19 }
 0x4bb   :  { %4924 = vmatmul.f32.gmra.mxu2 %v15584_v58  ;;  %v4289_v4 = vadd.f32 %v4288_v6, %v15359_v51  ;;  %20867 = vst [vmem:[#allocation51_spill] sm:$0xff] %v15651_v56  ;;  %v4660_v58 = vsel %vm155_vm2, %v4627_v36, 0  ;;  %v12819_v51 = vld [vmem:[%s20360_s0 + $0x58] sm:$0xf]  ;;  %v15667_v36 = vand.u32 4294901760, %v15651_v56 }
 0x4bc   :  { %v4538_v46 = vpop.f32.mrf.mxu3  ;;  %v4628_v17 = vrot.slane %v12819_v51, 4  ;;  %v5346_v45 = vsub.f32 %v15645_v19, %v20427_v8 }
 0x4bd   :  { %4733 = vmatmul.f32.gmra.mxu0 %v15634_v59  ;;  %v4370_v13 = vpop.f32.mrf.mxu1  ;;  %20868 = vst [vmem:[#allocation32_spill] sm:$0xff] %v15667_v36  ;;  %v4747_v12 = vsub.f32 %v15651_v56, %v15667_v36 }
 0x4be   :  { %v4371_v5 = vadd.f32 %v4370_v13, %v4289_v4  ;;  %v4469_v53 = vpop.f32.mrf.mxu2  ;;  %v15664_v4 = vand.u32 4294901760, %v4739_v15  ;;  %v15669_v13 = vand.u32 4294901760, %v4660_v58  ;;  %v5347_v49 = vand.u32 4294901760, %v5346_v45 }
 0x4c0   :  { %v4470_v6 = vadd.f32 %v4469_v53, %v4371_v5  ;;  %4846 = vmatmul.f32.gmra.mxu1 %v15575_v57  ;;  %v4629_v53 = vsel %vm180_vm0, %v4626_v9, %v4628_v17  ;;  %v20869_v5 = vld [vmem:[#allocation29_spill] sm:$0xff]  ;;  %5348 = vmatpush.msrb.mxu3 %v5347_v49 }
 0x4c1   :  { %5016 = vmatmul.f32.gmra.mxu3 %v15637_v61  ;;  %v4662_v9 = vsel %vm155_vm2, %v4629_v53, 0  ;;  %v12821_v49 = vld [vmem:[%s20360_s0 + $0x68] sm:$0xff] }
 0x4c2   :  { %v4539_v0 = vadd.f32 %v4538_v46, %v4470_v6  ;;  %v4293_v26 = vpop.f32.mrf.mxu0  ;;  %v15681_v46 = vsub.f32 %v4660_v58, %v15669_v13  ;;  %v15692_v58 = vand.u32 4294901760, %v4747_v12  ;;  %v15697_v53 = vand.u32 4294901760, %v4662_v9  ;;  %v12703_v12 = vld [vmem:[%s20361_s1 + $0x108] sm:$0xff] }
 0x4c3   :  { %4929 = vmatmul.f32.gmra.mxu2 %v15617_v60  ;;  %v4294_v8 = vadd.f32 %v4293_v26, %v15369_v20  ;;  %v4631_v26 = vrot.slane %v12821_v49, 4  ;;  %v20874_v60 = vand.u32 4294901760, %v15444_v34 }
 0x4c4   :  { %v15674_v51 = vadd.f32 %v4539_v0, %v20869_v5  ;;  %v4542_v61 = vpop.f32.mrf.mxu3  ;;  %v12820_v0 = vld [vmem:[%s20360_s0 + $0x60] sm:$0xff] }
 0x4c5   :  { %4741 = vmatmul.f32.gmra.mxu0 %v15664_v4  ;;  %v4376_v15 = vpop.f32.mrf.mxu1  ;;  %v4630_v20 = vrot.slane %v12820_v0, 4 }
 0x4c6   :  { %20870 = vst [vmem:[#allocation20_spill] sm:$0xff] %v15674_v51  ;;  %v4377_v6 = vadd.f32 %v4376_v15, %v4294_v8  ;;  %v4473_v45 = vpop.f32.mrf.mxu2  ;;  %v15695_v8 = vand.u32 4294901760, %v15681_v46  ;;  %v20872_v51 = vld [vmem:[#allocation18_spill] sm:$0xff] }
 0x4c7   :  { %v4632_v0 = vsel %vm180_vm0, %v4630_v20, %v4631_v26  ;;  %v15714_v20 = vand.u32 4294901760, %v12703_v12 }
 0x4c8   :  { %v4474_v17 = vadd.f32 %v4473_v45, %v4377_v6  ;;  %4850 = vmatmul.f32.gmra.mxu1 %v15605_v10  ;;  %20871 = vst [vmem:[#allocation25_spill] sm:$0xff] %v15695_v8 }
 0x4c9   :  { %5022 = vmatmul.f32.gmra.mxu3 %v15667_v36  ;;  %5221 = vmatpush.msrb.mxu2 %v15714_v20 }
 0x4ca   :  { %v4543_v5 = vadd.f32 %v4542_v61, %v4474_v17  ;;  %v4298_v15 = vpop.f32.mrf.mxu0  ;;  %v4755_v61 = vsub.f32 %v15681_v46, %v15695_v8  ;;  %v15712_v17 = vsub.f32 %v4662_v9, %v15697_v53  ;;  %5508 = vmatpush.msra.mxu1 %v15714_v20  ;;  %v5350_v9 = vsub.f32 %v12703_v12, %v15714_v20 }
 0x4cb   :  { %4934 = vmatmul.f32.gmra.mxu2 %v15651_v56  ;;  %v4299_v6 = vadd.f32 %v4298_v15, %v15382_v11  ;;  %v4664_v11 = vsel %vm155_vm2, %v4632_v0, 0  ;;  %v12822_v15 = vld [vmem:[%s20360_s0 + $0x70] sm:$0xff] }
 0x4cc   :  { %v15702_v49 = vadd.f32 %v4543_v5, %v20872_v51  ;;  %v4546_v45 = vpop.f32.mrf.mxu3  ;;  %5597 = vmatpush.msra.mxu2 %v20874_v60  ;;  %v15730_v0 = vand.u32 4294901760, %v15712_v17  ;;  %v5351_v2 = vand.u32 4294901760, %v5350_v9  ;;  %5427 = vmatpush.msra.mxu0 %v5350_v9 }
 0x4cd   :  { %4749 = vmatmul.f32.gmra.mxu0 %v15692_v58  ;;  %v4382_v36 = vpop.f32.mrf.mxu1 }
 0x4ce   :  { %20873 = vst [vmem:[#allocation55_spill] sm:$0xff] %v15702_v49  ;;  %v4383_v51 = vadd.f32 %v4382_v36, %v4299_v6  ;;  %v4477_v5 = vpop.f32.mrf.mxu2  ;;  %v4633_v49 = vrot.slane %v12822_v15, 4  ;;  %v15727_v36 = vand.u32 4294901760, %v4755_v61  ;;  %v15732_v6 = vand.u32 4294901760, %v4664_v11 }
 0x4d0   :  { %v4478_v56 = vadd.f32 %v4477_v5, %v4383_v51  ;;  %4854 = vmatmul.f32.gmra.mxu1 %v15639_v25  ;;  %v20875_v51 = vand.u32 4294901760, %v15546_v42  ;;  %v4634_v34 = vsel %vm180_vm0, %v4631_v26, %v4633_v49  ;;  %v5352_v5 = vsub.f32 %v5350_v9, %v5351_v2 }
 0x4d1   :  { %5028 = vmatmul.f32.gmra.mxu3 %v15695_v8  ;;  %v20877_v8 = vand.u32 4294901760, %v15645_v19  ;;  %v4763_v42 = vsub.f32 %v15712_v17, %v15730_v0 }
 0x4d2   :  { %v4547_v15 = vadd.f32 %v4546_v45, %v4478_v56  ;;  %v4303_v14 = vpop.f32.mrf.mxu0  ;;  %5601 = vmatpush.msra.mxu2 %v20875_v51  ;;  %v15748_v45 = vsub.f32 %v4664_v11, %v15732_v6 }
 0x4d3   :  { %4939 = vmatmul.f32.gmra.mxu2 %v15681_v46  ;;  %v4304_v12 = vadd.f32 %v4303_v14, %v15396_v22  ;;  %v12823_v22 = vld [vmem:[%s20360_s0 + $0x78] sm:$0xf] }
 0x4d4   :  { %v15739_v60 = vadd.f32 %v4547_v15, %v15122_v16  ;;  %v4550_v61 = vpop.f32.mrf.mxu3  ;;  %5605 = vmatpush.msra.mxu2 %v20877_v8  ;;  %v4666_v16 = vsel %vm155_vm2, %v4634_v34, 0  ;;  %v5353_v15 = vand.u32 4294901760, %v5352_v5  ;;  %v4635_v14 = vrot.slane %v12823_v22, 4 }
 0x4d5   :  { %4757 = vmatmul.f32.gmra.mxu0 %v15727_v36  ;;  %v4388_v56 = vpop.f32.mrf.mxu1  ;;  %v15756_v8 = vand.u32 4294901760, %v4763_v42  ;;  %v15759_v11 = vand.u32 4294901760, %v15748_v45  ;;  %v15761_v9 = vand.u32 4294901760, %v4666_v16 }
 0x4d6   :  { %20876 = vst [vmem:[#allocation48_spill] sm:$0xff] %v15739_v60  ;;  %v4389_v26 = vadd.f32 %v4388_v56, %v4304_v12  ;;  %v4481_v51 = vpop.f32.mrf.mxu2  ;;  %5609 = vmatpush.msra.mxu2 %v5351_v2  ;;  %5354 = vmatpush.msrb.mxu3 %v5353_v15  ;;  %v4636_v12 = vsel %vm180_vm0, %v4633_v49, %v4635_v14  ;;  %v20907_v60 = vld [vmem:[#allocation32_spill] sm:$0xff] }
 0x4d7   :  { %v4668_v49 = vsel %vm155_vm2, %v4636_v12, 0 }
 0x4d8   :  { %v4482_v19 = vadd.f32 %v4481_v51, %v4389_v26  ;;  %4858 = vmatmul.f32.gmra.mxu1 %v15669_v13  ;;  %5672 = vmatpush.msra.mxu3 %v15431_v54  ;;  %v15775_v54 = vsub.f32 %v4666_v16, %v15761_v9  ;;  %v15787_v16 = vand.u32 4294901760, %v4668_v49 }
 0x4d9   :  { %5034 = vmatmul.f32.gmra.mxu3 %v15730_v0 }
 0x4da   :  { %v4551_v34 = vadd.f32 %v4550_v61, %v4482_v19  ;;  %v4308_v2 = vpop.f32.mrf.mxu0  ;;  %5674 = vmatpush.msra.mxu3 %v15518_v33  ;;  %v4771_v61 = vsub.f32 %v15748_v45, %v15759_v11  ;;  %v15785_v33 = vand.u32 4294901760, %v15775_v54  ;;  %v15798_v12 = vsub.f32 %v4668_v49, %v15787_v16 }
 0x4db   :  { %4944 = vmatmul.f32.gmra.mxu2 %v15712_v17  ;;  %v4309_v56 = vadd.f32 %v4308_v2, %v15409_v40 }
 0x4dc   :  { %v15767_v5 = vadd.f32 %v4551_v34, %v15150_v3  ;;  %v4554_v42 = vpop.f32.mrf.mxu3  ;;  %5676 = vmatpush.msra.mxu3 %v15619_v1  ;;  %v15782_v40 = vand.u32 4294901760, %v4771_v61  ;;  %v4779_v2 = vsub.f32 %v15775_v54, %v15785_v33 }
 0x4dd   :  { %4765 = vmatmul.f32.gmra.mxu0 %v15756_v8  ;;  %v4394_v26 = vpop.f32.mrf.mxu1 }
 0x4de   :  { %20878 = vst [vmem:[#allocation13_spill] sm:$0xff] %v15767_v5  ;;  %v4395_v51 = vadd.f32 %v4394_v26, %v4309_v56  ;;  %v4485_v15 = vpop.f32.mrf.mxu2  ;;  %5678 = vmatpush.msra.mxu3 %v15714_v20 }
 0x4e0   :  { %v4486_v3 = vadd.f32 %v4485_v15, %v4395_v51  ;;  %4862 = vmatmul.f32.gmra.mxu1 %v15697_v53 }
 0x4e1   :  { %5040 = vmatmul.f32.gmra.mxu3 %v15759_v11 }
 0x4e2   :  { %v4555_v22 = vadd.f32 %v4554_v42, %v4486_v3  ;;  %v4313_v14 = vpop.f32.mrf.mxu0 }
 0x4e3   :  { %4949 = vmatmul.f32.gmra.mxu2 %v15748_v45  ;;  %v4314_v19 = vadd.f32 %v4313_v14, %v15433_v21  ;;  %v15805_v21 = vand.u32 4294901760, %v15798_v12 }
 0x4e4   :  { %v15791_v1 = vadd.f32 %v4555_v22, %v15174_v52  ;;  %v4558_v34 = vpop.f32.mrf.mxu3  ;;  %v15802_v52 = vand.u32 4294901760, %v4779_v2 }
 0x4e5   :  { %4773 = vmatmul.f32.gmra.mxu0 %v15782_v40  ;;  %v4400_v20 = vpop.f32.mrf.mxu1  ;;  %v4787_v14 = vsub.f32 %v15798_v12, %v15805_v21 }
 0x4e6   :  { %20879 = vst [vmem:[#allocation56_spill] sm:$0xff] %v15791_v1  ;;  %v4401_v56 = vadd.f32 %v4400_v20, %v4314_v19  ;;  %v4489_v42 = vpop.f32.mrf.mxu2 }
 0x4e8   :  { %v4490_v26 = vadd.f32 %v4489_v42, %v4401_v56  ;;  %4866 = vmatmul.f32.gmra.mxu1 %v15732_v6 }
 0x4e9   :  { %5046 = vmatmul.f32.gmra.mxu3 %v15785_v33 }
 0x4ea   :  { %v4559_v61 = vadd.f32 %v4558_v34, %v4490_v26  ;;  %v4318_v51 = vpop.f32.mrf.mxu0  ;;  %v15817_v34 = vand.u32 4294901760, %v4787_v14 }
 0x4eb   :  { %4954 = vmatmul.f32.gmra.mxu2 %v15775_v54  ;;  %v4319_v49 = vadd.f32 %v4318_v51, %v15461_v35 }
 0x4ec   :  { %v15809_v15 = vadd.f32 %v4559_v61, %v15192_v55  ;;  %v4562_v3 = vpop.f32.mrf.mxu3 }
 0x4ed   :  { %4781 = vmatmul.f32.gmra.mxu0 %v15802_v52  ;;  %v4406_v22 = vpop.f32.mrf.mxu1 }
 0x4ee   :  { %20880 = vst [vmem:[#allocation26_spill] sm:$0xff] %v15809_v15  ;;  %v4407_v19 = vadd.f32 %v4406_v22, %v4319_v49  ;;  %v4493_v20 = vpop.f32.mrf.mxu2 }
 0x4f0   :  { %v4494_v2 = vadd.f32 %v4493_v20, %v4407_v19  ;;  %4870 = vmatmul.f32.gmra.mxu1 %v15761_v9 }
 0x4f1   :  { %5052 = vmatmul.f32.gmra.mxu3 %v15805_v21 }
 0x4f2   :  { %v4563_v55 = vadd.f32 %v4562_v3, %v4494_v2  ;;  %v4323_v56 = vpop.f32.mrf.mxu0 }
 0x4f3   :  { %4959 = vmatmul.f32.gmra.mxu2 %v15798_v12  ;;  %v4324_v42 = vadd.f32 %v4323_v56, %v15486_v43 }
 0x4f4   :  { %v15821_v35 = vadd.f32 %v4563_v55, %v15204_v50  ;;  %v4566_v26 = vpop.f32.mrf.mxu3 }
 0x4f5   :  { %4789 = vmatmul.f32.gmra.mxu0 %v15817_v34  ;;  %v4412_v61 = vpop.f32.mrf.mxu1 }
 0x4f6   :  { %20881 = vst [vmem:[#allocation21_spill] sm:$0xff] %v15821_v35  ;;  %v4413_v51 = vadd.f32 %v4412_v61, %v4324_v42  ;;  %v4497_v49 = vpop.f32.mrf.mxu2 }
 0x4f8   :  { %v4498_v22 = vadd.f32 %v4497_v49, %v4413_v51  ;;  %4874 = vmatmul.f32.gmra.mxu1 %v15787_v16 }
 0x4f9   :  { %5356 = vmatmul.f32.vlgmr.msrb.gmra.mxu3 %v15447_v32 }
 0x4fa   :  { %v4567_v3 = vadd.f32 %v4566_v26, %v4498_v22  ;;  %v4328_v14 = vpop.f32.mrf.mxu0 }
 0x4fb   :  { %5227 = vmatmul.f32.vlgmr.msrb.gmra.mxu2 %v15499_v62  ;;  %v4329_v43 = vadd.f32 %v4328_v14, %v15522_v38 }
 0x4fc   :  { %v15829_v50 = vadd.f32 %v4567_v3, %v15212_v37  ;;  %v4570_v19 = vpop.f32.mrf.mxu3 }
 0x4fd   :  { %5085 = vmatmul.f32.vlgmr.msrb.gmra.mxu0 %v15447_v32  ;;  %v4418_v20 = vpop.f32.mrf.mxu1 }
 0x4fe   :  { %20882 = vst [vmem:[#allocation38_spill] sm:$0xff] %v15829_v50  ;;  %v4419_v2 = vadd.f32 %v4418_v20, %v4329_v43  ;;  %v4501_v55 = vpop.f32.mrf.mxu2 }
 0x500   :  { %v4502_v56 = vadd.f32 %v4501_v55, %v4419_v2  ;;  %5154 = vmatmul.f32.vlgmr.msrb.gmra.mxu1 %v15447_v32 }
 0x501   :  { %5360 = vmatmul.f32.gmra.mxu3 %v15474_v7 }
 0x502   :  { %v4571_v42 = vadd.f32 %v4570_v19, %v4502_v56  ;;  %v4333_v26 = vpop.f32.mrf.mxu0 }
 0x503   :  { %5235 = vmatmul.f32.gmra.mxu2 %v15533_v18  ;;  %v4334_v62 = vadd.f32 %v4333_v26, %v15557_v47 }
 0x504   :  { %v15837_v37 = vadd.f32 %v4571_v42, %v15220_v24  ;;  %v4574_v38 = vpop.f32.mrf.mxu3 }
 0x505   :  { %5089 = vmatmul.f32.gmra.mxu0 %v15474_v7  ;;  %v4424_v61 = vpop.f32.mrf.mxu1 }
 0x506   :  { %20883 = vst [vmem:[#allocation36_spill] sm:$0xff] %v15837_v37  ;;  %v4425_v51 = vadd.f32 %v4424_v61, %v4334_v62  ;;  %v4505_v49 = vpop.f32.mrf.mxu2 }
 0x508   :  { %v4506_v22 = vadd.f32 %v4505_v49, %v4425_v51  ;;  %5158 = vmatmul.f32.gmra.mxu1 %v15474_v7 }
 0x509   :  { %5364 = vmatmul.f32.gmra.mxu3 %v15504_v48 }
 0x50a   :  { %v4575_v3 = vadd.f32 %v4574_v38, %v4506_v22  ;;  %v4338_v14 = vpop.f32.mrf.mxu0 }
 0x50b   :  { %5243 = vmatmul.f32.gmra.mxu2 %v15570_v28  ;;  %v4339_v18 = vadd.f32 %v4338_v14, %v15587_v31 }
 0x50c   :  { %v15845_v24 = vadd.f32 %v4575_v3, %v15228_v39  ;;  %v4578_v47 = vpop.f32.mrf.mxu3 }
 0x50d   :  { %5093 = vmatmul.f32.gmra.mxu0 %v15504_v48  ;;  %v4430_v43 = vpop.f32.mrf.mxu1 }
 0x50e   :  { %20884 = vst [vmem:[#allocation57_spill] sm:$0xff] %v15845_v24  ;;  %v4431_v19 = vadd.f32 %v4430_v43, %v4339_v18  ;;  %v4509_v20 = vpop.f32.mrf.mxu2 }
 0x510   :  { %v4510_v2 = vadd.f32 %v4509_v20, %v4431_v19  ;;  %5162 = vmatmul.f32.gmra.mxu1 %v15504_v48 }
 0x511   :  { %5368 = vmatmul.f32.gmra.mxu3 %v15538_v41 }
 0x512   :  { %v4579_v55 = vadd.f32 %v4578_v47, %v4510_v2  ;;  %v4343_v56 = vpop.f32.mrf.mxu0 }
 0x513   :  { %5251 = vmatmul.f32.gmra.mxu2 %v15600_v23  ;;  %v4344_v31 = vadd.f32 %v4343_v56, %v15622_v27 }
 0x514   :  { %v15853_v39 = vadd.f32 %v4579_v55, %v15236_v44  ;;  %v4582_v28 = vpop.f32.mrf.mxu3 }
 0x515   :  { %5097 = vmatmul.f32.gmra.mxu0 %v15538_v41  ;;  %v4436_v42 = vpop.f32.mrf.mxu1 }
 0x516   :  { %20885 = vst [vmem:[#allocation22_spill] sm:$0xff] %v15853_v39  ;;  %v4437_v26 = vadd.f32 %v4436_v42, %v4344_v31  ;;  %v4513_v62 = vpop.f32.mrf.mxu2 }
 0x518   :  { %v4514_v38 = vadd.f32 %v4513_v62, %v4437_v26  ;;  %5166 = vmatmul.f32.gmra.mxu1 %v15538_v41 }
 0x519   :  { %5372 = vmatmul.f32.gmra.mxu3 %v15575_v57 }
 0x51a   :  { %v4583_v61 = vadd.f32 %v4582_v28, %v4514_v38  ;;  %v4702_v51 = vpop.f32.mrf.mxu0 }
 0x51b   :  { %5259 = vmatmul.f32.gmra.mxu2 %v15634_v59 }
 0x51c   :  { %v15861_v44 = vadd.f32 %v4583_v61, %v15244_v29  ;;  %v4987_v23 = vpop.f32.mrf.mxu3 }
 0x51d   :  { %5101 = vmatmul.f32.gmra.mxu0 %v15575_v57  ;;  %v4831_v27 = vpop.f32.mrf.mxu1 }
 0x51e   :  { %20886 = vst [vmem:[#allocation28_spill] sm:$0xff] %v15861_v44  ;;  %v4832_v49 = vadd.f32 %v4831_v27, %v4702_v51  ;;  %v4905_v22 = vpop.f32.mrf.mxu2  ;;  %v5813_v44 = vld [vmem:[#allocation4 + $0x38] sm:$0xff] }
 0x51f   :  { %v16018_v24 = vand.u32 4294901760, %v5813_v44 }
 0x520   :  { %v4906_v3 = vadd.f32 %v4905_v22, %v4832_v49  ;;  %5170 = vmatmul.f32.gmra.mxu1 %v15575_v57 }
 0x521   :  { %5376 = vmatmul.f32.gmra.mxu3 %v15605_v10 }
 0x522   :  { %v4710_v14 = vpop.f32.mrf.mxu0  ;;  %v15866_v18 = vadd.f32 %v4987_v23, %v4906_v3 }
 0x523   :  { %5267 = vmatmul.f32.gmra.mxu2 %v15664_v4 }
 0x524   :  { %v4993_v59 = vpop.f32.mrf.mxu3 }
 0x525   :  { %5105 = vmatmul.f32.gmra.mxu0 %v15605_v10  ;;  %v4835_v29 = vpop.f32.mrf.mxu1 }
 0x526   :  { %v4836_v47 = vadd.f32 %v4835_v29, %v4710_v14  ;;  %v4910_v43 = vpop.f32.mrf.mxu2 }
 0x528   :  { %v4911_v19 = vadd.f32 %v4910_v43, %v4836_v47  ;;  %5174 = vmatmul.f32.gmra.mxu1 %v15605_v10  ;;  %v5821_v43 = vld [vmem:[#allocation4 + $0x78] sm:$0xff] }
 0x529   :  { %5380 = vmatmul.f32.gmra.mxu3 %v15639_v25 }
 0x52a   :  { %v4718_v20 = vpop.f32.mrf.mxu0  ;;  %v15872_v2 = vadd.f32 %v4993_v59, %v4911_v19  ;;  %v15894_v19 = vand.u32 4294901760, %v5821_v43 }
 0x52b   :  { %5275 = vmatmul.f32.gmra.mxu2 %v15692_v58 }
 0x52c   :  { %v4999_v55 = vpop.f32.mrf.mxu3  ;;  %5862 = vmatpush.msrb.mxu0 %v15894_v19  ;;  %6245 = vmatpush.msrb.mxu3 %v15894_v19 }
 0x52d   :  { %5109 = vmatmul.f32.gmra.mxu0 %v15639_v25  ;;  %v4839_v4 = vpop.f32.mrf.mxu1 }
 0x52e   :  { %v4840_v56 = vadd.f32 %v4839_v4, %v4718_v20  ;;  %v4915_v31 = vpop.f32.mrf.mxu2  ;;  %v15897_v4 = vsub.f32 %v5821_v43, %v15894_v19 }
 0x530   :  { %v4916_v28 = vadd.f32 %v4915_v31, %v4840_v56  ;;  %5178 = vmatmul.f32.gmra.mxu1 %v15639_v25  ;;  %6137 = vmatpush.msrb.mxu2 %v15897_v4 }
 0x531   :  { %5384 = vmatmul.f32.gmra.mxu3 %v15669_v13 }
 0x532   :  { %v4726_v42 = vpop.f32.mrf.mxu0  ;;  %v15878_v26 = vadd.f32 %v4999_v55, %v4916_v28  ;;  %v5820_v28 = vld [vmem:[#allocation4 + $0x70] sm:$0xff] }
 0x533   :  { %5283 = vmatmul.f32.gmra.mxu2 %v15727_v36 }
 0x534   :  { %v5005_v62 = vpop.f32.mrf.mxu3 }
 0x535   :  { %5113 = vmatmul.f32.gmra.mxu0 %v15669_v13  ;;  %v4843_v58 = vpop.f32.mrf.mxu1 }
 0x536   :  { %v4844_v38 = vadd.f32 %v4843_v58, %v4726_v42  ;;  %v4920_v61 = vpop.f32.mrf.mxu2  ;;  %v15911_v58 = vand.u32 4294901760, %v5820_v28 }
 0x538   :  { %v4921_v51 = vadd.f32 %v4920_v61, %v4844_v38  ;;  %5182 = vmatmul.f32.gmra.mxu1 %v15669_v13  ;;  %6247 = vmatpush.msrb.mxu3 %v15911_v58 }
 0x539   :  { %5388 = vmatmul.f32.gmra.mxu3 %v15697_v53  ;;  %5864 = vmatpush.msrb.mxu0 %v15911_v58 }
 0x53a   :  { %v4734_v23 = vpop.f32.mrf.mxu0  ;;  %v15884_v27 = vadd.f32 %v5005_v62, %v4921_v51 }
 0x53b   :  { %5291 = vmatmul.f32.gmra.mxu2 %v15756_v8 }
 0x53c   :  { %v5011_v49 = vpop.f32.mrf.mxu3 }
 0x53d   :  { %5117 = vmatmul.f32.gmra.mxu0 %v15697_v53  ;;  %v4847_v36 = vpop.f32.mrf.mxu1 }
 0x53e   :  { %v4848_v22 = vadd.f32 %v4847_v36, %v4734_v23  ;;  %v4925_v3 = vpop.f32.mrf.mxu2  ;;  %v15915_v23 = vsub.f32 %v5820_v28, %v15911_v58 }
 0x540   :  { %v4926_v14 = vadd.f32 %v4925_v3, %v4848_v22  ;;  %5186 = vmatmul.f32.gmra.mxu1 %v15697_v53  ;;  %6140 = vmatpush.msrb.mxu2 %v15915_v23  ;;  %v20438_v22 = vand.u32 4294901760, %v15915_v23  ;;  %v5819_v3 = vld [vmem:[#allocation4 + $0x68] sm:$0xff] }
 0x541   :  { %5392 = vmatmul.f32.gmra.mxu3 %v15732_v6 }
 0x542   :  { %v4742_v59 = vpop.f32.mrf.mxu0  ;;  %v15890_v29 = vadd.f32 %v5011_v49, %v4926_v14  ;;  %v15923_v14 = vand.u32 4294901760, %v5819_v3 }
 0x543   :  { %5299 = vmatmul.f32.gmra.mxu2 %v15782_v40  ;;  %v20440_v40 = vand.u32 4294901760, %v15897_v4 }
 0x544   :  { %v5017_v47 = vpop.f32.mrf.mxu3  ;;  %5866 = vmatpush.msrb.mxu0 %v15923_v14  ;;  %6249 = vmatpush.msrb.mxu3 %v15923_v14 }
 0x545   :  { %5121 = vmatmul.f32.gmra.mxu0 %v15732_v6  ;;  %v4851_v8 = vpop.f32.mrf.mxu1  ;;  %v5993_v62 = vsub.f32 %v15897_v4, %v20440_v40 }
 0x546   :  { %v4852_v20 = vadd.f32 %v4851_v8, %v4742_v59  ;;  %v4930_v55 = vpop.f32.mrf.mxu2  ;;  %v15932_v8 = vsub.f32 %v5819_v3, %v15923_v14 }
 0x547   :  { %v5994_v51 = vand.u32 4294901760, %v5993_v62 }
 0x548   :  { %v4931_v56 = vadd.f32 %v4930_v55, %v4852_v20  ;;  %5190 = vmatmul.f32.gmra.mxu1 %v15732_v6  ;;  %6143 = vmatpush.msrb.mxu2 %v15932_v8 }
 0x549   :  { %5396 = vmatmul.f32.gmra.mxu3 %v15761_v9  ;;  %5995 = vmatpush.msrb.mxu1 %v5994_v51 }
 0x54a   :  { %v4750_v31 = vpop.f32.mrf.mxu0  ;;  %v15905_v42 = vadd.f32 %v5017_v47, %v4931_v56  ;;  %v5999_v47 = vsub.f32 %v15915_v23, %v20438_v22 }
 0x54b   :  { %5307 = vmatmul.f32.gmra.mxu2 %v15802_v52 }
 0x54c   :  { %v5023_v38 = vpop.f32.mrf.mxu3  ;;  %v6000_v55 = vand.u32 4294901760, %v5999_v47  ;;  %v5817_v47 = vld [vmem:[#allocation4 + $0x58] sm:$0xff] }
 0x54d   :  { %5125 = vmatmul.f32.gmra.mxu0 %v15761_v9  ;;  %v4855_v61 = vpop.f32.mrf.mxu1 }
 0x54e   :  { %v4856_v49 = vadd.f32 %v4855_v61, %v4750_v31  ;;  %v4935_v36 = vpop.f32.mrf.mxu2  ;;  %v20437_v31 = vand.u32 4294901760, %v15932_v8  ;;  %6001 = vmatpush.msrb.mxu1 %v6000_v55  ;;  %v5818_v61 = vld [vmem:[#allocation4 + $0x60] sm:$0xff] }
 0x550   :  { %v4936_v52 = vadd.f32 %v4935_v36, %v4856_v49  ;;  %5194 = vmatmul.f32.gmra.mxu1 %v15761_v9  ;;  %v15944_v49 = vand.u32 4294901760, %v5818_v61 }
 0x551   :  { %5400 = vmatmul.f32.gmra.mxu3 %v15787_v16 }
 0x552   :  { %v4758_v59 = vpop.f32.mrf.mxu0  ;;  %v15928_v43 = vadd.f32 %v5023_v38, %v4936_v52  ;;  %v15950_v3 = vsub.f32 %v5818_v61, %v15944_v49  ;;  %5868 = vmatpush.msrb.mxu0 %v15944_v49  ;;  %6251 = vmatpush.msrb.mxu3 %v15944_v49 }
 0x553   :  { %5315 = vmatmul.f32.gmra.mxu2 %v15817_v34  ;;  %v6005_v34 = vsub.f32 %v15932_v8, %v20437_v31 }
 0x554   :  { %v5029_v20 = vpop.f32.mrf.mxu3  ;;  %6146 = vmatpush.msrb.mxu2 %v15950_v3 }
 0x555   :  { %5129 = vmatmul.f32.gmra.mxu0 %v15787_v16  ;;  %v4859_v56 = vpop.f32.mrf.mxu1  ;;  %v6006_v51 = vand.u32 4294901760, %v6005_v34 }
 0x556   :  { %v4860_v28 = vadd.f32 %v4859_v56, %v4758_v59  ;;  %v4940_v62 = vpop.f32.mrf.mxu2  ;;  %v15957_v56 = vand.u32 4294901760, %v5817_v47 }
 0x557   :  { %6007 = vmatpush.msrb.mxu1 %v6006_v51 }
 0x558   :  { %v4941_v38 = vadd.f32 %v4940_v62, %v4860_v28  ;;  %5198 = vmatmul.f32.gmra.mxu1 %v15787_v16  ;;  %v15963_v34 = vsub.f32 %v5817_v47, %v15957_v56  ;;  %5870 = vmatpush.msrb.mxu0 %v15957_v56  ;;  %v20887_v47 = vld [vmem:[#allocation24_spill] sm:$0xff] }
 0x559   :  { %5680 = vmatmul.f32.vlgmr.msra.gmra.mxu3 %v15447_v32 }
 0x55a   :  { %v4766_v36 = vpop.f32.mrf.mxu0  ;;  %v15946_v52 = vadd.f32 %v5029_v20, %v4941_v38  ;;  %v20436_v20 = vand.u32 4294901760, %v15950_v3  ;;  %6253 = vmatpush.msrb.mxu3 %v15957_v56  ;;  %6149 = vmatpush.msrb.mxu2 %v15963_v34 }
 0x55b   :  { %5611 = vmatmul.f32.vlgmr.msra.gmra.mxu2 %v15447_v32 }
 0x55c   :  { %v5035_v59 = vpop.f32.mrf.mxu3  ;;  %v6011_v62 = vsub.f32 %v15950_v3, %v20436_v20 }
 0x55d   :  { %5430 = vmatmul.f32.vlgmr.msra.gmra.mxu0 %v15458_v30  ;;  %v4863_v55 = vpop.f32.mrf.mxu1 }
 0x55e   :  { %v4864_v32 = vadd.f32 %v4863_v55, %v4766_v36  ;;  %v4945_v28 = vpop.f32.mrf.mxu2  ;;  %v6012_v38 = vand.u32 4294901760, %v6011_v62  ;;  %v5816_v62 = vld [vmem:[#allocation4 + $0x50] sm:$0xff] }
 0x55f   :  { %v15977_v22 = vand.u32 4294901760, %v5816_v62 }
 0x560   :  { %v4946_v30 = vadd.f32 %v4945_v28, %v4864_v32  ;;  %5512 = vmatmul.f32.vlgmr.msra.gmra.mxu1 %v15472_v63  ;;  %v20888_v28 = vld [vmem:[#allocation34_spill] sm:$0xff]  ;;  %v20439_v63 = vand.u32 4294901760, %v15963_v34 }
 0x561   :  { %5684 = vmatmul.f32.gmra.mxu3 %v15474_v7  ;;  %6013 = vmatpush.msrb.mxu1 %v6012_v38 }
 0x562   :  { %v4774_v61 = vpop.f32.mrf.mxu0  ;;  %v15970_v51 = vadd.f32 %v5035_v59, %v4946_v30  ;;  %5872 = vmatpush.msrb.mxu0 %v15977_v22  ;;  %6255 = vmatpush.msrb.mxu3 %v15977_v22 }
 0x563   :  { %5615 = vmatmul.f32.gmra.mxu2 %v15474_v7  ;;  %v6017_v7 = vsub.f32 %v15963_v34, %v20439_v63 }
 0x564   :  { %v5041_v36 = vpop.f32.mrf.mxu3 }
 0x565   :  { %5435 = vmatmul.f32.gmra.mxu0 %v20887_v47  ;;  %v4867_v55 = vpop.f32.mrf.mxu1  ;;  %v6018_v38 = vand.u32 4294901760, %v6017_v7 }
 0x566   :  { %v4868_v20 = vadd.f32 %v4867_v55, %v4774_v61  ;;  %v4950_v31 = vpop.f32.mrf.mxu2  ;;  %v20890_v61 = vld [vmem:[#allocation15_spill] sm:$0xff] }
 0x567   :  { %6019 = vmatpush.msrb.mxu1 %v6018_v38 }
 0x568   :  { %v4951_v32 = vadd.f32 %v4950_v31, %v4868_v20  ;;  %5518 = vmatmul.f32.gmra.mxu1 %v20888_v28  ;;  %v15986_v31 = vsub.f32 %v5816_v62, %v15977_v22  ;;  %v5815_v62 = vld [vmem:[#allocation4 + $0x48] sm:$0xff] }
 0x569   :  { %5688 = vmatmul.f32.gmra.mxu3 %v15504_v48  ;;  %v15995_v63 = vand.u32 4294901760, %v5815_v62 }
 0x56a   :  { %v4782_v59 = vpop.f32.mrf.mxu0  ;;  %v15982_v30 = vadd.f32 %v5041_v36, %v4951_v32  ;;  %6152 = vmatpush.msrb.mxu2 %v15986_v31  ;;  %v20891_v32 = vld [vmem:[#allocation37_spill] sm:$0xff] }
 0x56b   :  { %5619 = vmatmul.f32.gmra.mxu2 %v15504_v48  ;;  %v20441_v48 = vand.u32 4294901760, %v15986_v31  ;;  %5874 = vmatpush.msrb.mxu0 %v15995_v63 }
 0x56c   :  { %20889 = vst [vmem:[#allocation42_spill] sm:$0xff] %v15982_v30  ;;  %v5047_v20 = vpop.f32.mrf.mxu3  ;;  %6257 = vmatpush.msrb.mxu3 %v15995_v63  ;;  %v20911_v30 = vld [vmem:[#allocation25_spill] sm:$0xff] }
 0x56d   :  { %5440 = vmatmul.f32.gmra.mxu0 %v20890_v61  ;;  %v4871_v47 = vpop.f32.mrf.mxu1  ;;  %v6023_v61 = vsub.f32 %v15986_v31, %v20441_v48  ;;  %v20894_v48 = vld [vmem:[#allocation49_spill] sm:$0xff] }
 0x56e   :  { %v4872_v55 = vadd.f32 %v4871_v47, %v4782_v59  ;;  %v4955_v28 = vpop.f32.mrf.mxu2  ;;  %v16004_v59 = vsub.f32 %v5815_v62, %v15995_v63 }
 0x56f   :  { %v6024_v47 = vand.u32 4294901760, %v6023_v61  ;;  %v5814_v61 = vld [vmem:[#allocation4 + $0x40] sm:$0xff] }
 0x570   :  { %v4956_v36 = vadd.f32 %v4955_v28, %v4872_v55  ;;  %5524 = vmatmul.f32.gmra.mxu1 %v20891_v32  ;;  %v20893_v55 = vld [vmem:[#allocation27_spill] sm:$0xff]  ;;  %6155 = vmatpush.msrb.mxu2 %v16004_v59  ;;  %v20442_v32 = vand.u32 4294901760, %v16004_v59  ;;  %v16016_v39 = vand.u32 4294901760, %v5814_v61 }
 0x571   :  { %5692 = vmatmul.f32.gmra.mxu3 %v15538_v41  ;;  %6025 = vmatpush.msrb.mxu1 %v6024_v47 }
 0x572   :  { %v4790_v7 = vpop.f32.mrf.mxu0  ;;  %v16000_v40 = vadd.f32 %v5047_v20, %v4956_v36  ;;  %v16024_v47 = vsub.f32 %v5814_v61, %v16016_v39  ;;  %5876 = vmatpush.msrb.mxu0 %v16016_v39  ;;  %6259 = vmatpush.msrb.mxu3 %v16016_v39 }
 0x573   :  { %5623 = vmatmul.f32.gmra.mxu2 %v15538_v41  ;;  %v6029_v41 = vsub.f32 %v16004_v59, %v20442_v32 }
 0x574   :  { %20892 = vst [vmem:[#allocation16_spill] sm:$0xff] %v16000_v40  ;;  %v5053_v38 = vpop.f32.mrf.mxu3  ;;  %6158 = vmatpush.msrb.mxu2 %v16024_v47  ;;  %5878 = vmatpush.msrb.mxu0 %v16018_v24 }
 0x575   :  { %5445 = vmatmul.f32.gmra.mxu0 %v20893_v55  ;;  %v4875_v28 = vpop.f32.mrf.mxu1  ;;  %v6030_v55 = vand.u32 4294901760, %v6029_v41  ;;  %6261 = vmatpush.msrb.mxu3 %v16018_v24 }
 0x576   :  { %v4876_v20 = vadd.f32 %v4875_v28, %v4790_v7  ;;  %v4960_v36 = vpop.f32.mrf.mxu2 }
 0x577   :  { %6031 = vmatpush.msrb.mxu1 %v6030_v55  ;;  %v20899_v55 = vld [vmem:[#allocation52_spill] sm:$0xff] }
 0x578   :  { %v4961_v62 = vadd.f32 %v4960_v36, %v4876_v20  ;;  %5530 = vmatmul.f32.gmra.mxu1 %v20894_v48  ;;  %v16027_v48 = vsub.f32 %v5813_v44, %v16018_v24  ;;  %v20896_v36 = vld [vmem:[#allocation47_spill] sm:$0xff] }
 0x579   :  { %5696 = vmatmul.f32.gmra.mxu3 %v15575_v57 }
 0x57a   :  { %v5086_v37 = vpop.f32.mrf.mxu0  ;;  %v16020_v7 = vadd.f32 %v5053_v38, %v4961_v62  ;;  %6161 = vmatpush.msrb.mxu2 %v16027_v48 }
 0x57b   :  { %5627 = vmatmul.f32.gmra.mxu2 %v15575_v57  ;;  %v5087_v28 = vadd.f32 %v5086_v37, %v15866_v18  ;;  %v20443_v57 = vand.u32 4294901760, %v16024_v47  ;;  %v20898_v18 = vld [vmem:[#allocation39_spill] sm:$0xff] }
 0x57c   :  { %20895 = vst [vmem:[#allocation45_spill] sm:$0xff] %v16020_v7  ;;  %v5357_v20 = vpop.f32.mrf.mxu3 }
 0x57d   :  { %5450 = vmatmul.f32.gmra.mxu0 %v20896_v36  ;;  %v5155_v38 = vpop.f32.mrf.mxu1  ;;  %v6035_v37 = vsub.f32 %v16024_v47, %v20443_v57  ;;  %v5812_v36 = vld [vmem:[#allocation4 + $0x30] sm:$0xff] }
 0x57e   :  { %v5156_v41 = vadd.f32 %v5155_v38, %v5087_v28  ;;  %v5228_v62 = vpop.f32.mrf.mxu2  ;;  %v20444_v28 = vand.u32 4294901760, %v16027_v48  ;;  %v16049_v32 = vand.u32 4294901760, %v5812_v36 }
 0x57f   :  { %v16037_v44 = vadd.f32 %v5357_v20, %v5228_v62  ;;  %v6036_v38 = vand.u32 4294901760, %v6035_v37  ;;  %v20900_v37 = vld [vmem:[#allocation53_spill] sm:$0xff] }
 0x580   :  { %v16044_v61 = vadd.f32 %v5156_v41, %v20898_v18  ;;  %5536 = vmatmul.f32.gmra.mxu1 %v20899_v55  ;;  %v6041_v62 = vsub.f32 %v16027_v48, %v20444_v28  ;;  %v16056_v41 = vsub.f32 %v5812_v36, %v16049_v32  ;;  %5880 = vmatpush.msrb.mxu0 %v16049_v32  ;;  %v20902_v36 = vld [vmem:[#allocation14_spill] sm:$0xff] }
 0x581   :  { %20897 = vst [vmem:[#allocation31_spill] sm:$0xff] %v16037_v44  ;;  %5700 = vmatmul.f32.gmra.mxu3 %v15605_v10  ;;  %6037 = vmatpush.msrb.mxu1 %v6036_v38 }
 0x582   :  { %v5090_v20 = vpop.f32.mrf.mxu0  ;;  %v6042_v57 = vand.u32 4294901760, %v6041_v62  ;;  %6263 = vmatpush.msrb.mxu3 %v16049_v32  ;;  %6164 = vmatpush.msrb.mxu2 %v16056_v41  ;;  %v5811_v62 = vld [vmem:[#allocation4 + $0x28] sm:$0xff] }
 0x583   :  { %5631 = vmatmul.f32.gmra.mxu2 %v15605_v10  ;;  %v5091_v18 = vadd.f32 %v5090_v20, %v15872_v2  ;;  %v20903_v2 = vld [vmem:[#allocation58_spill] sm:$0xff]  ;;  %v20445_v20 = vand.u32 4294901760, %v16056_v41  ;;  %v16071_v15 = vand.u32 4294901760, %v5811_v62 }
 0x584   :  { %v5361_v55 = vpop.f32.mrf.mxu3  ;;  %6043 = vmatpush.msrb.mxu1 %v6042_v57 }
 0x585   :  { %5455 = vmatmul.f32.gmra.mxu0 %v20900_v37  ;;  %v5159_v50 = vpop.f32.mrf.mxu1  ;;  %6265 = vmatpush.msrb.mxu3 %v16071_v15 }
 0x586   :  { %v5160_v28 = vadd.f32 %v5159_v50, %v5091_v18  ;;  %v5236_v35 = vpop.f32.mrf.mxu2  ;;  %v6047_v50 = vsub.f32 %v16056_v41, %v20445_v20  ;;  %5882 = vmatpush.msrb.mxu0 %v16071_v15  ;;  %v5810_v20 = vld [vmem:[#allocation4 + $0x20] sm:$0xff] }
 0x587   :  { %v16063_v10 = vadd.f32 %v5361_v55, %v5236_v35  ;;  %v16078_v35 = vsub.f32 %v5811_v62, %v16071_v15  ;;  %v20904_v55 = vld [vmem:[#allocation51_spill] sm:$0xff]  ;;  %v16086_v62 = vand.u32 4294901760, %v5810_v20 }
 0x588   :  { %v16066_v38 = vadd.f32 %v5160_v28, %v20902_v36  ;;  %5542 = vmatmul.f32.gmra.mxu1 %v20903_v2  ;;  %v6048_v18 = vand.u32 4294901760, %v6047_v50  ;;  %v20906_v50 = vld [vmem:[#allocation30_spill] sm:$0xff] }
 0x589   :  { %20901 = vst [vmem:[#allocation46_spill] sm:$0xff] %v16063_v10  ;;  %5704 = vmatmul.f32.gmra.mxu3 %v15639_v25  ;;  %6167 = vmatpush.msrb.mxu2 %v16078_v35  ;;  %v20446_v2 = vand.u32 4294901760, %v16078_v35  ;;  %v16098_v10 = vsub.f32 %v5810_v20, %v16086_v62 }
 0x58a   :  { %v5094_v37 = vpop.f32.mrf.mxu0  ;;  %6049 = vmatpush.msrb.mxu1 %v6048_v18  ;;  %5884 = vmatpush.msrb.mxu0 %v16086_v62 }
 0x58b   :  { %5635 = vmatmul.f32.gmra.mxu2 %v15639_v25  ;;  %v5095_v57 = vadd.f32 %v5094_v37, %v15878_v26  ;;  %v6053_v26 = vsub.f32 %v16078_v35, %v20446_v2  ;;  %v5809_v37 = vld [vmem:[#allocation4 + $0x18] sm:$0xff]  ;;  %6267 = vmatpush.msrb.mxu3 %v16086_v62 }
 0x58c   :  { %v5365_v28 = vpop.f32.mrf.mxu3  ;;  %6170 = vmatpush.msrb.mxu2 %v16098_v10 }
 0x58d   :  { %5460 = vmatmul.f32.gmra.mxu0 %v20904_v55  ;;  %v5163_v36 = vpop.f32.mrf.mxu1 }
 0x58e   :  { %v5164_v25 = vadd.f32 %v5163_v36, %v5095_v57  ;;  %v5244_v1 = vpop.f32.mrf.mxu2  ;;  %v16101_v57 = vand.u32 4294901760, %v5809_v37  ;;  %v20447_v36 = vand.u32 4294901760, %v16098_v10 }
 0x58f   :  { %v16088_v5 = vadd.f32 %v5365_v28, %v5244_v1  ;;  %v6054_v1 = vand.u32 4294901760, %v6053_v26  ;;  %v5808_v28 = vld [vmem:[#allocation4 + $0x10] sm:$0xff] }
 0x590   :  { %v16094_v55 = vadd.f32 %v5164_v25, %v20906_v50  ;;  %5548 = vmatmul.f32.gmra.mxu1 %v20907_v60  ;;  %v16108_v60 = vsub.f32 %v5809_v37, %v16101_v57  ;;  %v16110_v20 = vand.u32 4294901760, %v5808_v28  ;;  %v5807_v25 = vld [vmem:[#allocation4 + $0x8] sm:$0xff]  ;;  %v6059_v2 = vsub.f32 %v16098_v10, %v20447_v36  ;;  %5886 = vmatpush.msrb.mxu0 %v16101_v57 }
 0x591   :  { %20905 = vst [vmem:[#allocation17_spill] sm:$0xff] %v16088_v5  ;;  %5708 = vmatmul.f32.gmra.mxu3 %v15669_v13  ;;  %6055 = vmatpush.msrb.mxu1 %v6054_v1  ;;  %v5806_v1 = vld [vmem:[#allocation4] sm:$0xff] }
 0x592   :  { %v5098_v18 = vpop.f32.mrf.mxu0  ;;  %6173 = vmatpush.msrb.mxu2 %v16108_v60  ;;  %v20448_v37 = vand.u32 4294901760, %v16108_v60  ;;  %v16121_v5 = vsub.f32 %v5808_v28, %v16110_v20  ;;  %6269 = vmatpush.msrb.mxu3 %v16101_v57  ;;  %v6060_v36 = vand.u32 4294901760, %v6059_v2  ;;  %v20910_v2 = vld [vmem:[#allocation40_spill] sm:$0xff] }
 0x593   :  { %5639 = vmatmul.f32.gmra.mxu2 %v15669_v13  ;;  %v5099_v50 = vadd.f32 %v5098_v18, %v15884_v27  ;;  %v16125_v27 = vand.u32 4294901760, %v5807_v25  ;;  %5888 = vmatpush.msrb.mxu0 %v16110_v20 }
 0x594   :  { %v5369_v26 = vpop.f32.mrf.mxu3  ;;  %v6065_v7 = vsub.f32 %v16108_v60, %v20448_v37  ;;  %6176 = vmatpush.msrb.mxu2 %v16121_v5  ;;  %6271 = vmatpush.msrb.mxu3 %v16110_v20 }
 0x595   :  { %5465 = vmatmul.f32.gmra.mxu0 %v15681_v46  ;;  %v5167_v13 = vpop.f32.mrf.mxu1  ;;  %20908 = vst [vmem:[#allocation35_spill] sm:$0xff] %v16125_v27  ;;  %v20450_v46 = vand.u32 4294901760, %v16121_v5  ;;  %v16137_v40 = vsub.f32 %v5807_v25, %v16125_v27  ;;  %6061 = vmatpush.msrb.mxu1 %v6060_v36 }
 0x596   :  { %v5168_v18 = vadd.f32 %v5167_v13, %v5099_v50  ;;  %v5252_v44 = vpop.f32.mrf.mxu2  ;;  %v16139_v50 = vand.u32 4294901760, %v5806_v1  ;;  %v6066_v37 = vand.u32 4294901760, %v6065_v7  ;;  %5890 = vmatpush.msrb.mxu0 %v16125_v27  ;;  %6273 = vmatpush.msrb.mxu3 %v16125_v27 }
 0x597   :  { %v16132_v28 = vadd.f32 %v5369_v26, %v5252_v44  ;;  %v6071_v44 = vsub.f32 %v16121_v5, %v20450_v46  ;;  %v20449_v26 = vand.u32 4294901760, %v16137_v40  ;;  %6179 = vmatpush.msrb.mxu2 %v16137_v40 }
 0x598   :  { %v16142_v13 = vadd.f32 %v5168_v18, %v20910_v2  ;;  %5554 = vmatmul.f32.gmra.mxu1 %v20911_v30  ;;  %v16151_v25 = vsub.f32 %v5806_v1, %v16139_v50  ;;  %v16164_v1 = vld [vmem:[%s20362_s2] sm:$0x3]  ;;  %6275 = vmatpush.msrb.mxu3 %v16139_v50 }
 0x599   :  { %20909 = vst [vmem:[#allocation29_spill] sm:$0xff] %v16132_v28  ;;  %5712 = vmatmul.f32.gmra.mxu3 %v15697_v53  ;;  %6067 = vmatpush.msrb.mxu1 %v6066_v37  ;;  %v6072_v30 = vand.u32 4294901760, %v6071_v44  ;;  %v6077_v7 = vsub.f32 %v16137_v40, %v20449_v26 }
 0x59a   :  { %v5102_v28 = vpop.f32.mrf.mxu0  ;;  %v6082_v36 = vand.u32 4294901760, %v16151_v25  ;;  %6182 = vmatpush.msrb.mxu2 %v16151_v25  ;;  %5892 = vmatpush.msrb.mxu0 %v16139_v50 }
 0x59b   :  { %5643 = vmatmul.f32.gmra.mxu2 %v15697_v53  ;;  %v5103_v18 = vadd.f32 %v5102_v28, %v15890_v29  ;;  %6073 = vmatpush.msrb.mxu1 %v6072_v30  ;;  %v6078_v37 = vand.u32 4294901760, %v6077_v7  ;;  %v16175_v29 = vperm.slane %v16164_v1, 0  ;;  %v20913_v30 = vld [vmem:[#allocation23_spill] sm:$0xff] }
 0x59c   :  { %v5373_v2 = vpop.f32.mrf.mxu3  ;;  %v6083_v44 = vsub.f32 %v16151_v25, %v6082_v36 }
 0x59d   :  { %5470 = vmatmul.f32.gmra.mxu0 %v15712_v17  ;;  %v5171_v53 = vpop.f32.mrf.mxu1  ;;  %6079 = vmatpush.msrb.mxu1 %v6078_v37  ;;  %v20912_v17 = vand.u32 4294901760, %v15897_v4 }
 0x59e   :  { %v5172_v26 = vadd.f32 %v5171_v53, %v5103_v18  ;;  %v5260_v46 = vpop.f32.mrf.mxu2  ;;  %v6084_v27 = vand.u32 4294901760, %v6083_v44  ;;  %v20914_v53 = vand.u32 4294901760, %v15915_v23  ;;  %v20916_v23 = vand.u32 4294901760, %v15950_v3 }
 0x59f   :  { %v16177_v28 = vadd.f32 %v5373_v2, %v5260_v46  ;;  %6352 = vmatpush.msra.mxu0 %v20912_v17  ;;  %v5758_v46 = vadd.f32 %v16175_v29, %v16044_v61  ;;  %v20919_v3 = vand.u32 4294901760, %v15986_v31  ;;  %v5760_v17 = vadd.f32 %v16175_v29, %v16066_v38 }
 0x5a0   :  { %v16182_v7 = vadd.f32 %v5172_v26, %v20913_v30  ;;  %5560 = vmatmul.f32.gmra.mxu1 %v15730_v0  ;;  %v20915_v0 = vand.u32 4294901760, %v15932_v8  ;;  %v20918_v8 = vand.u32 4294901760, %v15963_v34  ;;  %v20921_v31 = vand.u32 4294901760, %v16004_v59  ;;  %v20924_v59 = vld [vmem:[#allocation19_spill] sm:$0xff] }
 0x5a1   :  { %5716 = vmatmul.f32.gmra.mxu3 %v15732_v6  ;;  %6085 = vmatpush.msrb.mxu1 %v6084_v27  ;;  %v5782_v61 = vmax.f32 %v5758_v46, 0.0 }
 0x5a2   :  { %v5106_v18 = vpop.f32.mrf.mxu0  ;;  %6356 = vmatpush.msra.mxu0 %v20914_v53 }
 0x5a3   :  { %6463 = vmatpush.msra.mxu1 %v15894_v19  ;;  %5647 = vmatmul.f32.gmra.mxu2 %v15732_v6  ;;  %v5107_v4 = vadd.f32 %v5106_v18, %v15905_v42  ;;  %v20917_v42 = vld [vmem:[#allocation33_spill] sm:$0xff]  ;;  %v16214_v44 = vand.u32 4294901760, %v5782_v61  ;;  %v5784_v18 = vmax.f32 %v5760_v17, 0.0 }
 0x5a4   :  { %v5377_v26 = vpop.f32.mrf.mxu3  ;;  %6360 = vmatpush.msra.mxu0 %v20915_v0 }
 0x5a5   :  { %6465 = vmatpush.msra.mxu1 %v15911_v58  ;;  %5475 = vmatmul.f32.gmra.mxu0 %v15748_v45  ;;  %v5175_v27 = vpop.f32.mrf.mxu1  ;;  %v5823_v58 = vld [vmem:[#allocation4 + $0x88] sm:$0xff]  ;;  %20920 = vst [vmem:[#allocation18_spill] sm:$0xff] %v16214_v44 }
 0x5a6   :  { %v5176_v19 = vadd.f32 %v5175_v27, %v5107_v4  ;;  %v5268_v2 = vpop.f32.mrf.mxu2  ;;  %6364 = vmatpush.msra.mxu0 %v20916_v23  ;;  %v16209_v45 = vand.u32 4294901760, %v5823_v58 }
 0x5a7   :  { %6467 = vmatpush.msra.mxu1 %v15923_v14  ;;  %v16200_v6 = vadd.f32 %v5377_v26, %v5268_v2  ;;  %v16251_v26 = vand.u32 4294901760, %v5784_v18 }
 0x5a8   :  { %v16203_v37 = vadd.f32 %v5176_v19, %v20917_v42  ;;  %5566 = vmatmul.f32.gmra.mxu1 %v15759_v11  ;;  %6368 = vmatpush.msra.mxu0 %v20918_v8  ;;  %v20929_v19 = vand.u32 4294901760, %v16078_v35  ;;  %v20934_v42 = vand.u32 4294901760, %v16121_v5  ;;  %v20938_v5 = vand.u32 4294901760, %v16137_v40 }
 0x5a9   :  { %5720 = vmatmul.f32.gmra.mxu3 %v15761_v9  ;;  %6469 = vmatpush.msra.mxu1 %v15944_v49  ;;  %v16223_v49 = vsub.f32 %v5823_v58, %v16209_v45  ;;  %20927 = vst [vmem:[#allocation34_spill] sm:$0xff] %v16251_v26 }
 0x5aa   :  { %v5110_v14 = vpop.f32.mrf.mxu0  ;;  %6372 = vmatpush.msra.mxu0 %v20919_v3  ;;  %6558 = vmatpush.msra.mxu2 %v16209_v45 }
 0x5ab   :  { %5651 = vmatmul.f32.gmra.mxu2 %v15761_v9  ;;  %6471 = vmatpush.msra.mxu1 %v15957_v56  ;;  %v5111_v11 = vadd.f32 %v5110_v14, %v15928_v43  ;;  %v20922_v56 = vand.u32 4294901760, %v16024_v47  ;;  %v16232_v43 = vsub.f32 %v5782_v61, %v16214_v44 }
 0x5ac   :  { %v5381_v34 = vpop.f32.mrf.mxu3  ;;  %6376 = vmatpush.msra.mxu0 %v20921_v31  ;;  %v5766_v31 = vadd.f32 %v16175_v29, %v16182_v7 }
 0x5ad   :  { %5480 = vmatmul.f32.gmra.mxu0 %v15775_v54  ;;  %v5179_v30 = vpop.f32.mrf.mxu1  ;;  %6473 = vmatpush.msra.mxu1 %v15977_v22  ;;  %20923 = vst [vmem:[#allocation24_spill] sm:$0xff] %v16232_v43  ;;  %v6674_v54 = vand.u32 4294901760, %v16223_v49  ;;  %v20925_v22 = vand.u32 4294901760, %v16027_v48  ;;  %v16257_v48 = vand.u32 4294901760, %v16232_v43 }
 0x5ae   :  { %v5180_v38 = vadd.f32 %v5179_v30, %v5111_v11  ;;  %v5276_v9 = vpop.f32.mrf.mxu2  ;;  %6380 = vmatpush.msra.mxu0 %v20922_v56 }
 0x5af   :  { %v16234_v53 = vadd.f32 %v5381_v34, %v5276_v9  ;;  %6475 = vmatpush.msra.mxu1 %v15995_v63  ;;  %v6675_v4 = vsub.f32 %v16223_v49, %v6674_v54  ;;  %v20926_v63 = vand.u32 4294901760, %v16056_v41  ;;  %20928 = vst [vmem:[#allocation15_spill] sm:$0xff] %v16257_v48  ;;  %v5896_v35 = vsub.f32 %v16232_v43, %v16257_v48  ;;  %v20941_v34 = vld [vmem:[#allocation44_spill] sm:$0xff]  ;;  %v20945_v9 = vld [vmem:[#allocation42_spill] sm:$0xff] }
 0x5b0   :  { %v16238_v46 = vadd.f32 %v5180_v38, %v20924_v59  ;;  %5572 = vmatmul.f32.gmra.mxu1 %v15785_v33  ;;  %6384 = vmatpush.msra.mxu0 %v20925_v22  ;;  %v5762_v33 = vadd.f32 %v16175_v29, %v16094_v55 }
 0x5b1   :  { %5724 = vmatmul.f32.gmra.mxu3 %v15787_v16  ;;  %6477 = vmatpush.msra.mxu1 %v16016_v39  ;;  %v6676_v27 = vand.u32 4294901760, %v6675_v4  ;;  %v16290_v8 = vand.u32 4294901760, %v5896_v35  ;;  %v5790_v4 = vmax.f32 %v5766_v31, 0.0 }
 0x5b2   :  { %v5114_v47 = vpop.f32.mrf.mxu0  ;;  %6388 = vmatpush.msra.mxu0 %v20926_v63 }
 0x5b3   :  { %5655 = vmatmul.f32.gmra.mxu2 %v15787_v16  ;;  %6479 = vmatpush.msra.mxu1 %v16018_v24  ;;  %v5115_v39 = vadd.f32 %v5114_v47, %v15946_v52  ;;  %v20930_v16 = vand.u32 4294901760, %v16098_v10  ;;  %v16268_v24 = vsub.f32 %v5784_v18, %v16251_v26  ;;  %v5786_v52 = vmax.f32 %v5762_v33, 0.0  ;;  %20936 = vst [vmem:[#allocation49_spill] sm:$0xff] %v16290_v8  ;;  %v20947_v33 = vld [vmem:[#allocation41_spill] sm:$0xff] }
 0x5b4   :  { %v5385_v0 = vpop.f32.mrf.mxu3  ;;  %6392 = vmatpush.msra.mxu0 %v20929_v19  ;;  %6677 = vmatpush.msra.mxu3 %v6676_v27  ;;  %v16343_v27 = vand.u32 4294901760, %v5790_v4  ;;  %v5768_v19 = vadd.f32 %v16175_v29, %v16203_v37 }
 0x5b5   :  { %5485 = vmatmul.f32.gmra.mxu0 %v15798_v12  ;;  %v5183_v41 = vpop.f32.mrf.mxu1  ;;  %6481 = vmatpush.msra.mxu1 %v16049_v32  ;;  %20931 = vst [vmem:[#allocation37_spill] sm:$0xff] %v16268_v24  ;;  %v20932_v12 = vld [vmem:[#allocation43_spill] sm:$0xff]  ;;  %v20933_v32 = vand.u32 4294901760, %v16108_v60  ;;  %v16285_v58 = vand.u32 4294901760, %v5786_v52 }
 0x5b6   :  { %v5184_v55 = vadd.f32 %v5183_v41, %v5115_v39  ;;  %v5284_v2 = vpop.f32.mrf.mxu2  ;;  %6396 = vmatpush.msra.mxu0 %v20930_v16  ;;  %20948 = vst [vmem:[#allocation51_spill] sm:$0xff] %v16343_v27 }
 0x5b7   :  { %v16270_v23 = vadd.f32 %v5385_v0, %v5284_v2  ;;  %6483 = vmatpush.msra.mxu1 %v16071_v15  ;;  %20935 = vst [vmem:[#allocation27_spill] sm:$0xff] %v16285_v58  ;;  %v5764_v15 = vadd.f32 %v16175_v29, %v16142_v13  ;;  %v16304_v17 = vsub.f32 %v5786_v52, %v16285_v58  ;;  %v20951_v2 = vld [vmem:[#allocation16_spill] sm:$0xff] }
 0x5b8   :  { %v16276_v61 = vadd.f32 %v5184_v55, %v20932_v12  ;;  %5578 = vmatmul.f32.gmra.mxu1 %v15805_v21  ;;  %6400 = vmatpush.msra.mxu0 %v20933_v32  ;;  %v16293_v21 = vand.u32 4294901760, %v16268_v24 }
 0x5b9   :  { %6279 = vmatmul.f32.vlgmr.msrb.gmra.mxu3 %v16257_v48  ;;  %6485 = vmatpush.msra.mxu1 %v16086_v62  ;;  %20939 = vst [vmem:[#allocation39_spill] sm:$0xff] %v16304_v17  ;;  %v16327_v38 = vand.u32 4294901760, %v16304_v17 }
 0x5ba   :  { %v5118_v10 = vpop.f32.mrf.mxu0  ;;  %6404 = vmatpush.msra.mxu0 %v20934_v42  ;;  %20937 = vst [vmem:[#allocation47_spill] sm:$0xff] %v16293_v21  ;;  %v5904_v40 = vsub.f32 %v16268_v24, %v16293_v21  ;;  %v5792_v42 = vmax.f32 %v5768_v19, 0.0 }
 0x5bb   :  { %6185 = vmatmul.f32.vlgmr.msrb.gmra.mxu2 %v16232_v43  ;;  %6487 = vmatpush.msra.mxu1 %v16101_v57  ;;  %v5119_v62 = vadd.f32 %v5118_v10, %v15970_v51  ;;  %v5788_v57 = vmax.f32 %v5764_v15, 0.0  ;;  %v20940_v51 = vld [vmem:[#allocation35_spill] sm:$0xff]  ;;  %20944 = vst [vmem:[#allocation14_spill] sm:$0xff] %v16327_v38  ;;  %v5912_v63 = vsub.f32 %v16304_v17, %v16327_v38 }
 0x5bc   :  { %v5389_v60 = vpop.f32.mrf.mxu3  ;;  %6408 = vmatpush.msra.mxu0 %v20938_v5  ;;  %v16324_v30 = vand.u32 4294901760, %v5904_v40  ;;  %v16356_v10 = vsub.f32 %v5790_v4, %v16343_v27  ;;  %v5770_v5 = vadd.f32 %v16175_v29, %v16238_v46  ;;  %v20957_v40 = vld [vmem:[#allocation45_spill] sm:$0xff] }
 0x5bd   :  { %5898 = vmatmul.f32.vlgmr.msrb.gmra.mxu0 %v16290_v8  ;;  %v5187_v14 = vpop.f32.mrf.mxu1  ;;  %6489 = vmatpush.msra.mxu1 %v16110_v20  ;;  %v16348_v41 = vand.u32 4294901760, %v5912_v63 }
 0x5be   :  { %v5188_v13 = vadd.f32 %v5187_v14, %v5119_v62  ;;  %v5292_v3 = vpop.f32.mrf.mxu2  ;;  %6412 = vmatpush.msra.mxu0 %v6082_v36  ;;  %v16319_v36 = vand.u32 4294901760, %v5788_v57  ;;  %20943 = vst [vmem:[#allocation53_spill] sm:$0xff] %v16324_v30  ;;  %v20953_v62 = vld [vmem:[#allocation50_spill] sm:$0xff]  ;;  %v5794_v31 = vmax.f32 %v5770_v5, 0.0 }
 0x5bf   :  { %v16306_v11 = vadd.f32 %v5389_v60, %v5292_v3  ;;  %6491 = vmatpush.msra.mxu1 %v20940_v51  ;;  %20949 = vst [vmem:[#allocation30_spill] sm:$0xff] %v16348_v41 }
 0x5c0   :  { %6749 = vmatpush.msrb.mxu0 %v16223_v49  ;;  %v16313_v20 = vadd.f32 %v5188_v13, %v20941_v34  ;;  %6087 = vmatmul.f32.vlgmr.msrb.gmra.mxu1 %v16214_v44  ;;  %20942 = vst [vmem:[#allocation52_spill] sm:$0xff] %v16319_v36  ;;  %v16332_v47 = vsub.f32 %v5788_v57, %v16319_v36  ;;  %v16369_v13 = vand.u32 4294901760, %v5792_v42  ;;  %v16375_v57 = vand.u32 4294901760, %v16356_v10  ;;  %v20969_v49 = vld [vmem:[#allocation46_spill] sm:$0xff] }
 0x5c1   :  { %6285 = vmatmul.f32.gmra.mxu3 %v16293_v21  ;;  %6493 = vmatpush.msra.mxu1 %v16139_v50  ;;  %20952 = vst [vmem:[#allocation40_spill] sm:$0xff] %v16356_v10  ;;  %v16391_v4 = vand.u32 4294901760, %v5794_v31  ;;  %v7057_v21 = vld [vmem:[#allocation4 + $0xf8] sm:$0xff] }
 0x5c2   :  { %v5122_v25 = vpop.f32.mrf.mxu0  ;;  %20946 = vst [vmem:[#allocation58_spill] sm:$0xff] %v16332_v47  ;;  %v16351_v55 = vand.u32 4294901760, %v16332_v47  ;;  %v16380_v46 = vsub.f32 %v5792_v42, %v16369_v13 }
 0x5c3   :  { %6829 = vmatpush.msrb.mxu1 %v16209_v45  ;;  %6190 = vmatmul.f32.gmra.mxu2 %v16268_v24  ;;  %v5123_v56 = vadd.f32 %v5122_v25, %v20945_v9  ;;  %20954 = vst [vmem:[#allocation25_spill] sm:$0xff] %v16369_v13 }
 0x5c4   :  { %v5393_v18 = vpop.f32.mrf.mxu3  ;;  %20950 = vst [vmem:[#allocation32_spill] sm:$0xff] %v16351_v55  ;;  %v5920_v15 = vsub.f32 %v16332_v47, %v16351_v55  ;;  %v16399_v19 = vand.u32 4294901760, %v16380_v46 }
 0x5c5   :  { %5906 = vmatmul.f32.gmra.mxu0 %v16324_v30  ;;  %v5191_v50 = vpop.f32.mrf.mxu1  ;;  %20956 = vst [vmem:[#allocation33_spill] sm:$0xff] %v16375_v57 }
 0x5c6   :  { %v5192_v59 = vadd.f32 %v5191_v50, %v5123_v56  ;;  %v5300_v22 = vpop.f32.mrf.mxu2  ;;  %v16372_v3 = vand.u32 4294901760, %v5920_v15  ;;  %20958 = vst [vmem:[#allocation19_spill] sm:$0xff] %v16380_v46  ;;  %v5928_v50 = vsub.f32 %v16356_v10, %v16375_v57  ;;  %v5936_v5 = vsub.f32 %v16380_v46, %v16399_v19 }
 0x5c7   :  { %v16334_v7 = vadd.f32 %v5393_v18, %v5300_v22  ;;  %20960 = vst [vmem:[#allocation43_spill] sm:$0xff] %v16391_v4 }
 0x5c8   :  { %v16339_v39 = vadd.f32 %v5192_v59, %v20947_v33  ;;  %6091 = vmatmul.f32.gmra.mxu1 %v16251_v26  ;;  %20955 = vst [vmem:[#allocation23_spill] sm:$0xff] %v16372_v3  ;;  %v20959_v59 = vld [vmem:[#allocation54_spill] sm:$0xff]  ;;  %v5772_v33 = vadd.f32 %v16175_v29, %v16276_v61 }
 0x5c9   :  { %6291 = vmatmul.f32.gmra.mxu3 %v16327_v38  ;;  %20962 = vst [vmem:[#allocation44_spill] sm:$0xff] %v16399_v19 }
 0x5ca   :  { %v5126_v0 = vpop.f32.mrf.mxu0 }
 0x5cb   :  { %6195 = vmatmul.f32.gmra.mxu2 %v16304_v17  ;;  %v5127_v16 = vadd.f32 %v5126_v0, %v20951_v2  ;;  %v16396_v0 = vand.u32 4294901760, %v5928_v50  ;;  %v20963_v2 = vld [vmem:[#allocation31_spill] sm:$0xff] }
 0x5cc   :  { %v5397_v52 = vpop.f32.mrf.mxu3 }
 0x5cd   :  { %5914 = vmatmul.f32.gmra.mxu0 %v16348_v41  ;;  %v5195_v35 = vpop.f32.mrf.mxu1  ;;  %20961 = vst [vmem:[#allocation35_spill] sm:$0xff] %v16396_v0 }
 0x5ce   :  { %v5196_v12 = vadd.f32 %v5195_v35, %v5127_v16  ;;  %v5308_v32 = vpop.f32.mrf.mxu2 }
 0x5cf   :  { %v16358_v37 = vadd.f32 %v5397_v52, %v5308_v32  ;;  %v16404_v32 = vsub.f32 %v5794_v31, %v16391_v4  ;;  %v5774_v31 = vadd.f32 %v16175_v29, %v16313_v20 }
 0x5d0   :  { %v16363_v60 = vadd.f32 %v5196_v12, %v20953_v62  ;;  %6095 = vmatmul.f32.gmra.mxu1 %v16285_v58  ;;  %v5822_v12 = vld [vmem:[#allocation4 + $0x80] sm:$0xff]  ;;  %v5796_v62 = vmax.f32 %v5772_v33, 0.0 }
 0x5d1   :  { %6297 = vmatmul.f32.gmra.mxu3 %v16351_v55  ;;  %20964 = vst [vmem:[#allocation42_spill] sm:$0xff] %v16404_v32  ;;  %v6559_v61 = vand.u32 4294901760, %v5822_v12 }
 0x5d2   :  { %v5130_v14 = vpop.f32.mrf.mxu0 }
 0x5d3   :  { %6200 = vmatmul.f32.gmra.mxu2 %v16332_v47  ;;  %v5131_v51 = vadd.f32 %v5130_v14, %v20957_v40  ;;  %6831 = vmatpush.msrb.mxu1 %v6559_v61  ;;  %v6679_v33 = vsub.f32 %v5822_v12, %v6559_v61 }
 0x5d4   :  { %v5401_v34 = vpop.f32.mrf.mxu3  ;;  %6560 = vmatpush.msra.mxu2 %v6559_v61 }
 0x5d5   :  { %5922 = vmatmul.f32.gmra.mxu0 %v16372_v3  ;;  %v5199_v25 = vpop.f32.mrf.mxu1 }
 0x5d6   :  { %v5200_v9 = vadd.f32 %v5199_v25, %v5131_v51  ;;  %v5316_v56 = vpop.f32.mrf.mxu2  ;;  %6922 = vmatpush.msrb.mxu2 %v6674_v54  ;;  %v16415_v25 = vand.u32 4294901760, %v5796_v62  ;;  %6752 = vmatpush.msrb.mxu0 %v6679_v33 }
 0x5d7   :  { %v16382_v18 = vadd.f32 %v5401_v34, %v5316_v56  ;;  %v16413_v34 = vand.u32 4294901760, %v16404_v32  ;;  %v20968_v56 = vld [vmem:[#allocation20_spill] sm:$0xff] }
 0x5d8   :  { %v16387_v22 = vadd.f32 %v5200_v9, %v20959_v59  ;;  %6099 = vmatmul.f32.gmra.mxu1 %v16319_v36  ;;  %20966 = vst [vmem:[#allocation16_spill] sm:$0xff] %v16415_v25  ;;  %v16420_v9 = vand.u32 4294901760, %v5936_v5  ;;  %v16430_v20 = vsub.f32 %v5796_v62, %v16415_v25  ;;  %v5776_v62 = vadd.f32 %v16175_v29, %v16339_v39 }
 0x5d9   :  { %6303 = vmatmul.f32.gmra.mxu3 %v16375_v57  ;;  %20965 = vst [vmem:[#allocation41_spill] sm:$0xff] %v16413_v34 }
 0x5da   :  { %v5431_v63 = vpop.f32.mrf.mxu0  ;;  %20967 = vst [vmem:[#allocation50_spill] sm:$0xff] %v16420_v9 }
 0x5db   :  { %6205 = vmatmul.f32.gmra.mxu2 %v16356_v10  ;;  %v5432_v16 = vadd.f32 %v5431_v63, %v20963_v2  ;;  %20970 = vst [vmem:[#allocation45_spill] sm:$0xff] %v16430_v20 }
 0x5dc   :  { %v5681_v52 = vpop.f32.mrf.mxu3 }
 0x5dd   :  { %5930 = vmatmul.f32.gmra.mxu0 %v16396_v0  ;;  %v5513_v35 = vpop.f32.mrf.mxu1 }
 0x5de   :  { %v5514_v42 = vadd.f32 %v5513_v35, %v5432_v16  ;;  %v5612_v15 = vpop.f32.mrf.mxu2  ;;  %v5798_v35 = vmax.f32 %v5774_v31, 0.0  ;;  %v16442_v31 = vand.u32 4294901760, %v16430_v20 }
 0x5e0   :  { %v5613_v14 = vadd.f32 %v5612_v15, %v5514_v42  ;;  %6103 = vmatmul.f32.gmra.mxu1 %v16343_v27  ;;  %v6680_v42 = vand.u32 4294901760, %v6679_v33  ;;  %20973 = vst [vmem:[#allocation20_spill] sm:$0xff] %v16442_v31 }
 0x5e1   :  { %6309 = vmatmul.f32.gmra.mxu3 %v16399_v19 }
 0x5e2   :  { %v5682_v40 = vadd.f32 %v5681_v52, %v5613_v14  ;;  %v5436_v51 = vpop.f32.mrf.mxu0  ;;  %v5944_v52 = vsub.f32 %v16404_v32, %v16413_v34  ;;  %v6681_v5 = vsub.f32 %v6679_v33, %v6680_v42  ;;  %6926 = vmatpush.msrb.mxu2 %v6680_v42  ;;  %v5800_v42 = vmax.f32 %v5776_v62, 0.0 }
 0x5e3   :  { %6210 = vmatmul.f32.gmra.mxu2 %v16380_v46  ;;  %v5437_v54 = vadd.f32 %v5436_v51, %v20969_v49  ;;  %v16436_v51 = vand.u32 4294901760, %v5798_v35  ;;  %v20974_v49 = vld [vmem:[#allocation55_spill] sm:$0xff] }
 0x5e4   :  { %v16423_v50 = vadd.f32 %v5682_v40, %v20968_v56  ;;  %v5685_v59 = vpop.f32.mrf.mxu3  ;;  %v16434_v40 = vand.u32 4294901760, %v5944_v52  ;;  %v6682_v56 = vand.u32 4294901760, %v6681_v5 }
 0x5e5   :  { %5938 = vmatmul.f32.gmra.mxu0 %v16420_v9  ;;  %v5519_v63 = vpop.f32.mrf.mxu1  ;;  %20972 = vst [vmem:[#allocation31_spill] sm:$0xff] %v16436_v51  ;;  %v16451_v39 = vsub.f32 %v5798_v35, %v16436_v51 }
 0x5e6   :  { %v5520_v2 = vadd.f32 %v5519_v63, %v5437_v54  ;;  %v5616_v16 = vpop.f32.mrf.mxu2  ;;  %20971 = vst [vmem:[#allocation54_spill] sm:$0xff] %v16434_v40  ;;  %v20975_v63 = vld [vmem:[#allocation17_spill] sm:$0xff]  ;;  %6683 = vmatpush.msra.mxu3 %v6682_v56  ;;  %v16457_v56 = vand.u32 4294901760, %v5800_v42 }
 0x5e7   :  { %20976 = vst [vmem:[#allocation46_spill] sm:$0xff] %v16451_v39  ;;  %v16465_v62 = vand.u32 4294901760, %v16451_v39 }
 0x5e8   :  { %v5617_v15 = vadd.f32 %v5616_v16, %v5520_v2  ;;  %6107 = vmatmul.f32.gmra.mxu1 %v16369_v13  ;;  %6991 = vmatpush.msrb.mxu3 %v16209_v45  ;;  %20977 = vst [vmem:[#allocation55_spill] sm:$0xff] %v16457_v56  ;;  %v5778_v45 = vadd.f32 %v16175_v29, %v16363_v60 }
 0x5e9   :  { %6315 = vmatmul.f32.gmra.mxu3 %v16413_v34  ;;  %20979 = vst [vmem:[#allocation59_spill] sm:$0xff] %v16465_v62  ;;  %v16473_v60 = vsub.f32 %v5800_v42, %v16457_v56  ;;  %v5780_v42 = vadd.f32 %v16175_v29, %v16387_v22 }
 0x5ea   :  { %v5686_v14 = vadd.f32 %v5685_v59, %v5617_v15  ;;  %v5441_v12 = vpop.f32.mrf.mxu0  ;;  %v5952_v15 = vsub.f32 %v16430_v20, %v16442_v31  ;;  %6993 = vmatpush.msrb.mxu3 %v6559_v61  ;;  %v20981_v61 = vld [vmem:[#allocation29_spill] sm:$0xff] }
 0x5eb   :  { %6215 = vmatmul.f32.gmra.mxu2 %v16404_v32  ;;  %v5442_v33 = vadd.f32 %v5441_v12, %v20975_v63 }
 0x5ec   :  { %v16445_v54 = vadd.f32 %v5686_v14, %v20974_v49  ;;  %v5689_v59 = vpop.f32.mrf.mxu3  ;;  %v16462_v35 = vand.u32 4294901760, %v5952_v15  ;;  %v20980_v49 = vld [vmem:[#allocation48_spill] sm:$0xff]  ;;  %v5960_v15 = vsub.f32 %v16451_v39, %v16465_v62 }
 0x5ed   :  { %5946 = vmatmul.f32.gmra.mxu0 %v16434_v40  ;;  %v5525_v2 = vpop.f32.mrf.mxu1  ;;  %20982 = vst [vmem:[#allocation48_spill] sm:$0xff] %v16473_v60 }
 0x5ee   :  { %v5526_v16 = vadd.f32 %v5525_v2, %v5442_v33  ;;  %v5620_v52 = vpop.f32.mrf.mxu2  ;;  %20978 = vst [vmem:[#allocation17_spill] sm:$0xff] %v16462_v35 }
 0x5f0   :  { %v5621_v5 = vadd.f32 %v5620_v52, %v5526_v16  ;;  %6111 = vmatmul.f32.gmra.mxu1 %v16391_v4 }
 0x5f1   :  { %6321 = vmatmul.f32.gmra.mxu3 %v16442_v31 }
 0x5f2   :  { %v5690_v14 = vadd.f32 %v5689_v59, %v5621_v5  ;;  %v5446_v12 = vpop.f32.mrf.mxu0  ;;  %v5802_v5 = vmax.f32 %v5778_v45, 0.0  ;;  %v16487_v45 = vand.u32 4294901760, %v5960_v15 }
 0x5f3   :  { %6220 = vmatmul.f32.gmra.mxu2 %v16430_v20  ;;  %v5447_v33 = vadd.f32 %v5446_v12, %v20981_v61 }
 0x5f4   :  { %v16468_v63 = vadd.f32 %v5690_v14, %v20980_v49  ;;  %v5693_v2 = vpop.f32.mrf.mxu3  ;;  %v16480_v14 = vperm.slane %v16164_v1, 1  ;;  %v16482_v61 = vand.u32 4294901760, %v5802_v5  ;;  %20984 = vst [vmem:[#allocation60_spill] sm:$0xff] %v16487_v45 }
 0x5f5   :  { %5954 = vmatmul.f32.gmra.mxu0 %v16462_v35  ;;  %v5531_v59 = vpop.f32.mrf.mxu1 }
 0x5f6   :  { %v5532_v16 = vadd.f32 %v5531_v59, %v5447_v33  ;;  %v5624_v52 = vpop.f32.mrf.mxu2  ;;  %20983 = vst [vmem:[#allocation29_spill] sm:$0xff] %v16482_v61  ;;  %v16490_v33 = vand.u32 4294901760, %v16473_v60  ;;  %v20986_v59 = vld [vmem:[#allocation13_spill] sm:$0xff]  ;;  %v16500_v15 = vsub.f32 %v5802_v5, %v16482_v61 }
 0x5f8   :  { %v5625_v20 = vadd.f32 %v5624_v52, %v5532_v16  ;;  %6115 = vmatmul.f32.gmra.mxu1 %v16415_v25  ;;  %20985 = vst [vmem:[#allocation61_spill] sm:$0xff] %v16490_v33  ;;  %v16512_v5 = vand.u32 4294901760, %v16500_v15 }
 0x5f9   :  { %6327 = vmatmul.f32.gmra.mxu3 %v16465_v62  ;;  %20987 = vst [vmem:[#allocation13_spill] sm:$0xff] %v16500_v15  ;;  %v5968_v62 = vsub.f32 %v16473_v60, %v16490_v33 }
 0x5fa   :  { %v5694_v12 = vadd.f32 %v5693_v2, %v5625_v20  ;;  %v5451_v49 = vpop.f32.mrf.mxu0  ;;  %v5759_v2 = vadd.f32 %v16480_v14, %v16423_v50  ;;  %20990 = vst [vmem:[#allocation64_spill] sm:$0xff] %v16512_v5 }
 0x5fb   :  { %6225 = vmatmul.f32.gmra.mxu2 %v16451_v39  ;;  %v5452_v1 = vadd.f32 %v5451_v49, %v16177_v28  ;;  %v5804_v39 = vmax.f32 %v5780_v42, 0.0  ;;  %v16509_v50 = vand.u32 4294901760, %v5968_v62  ;;  %v20991_v42 = vld [vmem:[#allocation56_spill] sm:$0xff] }
 0x5fc   :  { %v16493_v16 = vadd.f32 %v5694_v12, %v20986_v59  ;;  %v5697_v52 = vpop.f32.mrf.mxu3  ;;  %v5783_v28 = vmax.f32 %v5759_v2, 0.0 }
 0x5fd   :  { %5962 = vmatmul.f32.gmra.mxu0 %v16487_v45  ;;  %v5537_v20 = vpop.f32.mrf.mxu1  ;;  %v16506_v45 = vand.u32 4294901760, %v5804_v39  ;;  %20989 = vst [vmem:[#allocation63_spill] sm:$0xff] %v16509_v50 }
 0x5fe   :  { %v5538_v29 = vadd.f32 %v5537_v20, %v5452_v1  ;;  %v5628_v22 = vpop.f32.mrf.mxu2  ;;  %v5826_v2 = vsel %vm5824_vm5, %v5783_v28, 0 }
 0x5ff   :  { %20988 = vst [vmem:[#allocation62_spill] sm:$0xff] %v16506_v45 }
 0x600   :  { %v5629_v12 = vadd.f32 %v5628_v22, %v5538_v29  ;;  %6119 = vmatmul.f32.gmra.mxu1 %v16436_v51  ;;  %v5761_v22 = vadd.f32 %v16480_v14, %v16445_v54 }
 0x601   :  { %6333 = vmatmul.f32.gmra.mxu3 %v16490_v33 }
 0x602   :  { %v5698_v49 = vadd.f32 %v5697_v52, %v5629_v12  ;;  %v5456_v59 = vpop.f32.mrf.mxu0 }
 0x603   :  { %6230 = vmatmul.f32.gmra.mxu2 %v16473_v60  ;;  %v5457_v20 = vadd.f32 %v5456_v59, %v16200_v6  ;;  %v16523_v60 = vsub.f32 %v5804_v39, %v16506_v45  ;;  %v16528_v6 = vand.u32 4294901760, %v5826_v2  ;;  %v5785_v59 = vmax.f32 %v5761_v22, 0.0 }
 0x604   :  { %v16515_v1 = vadd.f32 %v5698_v49, %v20991_v42  ;;  %v5701_v29 = vpop.f32.mrf.mxu3  ;;  %v5976_v49 = vsub.f32 %v16500_v15, %v16512_v5 }
 0x605   :  { %5970 = vmatmul.f32.gmra.mxu0 %v16509_v50  ;;  %v5543_v52 = vpop.f32.mrf.mxu1  ;;  %20992 = vst [vmem:[#allocation56_spill] sm:$0xff] %v16523_v60  ;;  %v16535_v39 = vand.u32 4294901760, %v16523_v60  ;;  %v16542_v33 = vsub.f32 %v5826_v2, %v16528_v6  ;;  %v5829_v22 = vsel %vm5824_vm5, %v5785_v59, 0 }
 0x606   :  { %v5544_v12 = vadd.f32 %v5543_v52, %v5457_v20  ;;  %v5632_v62 = vpop.f32.mrf.mxu2  ;;  %20993 = vst [vmem:[#allocation65_spill] sm:$0xff] %v16528_v6  ;;  %v16532_v54 = vand.u32 4294901760, %v5976_v49  ;;  %v20996_v20 = vld [vmem:[#allocation26_spill] sm:$0xff]  ;;  %v5763_v49 = vadd.f32 %v16480_v14, %v16468_v63 }
 0x607   :  { %20995 = vst [vmem:[#allocation67_spill] sm:$0xff] %v16535_v39 }
 0x608   :  { %v5633_v42 = vadd.f32 %v5632_v62, %v5544_v12  ;;  %6123 = vmatmul.f32.gmra.mxu1 %v16457_v56  ;;  %20994 = vst [vmem:[#allocation66_spill] sm:$0xff] %v16532_v54  ;;  %v5787_v2 = vmax.f32 %v5763_v49, 0.0 }
 0x609   :  { %6339 = vmatmul.f32.gmra.mxu3 %v16512_v5  ;;  %20997 = vst [vmem:[#allocation26_spill] sm:$0xff] %v16542_v33 }
 0x60a   :  { %v5702_v28 = vadd.f32 %v5701_v29, %v5633_v42  ;;  %v5461_v50 = vpop.f32.mrf.mxu0  ;;  %v5832_v49 = vsel %vm5824_vm5, %v5787_v2, 0 }
 0x60b   :  { %6235 = vmatmul.f32.gmra.mxu2 %v16500_v15  ;;  %v5462_v12 = vadd.f32 %v5461_v50, %v16234_v53  ;;  %v16551_v53 = vand.u32 4294901760, %v5829_v22  ;;  %v16555_v50 = vand.u32 4294901760, %v16542_v33 }
 0x60c   :  { %v16538_v52 = vadd.f32 %v5702_v28, %v20996_v20  ;;  %v5705_v62 = vpop.f32.mrf.mxu3  ;;  %v5984_v28 = vsub.f32 %v16523_v60, %v16535_v39 }
 0x60d   :  { %5978 = vmatmul.f32.gmra.mxu0 %v16532_v54  ;;  %v5549_v29 = vpop.f32.mrf.mxu1  ;;  %20998 = vst [vmem:[#allocation68_spill] sm:$0xff] %v16551_v53  ;;  %v16565_v5 = vsub.f32 %v5829_v22, %v16551_v53 }
 0x60e   :  { %v5550_v42 = vadd.f32 %v5549_v29, %v5462_v12  ;;  %v5636_v15 = vpop.f32.mrf.mxu2  ;;  %20999 = vst [vmem:[#allocation69_spill] sm:$0xff] %v16555_v50  ;;  %v16558_v63 = vand.u32 4294901760, %v5984_v28  ;;  %v21001_v12 = vld [vmem:[#allocation21_spill] sm:$0xff]  ;;  %v5765_v28 = vadd.f32 %v16480_v14, %v16493_v16  ;;  %v21006_v16 = vld [vmem:[#allocation38_spill] sm:$0xff] }
 0x60f   :  { %21002 = vst [vmem:[#allocation21_spill] sm:$0xff] %v16565_v5  ;;  %v16580_v22 = vand.u32 4294901760, %v16565_v5 }
 0x610   :  { %v5637_v20 = vadd.f32 %v5636_v15, %v5550_v42  ;;  %6127 = vmatmul.f32.gmra.mxu1 %v16482_v61  ;;  %21000 = vst [vmem:[#allocation70_spill] sm:$0xff] %v16558_v63 }
 0x611   :  { %6345 = vmatmul.f32.gmra.mxu3 %v16535_v39  ;;  %21005 = vst [vmem:[#allocation73_spill] sm:$0xff] %v16580_v22  ;;  %v6572_v35 = vsub.f32 %v16565_v5, %v16580_v22 }
 0x612   :  { %v5706_v59 = vadd.f32 %v5705_v62, %v5637_v20  ;;  %v5466_v54 = vpop.f32.mrf.mxu0  ;;  %v6564_v62 = vsub.f32 %v16542_v33, %v16555_v50 }
 0x613   :  { %6240 = vmatmul.f32.gmra.mxu2 %v16523_v60  ;;  %v5467_v15 = vadd.f32 %v5466_v54, %v16270_v23  ;;  %v16574_v23 = vand.u32 4294901760, %v5832_v49 }
 0x614   :  { %v16561_v29 = vadd.f32 %v5706_v59, %v21001_v12  ;;  %v5709_v42 = vpop.f32.mrf.mxu3  ;;  %v16577_v54 = vand.u32 4294901760, %v6564_v62 }
 0x615   :  { %5986 = vmatmul.f32.gmra.mxu0 %v16558_v63  ;;  %v5555_v39 = vpop.f32.mrf.mxu1  ;;  %21003 = vst [vmem:[#allocation71_spill] sm:$0xff] %v16574_v23  ;;  %v5789_v63 = vmax.f32 %v5765_v28, 0.0  ;;  %v5767_v28 = vadd.f32 %v16480_v14, %v16515_v1  ;;  %v21011_v1 = vld [vmem:[#allocation36_spill] sm:$0xff] }
 0x616   :  { %v5556_v20 = vadd.f32 %v5555_v39, %v5467_v15  ;;  %v5640_v59 = vpop.f32.mrf.mxu2  ;;  %21004 = vst [vmem:[#allocation72_spill] sm:$0xff] %v16577_v54 }
 0x618   :  { %v5641_v12 = vadd.f32 %v5640_v59, %v5556_v20  ;;  %6131 = vmatmul.f32.gmra.mxu1 %v16506_v45  ;;  %v16588_v59 = vsub.f32 %v5832_v49, %v16574_v23  ;;  %v16600_v49 = vand.u32 4294901760, %v6572_v35 }
 0x619   :  { %6685 = vmatmul.f32.vlgmr.msra.gmra.mxu3 %v16528_v6 }
 0x61a   :  { %v5710_v60 = vadd.f32 %v5709_v42, %v5641_v12  ;;  %v5471_v2 = vpop.f32.mrf.mxu0  ;;  %21007 = vst [vmem:[#allocation38_spill] sm:$0xff] %v16588_v59  ;;  %v5835_v42 = vsel %vm5824_vm5, %v5789_v63, 0 }
 0x61b   :  { %6566 = vmatmul.f32.vlgmr.msra.gmra.mxu2 %v16577_v54  ;;  %v5472_v15 = vadd.f32 %v5471_v2, %v16306_v11  ;;  %v16597_v11 = vand.u32 4294901760, %v5835_v42  ;;  %21009 = vst [vmem:[#allocation75_spill] sm:$0xff] %v16600_v49  ;;  %v16603_v2 = vand.u32 4294901760, %v16588_v59  ;;  %v5791_v54 = vmax.f32 %v5767_v28, 0.0 }
 0x61c   :  { %v16584_v39 = vadd.f32 %v5710_v60, %v21006_v16  ;;  %v5713_v20 = vpop.f32.mrf.mxu3  ;;  %v5769_v28 = vadd.f32 %v16480_v14, %v16538_v52  ;;  %v21016_v52 = vld [vmem:[#allocation57_spill] sm:$0xff] }
 0x61d   :  { %6414 = vmatmul.f32.vlgmr.msra.gmra.mxu0 %v16214_v44  ;;  %v5561_v62 = vpop.f32.mrf.mxu1  ;;  %21008 = vst [vmem:[#allocation74_spill] sm:$0xff] %v16597_v11  ;;  %v6580_v40 = vsub.f32 %v16588_v59, %v16603_v2 }
 0x61e   :  { %v5562_v12 = vadd.f32 %v5561_v62, %v5472_v15  ;;  %v5644_v60 = vpop.f32.mrf.mxu2  ;;  %21010 = vst [vmem:[#allocation76_spill] sm:$0xff] %v16603_v2 }
 0x620   :  { %v5645_v16 = vadd.f32 %v5644_v60, %v5562_v12  ;;  %6495 = vmatmul.f32.vlgmr.msra.gmra.mxu1 %v16214_v44  ;;  %v16611_v60 = vsub.f32 %v5835_v42, %v16597_v11  ;;  %v16623_v42 = vand.u32 4294901760, %v6580_v40 }
 0x621   :  { %6689 = vmatmul.f32.gmra.mxu3 %v16551_v53 }
 0x622   :  { %v5714_v31 = vadd.f32 %v5713_v20, %v5645_v16  ;;  %v5476_v63 = vpop.f32.mrf.mxu0  ;;  %21012 = vst [vmem:[#allocation36_spill] sm:$0xff] %v16611_v60  ;;  %v5838_v20 = vsel %vm5824_vm5, %v5791_v54, 0 }
 0x623   :  { %6574 = vmatmul.f32.gmra.mxu2 %v16600_v49  ;;  %v5477_v62 = vadd.f32 %v5476_v63, %v16334_v7  ;;  %v16620_v7 = vand.u32 4294901760, %v5838_v20  ;;  %21014 = vst [vmem:[#allocation78_spill] sm:$0xff] %v16623_v42  ;;  %v16626_v63 = vand.u32 4294901760, %v16611_v60  ;;  %v5793_v49 = vmax.f32 %v5769_v28, 0.0 }
 0x624   :  { %v16607_v15 = vadd.f32 %v5714_v31, %v21011_v1  ;;  %v5717_v12 = vpop.f32.mrf.mxu3  ;;  %v5771_v28 = vadd.f32 %v16480_v14, %v16561_v29  ;;  %v21021_v29 = vld [vmem:[#allocation22_spill] sm:$0xff] }
 0x625   :  { %6418 = vmatmul.f32.gmra.mxu0 %v16251_v26  ;;  %v5567_v35 = vpop.f32.mrf.mxu1  ;;  %21013 = vst [vmem:[#allocation77_spill] sm:$0xff] %v16620_v7  ;;  %v6588_v34 = vsub.f32 %v16611_v60, %v16626_v63 }
 0x626   :  { %v5568_v16 = vadd.f32 %v5567_v35, %v5477_v62  ;;  %v5648_v31 = vpop.f32.mrf.mxu2  ;;  %21015 = vst [vmem:[#allocation79_spill] sm:$0xff] %v16626_v63 }
 0x628   :  { %v5649_v1 = vadd.f32 %v5648_v31, %v5568_v16  ;;  %6499 = vmatmul.f32.gmra.mxu1 %v16251_v26  ;;  %v16634_v31 = vsub.f32 %v5838_v20, %v16620_v7  ;;  %v16646_v20 = vand.u32 4294901760, %v6588_v34 }
 0x629   :  { %6693 = vmatmul.f32.gmra.mxu3 %v16574_v23 }
 0x62a   :  { %v5718_v32 = vadd.f32 %v5717_v12, %v5649_v1  ;;  %v5481_v54 = vpop.f32.mrf.mxu0  ;;  %21017 = vst [vmem:[#allocation57_spill] sm:$0xff] %v16634_v31  ;;  %v5841_v12 = vsel %vm5824_vm5, %v5793_v49, 0 }
 0x62b   :  { %6582 = vmatmul.f32.gmra.mxu2 %v16623_v42  ;;  %v5482_v35 = vadd.f32 %v5481_v54, %v16358_v37  ;;  %v16643_v37 = vand.u32 4294901760, %v5841_v12  ;;  %21019 = vst [vmem:[#allocation81_spill] sm:$0xff] %v16646_v20  ;;  %v16649_v54 = vand.u32 4294901760, %v16634_v31  ;;  %v5795_v42 = vmax.f32 %v5771_v28, 0.0 }
 0x62c   :  { %v16630_v62 = vadd.f32 %v5718_v32, %v21016_v52  ;;  %v5721_v16 = vpop.f32.mrf.mxu3  ;;  %v5773_v28 = vadd.f32 %v16480_v14, %v16584_v39  ;;  %v21026_v39 = vld [vmem:[#allocation28_spill] sm:$0xff] }
 0x62d   :  { %6422 = vmatmul.f32.gmra.mxu0 %v16285_v58  ;;  %v5573_v40 = vpop.f32.mrf.mxu1  ;;  %21018 = vst [vmem:[#allocation80_spill] sm:$0xff] %v16643_v37  ;;  %v6596_v46 = vsub.f32 %v16634_v31, %v16649_v54 }
 0x62e   :  { %v5574_v1 = vadd.f32 %v5573_v40, %v5482_v35  ;;  %v5652_v32 = vpop.f32.mrf.mxu2  ;;  %21020 = vst [vmem:[#allocation82_spill] sm:$0xff] %v16649_v54 }
 0x630   :  { %v5653_v52 = vadd.f32 %v5652_v32, %v5574_v1  ;;  %6503 = vmatmul.f32.gmra.mxu1 %v16285_v58  ;;  %v16657_v32 = vsub.f32 %v5841_v12, %v16643_v37  ;;  %v16669_v12 = vand.u32 4294901760, %v6596_v46 }
 0x631   :  { %6697 = vmatmul.f32.gmra.mxu3 %v16597_v11 }
 0x632   :  { %v5722_v9 = vadd.f32 %v5721_v16, %v5653_v52  ;;  %v5486_v49 = vpop.f32.mrf.mxu0  ;;  %21022 = vst [vmem:[#allocation22_spill] sm:$0xff] %v16657_v32  ;;  %v5844_v16 = vsel %vm5824_vm5, %v5795_v42, 0 }
 0x633   :  { %6590 = vmatmul.f32.gmra.mxu2 %v16646_v20  ;;  %v5487_v40 = vadd.f32 %v5486_v49, %v16382_v18  ;;  %v16666_v18 = vand.u32 4294901760, %v5844_v16  ;;  %21024 = vst [vmem:[#allocation84_spill] sm:$0xff] %v16669_v12  ;;  %v16672_v49 = vand.u32 4294901760, %v16657_v32  ;;  %v5797_v20 = vmax.f32 %v5773_v28, 0.0 }
 0x634   :  { %v16653_v35 = vadd.f32 %v5722_v9, %v21021_v29  ;;  %v5725_v1 = vpop.f32.mrf.mxu3 }
 0x635   :  { %6426 = vmatmul.f32.gmra.mxu0 %v16319_v36  ;;  %v5579_v34 = vpop.f32.mrf.mxu1  ;;  %21023 = vst [vmem:[#allocation83_spill] sm:$0xff] %v16666_v18  ;;  %v6604_v46 = vsub.f32 %v16657_v32, %v16672_v49  ;;  %v5847_v0 = vsel %vm5824_vm5, %v5797_v20, 0 }
 0x636   :  { %v5580_v52 = vadd.f32 %v5579_v34, %v5487_v40  ;;  %v5656_v9 = vpop.f32.mrf.mxu2  ;;  %21025 = vst [vmem:[#allocation85_spill] sm:$0xff] %v16672_v49 }
 0x638   :  { %v5657_v29 = vadd.f32 %v5656_v9, %v5580_v52  ;;  %6507 = vmatmul.f32.gmra.mxu1 %v16319_v36  ;;  %v16679_v52 = vsub.f32 %v5844_v16, %v16666_v18  ;;  %v16691_v16 = vand.u32 4294901760, %v6604_v46 }
 0x639   :  { %6701 = vmatmul.f32.gmra.mxu3 %v16620_v7 }
 0x63a   :  { %v5726_v19 = vadd.f32 %v5725_v1, %v5657_v29  ;;  %v5899_v42 = vpop.f32.mrf.mxu0  ;;  %21027 = vst [vmem:[#allocation28_spill] sm:$0xff] %v16679_v52  ;;  %v5775_v1 = vadd.f32 %v16480_v14, %v16607_v15 }
 0x63b   :  { %6598 = vmatmul.f32.gmra.mxu2 %v16669_v12  ;;  %21029 = vst [vmem:[#allocation87_spill] sm:$0xff] %v16691_v16 }
 0x63c   :  { %v16676_v40 = vadd.f32 %v5726_v19, %v21026_v39  ;;  %v6280_v34 = vpop.f32.mrf.mxu3  ;;  %v16688_v19 = vand.u32 4294901760, %v5847_v0  ;;  %v16694_v39 = vand.u32 4294901760, %v16679_v52  ;;  %v5799_v10 = vmax.f32 %v5775_v1, 0.0 }
 0x63d   :  { %6430 = vmatmul.f32.gmra.mxu0 %v16343_v27  ;;  %v6088_v9 = vpop.f32.mrf.mxu1  ;;  %v5777_v1 = vadd.f32 %v16480_v14, %v16630_v62 }
 0x63e   :  { %v6089_v28 = vadd.f32 %v6088_v9, %v5899_v42  ;;  %v6186_v29 = vpop.f32.mrf.mxu2  ;;  %21028 = vst [vmem:[#allocation86_spill] sm:$0xff] %v16688_v19  ;;  %v16700_v42 = vsub.f32 %v5847_v0, %v16688_v19  ;;  %v6612_v46 = vsub.f32 %v16679_v52, %v16694_v39 }
 0x63f   :  { %21030 = vst [vmem:[#allocation88_spill] sm:$0xff] %v16694_v39  ;;  %v5801_v36 = vmax.f32 %v5777_v1, 0.0  ;;  %v5779_v1 = vadd.f32 %v16480_v14, %v16653_v35 }
 0x640   :  { %v6187_v12 = vadd.f32 %v6186_v29, %v6089_v28  ;;  %6511 = vmatmul.f32.gmra.mxu1 %v16343_v27  ;;  %21031 = vst [vmem:[#allocation89_spill] sm:$0xff] %v16700_v42  ;;  %v5850_v28 = vsel %vm5824_vm5, %v5799_v10, 0  ;;  %v16712_v0 = vand.u32 4294901760, %v6612_v46  ;;  %v16715_v27 = vand.u32 4294901760, %v16700_v42 }
 0x641   :  { %6705 = vmatmul.f32.gmra.mxu3 %v16643_v37  ;;  %v5803_v47 = vmax.f32 %v5779_v1, 0.0  ;;  %v5781_v1 = vadd.f32 %v16480_v14, %v16676_v40 }
 0x642   :  { %v5907_v57 = vpop.f32.mrf.mxu0  ;;  %v16696_v20 = vadd.f32 %v6280_v34, %v6187_v12  ;;  %21033 = vst [vmem:[#allocation91_spill] sm:$0xff] %v16712_v0  ;;  %v6620_v46 = vsub.f32 %v16700_v42, %v16715_v27 }
 0x643   :  { %6606 = vmatmul.f32.gmra.mxu2 %v16691_v16  ;;  %v16709_v16 = vand.u32 4294901760, %v5850_v28  ;;  %21034 = vst [vmem:[#allocation92_spill] sm:$0xff] %v16715_v27  ;;  %v5805_v58 = vmax.f32 %v5781_v1, 0.0 }
 0x644   :  { %v6286_v15 = vpop.f32.mrf.mxu3 }
 0x645   :  { %6434 = vmatmul.f32.gmra.mxu0 %v16369_v13  ;;  %v6092_v9 = vpop.f32.mrf.mxu1  ;;  %21032 = vst [vmem:[#allocation90_spill] sm:$0xff] %v16709_v16  ;;  %v16721_v62 = vsub.f32 %v5850_v28, %v16709_v16  ;;  %v16733_v28 = vand.u32 4294901760, %v6620_v46 }
 0x646   :  { %v6093_v29 = vadd.f32 %v6092_v9, %v5907_v57  ;;  %v6191_v12 = vpop.f32.mrf.mxu2 }
 0x647   :  { %21035 = vst [vmem:[#allocation93_spill] sm:$0xff] %v16733_v28 }
 0x648   :  { %v6192_v34 = vadd.f32 %v6191_v12, %v6093_v29  ;;  %6515 = vmatmul.f32.gmra.mxu1 %v16369_v13  ;;  %v5853_v29 = vsel %vm5824_vm5, %v5801_v36, 0  ;;  %v16736_v13 = vand.u32 4294901760, %v16721_v62 }
 0x649   :  { %6709 = vmatmul.f32.gmra.mxu3 %v16666_v18 }
 0x64a   :  { %v5915_v3 = vpop.f32.mrf.mxu0  ;;  %v16717_v10 = vadd.f32 %v6286_v15, %v6192_v34  ;;  %v6628_v46 = vsub.f32 %v16721_v62, %v16736_v13 }
 0x64b   :  { %6614 = vmatmul.f32.gmra.mxu2 %v16712_v0  ;;  %v16730_v0 = vand.u32 4294901760, %v5853_v29 }
 0x64c   :  { %v6292_v57 = vpop.f32.mrf.mxu3 }
 0x64d   :  { %6438 = vmatmul.f32.gmra.mxu0 %v16391_v4  ;;  %v6096_v9 = vpop.f32.mrf.mxu1  ;;  %v16742_v35 = vsub.f32 %v5853_v29, %v16730_v0  ;;  %v16754_v29 = vand.u32 4294901760, %v6628_v46  ;;  %v5859_v46 = vsel %vm5824_vm5, %v5805_v58, 0 }
 0x64e   :  { %v6097_v12 = vadd.f32 %v6096_v9, %v5915_v3  ;;  %v6196_v15 = vpop.f32.mrf.mxu2 }
 0x64f   :  { %21036 = vst [vmem:[#allocation94_spill] sm:$0xff] %v16754_v29 }
 0x650   :  { %v6197_v34 = vadd.f32 %v6196_v15, %v6097_v12  ;;  %6519 = vmatmul.f32.gmra.mxu1 %v16391_v4  ;;  %v5856_v12 = vsel %vm5824_vm5, %v5803_v47, 0  ;;  %v16757_v4 = vand.u32 4294901760, %v16742_v35 }
 0x651   :  { %6713 = vmatmul.f32.gmra.mxu3 %v16688_v19 }
 0x652   :  { %v5923_v55 = vpop.f32.mrf.mxu0  ;;  %v16738_v36 = vadd.f32 %v6292_v57, %v6197_v34 }
 0x653   :  { %6622 = vmatmul.f32.gmra.mxu2 %v16733_v28  ;;  %v16751_v28 = vand.u32 4294901760, %v5856_v12 }
 0x654   :  { %v6298_v3 = vpop.f32.mrf.mxu3 }
 0x655   :  { %6442 = vmatmul.f32.gmra.mxu0 %v16415_v25  ;;  %v6100_v9 = vpop.f32.mrf.mxu1  ;;  %v16763_v14 = vsub.f32 %v5856_v12, %v16751_v28 }
 0x656   :  { %v6101_v15 = vadd.f32 %v6100_v9, %v5923_v55  ;;  %v6201_v57 = vpop.f32.mrf.mxu2  ;;  %v6636_v9 = vsub.f32 %v16742_v35, %v16757_v4 }
 0x657   :  { %v16776_v12 = vand.u32 4294901760, %v16763_v14 }
 0x658   :  { %v6202_v34 = vadd.f32 %v6201_v57, %v6101_v15  ;;  %6523 = vmatmul.f32.gmra.mxu1 %v16415_v25 }
 0x659   :  { %6717 = vmatmul.f32.gmra.mxu3 %v16709_v16 }
 0x65a   :  { %v5931_v41 = vpop.f32.mrf.mxu0  ;;  %v16759_v47 = vadd.f32 %v6298_v3, %v6202_v34  ;;  %v16770_v3 = vand.u32 4294901760, %v5859_v46  ;;  %v16773_v34 = vand.u32 4294901760, %v6636_v9  ;;  %v6644_v9 = vsub.f32 %v16763_v14, %v16776_v12 }
 0x65b   :  { %6630 = vmatmul.f32.gmra.mxu2 %v16754_v29 }
 0x65c   :  { %v6304_v55 = vpop.f32.mrf.mxu3  ;;  %21037 = vst [vmem:[#allocation95_spill] sm:$0xff] %v16773_v34 }
 0x65d   :  { %6446 = vmatmul.f32.gmra.mxu0 %v16436_v51  ;;  %v6104_v40 = vpop.f32.mrf.mxu1 }
 0x65e   :  { %v6105_v15 = vadd.f32 %v6104_v40, %v5931_v41  ;;  %v6206_v57 = vpop.f32.mrf.mxu2  ;;  %v7059_v41 = vld [vmem:[#allocation4 + $0x108] sm:$0xff]  ;;  %v16782_v40 = vsub.f32 %v5859_v46, %v16770_v3  ;;  %v16796_v46 = vand.u32 4294901760, %v6644_v9 }
 0x660   :  { %v6207_v1 = vadd.f32 %v6206_v57, %v6105_v15  ;;  %6527 = vmatmul.f32.gmra.mxu1 %v16436_v51  ;;  %v16787_v57 = vand.u32 4294901760, %v7059_v41  ;;  %21038 = vst [vmem:[#allocation96_spill] sm:$0xff] %v16796_v46 }
 0x661   :  { %6721 = vmatmul.f32.gmra.mxu3 %v16730_v0 }
 0x662   :  { %v5939_v29 = vpop.f32.mrf.mxu0  ;;  %v16778_v25 = vadd.f32 %v6304_v55, %v6207_v1  ;;  %v16790_v55 = vsub.f32 %v7059_v41, %v16787_v57  ;;  %7063 = vmatpush.msra.mxu0 %v16787_v57  ;;  %7446 = vmatpush.msra.mxu3 %v16787_v57 }
 0x663   :  { %6638 = vmatmul.f32.gmra.mxu2 %v16773_v34  ;;  %v16799_v34 = vand.u32 4294901760, %v16782_v40 }
 0x664   :  { %v6310_v58 = vpop.f32.mrf.mxu3  ;;  %7338 = vmatpush.msra.mxu2 %v16790_v55 }
 0x665   :  { %6450 = vmatmul.f32.gmra.mxu0 %v16457_v56  ;;  %v6108_v15 = vpop.f32.mrf.mxu1  ;;  %21039 = vst [vmem:[#allocation97_spill] sm:$0xff] %v16799_v34  ;;  %v6652_v26 = vsub.f32 %v16782_v40, %v16799_v34 }
 0x666   :  { %v6109_v51 = vadd.f32 %v6108_v15, %v5939_v29  ;;  %v6211_v17 = vpop.f32.mrf.mxu2  ;;  %v20512_v29 = vand.u32 4294901760, %v16790_v55  ;;  %v7058_v15 = vld [vmem:[#allocation4 + $0x100] sm:$0xff] }
 0x668   :  { %v6212_v1 = vadd.f32 %v6211_v17, %v6109_v51  ;;  %6531 = vmatmul.f32.gmra.mxu1 %v16457_v56  ;;  %v7194_v17 = vsub.f32 %v16790_v55, %v20512_v29  ;;  %v16809_v51 = vand.u32 4294901760, %v7058_v15 }
 0x669   :  { %6725 = vmatmul.f32.gmra.mxu3 %v16751_v28 }
 0x66a   :  { %v5947_v41 = vpop.f32.mrf.mxu0  ;;  %v16803_v38 = vadd.f32 %v6310_v58, %v6212_v1  ;;  %v7195_v30 = vand.u32 4294901760, %v7194_v17  ;;  %v16815_v24 = vsub.f32 %v7058_v15, %v16809_v51  ;;  %7448 = vmatpush.msra.mxu3 %v16809_v51  ;;  %7065 = vmatpush.msra.mxu0 %v16809_v51  ;;  %v16823_v17 = vand.u32 4294901760, %v6652_v26 }
 0x66b   :  { %6646 = vmatmul.f32.gmra.mxu2 %v16796_v46  ;;  %v16825_v15 = vand.u32 4294901760, %v7057_v21 }
 0x66c   :  { %v6316_v9 = vpop.f32.mrf.mxu3  ;;  %7196 = vmatpush.msra.mxu1 %v7195_v30  ;;  %7341 = vmatpush.msra.mxu2 %v16815_v24  ;;  %v20517_v46 = vand.u32 4294901760, %v16815_v24  ;;  %21040 = vst [vmem:[#allocation98_spill] sm:$0xff] %v16823_v17 }
 0x66d   :  { %6454 = vmatmul.f32.gmra.mxu0 %v16482_v61  ;;  %v6112_v56 = vpop.f32.mrf.mxu1  ;;  %7450 = vmatpush.msra.mxu3 %v16825_v15 }
 0x66e   :  { %v6113_v58 = vadd.f32 %v6112_v56, %v5947_v41  ;;  %v6216_v1 = vpop.f32.mrf.mxu2  ;;  %v7200_v56 = vsub.f32 %v16815_v24, %v20517_v46  ;;  %v16834_v41 = vsub.f32 %v7057_v21, %v16825_v15  ;;  %7067 = vmatpush.msra.mxu0 %v16825_v15 }
 0x670   :  { %v6217_v29 = vadd.f32 %v6216_v1, %v6113_v58  ;;  %6535 = vmatmul.f32.gmra.mxu1 %v16482_v61  ;;  %v7201_v1 = vand.u32 4294901760, %v7200_v56  ;;  %7344 = vmatpush.msra.mxu2 %v16834_v41  ;;  %v20524_v46 = vand.u32 4294901760, %v16834_v41  ;;  %v7056_v56 = vld [vmem:[#allocation4 + $0xf0] sm:$0xff] }
 0x671   :  { %6729 = vmatmul.f32.gmra.mxu3 %v16770_v3  ;;  %v16846_v8 = vand.u32 4294901760, %v7056_v56 }
 0x672   :  { %v5955_v44 = vpop.f32.mrf.mxu0  ;;  %v16830_v30 = vadd.f32 %v6316_v9, %v6217_v29  ;;  %7202 = vmatpush.msra.mxu1 %v7201_v1  ;;  %v7206_v21 = vsub.f32 %v16834_v41, %v20524_v46 }
 0x673   :  { %6654 = vmatmul.f32.gmra.mxu2 %v16823_v17  ;;  %7069 = vmatpush.msra.mxu0 %v16846_v8 }
 0x674   :  { %v6322_v58 = vpop.f32.mrf.mxu3  ;;  %v7207_v61 = vand.u32 4294901760, %v7206_v21  ;;  %7452 = vmatpush.msra.mxu3 %v16846_v8 }
 0x675   :  { %6458 = vmatmul.f32.gmra.mxu0 %v16506_v45  ;;  %v6116_v26 = vpop.f32.mrf.mxu1 }
 0x676   :  { %v6117_v29 = vadd.f32 %v6116_v26, %v5955_v44  ;;  %v6221_v9 = vpop.f32.mrf.mxu2  ;;  %7208 = vmatpush.msra.mxu1 %v7207_v61  ;;  %v16852_v44 = vsub.f32 %v7056_v56, %v16846_v8  ;;  %v7055_v26 = vld [vmem:[#allocation4 + $0xe8] sm:$0xff] }
 0x678   :  { %v6222_v17 = vadd.f32 %v6221_v9, %v6117_v29  ;;  %6539 = vmatmul.f32.gmra.mxu1 %v16506_v45  ;;  %7347 = vmatpush.msra.mxu2 %v16852_v44 }
 0x679   :  { %6995 = vmatmul.f32.vlgmr.msrb.gmra.mxu3 %v16528_v6 }
 0x67a   :  { %v5963_v43 = vpop.f32.mrf.mxu0  ;;  %v16848_v48 = vadd.f32 %v6322_v58, %v6222_v17  ;;  %v20528_v17 = vand.u32 4294901760, %v16852_v44  ;;  %v16859_v58 = vand.u32 4294901760, %v7055_v26 }
 0x67b   :  { %6928 = vmatmul.f32.vlgmr.msrb.gmra.mxu2 %v16528_v6 }
 0x67c   :  { %v6328_v1 = vpop.f32.mrf.mxu3  ;;  %v7212_v21 = vsub.f32 %v16852_v44, %v20528_v17  ;;  %v16865_v56 = vsub.f32 %v7055_v26, %v16859_v58  ;;  %7071 = vmatpush.msra.mxu0 %v16859_v58  ;;  %7454 = vmatpush.msra.mxu3 %v16859_v58 }
 0x67d   :  { %6755 = vmatmul.f32.vlgmr.msrb.gmra.mxu0 %v16542_v33  ;;  %v6120_v29 = vpop.f32.mrf.mxu1 }
 0x67e   :  { %v6121_v9 = vadd.f32 %v6120_v29, %v5963_v43  ;;  %v6226_v61 = vpop.f32.mrf.mxu2  ;;  %v7213_v33 = vand.u32 4294901760, %v7212_v21  ;;  %7350 = vmatpush.msra.mxu2 %v16865_v56  ;;  %v20534_v43 = vand.u32 4294901760, %v16865_v56 }
 0x680   :  { %v6227_v46 = vadd.f32 %v6226_v61, %v6121_v9  ;;  %6835 = vmatmul.f32.vlgmr.msrb.gmra.mxu1 %v16555_v50  ;;  %v7218_v26 = vsub.f32 %v16865_v56, %v20534_v43  ;;  %v7054_v9 = vld [vmem:[#allocation4 + $0xe0] sm:$0xff]  ;;  %v7053_v43 = vld [vmem:[#allocation4 + $0xd8] sm:$0xff] }
 0x681   :  { %6999 = vmatmul.f32.gmra.mxu3 %v16551_v53  ;;  %7214 = vmatpush.msra.mxu1 %v7213_v33  ;;  %v16879_v17 = vand.u32 4294901760, %v7054_v9 }
 0x682   :  { %v5971_v29 = vpop.f32.mrf.mxu0  ;;  %v16873_v6 = vadd.f32 %v6328_v1, %v6227_v46  ;;  %v7219_v50 = vand.u32 4294901760, %v7218_v26 }
 0x683   :  { %6932 = vmatmul.f32.gmra.mxu2 %v16551_v53  ;;  %v16883_v46 = vsub.f32 %v7054_v9, %v16879_v17  ;;  %7073 = vmatpush.msra.mxu0 %v16879_v17 }
 0x684   :  { %v6334_v61 = vpop.f32.mrf.mxu3  ;;  %7456 = vmatpush.msra.mxu3 %v16879_v17  ;;  %7220 = vmatpush.msra.mxu1 %v7219_v50 }
 0x685   :  { %6760 = vmatmul.f32.gmra.mxu0 %v16565_v5  ;;  %v6124_v21 = vpop.f32.mrf.mxu1  ;;  %7353 = vmatpush.msra.mxu2 %v16883_v46  ;;  %v20536_v1 = vand.u32 4294901760, %v16883_v46 }
 0x686   :  { %v6125_v45 = vadd.f32 %v6124_v21, %v5971_v29  ;;  %v6231_v34 = vpop.f32.mrf.mxu2  ;;  %v16891_v29 = vand.u32 4294901760, %v7053_v43 }
 0x687   :  { %v7224_v9 = vsub.f32 %v16883_v46, %v20536_v1 }
 0x688   :  { %v6232_v33 = vadd.f32 %v6231_v34, %v6125_v45  ;;  %6841 = vmatmul.f32.gmra.mxu1 %v16580_v22  ;;  %v16900_v45 = vsub.f32 %v7053_v43, %v16891_v29  ;;  %7075 = vmatpush.msra.mxu0 %v16891_v29 }
 0x689   :  { %7003 = vmatmul.f32.gmra.mxu3 %v16574_v23  ;;  %v7225_v34 = vand.u32 4294901760, %v7224_v9  ;;  %v7052_v9 = vld [vmem:[#allocation4 + $0xd0] sm:$0xff] }
 0x68a   :  { %v5979_v26 = vpop.f32.mrf.mxu0  ;;  %v16896_v21 = vadd.f32 %v6334_v61, %v6232_v33  ;;  %7458 = vmatpush.msra.mxu3 %v16891_v29  ;;  %7356 = vmatpush.msra.mxu2 %v16900_v45  ;;  %v20543_v1 = vand.u32 4294901760, %v16900_v45 }
 0x68b   :  { %6936 = vmatmul.f32.gmra.mxu2 %v16574_v23  ;;  %7226 = vmatpush.msra.mxu1 %v7225_v34  ;;  %v7051_v34 = vld [vmem:[#allocation4 + $0xc8] sm:$0xff] }
 0x68c   :  { %21041 = vst [vmem:[#allocation99_spill] sm:$0xff] %v16896_v21  ;;  %v6340_v50 = vpop.f32.mrf.mxu3  ;;  %v7230_v43 = vsub.f32 %v16900_v45, %v20543_v1 }
 0x68d   :  { %6765 = vmatmul.f32.gmra.mxu0 %v16588_v59  ;;  %v6128_v22 = vpop.f32.mrf.mxu1  ;;  %v16912_v59 = vand.u32 4294901760, %v7052_v9 }
 0x68e   :  { %v6129_v61 = vadd.f32 %v6128_v22, %v5979_v26  ;;  %v6236_v33 = vpop.f32.mrf.mxu2  ;;  %v7231_v23 = vand.u32 4294901760, %v7230_v43 }
 0x68f   :  { %v16918_v22 = vsub.f32 %v7052_v9, %v16912_v59  ;;  %7077 = vmatpush.msra.mxu0 %v16912_v59  ;;  %7460 = vmatpush.msra.mxu3 %v16912_v59 }
 0x690   :  { %v6237_v5 = vadd.f32 %v6236_v33, %v6129_v61  ;;  %6847 = vmatmul.f32.gmra.mxu1 %v16603_v2 }
 0x691   :  { %7007 = vmatmul.f32.gmra.mxu3 %v16597_v11  ;;  %7232 = vmatpush.msra.mxu1 %v7231_v23 }
 0x692   :  { %v5987_v53 = vpop.f32.mrf.mxu0  ;;  %v16914_v21 = vadd.f32 %v6340_v50, %v6237_v5  ;;  %7359 = vmatpush.msra.mxu2 %v16918_v22  ;;  %v20546_v5 = vand.u32 4294901760, %v16918_v22  ;;  %v16925_v50 = vand.u32 4294901760, %v7051_v34 }
 0x693   :  { %6940 = vmatmul.f32.gmra.mxu2 %v16597_v11 }
 0x694   :  { %21042 = vst [vmem:[#allocation100_spill] sm:$0xff] %v16914_v21  ;;  %v6346_v26 = vpop.f32.mrf.mxu3  ;;  %v7236_v43 = vsub.f32 %v16918_v22, %v20546_v5  ;;  %v16931_v9 = vsub.f32 %v7051_v34, %v16925_v50  ;;  %7079 = vmatpush.msra.mxu0 %v16925_v50  ;;  %7462 = vmatpush.msra.mxu3 %v16925_v50 }
 0x695   :  { %6770 = vmatmul.f32.gmra.mxu0 %v16611_v60  ;;  %v6132_v61 = vpop.f32.mrf.mxu1 }
 0x696   :  { %v6133_v33 = vadd.f32 %v6132_v61, %v5987_v53  ;;  %v6241_v23 = vpop.f32.mrf.mxu2  ;;  %v7237_v60 = vand.u32 4294901760, %v7236_v43  ;;  %7362 = vmatpush.msra.mxu2 %v16931_v9  ;;  %v20550_v53 = vand.u32 4294901760, %v16931_v9 }
 0x698   :  { %v6242_v1 = vadd.f32 %v6241_v23, %v6133_v33  ;;  %6853 = vmatmul.f32.gmra.mxu1 %v16626_v63  ;;  %v7242_v34 = vsub.f32 %v16931_v9, %v20550_v53  ;;  %v7050_v33 = vld [vmem:[#allocation4 + $0xc0] sm:$0xff] }
 0x699   :  { %7011 = vmatmul.f32.gmra.mxu3 %v16620_v7  ;;  %7238 = vmatpush.msra.mxu1 %v7237_v60  ;;  %v16946_v63 = vand.u32 4294901760, %v7050_v33 }
 0x69a   :  { %v6415_v61 = vpop.f32.mrf.mxu0  ;;  %v16939_v2 = vadd.f32 %v6346_v26, %v6242_v1  ;;  %v7243_v11 = vand.u32 4294901760, %v7242_v34 }
 0x69b   :  { %6944 = vmatmul.f32.gmra.mxu2 %v16620_v7  ;;  %v6416_v23 = vadd.f32 %v6415_v61, %v16696_v20  ;;  %v16950_v26 = vsub.f32 %v7050_v33, %v16946_v63  ;;  %7081 = vmatpush.msra.mxu0 %v16946_v63  ;;  %v7049_v61 = vld [vmem:[#allocation4 + $0xb8] sm:$0xff]  ;;  %v21044_v7 = vand.u32 4294901760, %v16790_v55 }
 0x69c   :  { %v6686_v5 = vpop.f32.mrf.mxu3  ;;  %7464 = vmatpush.msra.mxu3 %v16946_v63  ;;  %7244 = vmatpush.msra.mxu1 %v7243_v11  ;;  %v16958_v34 = vand.u32 4294901760, %v7049_v61  ;;  %v7061_v55 = vld [vmem:[#allocation4 + $0x118] sm:$0xff] }
 0x69d   :  { %6775 = vmatmul.f32.gmra.mxu0 %v16634_v31  ;;  %v6496_v43 = vpop.f32.mrf.mxu1  ;;  %7365 = vmatpush.msra.mxu2 %v16950_v26  ;;  %v20552_v20 = vand.u32 4294901760, %v16950_v26 }
 0x69e   :  { %v6497_v21 = vadd.f32 %v6496_v43, %v6416_v23  ;;  %v6567_v1 = vpop.f32.mrf.mxu2  ;;  %v16967_v11 = vsub.f32 %v7049_v61, %v16958_v34  ;;  %7083 = vmatpush.msra.mxu0 %v16958_v34  ;;  %7466 = vmatpush.msra.mxu3 %v16958_v34 }
 0x69f   :  { %v7248_v33 = vsub.f32 %v16950_v26, %v20552_v20 }
 0x6a0   :  { %v6568_v60 = vadd.f32 %v6567_v1, %v6497_v21  ;;  %6859 = vmatmul.f32.gmra.mxu1 %v16649_v54  ;;  %7368 = vmatpush.msra.mxu2 %v16967_v11 }
 0x6a1   :  { %7015 = vmatmul.f32.gmra.mxu3 %v16643_v37  ;;  %v7249_v53 = vand.u32 4294901760, %v7248_v33 }
 0x6a2   :  { %v6419_v23 = vpop.f32.mrf.mxu0  ;;  %v16963_v43 = vadd.f32 %v6686_v5, %v6568_v60  ;;  %v20557_v5 = vand.u32 4294901760, %v16967_v11 }
 0x6a3   :  { %6948 = vmatmul.f32.gmra.mxu2 %v16643_v37  ;;  %v6420_v21 = vadd.f32 %v6419_v23, %v16717_v10  ;;  %7250 = vmatpush.msra.mxu1 %v7249_v53  ;;  %v7048_v10 = vld [vmem:[#allocation4 + $0xb0] sm:$0xff] }
 0x6a4   :  { %v6690_v1 = vpop.f32.mrf.mxu3  ;;  %v7254_v61 = vsub.f32 %v16967_v11, %v20557_v5  ;;  %v16980_v33 = vand.u32 4294901760, %v7048_v10 }
 0x6a5   :  { %6780 = vmatmul.f32.gmra.mxu0 %v16657_v32  ;;  %v6500_v54 = vpop.f32.mrf.mxu1 }
 0x6a6   :  { %v6501_v60 = vadd.f32 %v6500_v54, %v6420_v21  ;;  %v6575_v20 = vpop.f32.mrf.mxu2  ;;  %v7255_v23 = vand.u32 4294901760, %v7254_v61  ;;  %v16986_v54 = vsub.f32 %v7048_v10, %v16980_v33  ;;  %7085 = vmatpush.msra.mxu0 %v16980_v33  ;;  %7468 = vmatpush.msra.mxu3 %v16980_v33  ;;  %v7047_v21 = vld [vmem:[#allocation4 + $0xa8] sm:$0xff] }
 0x6a8   :  { %v6576_v31 = vadd.f32 %v6575_v20, %v6501_v60  ;;  %6865 = vmatmul.f32.gmra.mxu1 %v16672_v49  ;;  %7371 = vmatpush.msra.mxu2 %v16986_v54 }
 0x6a9   :  { %7019 = vmatmul.f32.gmra.mxu3 %v16666_v18  ;;  %7256 = vmatpush.msra.mxu1 %v7255_v23 }
 0x6aa   :  { %v6423_v32 = vpop.f32.mrf.mxu0  ;;  %v16982_v37 = vadd.f32 %v6690_v1, %v6576_v31  ;;  %v20559_v31 = vand.u32 4294901760, %v16986_v54  ;;  %v16994_v1 = vand.u32 4294901760, %v7047_v21 }
 0x6ab   :  { %6952 = vmatmul.f32.gmra.mxu2 %v16666_v18  ;;  %v6424_v53 = vadd.f32 %v6423_v32, %v16738_v36 }
 0x6ac   :  { %v6694_v20 = vpop.f32.mrf.mxu3  ;;  %v7260_v32 = vsub.f32 %v16986_v54, %v20559_v31  ;;  %v17000_v36 = vsub.f32 %v7047_v21, %v16994_v1  ;;  %7087 = vmatpush.msra.mxu0 %v16994_v1  ;;  %7470 = vmatpush.msra.mxu3 %v16994_v1 }
 0x6ad   :  { %6785 = vmatmul.f32.gmra.mxu0 %v16679_v52  ;;  %v6504_v60 = vpop.f32.mrf.mxu1  ;;  %v7046_v52 = vld [vmem:[#allocation4 + $0xa0] sm:$0xff] }
 0x6ae   :  { %v6505_v61 = vadd.f32 %v6504_v60, %v6424_v53  ;;  %v6583_v10 = vpop.f32.mrf.mxu2  ;;  %v7261_v5 = vand.u32 4294901760, %v7260_v32  ;;  %7374 = vmatpush.msra.mxu2 %v17000_v36  ;;  %v20566_v53 = vand.u32 4294901760, %v17000_v36 }
 0x6b0   :  { %v6584_v23 = vadd.f32 %v6583_v10, %v6505_v61  ;;  %6871 = vmatmul.f32.gmra.mxu1 %v16694_v39  ;;  %v7266_v21 = vsub.f32 %v17000_v36, %v20566_v53  ;;  %v17014_v61 = vand.u32 4294901760, %v7046_v52  ;;  %v7045_v39 = vld [vmem:[#allocation4 + $0x98] sm:$0xff]  ;;  %v7044_v53 = vld [vmem:[#allocation4 + $0x90] sm:$0xff] }
 0x6b1   :  { %7023 = vmatmul.f32.gmra.mxu3 %v16688_v19  ;;  %7262 = vmatpush.msra.mxu1 %v7261_v5  ;;  %v17022_v5 = vand.u32 4294901760, %v7045_v39 }
 0x6b2   :  { %v6427_v60 = vpop.f32.mrf.mxu0  ;;  %v17008_v31 = vadd.f32 %v6694_v20, %v6584_v23  ;;  %v7267_v18 = vand.u32 4294901760, %v7266_v21  ;;  %v17019_v20 = vsub.f32 %v7046_v52, %v17014_v61  ;;  %7472 = vmatpush.msra.mxu3 %v17014_v61  ;;  %7089 = vmatpush.msra.mxu0 %v17014_v61  ;;  %v17030_v21 = vand.u32 4294901760, %v7044_v53 }
 0x6b3   :  { %6956 = vmatmul.f32.gmra.mxu2 %v16688_v19  ;;  %v6428_v10 = vadd.f32 %v6427_v60, %v16759_v47  ;;  %v17028_v60 = vsub.f32 %v7045_v39, %v17022_v5 }
 0x6b4   :  { %v6698_v32 = vpop.f32.mrf.mxu3  ;;  %7268 = vmatpush.msra.mxu1 %v7267_v18  ;;  %7377 = vmatpush.msra.mxu2 %v17019_v20  ;;  %v20567_v47 = vand.u32 4294901760, %v17019_v20 }
 0x6b5   :  { %6790 = vmatmul.f32.gmra.mxu0 %v16700_v42  ;;  %v6508_v49 = vpop.f32.mrf.mxu1  ;;  %7474 = vmatpush.msra.mxu3 %v17022_v5  ;;  %v20572_v39 = vand.u32 4294901760, %v17028_v60 }
 0x6b6   :  { %v6509_v23 = vadd.f32 %v6508_v49, %v6428_v10  ;;  %v6591_v19 = vpop.f32.mrf.mxu2  ;;  %v7272_v18 = vsub.f32 %v17019_v20, %v20567_v47  ;;  %7380 = vmatpush.msra.mxu2 %v17028_v60  ;;  %v17040_v49 = vsub.f32 %v7044_v53, %v17030_v21  ;;  %7091 = vmatpush.msra.mxu0 %v17022_v5 }
 0x6b7   :  { %7476 = vmatpush.msra.mxu3 %v17030_v21  ;;  %v7278_v47 = vsub.f32 %v17028_v60, %v20572_v39 }
 0x6b8   :  { %v6592_v52 = vadd.f32 %v6591_v19, %v6509_v23  ;;  %6877 = vmatmul.f32.gmra.mxu1 %v16715_v27  ;;  %v7273_v23 = vand.u32 4294901760, %v7272_v18  ;;  %v7283_v27 = vand.u32 4294901760, %v17040_v49  ;;  %7383 = vmatpush.msra.mxu2 %v17040_v49 }
 0x6b9   :  { %7027 = vmatmul.f32.gmra.mxu3 %v16709_v16  ;;  %7093 = vmatpush.msra.mxu0 %v17030_v21 }
 0x6ba   :  { %v6431_v10 = vpop.f32.mrf.mxu0  ;;  %v17045_v19 = vadd.f32 %v6698_v32, %v6592_v52  ;;  %7274 = vmatpush.msra.mxu1 %v7273_v23  ;;  %v7279_v52 = vand.u32 4294901760, %v7278_v47  ;;  %v7284_v18 = vsub.f32 %v17040_v49, %v7283_v27  ;;  %v21046_v23 = vand.u32 4294901760, %v16834_v41  ;;  %v21065_v49 = vld [vmem:[#allocation37_spill] sm:$0xff] }
 0x6bb   :  { %6960 = vmatmul.f32.gmra.mxu2 %v16709_v16  ;;  %v6432_v53 = vadd.f32 %v6431_v10, %v16778_v25  ;;  %7553 = vmatpush.msrb.mxu0 %v21044_v7 }
 0x6bc   :  { %21043 = vst [vmem:[#allocation101_spill] sm:$0xff] %v17045_v19  ;;  %v6702_v42 = vpop.f32.mrf.mxu3  ;;  %7280 = vmatpush.msra.mxu1 %v7279_v52  ;;  %v7285_v25 = vand.u32 4294901760, %v7284_v18  ;;  %v21045_v19 = vand.u32 4294901760, %v16815_v24  ;;  %v21047_v24 = vand.u32 4294901760, %v16852_v44  ;;  %v21049_v44 = vand.u32 4294901760, %v16883_v46 }
 0x6bd   :  { %6795 = vmatmul.f32.gmra.mxu0 %v16721_v62  ;;  %v6512_v32 = vpop.f32.mrf.mxu1 }
 0x6be   :  { %v6513_v16 = vadd.f32 %v6512_v32, %v6432_v53  ;;  %v6599_v39 = vpop.f32.mrf.mxu2  ;;  %7557 = vmatpush.msrb.mxu0 %v21045_v19  ;;  %7286 = vmatpush.msra.mxu1 %v7285_v25 }
 0x6c0   :  { %v6600_v10 = vadd.f32 %v6599_v39, %v6513_v16  ;;  %6883 = vmatmul.f32.gmra.mxu1 %v16736_v13  ;;  %7561 = vmatpush.msrb.mxu0 %v21046_v23 }
 0x6c1   :  { %7031 = vmatmul.f32.gmra.mxu3 %v16730_v0  ;;  %7664 = vmatpush.msrb.mxu1 %v16787_v57  ;;  %v17076_v57 = vand.u32 4294901760, %v7061_v55 }
 0x6c2   :  { %v6435_v47 = vpop.f32.mrf.mxu0  ;;  %v17068_v53 = vadd.f32 %v6702_v42, %v6600_v10  ;;  %7565 = vmatpush.msrb.mxu0 %v21047_v24  ;;  %v21048_v42 = vand.u32 4294901760, %v16865_v56  ;;  %v21050_v56 = vand.u32 4294901760, %v16900_v45  ;;  %v21051_v10 = vand.u32 4294901760, %v16918_v22 }
 0x6c3   :  { %6964 = vmatmul.f32.gmra.mxu2 %v16730_v0  ;;  %v6436_v7 = vadd.f32 %v6435_v47, %v16803_v38  ;;  %7666 = vmatpush.msrb.mxu1 %v16809_v51  ;;  %v17083_v38 = vsub.f32 %v7061_v55, %v17076_v57  ;;  %v21056_v24 = vand.u32 4294901760, %v17000_v36  ;;  %v21061_v36 = vld [vmem:[#allocation24_spill] sm:$0xff] }
 0x6c4   :  { %v6706_v16 = vpop.f32.mrf.mxu3  ;;  %7569 = vmatpush.msrb.mxu0 %v21048_v42  ;;  %7759 = vmatpush.msrb.mxu2 %v17076_v57 }
 0x6c5   :  { %6800 = vmatmul.f32.gmra.mxu0 %v16742_v35  ;;  %v6516_v39 = vpop.f32.mrf.mxu1  ;;  %7668 = vmatpush.msrb.mxu1 %v16825_v15  ;;  %v7875_v32 = vand.u32 4294901760, %v17083_v38 }
 0x6c6   :  { %v6517_v41 = vadd.f32 %v6516_v39, %v6436_v7  ;;  %v6607_v19 = vpop.f32.mrf.mxu2  ;;  %7573 = vmatpush.msrb.mxu0 %v21049_v44  ;;  %v21052_v7 = vand.u32 4294901760, %v16931_v9 }
 0x6c7   :  { %7670 = vmatpush.msrb.mxu1 %v16846_v8  ;;  %v7876_v18 = vsub.f32 %v17083_v38, %v7875_v32 }
 0x6c8   :  { %v6608_v51 = vadd.f32 %v6607_v19, %v6517_v41  ;;  %6889 = vmatmul.f32.gmra.mxu1 %v16757_v4  ;;  %7577 = vmatpush.msrb.mxu0 %v21050_v56 }
 0x6c9   :  { %7035 = vmatmul.f32.gmra.mxu3 %v16751_v28  ;;  %7672 = vmatpush.msrb.mxu1 %v16859_v58  ;;  %v7877_v45 = vand.u32 4294901760, %v7876_v18 }
 0x6ca   :  { %v6439_v15 = vpop.f32.mrf.mxu0  ;;  %v17093_v52 = vadd.f32 %v6706_v16, %v6608_v51  ;;  %7581 = vmatpush.msrb.mxu0 %v21051_v10 }
 0x6cb   :  { %6968 = vmatmul.f32.gmra.mxu2 %v16751_v28  ;;  %v6440_v46 = vadd.f32 %v6439_v15, %v16830_v30  ;;  %7674 = vmatpush.msrb.mxu1 %v16879_v17  ;;  %v21053_v30 = vand.u32 4294901760, %v16950_v26  ;;  %v21054_v17 = vand.u32 4294901760, %v16967_v11  ;;  %v21055_v26 = vand.u32 4294901760, %v16986_v54  ;;  %v21059_v54 = vld [vmem:[#allocation15_spill] sm:$0xff]  ;;  %v21063_v15 = vld [vmem:[#allocation18_spill] sm:$0xff] }
 0x6cc   :  { %v6710_v25 = vpop.f32.mrf.mxu3  ;;  %7585 = vmatpush.msrb.mxu0 %v21052_v7  ;;  %7878 = vmatpush.msrb.mxu3 %v7877_v45  ;;  %v21068_v45 = vld [vmem:[#allocation34_spill] sm:$0xff]  ;;  %v21070_v7 = vld [vmem:[#allocation39_spill] sm:$0xff] }
 0x6cd   :  { %6805 = vmatmul.f32.gmra.mxu0 %v16763_v14  ;;  %v6520_v8 = vpop.f32.mrf.mxu1  ;;  %7676 = vmatpush.msrb.mxu1 %v16891_v29 }
 0x6ce   :  { %v6521_v47 = vadd.f32 %v6520_v8, %v6440_v46  ;;  %v6615_v23 = vpop.f32.mrf.mxu2  ;;  %7589 = vmatpush.msrb.mxu0 %v21053_v30  ;;  %v21067_v46 = vld [vmem:[#allocation53_spill] sm:$0xff] }
 0x6cf   :  { %7678 = vmatpush.msrb.mxu1 %v16912_v59 }
 0x6d0   :  { %v6616_v58 = vadd.f32 %v6615_v23, %v6521_v47  ;;  %6895 = vmatmul.f32.gmra.mxu1 %v16776_v12  ;;  %7593 = vmatpush.msrb.mxu0 %v21054_v17  ;;  %v21069_v47 = vld [vmem:[#allocation14_spill] sm:$0xff] }
 0x6d1   :  { %7039 = vmatmul.f32.gmra.mxu3 %v16770_v3  ;;  %7680 = vmatpush.msrb.mxu1 %v16925_v50  ;;  %v21057_v50 = vld [vmem:[#allocation97_spill] sm:$0xff]  ;;  %v21072_v17 = vld [vmem:[#allocation30_spill] sm:$0xff] }
 0x6d2   :  { %v6443_v22 = vpop.f32.mrf.mxu0  ;;  %v17115_v16 = vadd.f32 %v6710_v25, %v6616_v58  ;;  %7597 = vmatpush.msrb.mxu0 %v21055_v26  ;;  %v21071_v58 = vld [vmem:[#allocation100_spill] sm:$0xff] }
 0x6d3   :  { %6972 = vmatmul.f32.gmra.mxu2 %v16770_v3  ;;  %v6444_v29 = vadd.f32 %v6443_v22, %v16848_v48  ;;  %7682 = vmatpush.msrb.mxu1 %v16946_v63  ;;  %v21058_v48 = vand.u32 4294901760, %v17019_v20  ;;  %v21060_v63 = vand.u32 4294901760, %v17028_v60  ;;  %v21062_v20 = vld [vmem:[#allocation49_spill] sm:$0xff] }
 0x6d4   :  { %v6714_v9 = vpop.f32.mrf.mxu3  ;;  %7601 = vmatpush.msrb.mxu0 %v21056_v24 }
 0x6d5   :  { %6810 = vmatmul.f32.gmra.mxu0 %v16782_v40  ;;  %v6524_v55 = vpop.f32.mrf.mxu1  ;;  %7684 = vmatpush.msrb.mxu1 %v16958_v34 }
 0x6d6   :  { %v6525_v59 = vadd.f32 %v6524_v55, %v6444_v29  ;;  %v6623_v11 = vpop.f32.mrf.mxu2  ;;  %7605 = vmatpush.msrb.mxu0 %v21058_v48  ;;  %v21075_v48 = vld [vmem:[#allocation58_spill] sm:$0xff] }
 0x6d7   :  { %7686 = vmatpush.msrb.mxu1 %v16980_v33 }
 0x6d8   :  { %v6624_v39 = vadd.f32 %v6623_v11, %v6525_v59  ;;  %6901 = vmatmul.f32.gmra.mxu1 %v21057_v50  ;;  %7609 = vmatpush.msrb.mxu0 %v21060_v63  ;;  %v21073_v59 = vld [vmem:[#allocation27_spill] sm:$0xff]  ;;  %v21074_v11 = vld [vmem:[#allocation32_spill] sm:$0xff] }
 0x6d9   :  { %7480 = vmatmul.f32.vlgmr.msra.gmra.mxu3 %v21059_v54  ;;  %7688 = vmatpush.msrb.mxu1 %v16994_v1  ;;  %v21064_v1 = vld [vmem:[#allocation47_spill] sm:$0xff] }
 0x6da   :  { %v6447_v41 = vpop.f32.mrf.mxu0  ;;  %v17132_v19 = vadd.f32 %v6714_v9, %v6624_v39  ;;  %7613 = vmatpush.msrb.mxu0 %v7283_v27  ;;  %v7060_v63 = vld [vmem:[#allocation4 + $0x110] sm:$0xff] }
 0x6db   :  { %7386 = vmatmul.f32.vlgmr.msra.gmra.mxu2 %v21061_v36  ;;  %v6448_v34 = vadd.f32 %v6447_v41, %v16873_v6  ;;  %7690 = vmatpush.msrb.mxu1 %v17014_v61  ;;  %v21066_v61 = vld [vmem:[#allocation99_spill] sm:$0xff] }
 0x6dc   :  { %v6718_v42 = vpop.f32.mrf.mxu3  ;;  %v21076_v36 = vld [vmem:[#allocation23_spill] sm:$0xff] }
 0x6dd   :  { %7099 = vmatmul.f32.vlgmr.msra.gmra.mxu0 %v21062_v20  ;;  %v6528_v51 = vpop.f32.mrf.mxu1  ;;  %7692 = vmatpush.msrb.mxu1 %v17022_v5 }
 0x6de   :  { %v6529_v33 = vadd.f32 %v6528_v51, %v6448_v34  ;;  %v6631_v44 = vpop.f32.mrf.mxu2  ;;  %7950 = vmatpush.msra.mxu0 %v17083_v38 }
 0x6df   :  { %7694 = vmatpush.msrb.mxu1 %v17030_v21 }
 0x6e0   :  { %v6632_v60 = vadd.f32 %v6631_v44, %v6529_v33  ;;  %7288 = vmatmul.f32.vlgmr.msra.gmra.mxu1 %v21063_v15  ;;  %v21077_v44 = vld [vmem:[#allocation52_spill] sm:$0xff] }
 0x6e1   :  { %7486 = vmatmul.f32.gmra.mxu3 %v21064_v1  ;;  %8030 = vmatpush.msra.mxu1 %v17076_v57 }
 0x6e2   :  { %v6451_v6 = vpop.f32.mrf.mxu0  ;;  %v17148_v27 = vadd.f32 %v6718_v42, %v6632_v60  ;;  %v7760_v42 = vand.u32 4294901760, %v7060_v63  ;;  %v21078_v60 = vld [vmem:[#allocation33_spill] sm:$0xff] }
 0x6e3   :  { %7391 = vmatmul.f32.gmra.mxu2 %v21065_v49  ;;  %v6452_v56 = vadd.f32 %v6451_v6, %v21066_v61  ;;  %v21079_v49 = vld [vmem:[#allocation40_spill] sm:$0xff] }
 0x6e4   :  { %v6722_v18 = vpop.f32.mrf.mxu3  ;;  %7761 = vmatpush.msrb.mxu2 %v7760_v42  ;;  %8032 = vmatpush.msra.mxu1 %v7760_v42 }
 0x6e5   :  { %7107 = vmatmul.f32.gmra.mxu0 %v21067_v46  ;;  %v6532_v5 = vpop.f32.mrf.mxu1  ;;  %v21080_v46 = vld [vmem:[#allocation35_spill] sm:$0xff] }
 0x6e6   :  { %v6533_v25 = vadd.f32 %v6532_v5, %v6452_v56  ;;  %v6639_v10 = vpop.f32.mrf.mxu2  ;;  %8123 = vmatpush.msra.mxu2 %v7875_v32 }
 0x6e8   :  { %v6640_v8 = vadd.f32 %v6639_v10, %v6533_v25  ;;  %7292 = vmatmul.f32.gmra.mxu1 %v21068_v45 }
 0x6e9   :  { %7492 = vmatmul.f32.gmra.mxu3 %v21069_v47 }
 0x6ea   :  { %v6455_v21 = vpop.f32.mrf.mxu0  ;;  %v17156_v23 = vadd.f32 %v6722_v18, %v6640_v8  ;;  %v21081_v8 = vld [vmem:[#allocation51_spill] sm:$0xff] }
 0x6eb   :  { %7396 = vmatmul.f32.gmra.mxu2 %v21070_v7  ;;  %v6456_v30 = vadd.f32 %v6455_v21, %v21071_v58  ;;  %v21082_v21 = vld [vmem:[#allocation44_spill] sm:$0xff] }
 0x6ec   :  { %v6726_v22 = vpop.f32.mrf.mxu3 }
 0x6ed   :  { %7115 = vmatmul.f32.gmra.mxu0 %v21072_v17  ;;  %v6536_v29 = vpop.f32.mrf.mxu1  ;;  %v21084_v17 = vld [vmem:[#allocation50_spill] sm:$0xff] }
 0x6ee   :  { %v6537_v9 = vadd.f32 %v6536_v29, %v6456_v30  ;;  %v6647_v26 = vpop.f32.mrf.mxu2 }
 0x6f0   :  { %v6648_v55 = vadd.f32 %v6647_v26, %v6537_v9  ;;  %7296 = vmatmul.f32.gmra.mxu1 %v21073_v59 }
 0x6f1   :  { %7498 = vmatmul.f32.gmra.mxu3 %v21074_v11  ;;  %v21085_v11 = vld [vmem:[#allocation25_spill] sm:$0xff] }
 0x6f2   :  { %v6459_v24 = vpop.f32.mrf.mxu0  ;;  %v17163_v39 = vadd.f32 %v6726_v22, %v6648_v55 }
 0x6f3   :  { %7401 = vmatmul.f32.gmra.mxu2 %v21075_v48  ;;  %v6460_v54 = vadd.f32 %v6459_v24, %v16939_v2  ;;  %v7880_v2 = vsub.f32 %v7060_v63, %v7760_v42  ;;  %v21086_v24 = vld [vmem:[#allocation41_spill] sm:$0xff]  ;;  %v21088_v63 = vld [vmem:[#allocation54_spill] sm:$0xff] }
 0x6f4   :  { %v6730_v41 = vpop.f32.mrf.mxu3 }
 0x6f5   :  { %7123 = vmatmul.f32.gmra.mxu0 %v21076_v36  ;;  %v6540_v34 = vpop.f32.mrf.mxu1  ;;  %v7881_v18 = vand.u32 4294901760, %v7880_v2 }
 0x6f6   :  { %v6541_v20 = vadd.f32 %v6540_v34, %v6460_v54  ;;  %v6655_v51 = vpop.f32.mrf.mxu2  ;;  %7953 = vmatpush.msra.mxu0 %v7880_v2 }
 0x6f7   :  { %v7882_v38 = vsub.f32 %v7880_v2, %v7881_v18  ;;  %8127 = vmatpush.msra.mxu2 %v7881_v18  ;;  %v21091_v2 = vld [vmem:[#allocation45_spill] sm:$0xff] }
 0x6f8   :  { %v6656_v33 = vadd.f32 %v6655_v51, %v6541_v20  ;;  %7300 = vmatmul.f32.gmra.mxu1 %v21077_v44  ;;  %v21089_v51 = vld [vmem:[#allocation43_spill] sm:$0xff] }
 0x6f9   :  { %7504 = vmatmul.f32.gmra.mxu3 %v21078_v60  ;;  %v7883_v47 = vand.u32 4294901760, %v7882_v38  ;;  %v21095_v38 = vld [vmem:[#allocation59_spill] sm:$0xff] }
 0x6fa   :  { %v6756_v1 = vpop.f32.mrf.mxu0  ;;  %v17172_v6 = vadd.f32 %v6730_v41, %v6656_v33  ;;  %v21087_v41 = vld [vmem:[#allocation42_spill] sm:$0xff]  ;;  %v21090_v33 = vld [vmem:[#allocation20_spill] sm:$0xff] }
 0x6fb   :  { %7406 = vmatmul.f32.gmra.mxu2 %v21079_v49  ;;  %v6757_v61 = vadd.f32 %v6756_v1, %v16963_v43  ;;  %7884 = vmatpush.msrb.mxu3 %v7883_v47  ;;  %v21083_v43 = vld [vmem:[#allocation19_spill] sm:$0xff]  ;;  %v21092_v49 = vld [vmem:[#allocation101_spill] sm:$0xff] }
 0x6fc   :  { %v6996_v56 = vpop.f32.mrf.mxu3 }
 0x6fd   :  { %7131 = vmatmul.f32.gmra.mxu0 %v21080_v46  ;;  %v6836_v5 = vpop.f32.mrf.mxu1  ;;  %8192 = vmatpush.msra.mxu3 %v17076_v57 }
 0x6fe   :  { %v6837_v25 = vadd.f32 %v6836_v5, %v6757_v61  ;;  %v6929_v10 = vpop.f32.mrf.mxu2 }
 0x6ff   :  { %8194 = vmatpush.msra.mxu3 %v7760_v42 }
 0x700   :  { %v6930_v32 = vadd.f32 %v6929_v10, %v6837_v25  ;;  %7304 = vmatmul.f32.gmra.mxu1 %v21081_v8  ;;  %v21094_v10 = vld [vmem:[#allocation16_spill] sm:$0xff] }
 0x701   :  { %7510 = vmatmul.f32.gmra.mxu3 %v21082_v21  ;;  %v21096_v21 = vld [vmem:[#allocation46_spill] sm:$0xff] }
 0x702   :  { %v17179_v7 = vadd.f32 %v6996_v56, %v6930_v32  ;;  %v6761_v58 = vpop.f32.mrf.mxu0 }
 0x703   :  { %7411 = vmatmul.f32.gmra.mxu2 %v21083_v43  ;;  %v6762_v30 = vadd.f32 %v6761_v58, %v16982_v37 }
 0x704   :  { %v7000_v22 = vpop.f32.mrf.mxu3 }
 0x705   :  { %7139 = vmatmul.f32.gmra.mxu0 %v21084_v17  ;;  %v6842_v29 = vpop.f32.mrf.mxu1 }
 0x706   :  { %v6843_v9 = vadd.f32 %v6842_v29, %v6762_v30  ;;  %v6933_v26 = vpop.f32.mrf.mxu2  ;;  %v21097_v30 = vld [vmem:[#allocation60_spill] sm:$0xff] }
 0x708   :  { %v6934_v55 = vadd.f32 %v6933_v26, %v6843_v9  ;;  %7308 = vmatmul.f32.gmra.mxu1 %v21085_v11  ;;  %v21098_v26 = vld [vmem:[#allocation31_spill] sm:$0xff] }
 0x709   :  { %7516 = vmatmul.f32.gmra.mxu3 %v21086_v24 }
 0x70a   :  { %v17187_v48 = vadd.f32 %v7000_v22, %v6934_v55  ;;  %v6766_v54 = vpop.f32.mrf.mxu0  ;;  %v21099_v55 = vld [vmem:[#allocation61_spill] sm:$0xff] }
 0x70b   :  { %7416 = vmatmul.f32.gmra.mxu2 %v21087_v41  ;;  %v6767_v57 = vadd.f32 %v6766_v54, %v17008_v31  ;;  %v21093_v31 = vld [vmem:[#allocation17_spill] sm:$0xff]  ;;  %v21100_v41 = vld [vmem:[#allocation48_spill] sm:$0xff] }
 0x70c   :  { %v7004_v37 = vpop.f32.mrf.mxu3 }
 0x70d   :  { %7147 = vmatmul.f32.gmra.mxu0 %v21088_v63  ;;  %v6848_v36 = vpop.f32.mrf.mxu1 }
 0x70e   :  { %v6849_v34 = vadd.f32 %v6848_v36, %v6767_v57  ;;  %v6937_v42 = vpop.f32.mrf.mxu2 }
 0x710   :  { %v6938_v20 = vadd.f32 %v6937_v42, %v6849_v34  ;;  %7312 = vmatmul.f32.gmra.mxu1 %v21089_v51 }
 0x711   :  { %7522 = vmatmul.f32.gmra.mxu3 %v21090_v33  ;;  %v21103_v33 = vld [vmem:[#allocation64_spill] sm:$0xff] }
 0x712   :  { %v17194_v60 = vadd.f32 %v7004_v37, %v6938_v20  ;;  %v6771_v1 = vpop.f32.mrf.mxu0  ;;  %v21102_v20 = vld [vmem:[#allocation55_spill] sm:$0xff] }
 0x713   :  { %7421 = vmatmul.f32.gmra.mxu2 %v21091_v2  ;;  %v6772_v61 = vadd.f32 %v6771_v1, %v21092_v49  ;;  %v21105_v49 = vld [vmem:[#allocation13_spill] sm:$0xff] }
 0x714   :  { %v7008_v56 = vpop.f32.mrf.mxu3 }
 0x715   :  { %7155 = vmatmul.f32.gmra.mxu0 %v21093_v31  ;;  %v6854_v18 = vpop.f32.mrf.mxu1 }
 0x716   :  { %v6855_v46 = vadd.f32 %v6854_v18, %v6772_v61  ;;  %v6941_v5 = vpop.f32.mrf.mxu2 }
 0x718   :  { %v6942_v25 = vadd.f32 %v6941_v5, %v6855_v46  ;;  %7316 = vmatmul.f32.gmra.mxu1 %v21094_v10 }
 0x719   :  { %7528 = vmatmul.f32.gmra.mxu3 %v21095_v38  ;;  %v21108_v38 = vld [vmem:[#allocation67_spill] sm:$0xff] }
 0x71a   :  { %v17201_v32 = vadd.f32 %v7008_v56, %v6942_v25  ;;  %v6776_v47 = vpop.f32.mrf.mxu0  ;;  %v21107_v25 = vld [vmem:[#allocation29_spill] sm:$0xff] }
 0x71b   :  { %7426 = vmatmul.f32.gmra.mxu2 %v21096_v21  ;;  %v6777_v58 = vadd.f32 %v6776_v47, %v17068_v53  ;;  %v21101_v53 = vld [vmem:[#allocation63_spill] sm:$0xff] }
 0x71c   :  { %v7012_v43 = vpop.f32.mrf.mxu3 }
 0x71d   :  { %7163 = vmatmul.f32.gmra.mxu0 %v21097_v30  ;;  %v6860_v22 = vpop.f32.mrf.mxu1 }
 0x71e   :  { %v6861_v17 = vadd.f32 %v6860_v22, %v6777_v58  ;;  %v6945_v29 = vpop.f32.mrf.mxu2  ;;  %v21110_v58 = vld [vmem:[#allocation56_spill] sm:$0xff] }
 0x720   :  { %v6946_v9 = vadd.f32 %v6945_v29, %v6861_v17  ;;  %7320 = vmatmul.f32.gmra.mxu1 %v21098_v26 }
 0x721   :  { %7534 = vmatmul.f32.gmra.mxu3 %v21099_v55  ;;  %v21112_v55 = vld [vmem:[#allocation62_spill] sm:$0xff] }
 0x722   :  { %v17208_v24 = vadd.f32 %v7012_v43, %v6946_v9  ;;  %v6781_v54 = vpop.f32.mrf.mxu0 }
 0x723   :  { %7431 = vmatmul.f32.gmra.mxu2 %v21100_v41  ;;  %v6782_v57 = vadd.f32 %v6781_v54, %v17093_v52  ;;  %v21106_v52 = vld [vmem:[#allocation66_spill] sm:$0xff]  ;;  %v21113_v54 = vld [vmem:[#allocation65_spill] sm:$0xff] }
 0x724   :  { %v7016_v37 = vpop.f32.mrf.mxu3 }
 0x725   :  { %7171 = vmatmul.f32.gmra.mxu0 %v21101_v53  ;;  %v6866_v63 = vpop.f32.mrf.mxu1 }
 0x726   :  { %v6867_v36 = vadd.f32 %v6866_v63, %v6782_v57  ;;  %v6949_v34 = vpop.f32.mrf.mxu2 }
 0x728   :  { %v6950_v42 = vadd.f32 %v6949_v34, %v6867_v36  ;;  %7324 = vmatmul.f32.gmra.mxu1 %v21102_v20 }
 0x729   :  { %7540 = vmatmul.f32.gmra.mxu3 %v21103_v33  ;;  %v21116_v33 = vld [vmem:[#allocation68_spill] sm:$0xff] }
 0x72a   :  { %v17215_v1 = vadd.f32 %v7016_v37, %v6950_v42  ;;  %v6786_v2 = vpop.f32.mrf.mxu0  ;;  %v21115_v37 = vld [vmem:[#allocation72_spill] sm:$0xff] }
 0x72b   :  { %7436 = vmatmul.f32.gmra.mxu2 %v21105_v49  ;;  %v6787_v61 = vadd.f32 %v6786_v2, %v17115_v16  ;;  %v21111_v16 = vld [vmem:[#allocation70_spill] sm:$0xff] }
 0x72c   :  { %21104 = vst [vmem:[#allocation97_spill] sm:$0xff] %v17215_v1  ;;  %v7020_v56 = vpop.f32.mrf.mxu3 }
 0x72d   :  { %7179 = vmatmul.f32.gmra.mxu0 %v21106_v52  ;;  %v6872_v31 = vpop.f32.mrf.mxu1 }
 0x72e   :  { %v6873_v18 = vadd.f32 %v6872_v31, %v6787_v61  ;;  %v6953_v46 = vpop.f32.mrf.mxu2  ;;  %v21118_v61 = vld [vmem:[#allocation75_spill] sm:$0xff] }
 0x730   :  { %v6954_v5 = vadd.f32 %v6953_v46, %v6873_v18  ;;  %7328 = vmatmul.f32.gmra.mxu1 %v21107_v25 }
 0x731   :  { %7546 = vmatmul.f32.gmra.mxu3 %v21108_v38 }
 0x732   :  { %v17222_v47 = vadd.f32 %v7020_v56, %v6954_v5  ;;  %v6791_v21 = vpop.f32.mrf.mxu0  ;;  %v21119_v5 = vld [vmem:[#allocation71_spill] sm:$0xff] }
 0x733   :  { %7441 = vmatmul.f32.gmra.mxu2 %v21110_v58  ;;  %v6792_v43 = vadd.f32 %v6791_v21, %v17132_v19  ;;  %v21121_v21 = vld [vmem:[#allocation78_spill] sm:$0xff] }
 0x734   :  { %21109 = vst [vmem:[#allocation15_spill] sm:$0xff] %v17222_v47  ;;  %v7024_v30 = vpop.f32.mrf.mxu3 }
 0x735   :  { %7187 = vmatmul.f32.gmra.mxu0 %v21111_v16  ;;  %v6878_v22 = vpop.f32.mrf.mxu1 }
 0x736   :  { %v6879_v17 = vadd.f32 %v6878_v22, %v6792_v43  ;;  %v6957_v29 = vpop.f32.mrf.mxu2 }
 0x738   :  { %v6958_v9 = vadd.f32 %v6957_v29, %v6879_v17  ;;  %7332 = vmatmul.f32.gmra.mxu1 %v21112_v55  ;;  %v21122_v17 = vld [vmem:[#allocation74_spill] sm:$0xff] }
 0x739   :  { %7886 = vmatmul.f32.vlgmr.msrb.gmra.mxu3 %v21113_v54 }
 0x73a   :  { %v17229_v41 = vadd.f32 %v7024_v30, %v6958_v9  ;;  %v6796_v57 = vpop.f32.mrf.mxu0  ;;  %v21124_v9 = vld [vmem:[#allocation81_spill] sm:$0xff] }
 0x73b   :  { %7767 = vmatmul.f32.vlgmr.msrb.gmra.mxu2 %v21115_v37  ;;  %v6797_v53 = vadd.f32 %v6796_v57, %v17148_v27 }
 0x73c   :  { %21114 = vst [vmem:[#allocation24_spill] sm:$0xff] %v17229_v41  ;;  %v7028_v63 = vpop.f32.mrf.mxu3 }
 0x73d   :  { %7615 = vmatmul.f32.vlgmr.msrb.gmra.mxu0 %v21063_v15  ;;  %v6884_v19 = vpop.f32.mrf.mxu1 }
 0x73e   :  { %v6885_v36 = vadd.f32 %v6884_v19, %v6797_v53  ;;  %v6961_v34 = vpop.f32.mrf.mxu2 }
 0x740   :  { %v6962_v42 = vadd.f32 %v6961_v34, %v6885_v36  ;;  %7696 = vmatmul.f32.vlgmr.msrb.gmra.mxu1 %v21063_v15  ;;  %v21125_v36 = vld [vmem:[#allocation77_spill] sm:$0xff] }
 0x741   :  { %7890 = vmatmul.f32.gmra.mxu3 %v21116_v33 }
 0x742   :  { %v17236_v2 = vadd.f32 %v7028_v63, %v6962_v42  ;;  %v6801_v49 = vpop.f32.mrf.mxu0  ;;  %v21127_v42 = vld [vmem:[#allocation84_spill] sm:$0xff] }
 0x743   :  { %7775 = vmatmul.f32.gmra.mxu2 %v21118_v61  ;;  %v6802_v56 = vadd.f32 %v6801_v49, %v17156_v23 }
 0x744   :  { %21117 = vst [vmem:[#allocation49_spill] sm:$0xff] %v17236_v2  ;;  %v7032_v52 = vpop.f32.mrf.mxu3 }
 0x745   :  { %7619 = vmatmul.f32.gmra.mxu0 %v21068_v45  ;;  %v6890_v27 = vpop.f32.mrf.mxu1 }
 0x746   :  { %v6891_v31 = vadd.f32 %v6890_v27, %v6802_v56  ;;  %v6965_v18 = vpop.f32.mrf.mxu2  ;;  %v21128_v27 = vld [vmem:[#allocation80_spill] sm:$0xff] }
 0x748   :  { %v6966_v46 = vadd.f32 %v6965_v18, %v6891_v31  ;;  %7700 = vmatmul.f32.gmra.mxu1 %v21068_v45  ;;  %v21129_v18 = vld [vmem:[#allocation87_spill] sm:$0xff] }
 0x749   :  { %7894 = vmatmul.f32.gmra.mxu3 %v21119_v5 }
 0x74a   :  { %v17243_v15 = vadd.f32 %v7032_v52, %v6966_v46  ;;  %v6806_v38 = vpop.f32.mrf.mxu0 }
 0x74b   :  { %7783 = vmatmul.f32.gmra.mxu2 %v21121_v21  ;;  %v6807_v58 = vadd.f32 %v6806_v38, %v17163_v39 }
 0x74c   :  { %21120 = vst [vmem:[#allocation18_spill] sm:$0xff] %v17243_v15  ;;  %v7036_v43 = vpop.f32.mrf.mxu3 }
 0x74d   :  { %7623 = vmatmul.f32.gmra.mxu0 %v21073_v59  ;;  %v6896_v23 = vpop.f32.mrf.mxu1 }
 0x74e   :  { %v6897_v30 = vadd.f32 %v6896_v23, %v6807_v58  ;;  %v6969_v16 = vpop.f32.mrf.mxu2  ;;  %v21130_v23 = vld [vmem:[#allocation83_spill] sm:$0xff] }
 0x750   :  { %v6970_v22 = vadd.f32 %v6969_v16, %v6897_v30  ;;  %7704 = vmatmul.f32.gmra.mxu1 %v21073_v59  ;;  %v21131_v16 = vld [vmem:[#allocation91_spill] sm:$0xff] }
 0x751   :  { %7898 = vmatmul.f32.gmra.mxu3 %v21122_v17 }
 0x752   :  { %v17250_v45 = vadd.f32 %v7036_v43, %v6970_v22  ;;  %v6811_v29 = vpop.f32.mrf.mxu0 }
 0x753   :  { %7791 = vmatmul.f32.gmra.mxu2 %v21124_v9  ;;  %v6812_v57 = vadd.f32 %v6811_v29, %v17172_v6 }
 0x754   :  { %21123 = vst [vmem:[#allocation47_spill] sm:$0xff] %v17250_v45  ;;  %v7040_v37 = vpop.f32.mrf.mxu3 }
 0x755   :  { %7627 = vmatmul.f32.gmra.mxu0 %v21077_v44  ;;  %v6902_v39 = vpop.f32.mrf.mxu1 }
 0x756   :  { %v6903_v53 = vadd.f32 %v6902_v39, %v6812_v57  ;;  %v6973_v63 = vpop.f32.mrf.mxu2  ;;  %v21132_v39 = vld [vmem:[#allocation86_spill] sm:$0xff] }
 0x758   :  { %v6974_v19 = vadd.f32 %v6973_v63, %v6903_v53  ;;  %7708 = vmatmul.f32.gmra.mxu1 %v21077_v44  ;;  %v21133_v63 = vld [vmem:[#allocation93_spill] sm:$0xff] }
 0x759   :  { %7902 = vmatmul.f32.gmra.mxu3 %v21125_v36 }
 0x75a   :  { %v17257_v59 = vadd.f32 %v7040_v37, %v6974_v19  ;;  %v7100_v34 = vpop.f32.mrf.mxu0 }
 0x75b   :  { %7799 = vmatmul.f32.gmra.mxu2 %v21127_v42 }
 0x75c   :  { %21126 = vst [vmem:[#allocation37_spill] sm:$0xff] %v17257_v59  ;;  %v7481_v49 = vpop.f32.mrf.mxu3 }
 0x75d   :  { %7631 = vmatmul.f32.gmra.mxu0 %v21081_v8  ;;  %v7289_v6 = vpop.f32.mrf.mxu1 }
 0x75e   :  { %v7290_v61 = vadd.f32 %v7289_v6, %v7100_v34  ;;  %v7387_v56 = vpop.f32.mrf.mxu2 }
 0x760   :  { %v7388_v52 = vadd.f32 %v7387_v56, %v7290_v61  ;;  %7712 = vmatmul.f32.gmra.mxu1 %v21081_v8  ;;  %v21134_v61 = vld [vmem:[#allocation90_spill] sm:$0xff] }
 0x761   :  { %7906 = vmatmul.f32.gmra.mxu3 %v21128_v27 }
 0x762   :  { %v7108_v31 = vpop.f32.mrf.mxu0  ;;  %v17263_v44 = vadd.f32 %v7481_v49, %v7388_v52  ;;  %v21135_v52 = vld [vmem:[#allocation94_spill] sm:$0xff] }
 0x763   :  { %7807 = vmatmul.f32.gmra.mxu2 %v21129_v18 }
 0x764   :  { %v7487_v46 = vpop.f32.mrf.mxu3 }
 0x765   :  { %7635 = vmatmul.f32.gmra.mxu0 %v21085_v11  ;;  %v7293_v38 = vpop.f32.mrf.mxu1 }
 0x766   :  { %v7294_v21 = vadd.f32 %v7293_v38, %v7108_v31  ;;  %v7392_v58 = vpop.f32.mrf.mxu2 }
 0x768   :  { %v7393_v43 = vadd.f32 %v7392_v58, %v7294_v21  ;;  %7716 = vmatmul.f32.gmra.mxu1 %v21085_v11 }
 0x769   :  { %7910 = vmatmul.f32.gmra.mxu3 %v21130_v23 }
 0x76a   :  { %v7116_v30 = vpop.f32.mrf.mxu0  ;;  %v17269_v8 = vadd.f32 %v7487_v46, %v7393_v43  ;;  %v21136_v43 = vld [vmem:[#allocation95_spill] sm:$0xff] }
 0x76b   :  { %7815 = vmatmul.f32.gmra.mxu2 %v21131_v16 }
 0x76c   :  { %v7493_v22 = vpop.f32.mrf.mxu3 }
 0x76d   :  { %7639 = vmatmul.f32.gmra.mxu0 %v21089_v51  ;;  %v7297_v29 = vpop.f32.mrf.mxu1 }
 0x76e   :  { %v7298_v9 = vadd.f32 %v7297_v29, %v7116_v30  ;;  %v7397_v57 = vpop.f32.mrf.mxu2 }
 0x770   :  { %v7398_v37 = vadd.f32 %v7397_v57, %v7298_v9  ;;  %7720 = vmatmul.f32.gmra.mxu1 %v21089_v51 }
 0x771   :  { %7914 = vmatmul.f32.gmra.mxu3 %v21132_v39 }
 0x772   :  { %v7124_v53 = vpop.f32.mrf.mxu0  ;;  %v17275_v11 = vadd.f32 %v7493_v22, %v7398_v37  ;;  %v21137_v37 = vld [vmem:[#allocation96_spill] sm:$0xff] }
 0x773   :  { %7823 = vmatmul.f32.gmra.mxu2 %v21133_v63 }
 0x774   :  { %v7499_v19 = vpop.f32.mrf.mxu3 }
 0x775   :  { %7643 = vmatmul.f32.gmra.mxu0 %v21094_v10  ;;  %v7301_v34 = vpop.f32.mrf.mxu1 }
 0x776   :  { %v7302_v42 = vadd.f32 %v7301_v34, %v7124_v53  ;;  %v7402_v49 = vpop.f32.mrf.mxu2 }
 0x778   :  { %v7403_v6 = vadd.f32 %v7402_v49, %v7302_v42  ;;  %7724 = vmatmul.f32.gmra.mxu1 %v21094_v10 }
 0x779   :  { %7918 = vmatmul.f32.gmra.mxu3 %v21134_v61 }
 0x77a   :  { %v7132_v56 = vpop.f32.mrf.mxu0  ;;  %v17281_v51 = vadd.f32 %v7499_v19, %v7403_v6  ;;  %v21138_v6 = vld [vmem:[#allocation98_spill] sm:$0xff] }
 0x77b   :  { %7831 = vmatmul.f32.gmra.mxu2 %v21135_v52 }
 0x77c   :  { %v7505_v31 = vpop.f32.mrf.mxu3 }
 0x77d   :  { %7647 = vmatmul.f32.gmra.mxu0 %v21098_v26  ;;  %v7305_v18 = vpop.f32.mrf.mxu1 }
 0x77e   :  { %v7306_v46 = vadd.f32 %v7305_v18, %v7132_v56  ;;  %v7407_v38 = vpop.f32.mrf.mxu2 }
 0x780   :  { %v7408_v21 = vadd.f32 %v7407_v38, %v7306_v46  ;;  %7728 = vmatmul.f32.gmra.mxu1 %v21098_v26 }
 0x781   :  { %7922 = vmatmul.f32.gmra.mxu3 %v16730_v0 }
 0x782   :  { %v7140_v58 = vpop.f32.mrf.mxu0  ;;  %v17287_v10 = vadd.f32 %v7505_v31, %v7408_v21 }
 0x783   :  { %7839 = vmatmul.f32.gmra.mxu2 %v21136_v43 }
 0x784   :  { %v7511_v30 = vpop.f32.mrf.mxu3 }
 0x785   :  { %7651 = vmatmul.f32.gmra.mxu0 %v21102_v20  ;;  %v7309_v16 = vpop.f32.mrf.mxu1 }
 0x786   :  { %v7310_v22 = vadd.f32 %v7309_v16, %v7140_v58  ;;  %v7412_v29 = vpop.f32.mrf.mxu2  ;;  %v21140_v58 = vld [vmem:[#allocation26_spill] sm:$0xff] }
 0x788   :  { %v7413_v9 = vadd.f32 %v7412_v29, %v7310_v22  ;;  %7732 = vmatmul.f32.gmra.mxu1 %v21102_v20  ;;  %v21141_v29 = vld [vmem:[#allocation69_spill] sm:$0xff] }
 0x789   :  { %7926 = vmatmul.f32.gmra.mxu3 %v16751_v28 }
 0x78a   :  { %v7148_v57 = vpop.f32.mrf.mxu0  ;;  %v17293_v26 = vadd.f32 %v7511_v30, %v7413_v9 }
 0x78b   :  { %7847 = vmatmul.f32.gmra.mxu2 %v21137_v37  ;;  %v21143_v37 = vld [vmem:[#allocation21_spill] sm:$0xff] }
 0x78c   :  { %v7517_v53 = vpop.f32.mrf.mxu3 }
 0x78d   :  { %7655 = vmatmul.f32.gmra.mxu0 %v21107_v25  ;;  %v7313_v63 = vpop.f32.mrf.mxu1 }
 0x78e   :  { %v7314_v19 = vadd.f32 %v7313_v63, %v7148_v57  ;;  %v7417_v34 = vpop.f32.mrf.mxu2 }
 0x790   :  { %v7418_v42 = vadd.f32 %v7417_v34, %v7314_v19  ;;  %7736 = vmatmul.f32.gmra.mxu1 %v21107_v25  ;;  %v21144_v34 = vld [vmem:[#allocation73_spill] sm:$0xff] }
 0x791   :  { %7930 = vmatmul.f32.gmra.mxu3 %v16770_v3 }
 0x792   :  { %v7156_v49 = vpop.f32.mrf.mxu0  ;;  %v17299_v20 = vadd.f32 %v7517_v53, %v7418_v42 }
 0x793   :  { %7855 = vmatmul.f32.gmra.mxu2 %v21138_v6 }
 0x794   :  { %v7523_v56 = vpop.f32.mrf.mxu3 }
 0x795   :  { %7659 = vmatmul.f32.gmra.mxu0 %v21112_v55  ;;  %v7317_v52 = vpop.f32.mrf.mxu1 }
 0x796   :  { %v7318_v31 = vadd.f32 %v7317_v52, %v7156_v49  ;;  %v7422_v18 = vpop.f32.mrf.mxu2 }
 0x798   :  { %v7423_v46 = vadd.f32 %v7422_v18, %v7318_v31  ;;  %7740 = vmatmul.f32.gmra.mxu1 %v21112_v55 }
 0x799   :  { %8196 = vmatmul.f32.vlgmr.msra.gmra.mxu3 %v21113_v54 }
 0x79a   :  { %v7164_v38 = vpop.f32.mrf.mxu0  ;;  %v17305_v25 = vadd.f32 %v7523_v56, %v7423_v46  ;;  %v21146_v56 = vld [vmem:[#allocation38_spill] sm:$0xff]  ;;  %v21147_v46 = vld [vmem:[#allocation76_spill] sm:$0xff] }
 0x79b   :  { %8129 = vmatmul.f32.vlgmr.msra.gmra.mxu2 %v21113_v54 }
 0x79c   :  { %21139 = vst [vmem:[#allocation99_spill] sm:$0xff] %v17305_v25  ;;  %v7529_v21 = vpop.f32.mrf.mxu3 }
 0x79d   :  { %7956 = vmatmul.f32.vlgmr.msra.gmra.mxu0 %v21140_v58  ;;  %v7321_v43 = vpop.f32.mrf.mxu1 }
 0x79e   :  { %v7322_v30 = vadd.f32 %v7321_v43, %v7164_v38  ;;  %v7427_v16 = vpop.f32.mrf.mxu2  ;;  %v21149_v43 = vld [vmem:[#allocation36_spill] sm:$0xff] }
 0x7a0   :  { %v7428_v22 = vadd.f32 %v7427_v16, %v7322_v30  ;;  %8036 = vmatmul.f32.vlgmr.msra.gmra.mxu1 %v21141_v29  ;;  %v21150_v29 = vld [vmem:[#allocation79_spill] sm:$0xff] }
 0x7a1   :  { %8200 = vmatmul.f32.gmra.mxu3 %v21116_v33 }
 0x7a2   :  { %v7172_v9 = vpop.f32.mrf.mxu0  ;;  %v17311_v55 = vadd.f32 %v7529_v21, %v7428_v22 }
 0x7a3   :  { %8133 = vmatmul.f32.gmra.mxu2 %v21116_v33 }
 0x7a4   :  { %21142 = vst [vmem:[#allocation53_spill] sm:$0xff] %v17311_v55  ;;  %v7535_v57 = vpop.f32.mrf.mxu3 }
 0x7a5   :  { %7961 = vmatmul.f32.gmra.mxu0 %v21143_v37  ;;  %v7325_v54 = vpop.f32.mrf.mxu1 }
 0x7a6   :  { %v7326_v53 = vadd.f32 %v7325_v54, %v7172_v9  ;;  %v7432_v63 = vpop.f32.mrf.mxu2 }
 0x7a8   :  { %v7433_v19 = vadd.f32 %v7432_v63, %v7326_v53  ;;  %8042 = vmatmul.f32.gmra.mxu1 %v21144_v34  ;;  %v21153_v63 = vld [vmem:[#allocation82_spill] sm:$0xff] }
 0x7a9   :  { %8204 = vmatmul.f32.gmra.mxu3 %v21119_v5 }
 0x7aa   :  { %v7180_v42 = vpop.f32.mrf.mxu0  ;;  %v17317_v49 = vadd.f32 %v7535_v57, %v7433_v19 }
 0x7ab   :  { %8137 = vmatmul.f32.gmra.mxu2 %v21119_v5 }
 0x7ac   :  { %21145 = vst [vmem:[#allocation34_spill] sm:$0xff] %v17317_v49  ;;  %v7541_v6 = vpop.f32.mrf.mxu3 }
 0x7ad   :  { %7966 = vmatmul.f32.gmra.mxu0 %v21146_v56  ;;  %v7329_v33 = vpop.f32.mrf.mxu1  ;;  %v21155_v56 = vld [vmem:[#allocation85_spill] sm:$0xff] }
 0x7ae   :  { %v7330_v52 = vadd.f32 %v7329_v33, %v7180_v42  ;;  %v7437_v31 = vpop.f32.mrf.mxu2  ;;  %v21154_v42 = vld [vmem:[#allocation22_spill] sm:$0xff] }
 0x7b0   :  { %v7438_v18 = vadd.f32 %v7437_v31, %v7330_v52  ;;  %8048 = vmatmul.f32.gmra.mxu1 %v21147_v46  ;;  %v21156_v31 = vld [vmem:[#allocation28_spill] sm:$0xff] }
 0x7b1   :  { %8208 = vmatmul.f32.gmra.mxu3 %v21122_v17  ;;  %v21157_v46 = vld [vmem:[#allocation88_spill] sm:$0xff] }
 0x7b2   :  { %v7188_v38 = vpop.f32.mrf.mxu0  ;;  %v17323_v21 = vadd.f32 %v7541_v6, %v7438_v18 }
 0x7b3   :  { %8141 = vmatmul.f32.gmra.mxu2 %v21122_v17  ;;  %v21152_v17 = vld [vmem:[#allocation57_spill] sm:$0xff] }
 0x7b4   :  { %21148 = vst [vmem:[#allocation14_spill] sm:$0xff] %v17323_v21  ;;  %v7547_v58 = vpop.f32.mrf.mxu3 }
 0x7b5   :  { %7971 = vmatmul.f32.gmra.mxu0 %v21149_v43  ;;  %v7333_v5 = vpop.f32.mrf.mxu1  ;;  %v21158_v43 = vld [vmem:[#allocation89_spill] sm:$0xff] }
 0x7b6   :  { %v7334_v30 = vadd.f32 %v7333_v5, %v7188_v38  ;;  %v7442_v16 = vpop.f32.mrf.mxu2 }
 0x7b8   :  { %v7443_v22 = vadd.f32 %v7442_v16, %v7334_v30  ;;  %8054 = vmatmul.f32.gmra.mxu1 %v21150_v29  ;;  %v21159_v30 = vld [vmem:[#allocation92_spill] sm:$0xff] }
 0x7b9   :  { %8212 = vmatmul.f32.gmra.mxu3 %v21125_v36 }
 0x7ba   :  { %v17329_v9 = vpop.f32.mrf.mxu0  ;;  %v17331_v57 = vadd.f32 %v7547_v58, %v7443_v22 }
 0x7bb   :  { %8145 = vmatmul.f32.gmra.mxu2 %v21125_v36 }
 0x7bc   :  { %21151 = vst [vmem:[#allocation39_spill] sm:$0xff] %v17331_v57  ;;  %v17334_v37 = vpop.f32.mrf.mxu3 }
 0x7bd   :  { %7976 = vmatmul.f32.gmra.mxu0 %v21152_v17  ;;  %v17337_v54 = vpop.f32.mrf.mxu1 }
 0x7be   :  { %v17339_v53 = vpop.f32.mrf.mxu2 }
 0x7c0   :  { %8060 = vmatmul.f32.gmra.mxu1 %v21153_v63 }
 0x7c1   :  { %8216 = vmatmul.f32.gmra.mxu3 %v21128_v27 }
 0x7c2   :  { %v17343_v19 = vpop.f32.mrf.mxu0 }
 0x7c3   :  { %8149 = vmatmul.f32.gmra.mxu2 %v21128_v27 }
 0x7c4   :  { %v17346_v34 = vpop.f32.mrf.mxu3 }
 0x7c5   :  { %7981 = vmatmul.f32.gmra.mxu0 %v21154_v42  ;;  %v17349_v36 = vpop.f32.mrf.mxu1 }
 0x7c6   :  { %v17351_v6 = vpop.f32.mrf.mxu2 }
 0x7c8   :  { %8066 = vmatmul.f32.gmra.mxu1 %v21155_v56 }
 0x7c9   :  { %8220 = vmatmul.f32.gmra.mxu3 %v21130_v23 }
 0x7ca   :  { %v17355_v33 = vpop.f32.mrf.mxu0 }
 0x7cb   :  { %8153 = vmatmul.f32.gmra.mxu2 %v21130_v23 }
 0x7cc   :  { %v17358_v52 = vpop.f32.mrf.mxu3 }
 0x7cd   :  { %7986 = vmatmul.f32.gmra.mxu0 %v21156_v31  ;;  %v17361_v27 = vpop.f32.mrf.mxu1 }
 0x7ce   :  { %v17363_v18 = vpop.f32.mrf.mxu2 }
 0x7d0   :  { %8072 = vmatmul.f32.gmra.mxu1 %v21157_v46 }
 0x7d1   :  { %8224 = vmatmul.f32.gmra.mxu3 %v21132_v39 }
 0x7d2   :  { %v17367_v38 = vpop.f32.mrf.mxu0 }
 0x7d3   :  { %8157 = vmatmul.f32.gmra.mxu2 %v21132_v39 }
 0x7d4   :  { %v17370_v58 = vpop.f32.mrf.mxu3 }
 0x7d5   :  { %7991 = vmatmul.f32.gmra.mxu0 %v21158_v43  ;;  %v17373_v23 = vpop.f32.mrf.mxu1 }
 0x7d6   :  { %v17375_v5 = vpop.f32.mrf.mxu2 }
 0x7d8   :  { %8078 = vmatmul.f32.gmra.mxu1 %v21159_v30 }
 0x7d9   :  { %8228 = vmatmul.f32.gmra.mxu3 %v21134_v61 }
 0x7da   :  { %v17379_v16 = vpop.f32.mrf.mxu0 }
 0x7db   :  { %8161 = vmatmul.f32.gmra.mxu2 %v21134_v61 }
 0x7dc   :  { %v17382_v22 = vpop.f32.mrf.mxu3 }
 0x7dd   :  { %7996 = vmatmul.f32.gmra.mxu0 %v16721_v62  ;;  %v17385_v39 = vpop.f32.mrf.mxu1 }
 0x7de   :  { %v17387_v29 = vpop.f32.mrf.mxu2 }
 0x7e0   :  { %8084 = vmatmul.f32.gmra.mxu1 %v16736_v13 }
 0x7e1   :  { %8232 = vmatmul.f32.gmra.mxu3 %v16730_v0 }
 0x7e2   :  { %v17391_v17 = vpop.f32.mrf.mxu0 }
 0x7e3   :  { %8165 = vmatmul.f32.gmra.mxu2 %v16730_v0 }
 0x7e4   :  { %v17394_v63 = vpop.f32.mrf.mxu3 }
 0x7e5   :  { %8001 = vmatmul.f32.gmra.mxu0 %v16742_v35  ;;  %v17397_v61 = vpop.f32.mrf.mxu1 }
 0x7e6   :  { %v17399_v42 = vpop.f32.mrf.mxu2 }
 0x7e8   :  { %8090 = vmatmul.f32.gmra.mxu1 %v16757_v4 }
 0x7e9   :  { %8236 = vmatmul.f32.gmra.mxu3 %v16751_v28 }
 0x7ea   :  { %v17403_v62 = vpop.f32.mrf.mxu0 }
 0x7eb   :  { %8169 = vmatmul.f32.gmra.mxu2 %v16751_v28 }
 0x7ec   :  { %v17406_v13 = vpop.f32.mrf.mxu3 }
 0x7ed   :  { %21160 = vst [vmem:[#allocation100_spill] sm:$0xff] %v17406_v13  ;;  %8006 = vmatmul.f32.gmra.mxu0 %v16763_v14  ;;  %v17409_v0 = vpop.f32.mrf.mxu1 }
 0x7ee   :  { %v17411_v56 = vpop.f32.mrf.mxu2 }
 0x7f0   :  { %8096 = vmatmul.f32.gmra.mxu1 %v16776_v12 }
 0x7f1   :  { %8240 = vmatmul.f32.gmra.mxu3 %v16770_v3 }
 0x7f2   :  { %v17415_v35 = vpop.f32.mrf.mxu0 }
 0x7f3   :  { %21161 = vst [vmem:[#allocation30_spill] sm:$0xff] %v17415_v35  ;;  %8173 = vmatmul.f32.gmra.mxu2 %v16770_v3 }
 0x7f4   :  { %v17418_v4 = vpop.f32.mrf.mxu3 }
 0x7f5   :  { %21162 = vst [vmem:[#allocation27_spill] sm:$0xff] %v17418_v4  ;;  %8011 = vmatmul.f32.gmra.mxu0 %v16782_v40  ;;  %v17421_v28 = vpop.f32.mrf.mxu1  ;;  %v7621_v4 = vadd.f32 %v17343_v19, %v17269_v8 }
 0x7f6   :  { %21163 = vst [vmem:[#allocation32_spill] sm:$0xff] %v17421_v28  ;;  %v17423_v31 = vpop.f32.mrf.mxu2 }
 0x7f7   :  { %21164 = vst [vmem:[#allocation58_spill] sm:$0xff] %v17423_v31 }
 0x7f8   :  { %8102 = vmatmul.f32.gmra.mxu1 %v21057_v50  ;;  %v12718_v50 = vld [vmem:[%s20364_s4 + $0x88] sm:$0xff] }
 0x7f9   :  { %v17451_v57 = vand.u32 4294901760, %v12718_v50 }
 0x7fa   :  { %v17426_v14 = vpop.f32.mrf.mxu0 }
 0x7fb   :  { %21165 = vst [vmem:[#allocation23_spill] sm:$0xff] %v17426_v14  ;;  %8363 = vmatpush.msrb.mxu0 %v17451_v57  ;;  %8554 = vmatpush.msrb.mxu3 %v17451_v57 }
 0x7fc   :  { %v17428_v46 = vpop.f32.mrf.mxu3 }
 0x7fd   :  { %21166 = vst [vmem:[#allocation52_spill] sm:$0xff] %v17428_v46  ;;  %v17430_v12 = vpop.f32.mrf.mxu1 }
 0x7fe   :  { %21167 = vst [vmem:[#allocation33_spill] sm:$0xff] %v17430_v12  ;;  %v17432_v43 = vpop.f32.mrf.mxu2 }
 0x7ff   :  { %21168 = vst [vmem:[#allocation40_spill] sm:$0xff] %v17432_v43 }
 0x802   :  { %v17434_v30 = vpop.f32.mrf.mxu0 }
 0x803   :  { %21169 = vst [vmem:[#allocation35_spill] sm:$0xff] %v17434_v30 }
 0x804   :  { %v17436_v3 = vpop.f32.mrf.mxu3 }
 0x805   :  { %21170 = vst [vmem:[#allocation51_spill] sm:$0xff] %v17436_v3  ;;  %v17438_v59 = vpop.f32.mrf.mxu1  ;;  %v12717_v3 = vld [vmem:[%s20364_s4 + $0x80] sm:$0xff] }
 0x806   :  { %21171 = vst [vmem:[#allocation44_spill] sm:$0xff] %v17438_v59  ;;  %v17440_v40 = vpop.f32.mrf.mxu2 }
 0x807   :  { %21172 = vst [vmem:[#allocation19_spill] sm:$0xff] %v17440_v40 }
 0x80a   :  { %v17442_v45 = vpop.f32.mrf.mxu0 }
 0x80b   :  { %21173 = vst [vmem:[#allocation50_spill] sm:$0xff] %v17442_v45  ;;  %v17460_v45 = vsub.f32 %v12718_v50, %v17451_v57 }
 0x80c   :  { %v17444_v15 = vpop.f32.mrf.mxu3 }
 0x80d   :  { %21174 = vst [vmem:[#allocation25_spill] sm:$0xff] %v17444_v15  ;;  %v17449_v2 = vpop.f32.mrf.mxu1  ;;  %v17462_v15 = vand.u32 4294901760, %v12717_v3  ;;  %v20575_v41 = vand.u32 4294901760, %v17460_v45  ;;  %8500 = vmatpush.msrb.mxu2 %v17460_v45 }
 0x80e   :  { %21175 = vst [vmem:[#allocation41_spill] sm:$0xff] %v17449_v2  ;;  %v17453_v21 = vpop.f32.mrf.mxu2  ;;  %v7617_v2 = vadd.f32 %v17329_v9, %v17263_v44  ;;  %v12715_v44 = vld [vmem:[%s20364_s4 + $0x70] sm:$0xff] }
 0x80f   :  { %21176 = vst [vmem:[#allocation42_spill] sm:$0xff] %v17453_v21  ;;  %v12716_v21 = vld [vmem:[%s20364_s4 + $0x78] sm:$0xff]  ;;  %8365 = vmatpush.msrb.mxu0 %v17462_v15  ;;  %v17473_v40 = vsub.f32 %v12717_v3, %v17462_v15  ;;  %8556 = vmatpush.msrb.mxu3 %v17462_v15  ;;  %v8423_v9 = vsub.f32 %v17460_v45, %v20575_v41 }
 0x810   :  { %v17476_v50 = vand.u32 4294901760, %v12716_v21  ;;  %v7698_v46 = vadd.f32 %v17337_v54, %v7617_v2  ;;  %v17496_v54 = vand.u32 4294901760, %v12715_v44 }
 0x811   :  { %8503 = vmatpush.msrb.mxu2 %v17473_v40  ;;  %v8424_v3 = vand.u32 4294901760, %v8423_v9  ;;  %v12713_v9 = vld [vmem:[%s20364_s4 + $0x60] sm:$0xff] }
 0x812   :  { %v17479_v59 = vpop.f32.mrf.mxu0  ;;  %v17490_v43 = vsub.f32 %v12716_v21, %v17476_v50  ;;  %8367 = vmatpush.msrb.mxu0 %v17476_v50  ;;  %8558 = vmatpush.msrb.mxu3 %v17476_v50  ;;  %v21180_v21 = vand.u32 4294901760, %v17473_v40  ;;  %v7769_v47 = vadd.f32 %v17339_v53, %v7698_v46  ;;  %v17530_v19 = vand.u32 4294901760, %v12713_v9 }
 0x813   :  { %21177 = vst [vmem:[#allocation54_spill] sm:$0xff] %v17479_v59  ;;  %v12714_v59 = vld [vmem:[%s20364_s4 + $0x68] sm:$0xff]  ;;  %8425 = vmatpush.msrb.mxu1 %v8424_v3  ;;  %v7702_v46 = vadd.f32 %v17349_v36, %v7621_v4  ;;  %v12712_v3 = vld [vmem:[%s20364_s4 + $0x58] sm:$0xff] }
 0x814   :  { %v17494_v2 = vpop.f32.mrf.mxu3  ;;  %v8429_v30 = vsub.f32 %v17473_v40, %v21180_v21  ;;  %v20576_v49 = vand.u32 4294901760, %v17490_v43  ;;  %8506 = vmatpush.msrb.mxu2 %v17490_v43  ;;  %8560 = vmatpush.msrb.mxu3 %v17496_v54  ;;  %v7888_v36 = vadd.f32 %v17334_v37, %v7769_v47 }
 0x815   :  { %21178 = vst [vmem:[#allocation43_spill] sm:$0xff] %v17494_v2  ;;  %v17502_v41 = vpop.f32.mrf.mxu1  ;;  %v17509_v2 = vand.u32 4294901760, %v12714_v59  ;;  %8369 = vmatpush.msrb.mxu0 %v17496_v54 }
 0x816   :  { %21179 = vst [vmem:[#allocation20_spill] sm:$0xff] %v17502_v41  ;;  %v17514_v12 = vpop.f32.mrf.mxu2  ;;  %v17517_v41 = vsub.f32 %v12715_v44, %v17496_v54  ;;  %v8430_v21 = vand.u32 4294901760, %v8429_v30  ;;  %v8435_v53 = vsub.f32 %v17490_v43, %v20576_v49 }
 0x817   :  { %21181 = vst [vmem:[#allocation45_spill] sm:$0xff] %v17514_v12  ;;  %v17528_v8 = vsub.f32 %v12714_v59, %v17509_v2  ;;  %8562 = vmatpush.msrb.mxu3 %v17509_v2  ;;  %v17541_v59 = vsub.f32 %v12713_v9, %v17530_v19  ;;  %v17543_v12 = vand.u32 4294901760, %v12712_v3  ;;  %8371 = vmatpush.msrb.mxu0 %v17509_v2 }
 0x818   :  { %v20577_v44 = vand.u32 4294901760, %v17517_v41  ;;  %8509 = vmatpush.msrb.mxu2 %v17517_v41  ;;  %8431 = vmatpush.msrb.mxu1 %v8430_v21  ;;  %v8436_v30 = vand.u32 4294901760, %v8435_v53  ;;  %v12711_v21 = vld [vmem:[%s20364_s4 + $0x50] sm:$0xff]  ;;  %v7777_v53 = vadd.f32 %v17351_v6, %v7702_v46 }
 0x819   :  { %v20578_v49 = vand.u32 4294901760, %v17528_v8  ;;  %8564 = vmatpush.msrb.mxu3 %v17530_v19  ;;  %v20579_v47 = vand.u32 4294901760, %v17541_v59  ;;  %v17560_v37 = vsub.f32 %v12712_v3, %v17543_v12  ;;  %8373 = vmatpush.msrb.mxu0 %v17530_v19  ;;  %v17565_v1 = vand.u32 4294901760, %v12711_v21 }
 0x81a   :  { %v7957_v4 = vpop.f32.mrf.mxu0  ;;  %v8441_v14 = vsub.f32 %v17517_v41, %v20577_v44  ;;  %8512 = vmatpush.msrb.mxu2 %v17528_v8  ;;  %8437 = vmatpush.msrb.mxu1 %v8436_v30  ;;  %v12710_v30 = vld [vmem:[%s20364_s4 + $0x48] sm:$0xff] }
 0x81b   :  { %v8447_v9 = vsub.f32 %v17528_v8, %v20578_v49  ;;  %v7958_v44 = vadd.f32 %v7957_v4, %v7888_v36  ;;  %8566 = vmatpush.msrb.mxu3 %v17543_v12  ;;  %v8453_v13 = vsub.f32 %v17541_v59, %v20579_v47  ;;  %v20580_v6 = vand.u32 4294901760, %v17560_v37  ;;  %8375 = vmatpush.msrb.mxu0 %v17543_v12 }
 0x81c   :  { %v8197_v55 = vpop.f32.mrf.mxu3  ;;  %v8442_v31 = vand.u32 4294901760, %v8441_v14  ;;  %8515 = vmatpush.msrb.mxu2 %v17541_v59  ;;  %v17575_v46 = vand.u32 4294901760, %v12710_v30  ;;  %v17579_v4 = vsub.f32 %v12711_v21, %v17565_v1 }
 0x81d   :  { %v8037_v49 = vpop.f32.mrf.mxu1  ;;  %v8448_v3 = vand.u32 4294901760, %v8447_v9  ;;  %v8454_v28 = vand.u32 4294901760, %v8453_v13  ;;  %v8459_v9 = vsub.f32 %v17560_v37, %v20580_v6  ;;  %8568 = vmatpush.msrb.mxu3 %v17565_v1  ;;  %8377 = vmatpush.msrb.mxu0 %v17565_v1  ;;  %v7892_v13 = vadd.f32 %v17346_v34, %v7777_v53 }
 0x81e   :  { %v8038_v14 = vadd.f32 %v8037_v49, %v7958_v44  ;;  %v8130_v36 = vpop.f32.mrf.mxu2  ;;  %8443 = vmatpush.msrb.mxu1 %v8442_v31  ;;  %8518 = vmatpush.msrb.mxu2 %v17560_v37  ;;  %v17586_v47 = vsub.f32 %v12710_v30, %v17575_v46  ;;  %v7625_v49 = vadd.f32 %v17355_v33, %v17275_v11  ;;  %v8464_v44 = vand.u32 4294901760, %v17579_v4 }
 0x81f   :  { %v8460_v21 = vand.u32 4294901760, %v8459_v9  ;;  %8570 = vmatpush.msrb.mxu3 %v17575_v46  ;;  %8379 = vmatpush.msrb.mxu0 %v17575_v46  ;;  %v21182_v34 = vand.u32 4294901760, %v17460_v45  ;;  %v21184_v45 = vand.u32 4294901760, %v17490_v43  ;;  %v21186_v43 = vand.u32 4294901760, %v17528_v8 }
 0x820   :  { %v8131_v31 = vadd.f32 %v8130_v36, %v8038_v14  ;;  %8449 = vmatpush.msrb.mxu1 %v8448_v3  ;;  %8521 = vmatpush.msrb.mxu2 %v17579_v4  ;;  %v8470_v6 = vand.u32 4294901760, %v17586_v47  ;;  %v7706_v30 = vadd.f32 %v17361_v27, %v7625_v49  ;;  %v8465_v11 = vsub.f32 %v17579_v4, %v8464_v44 }
 0x821   :  { %8606 = vmatpush.msra.mxu0 %v21182_v34 }
 0x822   :  { %v8198_v35 = vadd.f32 %v8197_v55, %v8131_v31  ;;  %v7962_v25 = vpop.f32.mrf.mxu0  ;;  %8455 = vmatpush.msrb.mxu1 %v8454_v28  ;;  %8524 = vmatpush.msrb.mxu2 %v17586_v47  ;;  %v8471_v33 = vsub.f32 %v17586_v47, %v8470_v6  ;;  %v8466_v36 = vand.u32 4294901760, %v8465_v11  ;;  %v21183_v28 = vand.u32 4294901760, %v17473_v40 }
 0x823   :  { %v7963_v3 = vadd.f32 %v7962_v25, %v7892_v13  ;;  %v7785_v4 = vadd.f32 %v17363_v18, %v7706_v30 }
 0x824   :  { %v8244_v53 = vmax.f32 %v17179_v7, %v8198_v35  ;;  %v8201_v14 = vpop.f32.mrf.mxu3  ;;  %8461 = vmatpush.msrb.mxu1 %v8460_v21  ;;  %v8472_v55 = vand.u32 4294901760, %v8471_v33  ;;  %8610 = vmatpush.msra.mxu0 %v21183_v28  ;;  %v7629_v7 = vadd.f32 %v17367_v38, %v17281_v51  ;;  %v21185_v35 = vand.u32 4294901760, %v17517_v41 }
 0x825   :  { %v8043_v27 = vpop.f32.mrf.mxu1  ;;  %v7896_v49 = vadd.f32 %v17358_v52, %v7785_v4  ;;  %v21187_v41 = vand.u32 4294901760, %v17541_v59 }
 0x826   :  { %8257 = vst.msk [vmem:[#allocation2] sm:$0xff] %vm8256_vm6, %v8244_v53  ;;  %v8044_v9 = vadd.f32 %v8043_v27, %v7963_v3  ;;  %v8134_v47 = vpop.f32.mrf.mxu2  ;;  %8467 = vmatpush.msrb.mxu1 %v8466_v36  ;;  %8614 = vmatpush.msra.mxu0 %v21184_v45  ;;  %v7710_v18 = vadd.f32 %v17373_v23, %v7629_v7 }
 0x828   :  { %v8135_v25 = vadd.f32 %v8134_v47, %v8044_v9  ;;  %8473 = vmatpush.msrb.mxu1 %v8472_v55  ;;  %8618 = vmatpush.msra.mxu0 %v21185_v35 }
 0x82a   :  { %8664 = vmatpush.msra.mxu1 %v17451_v57  ;;  %v8202_v40 = vadd.f32 %v8201_v14, %v8135_v25  ;;  %v7967_v31 = vpop.f32.mrf.mxu0  ;;  %8622 = vmatpush.msra.mxu0 %v21186_v43  ;;  %v7793_v57 = vadd.f32 %v17375_v5, %v7710_v18 }
 0x82b   :  { %v7968_v38 = vadd.f32 %v7967_v31, %v7896_v49 }
 0x82c   :  { %8666 = vmatpush.msra.mxu1 %v17462_v15  ;;  %v8245_v51 = vmax.f32 %v17187_v48, %v8202_v40  ;;  %v8205_v13 = vpop.f32.mrf.mxu3  ;;  %8626 = vmatpush.msra.mxu0 %v21187_v41  ;;  %v21188_v15 = vand.u32 4294901760, %v17560_v37  ;;  %v7633_v48 = vadd.f32 %v17379_v16, %v17287_v10  ;;  %v7900_v5 = vadd.f32 %v17370_v58, %v7793_v57 }
 0x82d   :  { %v8049_v21 = vpop.f32.mrf.mxu1  ;;  %v7637_v58 = vadd.f32 %v17391_v17, %v17293_v26 }
 0x82e   :  { %8668 = vmatpush.msra.mxu1 %v17476_v50  ;;  %8258 = vst.msk [vmem:[#allocation2 + $0x8] sm:$0xff] %vm8256_vm6, %v8245_v51  ;;  %v8050_v52 = vadd.f32 %v8049_v21, %v7968_v38  ;;  %v8138_v23 = vpop.f32.mrf.mxu2  ;;  %8630 = vmatpush.msra.mxu0 %v21188_v15  ;;  %v7714_v50 = vadd.f32 %v17385_v39, %v7633_v48 }
 0x830   :  { %8670 = vmatpush.msra.mxu1 %v17496_v54  ;;  %v8139_v8 = vadd.f32 %v8138_v23, %v8050_v52  ;;  %8634 = vmatpush.msra.mxu0 %v8464_v44  ;;  %v7801_v10 = vadd.f32 %v17387_v29, %v7714_v50  ;;  %v21189_v23 = vld [vmem:[#allocation99_spill] sm:$0xff]  ;;  %v21191_v50 = vld [vmem:[#allocation32_spill] sm:$0xff] }
 0x832   :  { %8672 = vmatpush.msra.mxu1 %v17509_v2  ;;  %v8206_v59 = vadd.f32 %v8205_v13, %v8139_v8  ;;  %v7972_v30 = vpop.f32.mrf.mxu0  ;;  %8638 = vmatpush.msra.mxu0 %v8470_v6 }
 0x833   :  { %v7973_v37 = vadd.f32 %v7972_v30, %v7900_v5  ;;  %v21192_v30 = vld [vmem:[#allocation100_spill] sm:$0xff] }
 0x834   :  { %8674 = vmatpush.msra.mxu1 %v17530_v19  ;;  %v8246_v54 = vmax.f32 %v17194_v60, %v8206_v59  ;;  %v8209_v11 = vpop.f32.mrf.mxu3  ;;  %v7718_v60 = vadd.f32 %v17397_v61, %v7637_v58 }
 0x835   :  { %v8055_v33 = vpop.f32.mrf.mxu1  ;;  %v8269_v19 = vld [vmem:[#allocation2] ss:$2 sm:$0xff]  ;;  %v8285_v6 = vld [vmem:[#allocation2 + $0x1] ss:$2 sm:$0xff] }
 0x836   :  { %8676 = vmatpush.msra.mxu1 %v17543_v12  ;;  %8259 = vst.msk [vmem:[#allocation2 + $0x10] sm:$0xff] %vm8256_vm6, %v8246_v54  ;;  %v8056_v16 = vadd.f32 %v8055_v33, %v7973_v37  ;;  %v8142_v39 = vpop.f32.mrf.mxu2  ;;  %v7904_v12 = vadd.f32 %v17382_v22, %v7801_v10  ;;  %v17646_v34 = vmax.f32 %v8269_v19, %v8285_v6 }
 0x837   :  { %v7809_v26 = vadd.f32 %v17399_v42, %v7718_v60  ;;  %v7641_v22 = vadd.f32 %v17403_v62, %v17299_v20 }
 0x838   :  { %8678 = vmatpush.msra.mxu1 %v17565_v1  ;;  %v8143_v2 = vadd.f32 %v8142_v39, %v8056_v16  ;;  %v8325_v55 = vrot.slane %v17646_v34, 1  ;;  %v9426_v47 = vrot.slane %v17646_v34, 3 }
 0x839   :  { %v7908_v42 = vadd.f32 %v17394_v63, %v7809_v26  ;;  %v7722_v25 = vadd.f32 %v17409_v0, %v7641_v22  ;;  %v9803_v63 = vrot.slane %v17646_v34, 4  ;;  %v21197_v26 = vld [vmem:[#allocation33_spill] sm:$0xff]  ;;  %v21199_v22 = vld [vmem:[#allocation15_spill] sm:$0xff] }
 0x83a   :  { %8680 = vmatpush.msra.mxu1 %v17575_v46  ;;  %v8210_v44 = vadd.f32 %v8209_v11, %v8143_v2  ;;  %v7977_v29 = vpop.f32.mrf.mxu0  ;;  %v21193_v11 = vld [vmem:[#allocation97_spill] sm:$0xff]  ;;  %v21194_v2 = vld [vmem:[#allocation58_spill] sm:$0xff] }
 0x83b   :  { %v7978_v3 = vadd.f32 %v7977_v29, %v7904_v12  ;;  %v7817_v21 = vadd.f32 %v17411_v56, %v7722_v25  ;;  %v21196_v12 = vld [vmem:[#allocation23_spill] sm:$0xff]  ;;  %v21202_v25 = vld [vmem:[#allocation40_spill] sm:$0xff] }
 0x83c   :  { %v8247_v53 = vmax.f32 %v17201_v32, %v8210_v44  ;;  %v8213_v14 = vpop.f32.mrf.mxu3  ;;  %v9049_v32 = vrot.slane %v17646_v34, 2  ;;  %v21195_v44 = vld [vmem:[#allocation53_spill] sm:$0xff] }
 0x83d   :  { %v8061_v1 = vpop.f32.mrf.mxu1  ;;  %v8271_v17 = vld [vmem:[#allocation2 + $0x10] ss:$2 sm:$0xf]  ;;  %v8287_v36 = vld [vmem:[#allocation2 + $0x11] ss:$2 sm:$0xf]  ;;  %v7912_v54 = vadd.f32 %v21192_v30, %v7817_v21  ;;  %v7649_v29 = vadd.f32 %v21196_v12, %v21195_v44 }
 0x83e   :  { %8260 = vst.msk [vmem:[#allocation2 + $0x18] sm:$0xff] %vm8256_vm6, %v8247_v53  ;;  %v8062_v61 = vadd.f32 %v8061_v1, %v7978_v3  ;;  %v8146_v27 = vpop.f32.mrf.mxu2  ;;  %v8301_v46 = vmax.f32 %v8271_v17, %v8287_v36  ;;  %v21198_v36 = vld [vmem:[#allocation27_spill] sm:$0xff]  ;;  %v8316_v44 = vld [vmem:[%s20364_s4 + $0x40] sm:$0xff] }
 0x83f   :  { %v7730_v1 = vadd.f32 %v21197_v26, %v7649_v29  ;;  %v8315_v12 = vld [vmem:[%s20364_s4 + $0x38] sm:$0xff]  ;;  %v8314_v29 = vld [vmem:[%s20364_s4 + $0x30] sm:$0xff] }
 0x840   :  { %v8147_v28 = vadd.f32 %v8146_v27, %v8062_v61  ;;  %v8326_v4 = vrot.slane %v8301_v46, 1  ;;  %v9050_v9 = vrot.slane %v8301_v46, 2  ;;  %v9427_v45 = vrot.slane %v8301_v46, 3  ;;  %v21207_v26 = vld [vmem:[#allocation14_spill] sm:$0xff] }
 0x841   :  { %v9804_v7 = vrot.slane %v8301_v46, 4 }
 0x842   :  { %v8214_v35 = vadd.f32 %v8213_v14, %v8147_v28  ;;  %v7982_v18 = vpop.f32.mrf.mxu0  ;;  %v8327_v40 = vsel %vm117_vm1, %v8325_v55, %v8326_v4  ;;  %v17660_v20 = vsel %vm2321_vm3, %v9049_v32, %v9050_v9  ;;  %v17664_v49 = vsel %vm3465_vm4, %v9426_v47, %v9427_v45  ;;  %v21200_v32 = vld [vmem:[#allocation34_spill] sm:$0xff]  ;;  %v21201_v9 = vld [vmem:[#allocation35_spill] sm:$0xff] }
 0x843   :  { %v8347_v62 = vsel %vm8256_vm6, %v8327_v40, 0  ;;  %v7983_v43 = vadd.f32 %v7982_v18, %v7908_v42  ;;  %v17671_v13 = vsel %vm180_vm0, %v9803_v63, %v9804_v7  ;;  %v7653_v42 = vadd.f32 %v21201_v9, %v21200_v32  ;;  %v21203_v63 = vld [vmem:[#allocation44_spill] sm:$0xff]  ;;  %v21210_v32 = vld [vmem:[#allocation41_spill] sm:$0xff] }
 0x844   :  { %v8248_v31 = vmax.f32 %v17208_v24, %v8214_v35  ;;  %v8217_v51 = vpop.f32.mrf.mxu3  ;;  %v17668_v38 = vand.u32 4294901760, %v8347_v62  ;;  %v21190_v24 = vld [vmem:[#allocation30_spill] sm:$0xff]  ;;  %v7833_v35 = vadd.f32 %v21202_v25, %v7730_v1 }
 0x845   :  { %v8067_v0 = vpop.f32.mrf.mxu1  ;;  %v7645_v15 = vadd.f32 %v21190_v24, %v21189_v23  ;;  %v21208_v1 = vld [vmem:[#allocation50_spill] sm:$0xff] }
 0x846   :  { %8261 = vst.msk [vmem:[#allocation2 + $0x20] sm:$0xff] %vm8256_vm6, %v8248_v31  ;;  %v8068_v41 = vadd.f32 %v8067_v0, %v7983_v43  ;;  %v8150_v57 = vpop.f32.mrf.mxu2  ;;  %8475 = vmatmul.f32.vlgmr.msrb.gmra.mxu1 %v17668_v38  ;;  %v8381_v52 = vsub.f32 %v8347_v62, %v17668_v38  ;;  %v7734_v31 = vadd.f32 %v21203_v63, %v7653_v42  ;;  %v21211_v42 = vld [vmem:[#allocation39_spill] sm:$0xff] }
 0x847   :  { %v7726_v59 = vadd.f32 %v21191_v50, %v7645_v15  ;;  %v21204_v15 = vld [vmem:[#allocation52_spill] sm:$0xff] }
 0x848   :  { %v8151_v48 = vadd.f32 %v8150_v57, %v8068_v41  ;;  %8527 = vmatmul.f32.vlgmr.msrb.gmra.mxu2 %v8381_v52  ;;  %v8382_v8 = vand.u32 4294901760, %v8381_v52 }
 0x849   :  { %v7825_v19 = vadd.f32 %v21194_v2, %v7726_v59 }
 0x84a   :  { %v8218_v5 = vadd.f32 %v8217_v51, %v8151_v48  ;;  %v7987_v56 = vpop.f32.mrf.mxu0  ;;  %8574 = vmatmul.f32.vlgmr.msrb.gmra.mxu3 %v8382_v8  ;;  %v8383_v37 = vsub.f32 %v8381_v52, %v8382_v8  ;;  %v7920_v48 = vadd.f32 %v21204_v15, %v7833_v35 }
 0x84b   :  { %v7988_v10 = vadd.f32 %v7987_v56, %v7912_v54  ;;  %v7916_v61 = vadd.f32 %v21198_v36, %v7825_v19  ;;  %v21205_v56 = vld [vmem:[#allocation19_spill] sm:$0xff] }
 0x84c   :  { %v8249_v33 = vmax.f32 %v21193_v11, %v8218_v5  ;;  %v8221_v16 = vpop.f32.mrf.mxu3  ;;  %v8384_v39 = vand.u32 4294901760, %v8383_v37  ;;  %v7841_v37 = vadd.f32 %v21205_v56, %v7734_v31  ;;  %v21206_v11 = vld [vmem:[#allocation24_spill] sm:$0xff] }
 0x84d   :  { %v8073_v58 = vpop.f32.mrf.mxu1  ;;  %v8273_v3 = vld [vmem:[#allocation2 + $0x18] ss:$2 sm:$0xff]  ;;  %v8289_v14 = vld [vmem:[#allocation2 + $0x19] ss:$2 sm:$0xff] }
 0x84e   :  { %8262 = vst.msk [vmem:[#allocation2 + $0x28] sm:$0xff] %vm8256_vm6, %v8249_v33  ;;  %v8074_v6 = vadd.f32 %v8073_v58, %v7988_v10  ;;  %v8154_v60 = vpop.f32.mrf.mxu2  ;;  %8385 = vmatmul.f32.vlgmr.msrb.gmra.mxu0 %v8384_v39  ;;  %v17688_v46 = vmax.f32 %v8273_v3, %v8289_v14  ;;  %v17730_v3 = vand.u32 4294901760, %v8315_v12  ;;  %v17732_v14 = vand.u32 4294901760, %v8314_v29  ;;  %v21213_v31 = vld [vmem:[#allocation20_spill] sm:$0xff] }
 0x850   :  { %v8155_v53 = vadd.f32 %v8154_v60, %v8074_v6  ;;  %v8328_v43 = vrot.slane %v17688_v46, 1  ;;  %v9052_v21 = vrot.slane %v17688_v46, 2  ;;  %v9429_v57 = vrot.slane %v17688_v46, 3 }
 0x851   :  { %v9806_v54 = vrot.slane %v17688_v46, 4 }
 0x852   :  { %v8222_v17 = vadd.f32 %v8221_v16, %v8155_v53  ;;  %v7992_v27 = vpop.f32.mrf.mxu0  ;;  %v17728_v53 = vand.u32 4294901760, %v8316_v44 }
 0x853   :  { %v7993_v28 = vadd.f32 %v7992_v27, %v7916_v61  ;;  %v21209_v61 = vld [vmem:[#allocation51_spill] sm:$0xff] }
 0x854   :  { %v8250_v55 = vmax.f32 %v21199_v22, %v8222_v17  ;;  %v8225_v4 = vpop.f32.mrf.mxu3  ;;  %v7657_v17 = vadd.f32 %v21208_v1, %v21207_v26  ;;  %v7924_v27 = vadd.f32 %v21209_v61, %v7841_v37  ;;  %8714 = vmatpush.msra.mxu2 %v17728_v53  ;;  %8905 = vmatpush.msrb.mxu1 %v17728_v53 }
 0x855   :  { %v8079_v47 = vpop.f32.mrf.mxu1  ;;  %v8275_v45 = vld [vmem:[#allocation2 + $0x28] ss:$2 sm:$0xf]  ;;  %v8291_v7 = vld [vmem:[#allocation2 + $0x29] ss:$2 sm:$0xf] }
 0x856   :  { %8263 = vst.msk [vmem:[#allocation2 + $0x30] sm:$0xff] %vm8256_vm6, %v8250_v55  ;;  %v8080_v18 = vadd.f32 %v8079_v47, %v7993_v28  ;;  %v8158_v40 = vpop.f32.mrf.mxu2  ;;  %v8303_v62 = vmax.f32 %v8275_v45, %v8291_v7  ;;  %v17739_v55 = vsub.f32 %v8316_v44, %v17728_v53  ;;  %v17742_v28 = vsub.f32 %v8315_v12, %v17730_v3  ;;  %v21212_v47 = vld [vmem:[#allocation54_spill] sm:$0xff] }
 0x857   :  { %v7738_v9 = vadd.f32 %v21210_v32, %v7657_v17  ;;  %v7661_v45 = vadd.f32 %v21212_v47, %v21211_v42  ;;  %8716 = vmatpush.msra.mxu2 %v17730_v3  ;;  %8907 = vmatpush.msrb.mxu1 %v17730_v3  ;;  %v8311_v17 = vld [vmem:[%s20364_s4 + $0x18] sm:$0xff]  ;;  %v21218_v32 = vld [vmem:[#allocation18_spill] sm:$0xff] }
 0x858   :  { %v8159_v51 = vadd.f32 %v8158_v40, %v8080_v18  ;;  %v8329_v0 = vrot.slane %v8303_v62, 1  ;;  %v9053_v41 = vrot.slane %v8303_v62, 2  ;;  %v9430_v52 = vrot.slane %v8303_v62, 3  ;;  %v8313_v18 = vld [vmem:[%s20364_s4 + $0x28] sm:$0xff]  ;;  %8851 = vmatpush.msrb.mxu0 %v17739_v55  ;;  %v8310_v47 = vld [vmem:[%s20364_s4 + $0x10] sm:$0xff] }
 0x859   :  { %v9807_v23 = vrot.slane %v8303_v62, 4  ;;  %v8773_v40 = vand.u32 4294901760, %v17739_v55  ;;  %v8779_v62 = vand.u32 4294901760, %v17742_v28  ;;  %8718 = vmatpush.msra.mxu2 %v17732_v14  ;;  %v17769_v15 = vand.u32 4294901760, %v8313_v18  ;;  %8909 = vmatpush.msrb.mxu1 %v17732_v14 }
 0x85a   :  { %v8226_v24 = vadd.f32 %v8225_v4, %v8159_v51  ;;  %v7997_v8 = vpop.f32.mrf.mxu0  ;;  %v8330_v50 = vsel %vm117_vm1, %v8328_v43, %v8329_v0  ;;  %v17702_v59 = vsel %vm2321_vm3, %v9052_v21, %v9053_v41  ;;  %v17706_v30 = vsel %vm3465_vm4, %v9429_v57, %v9430_v52  ;;  %v21214_v51 = vld [vmem:[#allocation49_spill] sm:$0xff]  ;;  %8854 = vmatpush.msrb.mxu0 %v17742_v28 }
 0x85b   :  { %v8349_v5 = vsel %vm8256_vm6, %v8330_v50, 0  ;;  %v7998_v10 = vadd.f32 %v7997_v8, %v7920_v48  ;;  %v17714_v2 = vsel %vm180_vm0, %v9806_v54, %v9807_v23  ;;  %v17745_v4 = vsub.f32 %v8314_v29, %v17732_v14  ;;  %v21215_v8 = vld [vmem:[#allocation42_spill] sm:$0xff]  ;;  %8720 = vmatpush.msra.mxu2 %v17769_v15  ;;  %8911 = vmatpush.msrb.mxu1 %v17769_v15  ;;  %v21217_v29 = vld [vmem:[#allocation25_spill] sm:$0xff] }
 0x85c   :  { %v8251_v33 = vmax.f32 %v21206_v11, %v8226_v24  ;;  %v8229_v16 = vpop.f32.mrf.mxu3  ;;  %v17711_v39 = vand.u32 4294901760, %v8349_v5  ;;  %v7742_v43 = vadd.f32 %v21213_v31, %v7661_v45  ;;  %v8774_v23 = vsub.f32 %v17739_v55, %v8773_v40 }
 0x85d   :  { %v8085_v58 = vpop.f32.mrf.mxu1  ;;  %v8785_v63 = vand.u32 4294901760, %v17745_v4  ;;  %v8780_v24 = vsub.f32 %v17742_v28, %v8779_v62  ;;  %v7849_v50 = vadd.f32 %v21215_v8, %v7738_v9  ;;  %8857 = vmatpush.msrb.mxu0 %v17745_v4  ;;  %v17788_v44 = vsub.f32 %v8313_v18, %v17769_v15 }
 0x85e   :  { %8264 = vst.msk [vmem:[#allocation2 + $0x38] sm:$0xff] %vm8256_vm6, %v8251_v33  ;;  %v8086_v19 = vadd.f32 %v8085_v58, %v7998_v10  ;;  %v8162_v6 = vpop.f32.mrf.mxu2  ;;  %8479 = vmatmul.f32.gmra.mxu1 %v17711_v39  ;;  %v8389_v60 = vsub.f32 %v8349_v5, %v17711_v39  ;;  %v8775_v56 = vand.u32 4294901760, %v8774_v23  ;;  %v21216_v58 = vld [vmem:[#allocation45_spill] sm:$0xff] }
 0x85f   :  { %v8786_v48 = vsub.f32 %v17745_v4, %v8785_v63  ;;  %v8781_v37 = vand.u32 4294901760, %v8780_v24  ;;  %v7928_v26 = vadd.f32 %v21217_v29, %v7849_v50  ;;  %v8791_v61 = vand.u32 4294901760, %v17788_v44  ;;  %8860 = vmatpush.msrb.mxu0 %v17788_v44 }
 0x860   :  { %v8163_v36 = vadd.f32 %v8162_v6, %v8086_v19  ;;  %8532 = vmatmul.f32.gmra.mxu2 %v8389_v60  ;;  %v8390_v22 = vand.u32 4294901760, %v8389_v60  ;;  %v7857_v19 = vadd.f32 %v21216_v58, %v7742_v43  ;;  %8776 = vmatpush.msra.mxu3 %v8775_v56 }
 0x861   :  { %v8787_v6 = vand.u32 4294901760, %v8786_v48  ;;  %v8792_v31 = vsub.f32 %v17788_v44, %v8791_v61 }
 0x862   :  { %v8230_v7 = vadd.f32 %v8229_v16, %v8163_v36  ;;  %v8002_v25 = vpop.f32.mrf.mxu0  ;;  %8580 = vmatmul.f32.gmra.mxu3 %v8390_v22  ;;  %v8391_v35 = vsub.f32 %v8389_v60, %v8390_v22  ;;  %v8312_v16 = vld [vmem:[%s20364_s4 + $0x20] sm:$0xff] }
 0x863   :  { %v8003_v21 = vadd.f32 %v8002_v25, %v7924_v27  ;;  %v17785_v60 = vand.u32 4294901760, %v8312_v16  ;;  %8782 = vmatpush.msra.mxu3 %v8781_v37  ;;  %v17798_v27 = vand.u32 4294901760, %v8311_v17  ;;  %v8793_v48 = vand.u32 4294901760, %v8792_v31 }
 0x864   :  { %v8252_v0 = vmax.f32 %v21214_v51, %v8230_v7  ;;  %v8392_v41 = vand.u32 4294901760, %v8391_v35  ;;  %v8233_v57 = vpop.f32.mrf.mxu3  ;;  %v21219_v7 = vld [vmem:[#allocation43_spill] sm:$0xff] }
 0x865   :  { %v8091_v52 = vpop.f32.mrf.mxu1  ;;  %v8277_v33 = vld [vmem:[#allocation2 + $0x30] ss:$2 sm:$0xff]  ;;  %v8293_v10 = vld [vmem:[#allocation2 + $0x31] ss:$2 sm:$0xff]  ;;  %8722 = vmatpush.msra.mxu2 %v17785_v60  ;;  %v17801_v22 = vsub.f32 %v8312_v16, %v17785_v60  ;;  %8913 = vmatpush.msrb.mxu1 %v17785_v60  ;;  %v7932_v25 = vadd.f32 %v21219_v7, %v7857_v19  ;;  %v17815_v43 = vsub.f32 %v8311_v17, %v17798_v27 }
 0x866   :  { %8265 = vst.msk [vmem:[#allocation2 + $0x40] sm:$0xff] %vm8256_vm6, %v8252_v0  ;;  %v8092_v5 = vadd.f32 %v8091_v52, %v8003_v21  ;;  %v8166_v54 = vpop.f32.mrf.mxu2  ;;  %8393 = vmatmul.f32.gmra.mxu0 %v8392_v41  ;;  %v17794_v36 = vmax.f32 %v8277_v33, %v8293_v10  ;;  %8788 = vmatpush.msra.mxu3 %v8787_v6  ;;  %v8309_v52 = vld [vmem:[%s20364_s4 + $0x8] sm:$0xff] }
 0x867   :  { %8724 = vmatpush.msra.mxu2 %v17798_v27  ;;  %v8797_v41 = vand.u32 4294901760, %v17801_v22  ;;  %8915 = vmatpush.msrb.mxu1 %v17798_v27  ;;  %v8803_v8 = vand.u32 4294901760, %v17815_v43  ;;  %v17830_v50 = vand.u32 4294901760, %v8309_v52 }
 0x868   :  { %v8167_v11 = vadd.f32 %v8166_v54, %v8092_v5  ;;  %8863 = vmatpush.msrb.mxu0 %v17801_v22  ;;  %v8331_v24 = vrot.slane %v17794_v36, 1  ;;  %8794 = vmatpush.msra.mxu3 %v8793_v48  ;;  %v9055_v58 = vrot.slane %v17794_v36, 2  ;;  %v9809_v28 = vrot.slane %v17794_v36, 4 }
 0x869   :  { %v8798_v56 = vsub.f32 %v17801_v22, %v8797_v41  ;;  %v8804_v33 = vsub.f32 %v17815_v43, %v8803_v8  ;;  %v17850_v16 = vsub.f32 %v8309_v52, %v17830_v50  ;;  %v8698_v22 = vsel %vm8256_vm6, %v17646_v34, 0 }
 0x86a   :  { %v8234_v12 = vadd.f32 %v8233_v57, %v8167_v11  ;;  %v8007_v1 = vpop.f32.mrf.mxu0  ;;  %v17821_v57 = vand.u32 4294901760, %v8310_v47  ;;  %v8308_v11 = vld [vmem:[%s20364_s4] sm:$0xff]  ;;  %8866 = vmatpush.msrb.mxu0 %v17815_v43  ;;  %v17907_v43 = vand.u32 4294901760, %v8698_v22 }
 0x86b   :  { %v8008_v42 = vadd.f32 %v8007_v1, %v7928_v26  ;;  %v17847_v10 = vand.u32 4294901760, %v8308_v11  ;;  %v8799_v29 = vand.u32 4294901760, %v8798_v56 }
 0x86c   :  { %v8253_v9 = vmax.f32 %v21218_v32, %v8234_v12  ;;  %v8237_v23 = vpop.f32.mrf.mxu3  ;;  %8726 = vmatpush.msra.mxu2 %v17821_v57  ;;  %v17838_v37 = vsub.f32 %v8310_v47, %v17821_v57  ;;  %8917 = vmatpush.msrb.mxu1 %v17821_v57  ;;  %v8805_v32 = vand.u32 4294901760, %v8804_v33 }
 0x86d   :  { %v8097_v45 = vpop.f32.mrf.mxu1  ;;  %v8279_v35 = vld [vmem:[#allocation2 + $0x40] ss:$2 sm:$0xf]  ;;  %v8295_v18 = vld [vmem:[#allocation2 + $0x41] ss:$2 sm:$0xf]  ;;  %8800 = vmatpush.msra.mxu3 %v8799_v29 }
 0x86e   :  { %8266 = vst.msk [vmem:[#allocation2 + $0x48] sm:$0xff] %vm8256_vm6, %v8253_v9  ;;  %v8098_v51 = vadd.f32 %v8097_v45, %v8008_v42  ;;  %v8170_v0 = vpop.f32.mrf.mxu2  ;;  %v17818_v21 = vmax.f32 %v8279_v35, %v8295_v18  ;;  %8728 = vmatpush.msra.mxu2 %v17830_v50  ;;  %v8809_v26 = vand.u32 4294901760, %v17838_v37  ;;  %8919 = vmatpush.msrb.mxu1 %v17830_v50  ;;  %v8815_v9 = vand.u32 4294901760, %v17850_v16  ;;  %v21220_v42 = vld [vmem:[#allocation47_spill] sm:$0xff] }
 0x86f   :  { %8869 = vmatpush.msrb.mxu0 %v17838_v37  ;;  %v8820_v35 = vsub.f32 %v8308_v11, %v17847_v10  ;;  %8806 = vmatpush.msra.mxu3 %v8805_v32 }
 0x870   :  { %v8171_v5 = vadd.f32 %v8170_v0, %v8098_v51  ;;  %v8332_v54 = vrot.slane %v17818_v21, 1  ;;  %v8810_v7 = vsub.f32 %v17838_v37, %v8809_v26  ;;  %8730 = vmatpush.msra.mxu2 %v17847_v10  ;;  %8921 = vmatpush.msrb.mxu1 %v17847_v10  ;;  %v9056_v31 = vrot.slane %v17818_v21, 2 }
 0x871   :  { %v9432_v51 = vrot.slane %v17794_v36, 3  ;;  %v9433_v0 = vrot.slane %v17818_v21, 3  ;;  %v8821_v48 = vand.u32 4294901760, %v8820_v35  ;;  %8872 = vmatpush.msrb.mxu0 %v17850_v16 }
 0x872   :  { %v8238_v19 = vadd.f32 %v8237_v23, %v8171_v5  ;;  %v8012_v6 = vpop.f32.mrf.mxu0  ;;  %v8333_v12 = vsel %vm117_vm1, %v8331_v24, %v8332_v54  ;;  %8957 = vmatpush.msrb.mxu2 %v8773_v40  ;;  %v8811_v24 = vand.u32 4294901760, %v8810_v7  ;;  %v17881_v5 = vsel %vm2321_vm3, %v9055_v58, %v9056_v31 }
 0x873   :  { %v8013_v1 = vadd.f32 %v8012_v6, %v7932_v25  ;;  %v8351_v17 = vsel %vm8256_vm6, %v8333_v12, 0  ;;  %v8816_v25 = vsub.f32 %v17850_v16, %v8815_v9  ;;  %v17884_v54 = vsel %vm3465_vm4, %v9432_v51, %v9433_v0  ;;  %8875 = vmatpush.msrb.mxu0 %v8820_v35  ;;  %v21221_v12 = vld [vmem:[#allocation37_spill] sm:$0xff] }
 0x874   :  { %v8254_v47 = vmax.f32 %v21220_v42, %v8238_v19  ;;  %v17862_v45 = vand.u32 4294901760, %v8351_v17  ;;  %8961 = vmatpush.msrb.mxu2 %v8779_v62  ;;  %8812 = vmatpush.msra.mxu3 %v8811_v24  ;;  %v8822_v11 = vsub.f32 %v8820_v35, %v8821_v48  ;;  %v8241_v33 = vpop.f32.mrf.mxu3  ;;  %v9810_v62 = vrot.slane %v17818_v21, 4 }
 0x875   :  { %v8103_v18 = vpop.f32.mrf.mxu1  ;;  %v8817_v40 = vand.u32 4294901760, %v8816_v25  ;;  %v8702_v0 = vsel %vm8256_vm6, %v17794_v36, 0 }
 0x876   :  { %8267 = vst.msk [vmem:[#allocation2 + $0x50] sm:$0xff] %vm8256_vm6, %v8254_v47  ;;  %v8104_v52 = vadd.f32 %v8103_v18, %v8013_v1  ;;  %8483 = vmatmul.f32.gmra.mxu1 %v17862_v45  ;;  %v8397_v23 = vsub.f32 %v8351_v17, %v17862_v45  ;;  %v8174_v55 = vpop.f32.mrf.mxu2  ;;  %8965 = vmatpush.msrb.mxu2 %v8785_v63  ;;  %v8823_v19 = vand.u32 4294901760, %v8822_v11  ;;  %v8700_v47 = vsel %vm8256_vm6, %v17688_v46, 0  ;;  %v12727_v11 = vld [vmem:[%s20364_s4 + $0xd0] sm:$0xff] }
 0x877   :  { %8818 = vmatpush.msra.mxu3 %v8817_v40  ;;  %v17893_v6 = vsel %vm180_vm0, %v9809_v28, %v9810_v62  ;;  %v17934_v25 = vand.u32 4294901760, %v8700_v47  ;;  %v17947_v24 = vand.u32 4294901760, %v8702_v0  ;;  %v12726_v28 = vld [vmem:[%s20364_s4 + $0xc8] sm:$0xff] }
 0x878   :  { %v8175_v56 = vadd.f32 %v8174_v55, %v8104_v52  ;;  %8537 = vmatmul.f32.gmra.mxu2 %v8397_v23  ;;  %v8398_v37 = vand.u32 4294901760, %v8397_v23  ;;  %v17974_v62 = vand.u32 4294901760, %v12726_v28 }
 0x879   :  { %8969 = vmatpush.msrb.mxu2 %v8791_v61  ;;  %8824 = vmatpush.msra.mxu3 %v8823_v19  ;;  %v17954_v55 = vsub.f32 %v8702_v0, %v17947_v24  ;;  %v12725_v19 = vld [vmem:[%s20364_s4 + $0xc0] sm:$0xff] }
 0x87a   :  { %v8242_v16 = vadd.f32 %v8241_v33, %v8175_v56  ;;  %8586 = vmatmul.f32.gmra.mxu3 %v8398_v37  ;;  %v8399_v58 = vsub.f32 %v8397_v23, %v8398_v37  ;;  %v17965_v33 = vand.u32 4294901760, %v12727_v11 }
 0x87b   :  { %8973 = vmatpush.msrb.mxu2 %v8797_v41  ;;  %9015 = vmatpush.msrb.mxu3 %v17728_v53  ;;  %v8749_v56 = vand.u32 4294901760, %v17954_v55 }
 0x87c   :  { %v8255_v29 = vmax.f32 %v21221_v12, %v8242_v16  ;;  %v8400_v4 = vand.u32 4294901760, %v8399_v58 }
 0x87d   :  { %8977 = vmatpush.msrb.mxu2 %v8803_v8  ;;  %v8281_v63 = vld [vmem:[#allocation2 + $0x48] ss:$2 sm:$0xff]  ;;  %v8297_v44 = vld [vmem:[#allocation2 + $0x49] ss:$2 sm:$0xff]  ;;  %9017 = vmatpush.msrb.mxu3 %v17730_v3  ;;  %v8750_v16 = vsub.f32 %v17954_v55, %v8749_v56 }
 0x87e   :  { %8268 = vst.msk [vmem:[#allocation2 + $0x58] sm:$0xff] %vm8256_vm6, %v8255_v29  ;;  %8401 = vmatmul.f32.gmra.mxu0 %v8400_v4  ;;  %v8306_v61 = vmax.f32 %v8281_v63, %v8297_v44  ;;  %v17989_v29 = vsub.f32 %v12726_v28, %v17974_v62  ;;  %v17993_v4 = vand.u32 4294901760, %v12725_v19  ;;  %v12724_v63 = vld [vmem:[%s20364_s4 + $0xb8] sm:$0xff] }
 0x87f   :  { %8981 = vmatpush.msrb.mxu2 %v8809_v26  ;;  %9019 = vmatpush.msrb.mxu3 %v17732_v14 }
 0x880   :  { %v8334_v8 = vrot.slane %v8306_v61, 1  ;;  %v9058_v3 = vrot.slane %v8306_v61, 2  ;;  %v9435_v1 = vrot.slane %v8306_v61, 3  ;;  %v9812_v34 = vrot.slane %v8306_v61, 4 }
 0x881   :  { %8985 = vmatpush.msrb.mxu2 %v8815_v9  ;;  %9021 = vmatpush.msrb.mxu3 %v17769_v15  ;;  %v17913_v9 = vsub.f32 %v8698_v22, %v17907_v43  ;;  %v8704_v36 = vsel %vm8256_vm6, %v8306_v61, 0  ;;  %v9152_v61 = vand.u32 4294901760, %v17989_v29  ;;  %v18004_v22 = vsub.f32 %v12725_v19, %v17993_v4 }
 0x882   :  { %v17960_v37 = vand.u32 4294901760, %v8704_v36 }
 0x883   :  { %8989 = vmatpush.msrb.mxu2 %v8821_v48  ;;  %9023 = vmatpush.msrb.mxu3 %v17785_v60  ;;  %v8733_v18 = vand.u32 4294901760, %v17913_v9 }
 0x884   :  { %v17982_v58 = vsub.f32 %v8704_v36, %v17960_v37 }
 0x885   :  { %v8283_v21 = vld [vmem:[#allocation2 + $0x58] ss:$2 sm:$0xf]  ;;  %v8299_v41 = vld [vmem:[#allocation2 + $0x59] ss:$2 sm:$0xf]  ;;  %9025 = vmatpush.msrb.mxu3 %v17798_v27  ;;  %v8734_v51 = vsub.f32 %v17913_v9, %v8733_v18 }
 0x886   :  { %v8307_v53 = vmax.f32 %v8283_v21, %v8299_v41  ;;  %v18007_v21 = vand.u32 4294901760, %v12724_v63  ;;  %v8751_v41 = vand.u32 4294901760, %v8750_v16 }
 0x887   :  { %9027 = vmatpush.msrb.mxu3 %v17821_v57  ;;  %v8735_v23 = vand.u32 4294901760, %v8734_v51 }
 0x888   :  { %v8335_v26 = vrot.slane %v8307_v53, 1  ;;  %v9059_v14 = vrot.slane %v8307_v53, 2  ;;  %v9436_v17 = vrot.slane %v8307_v53, 3  ;;  %v9813_v32 = vrot.slane %v8307_v53, 4 }
 0x889   :  { %9029 = vmatpush.msrb.mxu3 %v17830_v50  ;;  %v17941_v50 = vsub.f32 %v8700_v47, %v17934_v25  ;;  %v8757_v53 = vand.u32 4294901760, %v17982_v58 }
 0x88a   :  { %v8336_v15 = vsel %vm117_vm1, %v8334_v8, %v8335_v26  ;;  %v17917_v42 = vsel %vm2321_vm3, %v9058_v3, %v9059_v14  ;;  %v17920_v60 = vsel %vm3465_vm4, %v9435_v1, %v9436_v17  ;;  %v17926_v7 = vsel %vm180_vm0, %v9812_v34, %v9813_v32  ;;  %v12723_v8 = vld [vmem:[%s20364_s4 + $0xb0] sm:$0xff]  ;;  %v12722_v17 = vld [vmem:[%s20364_s4 + $0xa8] sm:$0xff] }
 0x88b   :  { %v8353_v27 = vsel %vm8256_vm6, %v8336_v15, 0  ;;  %9031 = vmatpush.msrb.mxu3 %v17847_v10  ;;  %v8741_v10 = vand.u32 4294901760, %v17941_v50  ;;  %v9153_v26 = vsub.f32 %v17989_v29, %v9152_v61  ;;  %v9158_v14 = vand.u32 4294901760, %v18004_v22 }
 0x88c   :  { %v17928_v35 = vand.u32 4294901760, %v8353_v27  ;;  %v18021_v1 = vsub.f32 %v12724_v63, %v18007_v21  ;;  %v8758_v47 = vsub.f32 %v17982_v58, %v8757_v53  ;;  %v12719_v63 = vld [vmem:[%s20364_s4 + $0x90] sm:$0xff] }
 0x88d   :  { %v8742_v48 = vsub.f32 %v17941_v50, %v8741_v10  ;;  %v9154_v34 = vand.u32 4294901760, %v9153_v26  ;;  %v9159_v32 = vsub.f32 %v18004_v22, %v9158_v14 }
 0x88e   :  { %8487 = vmatmul.f32.gmra.mxu1 %v17928_v35  ;;  %v8405_v57 = vsub.f32 %v8353_v27, %v17928_v35  ;;  %v9164_v15 = vand.u32 4294901760, %v18021_v1  ;;  %v18036_v27 = vand.u32 4294901760, %v12722_v17  ;;  %v8759_v16 = vand.u32 4294901760, %v8758_v47 }
 0x88f   :  { %v8743_v40 = vand.u32 4294901760, %v8742_v48  ;;  %v12720_v48 = vld [vmem:[%s20364_s4 + $0x98] sm:$0xff] }
 0x890   :  { %8542 = vmatmul.f32.gmra.mxu2 %v8405_v57  ;;  %v8406_v31 = vand.u32 4294901760, %v8405_v57  ;;  %v9165_v51 = vsub.f32 %v18021_v1, %v9164_v15  ;;  %v18053_v0 = vsub.f32 %v12722_v17, %v18036_v27  ;;  %v18069_v28 = vand.u32 4294901760, %v12720_v48 }
 0x892   :  { %8592 = vmatmul.f32.gmra.mxu3 %v8406_v31  ;;  %v8407_v46 = vsub.f32 %v8405_v57, %v8406_v31  ;;  %v12721_v31 = vld [vmem:[%s20364_s4 + $0xa0] sm:$0xff]  ;;  %v9166_v36 = vand.u32 4294901760, %v9165_v51 }
 0x894   :  { %v8408_v52 = vand.u32 4294901760, %v8407_v46  ;;  %v9160_v46 = vand.u32 4294901760, %v9159_v32 }
 0x896   :  { %8409 = vmatmul.f32.gmra.mxu0 %v8408_v52  ;;  %8682 = vmatmul.f32.vlgmr.msra.gmra.mxu1 %v17668_v38  ;;  %v18056_v52 = vand.u32 4294901760, %v12721_v31 }
 0x898   :  { %8736 = vmatmul.f32.vlgmr.msra.gmra.mxu2 %v8735_v23 }
 0x89a   :  { %8826 = vmatmul.f32.vlgmr.msra.gmra.mxu3 %v17907_v43 }
 0x89b   :  { %9278 = vmatpush.msra.mxu3 %v17965_v33 }
 0x89d   :  { %9280 = vmatpush.msra.mxu3 %v17974_v62 }
 0x89e   :  { %8640 = vmatmul.f32.vlgmr.msra.gmra.mxu0 %v17668_v38  ;;  %8686 = vmatmul.f32.gmra.mxu1 %v17711_v39  ;;  %v17972_v38 = vsub.f32 %v12727_v11, %v17965_v33  ;;  %v18066_v11 = vsub.f32 %v12721_v31, %v18056_v52 }
 0x89f   :  { %9087 = vmatpush.msra.mxu0 %v17965_v33  ;;  %9282 = vmatpush.msra.mxu3 %v17993_v4 }
 0x8a0   :  { %8744 = vmatmul.f32.gmra.mxu2 %v8743_v40  ;;  %v9146_v12 = vand.u32 4294901760, %v17972_v38  ;;  %v9176_v40 = vand.u32 4294901760, %v18053_v0 }
 0x8a1   :  { %9224 = vmatpush.msra.mxu2 %v17972_v38  ;;  %9089 = vmatpush.msra.mxu0 %v17974_v62 }
 0x8a2   :  { %8830 = vmatmul.f32.gmra.mxu3 %v17934_v25  ;;  %v9147_v44 = vsub.f32 %v17972_v38, %v9146_v12 }
 0x8a3   :  { %9227 = vmatpush.msra.mxu2 %v17989_v29  ;;  %9091 = vmatpush.msra.mxu0 %v17993_v4 }
 0x8a4   :  { %v9148_v3 = vand.u32 4294901760, %v9147_v44  ;;  %9284 = vmatpush.msra.mxu3 %v18007_v21  ;;  %v9177_v44 = vsub.f32 %v18053_v0, %v9176_v40 }
 0x8a5   :  { %9230 = vmatpush.msra.mxu2 %v18004_v22  ;;  %9093 = vmatpush.msra.mxu0 %v18007_v21 }
 0x8a6   :  { %8644 = vmatmul.f32.gmra.mxu0 %v17711_v39  ;;  %8690 = vmatmul.f32.gmra.mxu1 %v17862_v45  ;;  %v18025_v39 = vand.u32 4294901760, %v12723_v8  ;;  %v9178_v26 = vand.u32 4294901760, %v9177_v44 }
 0x8a7   :  { %9149 = vmatpush.msra.mxu1 %v9148_v3  ;;  %9233 = vmatpush.msra.mxu2 %v18021_v1 }
 0x8a8   :  { %8752 = vmatmul.f32.gmra.mxu2 %v8751_v41  ;;  %v18043_v57 = vsub.f32 %v12723_v8, %v18025_v39  ;;  %9095 = vmatpush.msra.mxu0 %v18025_v39  ;;  %v9182_v41 = vand.u32 4294901760, %v18066_v11  ;;  %v18087_v8 = vand.u32 4294901760, %v12719_v63 }
 0x8a9   :  { %9155 = vmatpush.msra.mxu1 %v9154_v34  ;;  %9286 = vmatpush.msra.mxu3 %v18025_v39 }
 0x8aa   :  { %8834 = vmatmul.f32.gmra.mxu3 %v17947_v24  ;;  %v9170_v23 = vand.u32 4294901760, %v18043_v57  ;;  %9236 = vmatpush.msra.mxu2 %v18043_v57  ;;  %v9183_v17 = vsub.f32 %v18066_v11, %v9182_v41  ;;  %v18096_v32 = vsub.f32 %v12719_v63, %v18087_v8 }
 0x8ab   :  { %9097 = vmatpush.msra.mxu0 %v18036_v27  ;;  %9161 = vmatpush.msra.mxu1 %v9160_v46 }
 0x8ac   :  { %v9171_v19 = vsub.f32 %v18043_v57, %v9170_v23  ;;  %9239 = vmatpush.msra.mxu2 %v18053_v0  ;;  %9288 = vmatpush.msra.mxu3 %v18036_v27  ;;  %v9184_v47 = vand.u32 4294901760, %v9183_v17  ;;  %v9194_v46 = vand.u32 4294901760, %v18096_v32 }
 0x8ad   :  { %9167 = vmatpush.msra.mxu1 %v9166_v36  ;;  %9099 = vmatpush.msra.mxu0 %v18056_v52 }
 0x8ae   :  { %8648 = vmatmul.f32.gmra.mxu0 %v17862_v45  ;;  %8694 = vmatmul.f32.gmra.mxu1 %v17928_v35  ;;  %v18085_v45 = vsub.f32 %v12720_v48, %v18069_v28  ;;  %v9172_v3 = vand.u32 4294901760, %v9171_v19  ;;  %v9195_v48 = vsub.f32 %v18096_v32, %v9194_v46 }
 0x8af   :  { %9242 = vmatpush.msra.mxu2 %v18066_v11  ;;  %9290 = vmatpush.msra.mxu3 %v18056_v52 }
 0x8b0   :  { %8760 = vmatmul.f32.gmra.mxu2 %v8759_v16  ;;  %v9188_v34 = vand.u32 4294901760, %v18085_v45  ;;  %9173 = vmatpush.msra.mxu1 %v9172_v3  ;;  %v9196_v36 = vand.u32 4294901760, %v9195_v48 }
 0x8b1   :  { %9245 = vmatpush.msra.mxu2 %v18085_v45  ;;  %9101 = vmatpush.msra.mxu0 %v18069_v28 }
 0x8b2   :  { %8838 = vmatmul.f32.gmra.mxu3 %v17960_v37  ;;  %v9189_v31 = vsub.f32 %v18085_v45, %v9188_v34  ;;  %9179 = vmatpush.msra.mxu1 %v9178_v26 }
 0x8b3   :  { %9248 = vmatpush.msra.mxu2 %v18096_v32  ;;  %9292 = vmatpush.msra.mxu3 %v18069_v28 }
 0x8b4   :  { %v9190_v51 = vand.u32 4294901760, %v9189_v31  ;;  %9185 = vmatpush.msra.mxu1 %v9184_v47  ;;  %9103 = vmatpush.msra.mxu0 %v18087_v8 }
 0x8b5   :  { %9294 = vmatpush.msra.mxu3 %v18087_v8 }
 0x8b6   :  { %8652 = vmatmul.f32.gmra.mxu0 %v17928_v35  ;;  %8925 = vmatmul.f32.vlgmr.msrb.gmra.mxu1 %v8733_v18  ;;  %v12735_v35 = vld [vmem:[%s20364_s4 + $0x110] sm:$0xff] }
 0x8b7   :  { %9191 = vmatpush.msra.mxu1 %v9190_v51 }
 0x8b8   :  { %8991 = vmatmul.f32.vlgmr.msrb.gmra.mxu2 %v17907_v43 }
 0x8b9   :  { %9197 = vmatpush.msra.mxu1 %v9196_v36 }
 0x8ba   :  { %9033 = vmatmul.f32.vlgmr.msrb.gmra.mxu3 %v17907_v43  ;;  %v12736_v43 = vld [vmem:[%s20364_s4 + $0x118] sm:$0xff] }
 0x8bb   :  { %9388 = vmatpush.msrb.mxu1 %v17965_v33 }
 0x8bd   :  { %9390 = vmatpush.msrb.mxu1 %v17974_v62  ;;  %v12733_v62 = vld [vmem:[%s20364_s4 + $0x100] sm:$0xff] }
 0x8be   :  { %8878 = vmatmul.f32.vlgmr.msrb.gmra.mxu0 %v17913_v9  ;;  %8931 = vmatmul.f32.gmra.mxu1 %v8741_v10  ;;  %v18137_v9 = vand.u32 4294901760, %v12736_v43  ;;  %v12734_v10 = vld [vmem:[%s20364_s4 + $0x108] sm:$0xff]  ;;  %v18179_v29 = vand.u32 4294901760, %v12733_v62 }
 0x8bf   :  { %9330 = vmatpush.msrb.mxu0 %v9146_v12  ;;  %9392 = vmatpush.msrb.mxu1 %v17993_v4  ;;  %v18162_v33 = vand.u32 4294901760, %v12734_v10 }
 0x8c0   :  { %8995 = vmatmul.f32.gmra.mxu2 %v17934_v25  ;;  %v18149_v18 = vsub.f32 %v12736_v43, %v18137_v9 }
 0x8c1   :  { %9334 = vmatpush.msrb.mxu0 %v9152_v61  ;;  %9394 = vmatpush.msrb.mxu1 %v18007_v21  ;;  %v18182_v4 = vsub.f32 %v12734_v10, %v18162_v33 }
 0x8c2   :  { %9037 = vmatmul.f32.gmra.mxu3 %v17934_v25  ;;  %v18151_v25 = vand.u32 4294901760, %v12735_v35  ;;  %9464 = vmatpush.msrb.mxu2 %v18137_v9 }
 0x8c3   :  { %9338 = vmatpush.msrb.mxu0 %v9158_v14  ;;  %9396 = vmatpush.msrb.mxu1 %v18025_v39  ;;  %v9535_v14 = vand.u32 4294901760, %v18182_v4  ;;  %v18203_v39 = vsub.f32 %v12733_v62, %v18179_v29 }
 0x8c4   :  { %v18165_v38 = vsub.f32 %v12735_v35, %v18151_v25  ;;  %9466 = vmatpush.msrb.mxu2 %v18151_v25 }
 0x8c5   :  { %9342 = vmatpush.msrb.mxu0 %v9164_v15  ;;  %9398 = vmatpush.msrb.mxu1 %v18036_v27  ;;  %v12731_v15 = vld [vmem:[%s20364_s4 + $0xf0] sm:$0xff]  ;;  %v9536_v57 = vsub.f32 %v18182_v4, %v9535_v14 }
 0x8c6   :  { %8883 = vmatmul.f32.gmra.mxu0 %v17941_v50  ;;  %8937 = vmatmul.f32.gmra.mxu1 %v8749_v56  ;;  %v9071_v50 = vsel %vm8256_vm6, %v17660_v20, 0  ;;  %v9523_v56 = vand.u32 4294901760, %v18149_v18  ;;  %v9529_v12 = vand.u32 4294901760, %v18165_v38  ;;  %v18215_v0 = vand.u32 4294901760, %v12731_v15 }
 0x8c7   :  { %9346 = vmatpush.msrb.mxu0 %v9170_v23  ;;  %9400 = vmatpush.msrb.mxu1 %v18056_v52  ;;  %v18186_v61 = vand.u32 4294901760, %v9071_v50  ;;  %v9541_v23 = vand.u32 4294901760, %v18203_v39  ;;  %v9537_v11 = vand.u32 4294901760, %v9536_v57  ;;  %v9077_v57 = vsel %vm8256_vm6, %v17917_v42, 0 }
 0x8c8   :  { %8999 = vmatmul.f32.gmra.mxu2 %v17947_v24  ;;  %v9524_v20 = vsub.f32 %v18149_v18, %v9523_v56  ;;  %v9530_v21 = vsub.f32 %v18165_v38, %v9529_v12  ;;  %v18232_v16 = vsub.f32 %v12731_v15, %v18215_v0 }
 0x8c9   :  { %9350 = vmatpush.msrb.mxu0 %v9176_v40  ;;  %9468 = vmatpush.msrb.mxu2 %v18162_v33  ;;  %v9105_v52 = vsub.f32 %v9071_v50, %v18186_v61  ;;  %v9542_v19 = vsub.f32 %v18203_v39, %v9541_v23 }
 0x8ca   :  { %9041 = vmatmul.f32.gmra.mxu3 %v17947_v24  ;;  %v12732_v24 = vld [vmem:[%s20364_s4 + $0xf8] sm:$0xff]  ;;  %9402 = vmatpush.msrb.mxu1 %v18069_v28  ;;  %v9525_v22 = vand.u32 4294901760, %v9524_v20  ;;  %v9531_v27 = vand.u32 4294901760, %v9530_v21  ;;  %v9553_v44 = vand.u32 4294901760, %v18232_v16  ;;  %v9075_v20 = vsel %vm8256_vm6, %v17881_v5, 0 }
 0x8cb   :  { %9354 = vmatpush.msrb.mxu0 %v9182_v41  ;;  %9470 = vmatpush.msrb.mxu2 %v18179_v29  ;;  %v18200_v1 = vand.u32 4294901760, %v12732_v24  ;;  %v9543_v26 = vand.u32 4294901760, %v9542_v19  ;;  %v18374_v19 = vpop.f32.mrf.mxu0 }
 0x8cc   :  { %9404 = vmatpush.msrb.mxu1 %v18087_v8  ;;  %9526 = vmatpush.msrb.mxu3 %v9525_v22  ;;  %v9106_v8 = vand.u32 4294901760, %v9105_v52 }
 0x8cd   :  { %9472 = vmatpush.msrb.mxu2 %v18200_v1  ;;  %v18221_v40 = vsub.f32 %v12732_v24, %v18200_v1  ;;  %9358 = vmatpush.msrb.mxu0 %v9188_v34  ;;  %v9554_v34 = vsub.f32 %v18232_v16, %v9553_v44 }
 0x8ce   :  { %8888 = vmatmul.f32.gmra.mxu0 %v17954_v55  ;;  %8943 = vmatmul.f32.gmra.mxu1 %v8757_v53  ;;  %v12730_v55 = vld [vmem:[%s20364_s4 + $0xe8] sm:$0xff]  ;;  %v9073_v53 = vsel %vm8256_vm6, %v17702_v59, 0  ;;  %v12729_v59 = vld [vmem:[%s20364_s4 + $0xe0] sm:$0xff]  ;;  %v9107_v35 = vsub.f32 %v9105_v52, %v9106_v8 }
 0x8cf   :  { %v18229_v28 = vand.u32 4294901760, %v12730_v55  ;;  %9532 = vmatpush.msrb.mxu3 %v9531_v27  ;;  %9474 = vmatpush.msrb.mxu2 %v18215_v0  ;;  %v9547_v63 = vand.u32 4294901760, %v18221_v40  ;;  %v18246_v41 = vand.u32 4294901760, %v12729_v59  ;;  %v18253_v3 = vand.u32 4294901760, %v9073_v53 }
 0x8d0   :  { %9003 = vmatmul.f32.gmra.mxu2 %v17960_v37  ;;  %9362 = vmatpush.msrb.mxu0 %v9194_v46  ;;  %v9555_v51 = vand.u32 4294901760, %v9554_v34  ;;  %v9108_v21 = vand.u32 4294901760, %v9107_v35  ;;  %v18298_v27 = vand.u32 4294901760, %v9075_v20 }
 0x8d1   :  { %v18249_v45 = vsub.f32 %v12730_v55, %v18229_v28  ;;  %9538 = vmatpush.msrb.mxu3 %v9537_v11  ;;  %v9548_v17 = vsub.f32 %v18221_v40, %v9547_v63  ;;  %9476 = vmatpush.msrb.mxu2 %v18229_v28  ;;  %v18269_v31 = vsub.f32 %v12729_v59, %v18246_v41  ;;  %v9452_v55 = vsel %vm8256_vm6, %v17884_v54, 0  ;;  %v18383_v59 = vpop.f32.mrf.mxu2 }
 0x8d2   :  { %9045 = vmatmul.f32.gmra.mxu3 %v17960_v37  ;;  %v12728_v37 = vld [vmem:[%s20364_s4 + $0xd8] sm:$0xff]  ;;  %v9113_v10 = vsub.f32 %v9073_v53, %v18253_v3 }
 0x8d3   :  { %v9559_v32 = vand.u32 4294901760, %v18249_v45  ;;  %v18266_v47 = vand.u32 4294901760, %v12728_v37  ;;  %9544 = vmatpush.msrb.mxu3 %v9543_v26  ;;  %v9549_v46 = vand.u32 4294901760, %v9548_v17  ;;  %9478 = vmatpush.msrb.mxu2 %v18246_v41  ;;  %v9565_v36 = vand.u32 4294901760, %v18269_v31 }
 0x8d4   :  { %v9114_v15 = vand.u32 4294901760, %v9113_v10 }
 0x8d5   :  { %v9560_v48 = vsub.f32 %v18249_v45, %v9559_v32  ;;  %v18279_v43 = vsub.f32 %v12728_v37, %v18266_v47  ;;  %9550 = vmatpush.msrb.mxu3 %v9549_v46  ;;  %9480 = vmatpush.msrb.mxu2 %v18266_v47  ;;  %v9566_v50 = vsub.f32 %v18269_v31, %v9565_v36  ;;  %v12745_v37 = vld [vmem:[%s20364_s4 + $0x160] sm:$0xff] }
 0x8d6   :  { %8893 = vmatmul.f32.gmra.mxu0 %v17982_v58  ;;  %9199 = vmatmul.f32.vlgmr.msra.gmra.mxu1 %v18186_v61  ;;  %v18399_v34 = vand.u32 4294901760, %v12745_v37 }
 0x8d7   :  { %v9561_v58 = vand.u32 4294901760, %v9560_v48  ;;  %v9571_v62 = vand.u32 4294901760, %v18279_v43  ;;  %9655 = vmatpush.msra.mxu1 %v18137_v9  ;;  %9556 = vmatpush.msrb.mxu3 %v9555_v51  ;;  %v9567_v24 = vand.u32 4294901760, %v9566_v50 }
 0x8d8   :  { %9251 = vmatmul.f32.vlgmr.msra.gmra.mxu2 %v9105_v52  ;;  %v18317_v52 = vand.u32 4294901760, %v9077_v57  ;;  %v18419_v51 = vsub.f32 %v12745_v37, %v18399_v34 }
 0x8d9   :  { %9707 = vmatpush.msra.mxu2 %v9523_v56  ;;  %v9572_v22 = vsub.f32 %v18279_v43, %v9571_v62  ;;  %9657 = vmatpush.msra.mxu1 %v18151_v25  ;;  %v9115_v56 = vsub.f32 %v9113_v10, %v9114_v15 }
 0x8da   :  { %9298 = vmatmul.f32.vlgmr.msra.gmra.mxu3 %v9106_v8  ;;  %v9900_v35 = vand.u32 4294901760, %v18419_v51 }
 0x8db   :  { %9562 = vmatpush.msrb.mxu3 %v9561_v58  ;;  %9711 = vmatpush.msra.mxu2 %v9529_v12  ;;  %v9573_v5 = vand.u32 4294901760, %v9572_v22  ;;  %v9121_v12 = vsub.f32 %v9075_v20, %v18298_v27  ;;  %v12742_v20 = vld [vmem:[%s20364_s4 + $0x148] sm:$0xff] }
 0x8dc   :  { %9659 = vmatpush.msra.mxu1 %v18162_v33 }
 0x8dd   :  { %9568 = vmatpush.msrb.mxu3 %v9567_v24  ;;  %9715 = vmatpush.msra.mxu2 %v9535_v14  ;;  %v9116_v14 = vand.u32 4294901760, %v9115_v56  ;;  %v9901_v24 = vsub.f32 %v18419_v51, %v9900_v35 }
 0x8de   :  { %9109 = vmatmul.f32.vlgmr.msra.gmra.mxu0 %v9108_v21  ;;  %9203 = vmatmul.f32.gmra.mxu1 %v18253_v3 }
 0x8df   :  { %9574 = vmatpush.msrb.mxu3 %v9573_v5  ;;  %9601 = vmatpush.msra.mxu0 %v18149_v18  ;;  %v9448_v18 = vsel %vm8256_vm6, %v17664_v49, 0  ;;  %v9902_v5 = vand.u32 4294901760, %v9901_v24 }
 0x8e0   :  { %9256 = vmatmul.f32.gmra.mxu2 %v9113_v10  ;;  %9661 = vmatpush.msra.mxu1 %v18179_v29  ;;  %v18325_v49 = vand.u32 4294901760, %v9448_v18 }
 0x8e1   :  { %9765 = vmatpush.msra.mxu3 %v18137_v9  ;;  %9604 = vmatpush.msra.mxu0 %v18165_v38  ;;  %v9122_v9 = vand.u32 4294901760, %v9121_v12  ;;  %v9450_v38 = vsel %vm8256_vm6, %v17706_v30, 0 }
 0x8e2   :  { %9304 = vmatmul.f32.gmra.mxu3 %v9114_v15  ;;  %9719 = vmatpush.msra.mxu2 %v9541_v23  ;;  %v12741_v15 = vld [vmem:[%s20364_s4 + $0x140] sm:$0xff] }
 0x8e3   :  { %9767 = vmatpush.msra.mxu3 %v18151_v25  ;;  %9607 = vmatpush.msra.mxu0 %v18182_v4  ;;  %v9123_v42 = vsub.f32 %v9121_v12, %v9122_v9  ;;  %v9129_v25 = vsub.f32 %v9077_v57, %v18317_v52 }
 0x8e4   :  { %9663 = vmatpush.msra.mxu1 %v18200_v1  ;;  %9723 = vmatpush.msra.mxu2 %v9547_v63 }
 0x8e5   :  { %9769 = vmatpush.msra.mxu3 %v18162_v33  ;;  %9610 = vmatpush.msra.mxu0 %v18203_v39  ;;  %v18335_v33 = vsub.f32 %v9448_v18, %v18325_v49  ;;  %v9130_v4 = vand.u32 4294901760, %v9129_v25  ;;  %v18349_v39 = vand.u32 4294901760, %v9450_v38 }
 0x8e6   :  { %9117 = vmatmul.f32.gmra.mxu0 %v9116_v14  ;;  %9207 = vmatmul.f32.gmra.mxu1 %v18298_v27 }
 0x8e7   :  { %9665 = vmatpush.msra.mxu1 %v18215_v0  ;;  %9771 = vmatpush.msra.mxu3 %v18179_v29  ;;  %v9124_v29 = vand.u32 4294901760, %v9123_v42  ;;  %v9483_v30 = vand.u32 4294901760, %v18335_v33  ;;  %v18362_v23 = vsub.f32 %v9450_v38, %v18349_v39  ;;  %v12740_v42 = vld [vmem:[%s20364_s4 + $0x138] sm:$0xff] }
 0x8e8   :  { %9261 = vmatmul.f32.gmra.mxu2 %v9121_v12  ;;  %9613 = vmatpush.msra.mxu0 %v18221_v40  ;;  %v18365_v40 = vpop.f32.mrf.mxu1 }
 0x8e9   :  { %9667 = vmatpush.msra.mxu1 %v18229_v28  ;;  %9727 = vmatpush.msra.mxu2 %v9553_v44 }
 0x8ea   :  { %9310 = vmatmul.f32.gmra.mxu3 %v9122_v9  ;;  %9616 = vmatpush.msra.mxu0 %v18232_v16  ;;  %v18372_v16 = vand.u32 4294901760, %v9452_v55  ;;  %v18473_v9 = vand.u32 4294901760, %v12741_v15 }
 0x8eb   :  { %9773 = vmatpush.msra.mxu3 %v18200_v1  ;;  %9669 = vmatpush.msra.mxu1 %v18246_v41  ;;  %v9131_v1 = vsub.f32 %v9129_v25, %v9130_v4 }
 0x8ec   :  { %9731 = vmatpush.msra.mxu2 %v9559_v32  ;;  %9619 = vmatpush.msra.mxu0 %v18249_v45  ;;  %v18381_v63 = vsub.f32 %v9452_v55, %v18372_v16  ;;  %v18389_v45 = vpop.f32.mrf.mxu3  ;;  %v18401_v32 = vpop.f32.mrf.mxu0  ;;  %v18489_v55 = vsub.f32 %v12741_v15, %v18473_v9 }
 0x8ed   :  { %9775 = vmatpush.msra.mxu3 %v18215_v0  ;;  %9671 = vmatpush.msra.mxu1 %v18266_v47  ;;  %v9484_v0 = vsub.f32 %v18335_v33, %v9483_v30  ;;  %v9132_v53 = vand.u32 4294901760, %v9131_v1 }
 0x8ee   :  { %9125 = vmatmul.f32.gmra.mxu0 %v9124_v29  ;;  %9211 = vmatmul.f32.gmra.mxu1 %v18317_v52  ;;  %v9499_v26 = vand.u32 4294901760, %v18381_v63 }
 0x8ef   :  { %9735 = vmatpush.msra.mxu2 %v9565_v36  ;;  %9777 = vmatpush.msra.mxu3 %v18229_v28  ;;  %v9485_v11 = vand.u32 4294901760, %v9484_v0  ;;  %v9491_v28 = vand.u32 4294901760, %v18362_v23  ;;  %v12743_v36 = vld [vmem:[%s20364_s4 + $0x150] sm:$0xff]  ;;  %v18486_v0 = vand.u32 4294901760, %v12740_v42 }
 0x8f0   :  { %9266 = vmatmul.f32.gmra.mxu2 %v9129_v25  ;;  %9622 = vmatpush.msra.mxu0 %v18269_v31  ;;  %v18385_v44 = vpop.f32.mrf.mxu1  ;;  %v18413_v31 = vpop.f32.mrf.mxu2  ;;  %v18435_v58 = vand.u32 4294901760, %v12743_v36 }
 0x8f1   :  { %9739 = vmatpush.msra.mxu2 %v9571_v62  ;;  %9779 = vmatpush.msra.mxu3 %v18246_v41  ;;  %v9492_v54 = vsub.f32 %v18362_v23, %v9491_v28  ;;  %v9454_v41 = vsel %vm8256_vm6, %v17920_v60, 0  ;;  %v9500_v60 = vsub.f32 %v18381_v63, %v9499_v26 }
 0x8f2   :  { %9316 = vmatmul.f32.gmra.mxu3 %v9130_v4  ;;  %9625 = vmatpush.msra.mxu0 %v18279_v43  ;;  %v18394_v17 = vand.u32 4294901760, %v9454_v41  ;;  %v18448_v21 = vsub.f32 %v12743_v36, %v18435_v58  ;;  %v12738_v36 = vld [vmem:[%s20364_s4 + $0x128] sm:$0xff] }
 0x8f3   :  { %9781 = vmatpush.msra.mxu3 %v18266_v47  ;;  %v9493_v8 = vand.u32 4294901760, %v9492_v54  ;;  %v12744_v47 = vld [vmem:[%s20364_s4 + $0x158] sm:$0xff]  ;;  %v9501_v50 = vand.u32 4294901760, %v9500_v60  ;;  %v18517_v15 = vand.u32 4294901760, %v12738_v36 }
 0x8f4   :  { %v18421_v48 = vand.u32 4294901760, %v12744_v47  ;;  %v18427_v43 = vpop.f32.mrf.mxu3  ;;  %v9912_v12 = vand.u32 4294901760, %v18448_v21 }
 0x8f6   :  { %9133 = vmatmul.f32.gmra.mxu0 %v9132_v53  ;;  %9406 = vmatmul.f32.vlgmr.msrb.gmra.mxu1 %v18186_v61  ;;  %v18431_v10 = vsub.f32 %v12744_v47, %v18421_v48  ;;  %v9913_v4 = vsub.f32 %v18448_v21, %v9912_v12  ;;  %v12739_v53 = vld [vmem:[%s20364_s4 + $0x130] sm:$0xff]  ;;  %v20584_v47 = vand.u32 4294901760, %v18489_v55 }
 0x8f7   :  { %9903 = vmatpush.msrb.mxu1 %v9902_v5  ;;  %v18504_v37 = vand.u32 4294901760, %v12739_v53  ;;  %v12737_v5 = vld [vmem:[%s20364_s4 + $0x120] sm:$0xff] }
 0x8f8   :  { %9486 = vmatmul.f32.vlgmr.msrb.gmra.mxu2 %v9485_v11  ;;  %v18415_v46 = vpop.f32.mrf.mxu1  ;;  %v9906_v22 = vand.u32 4294901760, %v18431_v10  ;;  %v9914_v54 = vand.u32 4294901760, %v9913_v4 }
 0x8f9   :  { %9978 = vmatpush.msrb.mxu2 %v18419_v51  ;;  %v18515_v24 = vsub.f32 %v12739_v53, %v18504_v37  ;;  %v9825_v51 = vsel %vm8256_vm6, %v17671_v13, 0 }
 0x8fa   :  { %9576 = vmatmul.f32.vlgmr.msrb.gmra.mxu3 %v18325_v49  ;;  %v9907_v56 = vsub.f32 %v18431_v10, %v9906_v22 }
 0x8fb   :  { %10032 = vmatpush.msrb.mxu3 %v18399_v34  ;;  %9981 = vmatpush.msrb.mxu2 %v18431_v10  ;;  %v18467_v18 = vpop.f32.mrf.mxu0  ;;  %v18479_v25 = vpop.f32.mrf.mxu2 }
 0x8fc   :  { %v9908_v29 = vand.u32 4294901760, %v9907_v56 }
 0x8fd   :  { %10034 = vmatpush.msrb.mxu3 %v18421_v48  ;;  %9984 = vmatpush.msrb.mxu2 %v18448_v21  ;;  %v18496_v11 = vpop.f32.mrf.mxu3  ;;  %v9827_v21 = vsel %vm8256_vm6, %v17714_v2, 0 }
 0x8fe   :  { %9364 = vmatmul.f32.vlgmr.msrb.gmra.mxu0 %v18186_v61  ;;  %9410 = vmatmul.f32.gmra.mxu1 %v18253_v3  ;;  %v18408_v61 = vsub.f32 %v9454_v41, %v18394_v17 }
 0x8ff   :  { %9841 = vmatpush.msrb.mxu0 %v18399_v34  ;;  %10036 = vmatpush.msrb.mxu3 %v18435_v58 }
 0x900   :  { %9494 = vmatmul.f32.gmra.mxu2 %v9493_v8  ;;  %v20581_v62 = vand.u32 4294901760, %v18408_v61  ;;  %9909 = vmatpush.msrb.mxu1 %v9908_v29  ;;  %v18502_v8 = vsub.f32 %v12740_v42, %v18486_v0  ;;  %v18532_v42 = vsub.f32 %v12738_v36, %v18517_v15  ;;  %v18534_v29 = vand.u32 4294901760, %v12737_v5 }
 0x901   :  { %9843 = vmatpush.msrb.mxu0 %v18421_v48 }
 0x902   :  { %9580 = vmatmul.f32.gmra.mxu3 %v18349_v39  ;;  %v9508_v14 = vsub.f32 %v18408_v61, %v20581_v62  ;;  %9915 = vmatpush.msrb.mxu1 %v9914_v54  ;;  %v18545_v36 = vsub.f32 %v12737_v5, %v18534_v29 }
 0x903   :  { %9845 = vmatpush.msrb.mxu0 %v18435_v58 }
 0x904   :  { %v9509_v60 = vand.u32 4294901760, %v9508_v14  ;;  %v20583_v14 = vand.u32 4294901760, %v18515_v24 }
 0x906   :  { %9368 = vmatmul.f32.gmra.mxu0 %v18253_v3  ;;  %9414 = vmatmul.f32.gmra.mxu1 %v18298_v27  ;;  %v18451_v3 = vand.u32 4294901760, %v12742_v20 }
 0x908   :  { %9502 = vmatmul.f32.gmra.mxu2 %v9501_v50  ;;  %v18463_v57 = vsub.f32 %v12742_v20, %v18451_v3  ;;  %9847 = vmatpush.msrb.mxu0 %v18451_v3  ;;  %v20582_v20 = vand.u32 4294901760, %v18502_v8 }
 0x909   :  { %10038 = vmatpush.msrb.mxu3 %v18451_v3 }
 0x90a   :  { %9584 = vmatmul.f32.gmra.mxu3 %v18372_v16  ;;  %v9918_v1 = vand.u32 4294901760, %v18463_v57  ;;  %9987 = vmatpush.msrb.mxu2 %v18463_v57  ;;  %v9931_v56 = vsub.f32 %v18502_v8, %v20582_v20 }
 0x90b   :  { %v8488_v38 = vpop.f32.mrf.mxu1  ;;  %9849 = vmatpush.msrb.mxu0 %v18473_v9  ;;  %10040 = vmatpush.msrb.mxu3 %v18473_v9 }
 0x90c   :  { %v9919_v41 = vsub.f32 %v18463_v57, %v9918_v1  ;;  %9990 = vmatpush.msrb.mxu2 %v18489_v55 }
 0x90d   :  { %9851 = vmatpush.msrb.mxu0 %v18486_v0  ;;  %10042 = vmatpush.msrb.mxu3 %v18486_v0 }
 0x90e   :  { %9372 = vmatmul.f32.gmra.mxu0 %v18298_v27  ;;  %9418 = vmatmul.f32.gmra.mxu1 %v18317_v52  ;;  %v9920_v50 = vand.u32 4294901760, %v9919_v41  ;;  %v9925_v27 = vsub.f32 %v18489_v55, %v20584_v47  ;;  %v9932_v41 = vand.u32 4294901760, %v9931_v56  ;;  %v9948_v47 = vand.u32 4294901760, %v18545_v36 }
 0x90f   :  { %9993 = vmatpush.msrb.mxu2 %v18502_v8  ;;  %9853 = vmatpush.msrb.mxu0 %v18504_v37 }
 0x910   :  { %9510 = vmatmul.f32.gmra.mxu2 %v9509_v60  ;;  %9921 = vmatpush.msrb.mxu1 %v9920_v50  ;;  %v9926_v4 = vand.u32 4294901760, %v9925_v27  ;;  %v9937_v60 = vsub.f32 %v18515_v24, %v20583_v14  ;;  %v9942_v50 = vand.u32 4294901760, %v18532_v42 }
 0x911   :  { %9996 = vmatpush.msrb.mxu2 %v18515_v24  ;;  %10044 = vmatpush.msrb.mxu3 %v18504_v37 }
 0x912   :  { %9588 = vmatmul.f32.gmra.mxu3 %v18394_v17  ;;  %9927 = vmatpush.msrb.mxu1 %v9926_v4  ;;  %v9938_v20 = vand.u32 4294901760, %v9937_v60  ;;  %v9943_v14 = vsub.f32 %v18532_v42, %v9942_v50  ;;  %v9949_v4 = vsub.f32 %v18545_v36, %v9948_v47 }
 0x913   :  { %v8410_v53 = vpop.f32.mrf.mxu0  ;;  %v8543_v54 = vpop.f32.mrf.mxu2  ;;  %9999 = vmatpush.msrb.mxu2 %v18532_v42  ;;  %10046 = vmatpush.msrb.mxu3 %v18517_v15 }
 0x914   :  { %v8489_v62 = vadd.f32 %v8488_v38, %v8410_v53  ;;  %v18547_v27 = vpop.f32.mrf.mxu1  ;;  %9933 = vmatpush.msrb.mxu1 %v9932_v41  ;;  %v9944_v38 = vand.u32 4294901760, %v9943_v14  ;;  %v9950_v60 = vand.u32 4294901760, %v9949_v4  ;;  %9855 = vmatpush.msrb.mxu0 %v18517_v15 }
 0x915   :  { %v8593_v56 = vpop.f32.mrf.mxu3  ;;  %10002 = vmatpush.msrb.mxu2 %v18545_v36  ;;  %10048 = vmatpush.msrb.mxu3 %v18534_v29 }
 0x916   :  { %v8544_v5 = vadd.f32 %v8543_v54, %v8489_v62  ;;  %9376 = vmatmul.f32.gmra.mxu0 %v18317_v52  ;;  %9675 = vmatmul.f32.vlgmr.msra.gmra.mxu1 %v9483_v30 }
 0x917   :  { %9939 = vmatpush.msrb.mxu1 %v9938_v20  ;;  %9857 = vmatpush.msrb.mxu0 %v18534_v29 }
 0x918   :  { %v8594_v53 = vadd.f32 %v8593_v56, %v8544_v5  ;;  %9741 = vmatmul.f32.vlgmr.msra.gmra.mxu2 %v18325_v49 }
 0x919   :  { %9945 = vmatpush.msrb.mxu1 %v9944_v38 }
 0x91a   :  { %9783 = vmatmul.f32.vlgmr.msra.gmra.mxu3 %v18325_v49 }
 0x91b   :  { %v18565_v52 = vpop.f32.mrf.mxu0  ;;  %v18567_v30 = vpop.f32.mrf.mxu2  ;;  %9951 = vmatpush.msrb.mxu1 %v9950_v60 }
 0x91c   :  { %v18570_v62 = vpop.f32.mrf.mxu1 }
 0x91d   :  { %v18573_v14 = vpop.f32.mrf.mxu3  ;;  %10142 = vmatpush.msra.mxu1 %v18399_v34 }
 0x91e   :  { %9628 = vmatmul.f32.vlgmr.msra.gmra.mxu0 %v18335_v33  ;;  %9681 = vmatmul.f32.gmra.mxu1 %v9491_v28 }
 0x91f   :  { %10084 = vmatpush.msra.mxu0 %v9900_v35  ;;  %10144 = vmatpush.msra.mxu1 %v18421_v48  ;;  %v21223_v48 = vand.u32 4294901760, %v18502_v8  ;;  %v21224_v35 = vand.u32 4294901760, %v18515_v24  ;;  %v9829_v8 = vsel %vm8256_vm6, %v17893_v6, 0  ;;  %v9831_v6 = vsel %vm8256_vm6, %v17926_v7, 0 }
 0x920   :  { %9745 = vmatmul.f32.gmra.mxu2 %v18349_v39  ;;  %v9874_v42 = vand.u32 4294901760, %v9829_v8  ;;  %v9882_v38 = vand.u32 4294901760, %v9831_v6 }
 0x921   :  { %10088 = vmatpush.msra.mxu0 %v9906_v22  ;;  %10146 = vmatpush.msra.mxu1 %v18435_v58  ;;  %v18620_v58 = vand.u32 4294901760, %v9825_v51 }
 0x922   :  { %9787 = vmatmul.f32.gmra.mxu3 %v18349_v39  ;;  %v21222_v39 = vand.u32 4294901760, %v18489_v55  ;;  %v9875_v54 = vsub.f32 %v9829_v8, %v9874_v42  ;;  %v9883_v60 = vsub.f32 %v9831_v6, %v9882_v38 }
 0x923   :  { %v18586_v49 = vpop.f32.mrf.mxu0  ;;  %v18588_v33 = vpop.f32.mrf.mxu2  ;;  %10092 = vmatpush.msra.mxu0 %v9912_v12  ;;  %10148 = vmatpush.msra.mxu1 %v18451_v3  ;;  %v9859_v22 = vsub.f32 %v9825_v51, %v18620_v58 }
 0x924   :  { %v18593_v28 = vpop.f32.mrf.mxu1  ;;  %v9876_v5 = vand.u32 4294901760, %v9875_v54 }
 0x925   :  { %v18595_v34 = vpop.f32.mrf.mxu3  ;;  %10096 = vmatpush.msra.mxu0 %v9918_v1  ;;  %10150 = vmatpush.msra.mxu1 %v18473_v9  ;;  %v9860_v9 = vand.u32 4294901760, %v9859_v22  ;;  %v18640_v1 = vand.u32 4294901760, %v9827_v21 }
 0x926   :  { %9633 = vmatmul.f32.gmra.mxu0 %v18362_v23  ;;  %9687 = vmatmul.f32.gmra.mxu1 %v9499_v26 }
 0x927   :  { %10100 = vmatpush.msra.mxu0 %v21222_v39  ;;  %10152 = vmatpush.msra.mxu1 %v18486_v0  ;;  %v9861_v2 = vsub.f32 %v9859_v22, %v9860_v9 }
 0x928   :  { %9749 = vmatmul.f32.gmra.mxu2 %v18372_v16 }
 0x929   :  { %10104 = vmatpush.msra.mxu0 %v21223_v48  ;;  %10154 = vmatpush.msra.mxu1 %v18504_v37  ;;  %v9862_v24 = vand.u32 4294901760, %v9861_v2 }
 0x92a   :  { %9791 = vmatmul.f32.gmra.mxu3 %v18372_v16  ;;  %v21225_v16 = vand.u32 4294901760, %v18408_v61 }
 0x92b   :  { %v18613_v23 = vpop.f32.mrf.mxu0  ;;  %v18615_v26 = vpop.f32.mrf.mxu2  ;;  %10108 = vmatpush.msra.mxu0 %v21224_v35  ;;  %10156 = vmatpush.msra.mxu1 %v18517_v15  ;;  %v9884_v35 = vand.u32 4294901760, %v9883_v60 }
 0x92c   :  { %v8695_v10 = vpop.f32.mrf.mxu1 }
 0x92d   :  { %v18622_v13 = vpop.f32.mrf.mxu3  ;;  %10112 = vmatpush.msra.mxu0 %v9942_v50  ;;  %10158 = vmatpush.msra.mxu1 %v18534_v29 }
 0x92e   :  { %9638 = vmatmul.f32.gmra.mxu0 %v18381_v63  ;;  %9693 = vmatmul.f32.gmra.mxu1 %v21225_v16  ;;  %v9885_v16 = vsub.f32 %v9883_v60, %v9884_v35 }
 0x92f   :  { %10116 = vmatpush.msra.mxu0 %v9948_v47 }
 0x930   :  { %9753 = vmatmul.f32.gmra.mxu2 %v18394_v17 }
 0x932   :  { %9795 = vmatmul.f32.gmra.mxu3 %v18394_v17  ;;  %v9867_v17 = vsub.f32 %v9827_v21, %v18640_v1 }
 0x933   :  { %v8653_v3 = vpop.f32.mrf.mxu0  ;;  %v18636_v12 = vpop.f32.mrf.mxu2 }
 0x934   :  { %v8654_v57 = vadd.f32 %v8653_v3, %v8594_v53  ;;  %v18638_v63 = vpop.f32.mrf.mxu1  ;;  %v9868_v15 = vand.u32 4294901760, %v9867_v17  ;;  %v9877_v53 = vsub.f32 %v9875_v54, %v9876_v5 }
 0x935   :  { %v18642_v0 = vpop.f32.mrf.mxu3 }
 0x936   :  { %v18644_v55 = vadd.f32 %v8695_v10, %v8654_v57  ;;  %9643 = vmatmul.f32.gmra.mxu0 %v18408_v61  ;;  %9953 = vmatmul.f32.vlgmr.msrb.gmra.mxu1 %v18620_v58  ;;  %v9869_v29 = vsub.f32 %v9867_v17, %v9868_v15  ;;  %v9878_v48 = vand.u32 4294901760, %v9877_v53  ;;  %v9886_v57 = vand.u32 4294901760, %v9885_v16 }
 0x938   :  { %10005 = vmatmul.f32.vlgmr.msrb.gmra.mxu2 %v9859_v22  ;;  %v9870_v56 = vand.u32 4294901760, %v9869_v29 }
 0x93a   :  { %10052 = vmatmul.f32.vlgmr.msrb.gmra.mxu3 %v9860_v9 }
 0x93b   :  { %v18651_v37 = vpop.f32.mrf.mxu0  ;;  %v18653_v47 = vpop.f32.mrf.mxu2 }
 0x93c   :  { %v18655_v20 = vpop.f32.mrf.mxu1 }
 0x93d   :  { %v18657_v61 = vpop.f32.mrf.mxu3 }
 0x93e   :  { %21226 = vst [vmem:[#allocation101_spill] sm:$0xff] %v18657_v61  ;;  %9863 = vmatmul.f32.vlgmr.msrb.gmra.mxu0 %v9862_v24  ;;  %9957 = vmatmul.f32.gmra.mxu1 %v18640_v1 }
 0x940   :  { %10010 = vmatmul.f32.gmra.mxu2 %v9867_v17 }
 0x942   :  { %10058 = vmatmul.f32.gmra.mxu3 %v9868_v15 }
 0x943   :  { %v18662_v41 = vpop.f32.mrf.mxu0  ;;  %v18664_v50 = vpop.f32.mrf.mxu2 }
 0x944   :  { %v18666_v36 = vpop.f32.mrf.mxu1 }
 0x945   :  { %v18668_v4 = vpop.f32.mrf.mxu3 }
 0x946   :  { %21227 = vst [vmem:[#allocation17_spill] sm:$0xff] %v18668_v4  ;;  %9871 = vmatmul.f32.gmra.mxu0 %v9870_v56  ;;  %9961 = vmatmul.f32.gmra.mxu1 %v9874_v42 }
 0x948   :  { %10015 = vmatmul.f32.gmra.mxu2 %v9875_v54 }
 0x94a   :  { %10064 = vmatmul.f32.gmra.mxu3 %v9876_v5 }
 0x94b   :  { %v18670_v39 = vpop.f32.mrf.mxu0  ;;  %v18672_v7 = vpop.f32.mrf.mxu2 }
 0x94c   :  { %v18674_v51 = vpop.f32.mrf.mxu1 }
 0x94d   :  { %v18676_v10 = vpop.f32.mrf.mxu3 }
 0x94e   :  { %21228 = vst [vmem:[#allocation16_spill] sm:$0xff] %v18676_v10  ;;  %9879 = vmatmul.f32.gmra.mxu0 %v9878_v48  ;;  %9965 = vmatmul.f32.gmra.mxu1 %v9882_v38 }
 0x950   :  { %10020 = vmatmul.f32.gmra.mxu2 %v9883_v60 }
 0x952   :  { %10070 = vmatmul.f32.gmra.mxu3 %v9884_v35 }
 0x953   :  { %v18678_v22 = vpop.f32.mrf.mxu0  ;;  %v18680_v21 = vpop.f32.mrf.mxu2 }
 0x954   :  { %21229 = vst [vmem:[#allocation59_spill] sm:$0xff] %v18680_v21  ;;  %v18682_v3 = vpop.f32.mrf.mxu1 }
 0x955   :  { %v18684_v9 = vpop.f32.mrf.mxu3 }
 0x956   :  { %21230 = vst [vmem:[#allocation46_spill] sm:$0xff] %v18684_v9  ;;  %9887 = vmatmul.f32.gmra.mxu0 %v9886_v57  ;;  %10160 = vmatmul.f32.vlgmr.msra.gmra.mxu1 %v18620_v58 }
 0x95b   :  { %v18687_v2 = vpop.f32.mrf.mxu0  ;;  %v18689_v17 = vpop.f32.mrf.mxu2 }
 0x95c   :  { %v18691_v8 = vpop.f32.mrf.mxu1 }
 0x95d   :  { %v18693_v24 = vpop.f32.mrf.mxu3 }
 0x95e   :  { %10118 = vmatmul.f32.vlgmr.msra.gmra.mxu0 %v18620_v58  ;;  %10164 = vmatmul.f32.gmra.mxu1 %v18640_v1 }
 0x963   :  { %v18697_v15 = vpop.f32.mrf.mxu0  ;;  %v18699_v29 = vpop.f32.mrf.mxu2 }
 0x964   :  { %v18701_v54 = vpop.f32.mrf.mxu1 }
 0x965   :  { %v18703_v6 = vpop.f32.mrf.mxu3 }
 0x966   :  { %21231 = vst [vmem:[#allocation60_spill] sm:$0xff] %v18703_v6  ;;  %10122 = vmatmul.f32.gmra.mxu0 %v18640_v1  ;;  %10168 = vmatmul.f32.gmra.mxu1 %v9874_v42 }
 0x96b   :  { %v18706_v56 = vpop.f32.mrf.mxu0  ;;  %v18708_v5 = vpop.f32.mrf.mxu2 }
 0x96c   :  { %v18710_v53 = vpop.f32.mrf.mxu1 }
 0x96d   :  { %21232 = vst [vmem:[#allocation31_spill] sm:$0xff] %v18710_v53  ;;  %v18712_v58 = vpop.f32.mrf.mxu3 }
 0x96e   :  { %21233 = vst [vmem:[#allocation61_spill] sm:$0xff] %v18712_v58  ;;  %10126 = vmatmul.f32.gmra.mxu0 %v9874_v42  ;;  %10172 = vmatmul.f32.gmra.mxu1 %v9882_v38 }
 0x973   :  { %v18714_v60 = vpop.f32.mrf.mxu0  ;;  %v18716_v48 = vpop.f32.mrf.mxu2 }
 0x974   :  { %21234 = vst [vmem:[#allocation48_spill] sm:$0xff] %v18716_v48  ;;  %v18718_v35 = vpop.f32.mrf.mxu1 }
 0x975   :  { %21235 = vst [vmem:[#allocation63_spill] sm:$0xff] %v18718_v35  ;;  %v18720_v16 = vpop.f32.mrf.mxu3 }
 0x976   :  { %10130 = vmatmul.f32.gmra.mxu0 %v9882_v38  ;;  %21236 = vst [vmem:[#allocation55_spill] sm:$0xff] %v18720_v16 }
 0x97b   :  { %v18722_v1 = vpop.f32.mrf.mxu0  ;;  %v18724_v57 = vpop.f32.mrf.mxu2 }
 0x97c   :  { %21237 = vst [vmem:[#allocation64_spill] sm:$0xff] %v18722_v1  ;;  %v18726_v9 = vpop.f32.mrf.mxu1 }
 0x97d   :  { %21238 = vst [vmem:[#allocation13_spill] sm:$0xff] %v18726_v9  ;;  %v18728_v10 = vpop.f32.mrf.mxu3 }
 0x983   :  { %v18730_v21 = vpop.f32.mrf.mxu0  ;;  %v18732_v42 = vpop.f32.mrf.mxu2 }
 0x984   :  { %21239 = vst [vmem:[#allocation66_spill] sm:$0xff] %v18730_v21  ;;  %v18734_v4 = vpop.f32.mrf.mxu1 }
 0x985   :  { %21240 = vst [vmem:[#allocation29_spill] sm:$0xff] %v18734_v4  ;;  %v18738_v35 = vpop.f32.mrf.mxu3 }
 0x98b   :  { %v18736_v61 = vpop.f32.mrf.mxu0  ;;  %v18742_v16 = vpop.f32.mrf.mxu2 }
 0x98c   :  { %21241 = vst [vmem:[#allocation67_spill] sm:$0xff] %v18736_v61  ;;  %v18740_v38 = vpop.f32.mrf.mxu1 }
 0x98d   :  { %21242 = vst [vmem:[#allocation56_spill] sm:$0xff] %v18740_v38  ;;  %v18748_v9 = vpop.f32.mrf.mxu3 }
 0x98e   :  { %21245 = vst [vmem:[#allocation65_spill] sm:$0xff] %v18748_v9 }
 0x993   :  { %v18744_v1 = vpop.f32.mrf.mxu0  ;;  %v18750_v58 = vpop.f32.mrf.mxu2 }
 0x994   :  { %21243 = vst [vmem:[#allocation70_spill] sm:$0xff] %v18744_v1  ;;  %v18746_v48 = vpop.f32.mrf.mxu1  ;;  %v8477_v1 = vadd.f32 %v18365_v40, %v18374_v19 }
 0x995   :  { %21244 = vst [vmem:[#allocation62_spill] sm:$0xff] %v18746_v48  ;;  %v18756_v4 = vpop.f32.mrf.mxu3  ;;  %v8481_v48 = vadd.f32 %v18385_v44, %v18401_v32 }
 0x996   :  { %21246 = vst [vmem:[#allocation72_spill] sm:$0xff] %v18750_v58  ;;  %v8485_v58 = vadd.f32 %v18415_v46, %v18467_v18 }
 0x997   :  { %21249 = vst [vmem:[#allocation71_spill] sm:$0xff] %v18756_v4 }
 0x99b   :  { %v18752_v21 = vpop.f32.mrf.mxu0  ;;  %v18758_v61 = vpop.f32.mrf.mxu2 }
 0x99c   :  { %21247 = vst [vmem:[#allocation68_spill] sm:$0xff] %v18752_v21  ;;  %v18754_v6 = vpop.f32.mrf.mxu1  ;;  %v8529_v21 = vadd.f32 %v18383_v59, %v8477_v1 }
 0x99d   :  { %21248 = vst [vmem:[#allocation75_spill] sm:$0xff] %v18754_v6  ;;  %v8534_v6 = vadd.f32 %v18413_v31, %v8481_v48  ;;  %v18772_v4 = vpop.f32.mrf.mxu3  ;;  %v10203_v31 = vld [vmem:[%s20366_s6 + $0x58] sm:$0xff] }
 0x99e   :  { %21250 = vst [vmem:[#allocation78_spill] sm:$0xff] %v18758_v61  ;;  %v8576_v40 = vadd.f32 %v18389_v45, %v8529_v21  ;;  %v18789_v46 = vand.u32 4294901760, %v10203_v31 }
 0x99f   :  { %v8582_v19 = vadd.f32 %v18427_v43, %v8534_v6 }
 0x9a0   :  { %v8642_v59 = vadd.f32 %v18565_v52, %v8576_v40  ;;  %v18795_v45 = vsub.f32 %v10203_v31, %v18789_v46  ;;  %10437 = vmatpush.msrb.mxu1 %v18789_v46  ;;  %10222 = vmatpush.msra.mxu2 %v18789_v46  ;;  %v10199_v40 = vld [vmem:[%s20366_s6 + $0x38] sm:$0xff] }
 0x9a1   :  { %v8646_v32 = vadd.f32 %v18586_v49, %v8582_v19 }
 0x9a2   :  { %v8684_v43 = vadd.f32 %v18547_v27, %v8642_v59  ;;  %10377 = vmatpush.msrb.mxu0 %v18795_v45 }
 0x9a3   :  { %v18760_v53 = vpop.f32.mrf.mxu0  ;;  %v18774_v61 = vpop.f32.mrf.mxu2 }
 0x9a4   :  { %21251 = vst [vmem:[#allocation74_spill] sm:$0xff] %v18760_v53  ;;  %v18762_v38 = vpop.f32.mrf.mxu1  ;;  %v8738_v48 = vadd.f32 %v18567_v30, %v8684_v43 }
 0x9a5   :  { %21252 = vst [vmem:[#allocation81_spill] sm:$0xff] %v18762_v38  ;;  %v8539_v38 = vadd.f32 %v18479_v25, %v8485_v58  ;;  %v18801_v52 = vpop.f32.mrf.mxu3  ;;  %v10202_v58 = vld [vmem:[%s20366_s6 + $0x50] sm:$0xff] }
 0x9a7   :  { %v8588_v44 = vadd.f32 %v18496_v11, %v8539_v38  ;;  %v8688_v11 = vadd.f32 %v18570_v62, %v8646_v32  ;;  %v18816_v62 = vand.u32 4294901760, %v10202_v58  ;;  %v10201_v38 = vld [vmem:[%s20366_s6 + $0x48] sm:$0xff]  ;;  %v18839_v32 = vand.u32 4294901760, %v10199_v40 }
 0x9a8   :  { %v18832_v59 = vand.u32 4294901760, %v10201_v38 }
 0x9a9   :  { %v8650_v18 = vadd.f32 %v18613_v23, %v8588_v44  ;;  %v20585_v23 = vand.u32 4294901760, %v18795_v45  ;;  %v8746_v1 = vadd.f32 %v18588_v33, %v8688_v11  ;;  %v18830_v44 = vsub.f32 %v10202_v58, %v18816_v62  ;;  %10439 = vmatpush.msrb.mxu1 %v18816_v62  ;;  %10224 = vmatpush.msra.mxu2 %v18816_v62 }
 0x9aa   :  { %v18845_v43 = vsub.f32 %v10201_v38, %v18832_v59  ;;  %v8828_v58 = vadd.f32 %v18573_v14, %v8738_v48  ;;  %v8762_v48 = vadd.f32 %v18636_v12, %v18644_v55 }
 0x9ab   :  { %v18776_v53 = vpop.f32.mrf.mxu0  ;;  %v18805_v21 = vpop.f32.mrf.mxu2  ;;  %v8692_v6 = vadd.f32 %v18593_v28, %v8650_v18  ;;  %v10285_v27 = vsub.f32 %v18795_v45, %v20585_v23  ;;  %v10200_v28 = vld [vmem:[%s20366_s6 + $0x40] sm:$0xff]  ;;  %v20586_v18 = vand.u32 4294901760, %v18830_v44  ;;  %10380 = vmatpush.msrb.mxu0 %v18830_v44  ;;  %10441 = vmatpush.msrb.mxu1 %v18832_v59 }
 0x9ac   :  { %v18779_v9 = vpop.f32.mrf.mxu1  ;;  %v18834_v30 = vand.u32 4294901760, %v10200_v28  ;;  %10226 = vmatpush.msra.mxu2 %v18832_v59 }
 0x9ad   :  { %v10286_v19 = vand.u32 4294901760, %v10285_v27  ;;  %v8754_v33 = vadd.f32 %v18615_v26, %v8692_v6  ;;  %v18855_v26 = vsub.f32 %v10199_v40, %v18839_v32  ;;  %v8832_v6 = vadd.f32 %v18595_v34, %v8746_v1  ;;  %10383 = vmatpush.msrb.mxu0 %v18845_v43  ;;  %v18870_v23 = vpop.f32.mrf.mxu3 }
 0x9ae   :  { %v18849_v11 = vsub.f32 %v10200_v28, %v18834_v30  ;;  %v10291_v38 = vsub.f32 %v18830_v44, %v20586_v18  ;;  %v20591_v28 = vand.u32 4294901760, %v18845_v43  ;;  %v8880_v40 = vadd.f32 %v18651_v37, %v8828_v58  ;;  %10443 = vmatpush.msrb.mxu1 %v18834_v30  ;;  %10228 = vmatpush.msra.mxu2 %v18834_v30 }
 0x9af   :  { %10287 = vmatpush.msra.mxu3 %v10286_v19  ;;  %v8836_v14 = vadd.f32 %v18622_v13, %v8754_v33  ;;  %v20587_v34 = vand.u32 4294901760, %v18855_v26  ;;  %v8885_v1 = vadd.f32 %v18662_v41, %v8832_v6  ;;  %v9201_v33 = vadd.f32 %v18682_v3, %v18687_v2 }
 0x9b0   :  { %v10292_v19 = vand.u32 4294901760, %v10291_v38  ;;  %v10297_v13 = vsub.f32 %v18845_v43, %v20591_v28  ;;  %v21253_v12 = vand.u32 4294901760, %v18849_v11  ;;  %10386 = vmatpush.msrb.mxu0 %v18849_v11  ;;  %10445 = vmatpush.msrb.mxu1 %v18839_v32  ;;  %v8840_v38 = vadd.f32 %v18642_v0, %v8762_v48  ;;  %v10198_v0 = vld [vmem:[%s20366_s6 + $0x30] sm:$0xff] }
 0x9b1   :  { %v8890_v37 = vadd.f32 %v18670_v39, %v8836_v14  ;;  %v10309_v41 = vsub.f32 %v18855_v26, %v20587_v34  ;;  %10230 = vmatpush.msra.mxu2 %v18839_v32  ;;  %v8927_v39 = vadd.f32 %v18638_v63, %v8880_v40  ;;  %v8933_v2 = vadd.f32 %v18655_v20, %v8885_v1  ;;  %v10196_v1 = vld [vmem:[%s20366_s6 + $0x20] sm:$0xff] }
 0x9b2   :  { %v10303_v55 = vsub.f32 %v18849_v11, %v21253_v12  ;;  %10293 = vmatpush.msra.mxu3 %v10292_v19  ;;  %v10298_v58 = vand.u32 4294901760, %v10297_v13  ;;  %10389 = vmatpush.msrb.mxu0 %v18855_v26  ;;  %v8895_v34 = vadd.f32 %v18678_v22, %v8840_v38  ;;  %v9253_v19 = vadd.f32 %v18689_v17, %v9201_v33 }
 0x9b3   :  { %v18792_v25 = vpop.f32.mrf.mxu0  ;;  %v18876_v18 = vpop.f32.mrf.mxu2  ;;  %v10310_v3 = vand.u32 4294901760, %v10309_v41  ;;  %v8939_v12 = vadd.f32 %v18666_v36, %v8890_v37  ;;  %v9205_v63 = vadd.f32 %v18691_v8, %v18697_v15  ;;  %v18909_v48 = vand.u32 4294901760, %v10198_v0  ;;  %v10197_v36 = vld [vmem:[%s20366_s6 + $0x28] sm:$0xff] }
 0x9b4   :  { %v18803_v49 = vpop.f32.mrf.mxu1  ;;  %v10304_v6 = vand.u32 4294901760, %v10303_v55  ;;  %10299 = vmatpush.msra.mxu3 %v10298_v58  ;;  %v9209_v20 = vadd.f32 %v18701_v54, %v18706_v56  ;;  %v18917_v22 = vadd.f32 %v18653_v47, %v8927_v39  ;;  %v18922_v40 = vand.u32 4294901760, %v10197_v36  ;;  %v21256_v58 = vld [vmem:[#allocation31_spill] sm:$0xff] }
 0x9b5   :  { %v18920_v17 = vsub.f32 %v10198_v0, %v18909_v48  ;;  %10447 = vmatpush.msrb.mxu1 %v18909_v48  ;;  %v18926_v8 = vadd.f32 %v18664_v50, %v8933_v2  ;;  %v18929_v15 = vadd.f32 %v18672_v7, %v8939_v12  ;;  %v18932_v54 = vadd.f32 %v18674_v51, %v8895_v34  ;;  %v18937_v56 = vpop.f32.mrf.mxu3  ;;  %v10195_v34 = vld [vmem:[%s20366_s6 + $0x18] sm:$0xff] }
 0x9b6   :  { %10305 = vmatpush.msra.mxu3 %v10304_v6  ;;  %v18935_v47 = vadd.f32 %v18693_v24, %v9253_v19  ;;  %21254 = vst [vmem:[#allocation77_spill] sm:$0xff] %v18937_v56  ;;  %10232 = vmatpush.msra.mxu2 %v18909_v48  ;;  %v9258_v50 = vadd.f32 %v18699_v29, %v9205_v63  ;;  %v18951_v24 = vand.u32 4294901760, %v10196_v1  ;;  %v18962_v41 = vand.u32 4294901760, %v10195_v34  ;;  %v10194_v19 = vld [vmem:[%s20366_s6 + $0x10] sm:$0xff] }
 0x9b7   :  { %v20590_v7 = vand.u32 4294901760, %v18920_v17  ;;  %v18948_v51 = vsub.f32 %v10197_v36, %v18922_v40  ;;  %10392 = vmatpush.msrb.mxu0 %v18920_v17  ;;  %10449 = vmatpush.msrb.mxu1 %v18922_v40  ;;  %v9263_v37 = vadd.f32 %v18708_v5, %v9209_v20  ;;  %v9578_v29 = vadd.f32 %v18728_v10, %v18724_v57 }
 0x9b8   :  { %10311 = vmatpush.msra.mxu3 %v10310_v3  ;;  %v9582_v33 = vadd.f32 %v18738_v35, %v18732_v42  ;;  %21255 = vst [vmem:[#allocation84_spill] sm:$0xff] %v18962_v41  ;;  %10234 = vmatpush.msra.mxu2 %v18922_v40  ;;  %v9213_v6 = vadd.f32 %v21256_v58, %v18714_v60  ;;  %v21257_v35 = vld [vmem:[#allocation65_spill] sm:$0xff]  ;;  %v21258_v42 = vld [vmem:[#allocation68_spill] sm:$0xff]  ;;  %v21259_v3 = vld [vmem:[#allocation74_spill] sm:$0xff]  ;;  %v18996_v36 = vand.u32 4294901760, %v10194_v19 }
 0x9b9   :  { %v10315_v39 = vsub.f32 %v18920_v17, %v20590_v7  ;;  %v20589_v5 = vand.u32 4294901760, %v18948_v51  ;;  %v18974_v10 = vsub.f32 %v10196_v1, %v18951_v24  ;;  %10395 = vmatpush.msrb.mxu0 %v18948_v51  ;;  %10451 = vmatpush.msrb.mxu1 %v18951_v24  ;;  %v9586_v57 = vadd.f32 %v21257_v35, %v18742_v16  ;;  %v21261_v1 = vld [vmem:[#allocation60_spill] sm:$0xff]  ;;  %v10193_v35 = vld [vmem:[%s20366_s6 + $0x8] sm:$0xff] }
 0x9ba   :  { %v9630_v60 = vadd.f32 %v21258_v42, %v9578_v29  ;;  %v9635_v2 = vadd.f32 %v21259_v3, %v9582_v33  ;;  %v18983_v12 = vsub.f32 %v10195_v34, %v18962_v41  ;;  %10236 = vmatpush.msra.mxu2 %v18951_v24  ;;  %21260 = vst [vmem:[#allocation80_spill] sm:$0xff] %v18996_v36  ;;  %v21262_v29 = vld [vmem:[#allocation61_spill] sm:$0xff] }
 0x9bb   :  { %v18841_v31 = vpop.f32.mrf.mxu0  ;;  %v18944_v55 = vpop.f32.mrf.mxu2  ;;  %v10316_v63 = vand.u32 4294901760, %v10315_v39  ;;  %v10321_v16 = vsub.f32 %v18948_v51, %v20589_v5  ;;  %v20588_v20 = vand.u32 4294901760, %v18974_v10  ;;  %10398 = vmatpush.msrb.mxu0 %v18974_v10  ;;  %10453 = vmatpush.msrb.mxu1 %v18962_v41  ;;  %v9306_v34 = vadd.f32 %v21261_v1, %v9258_v50 }
 0x9bc   :  { %v18852_v27 = vpop.f32.mrf.mxu1  ;;  %v9312_v33 = vadd.f32 %v21262_v29, %v9263_v37  ;;  %v9640_v58 = vadd.f32 %v18776_v53, %v9586_v57  ;;  %v20592_v39 = vand.u32 4294901760, %v18983_v12  ;;  %10238 = vmatpush.msra.mxu2 %v18962_v41  ;;  %v19011_v50 = vsub.f32 %v10194_v19, %v18996_v36  ;;  %v10192_v37 = vld [vmem:[%s20366_s6] sm:$0xff]  ;;  %v21266_v29 = vld [vmem:[#allocation62_spill] sm:$0xff]  ;;  %v21267_v19 = vld [vmem:[#allocation75_spill] sm:$0xff] }
 0x9bd   :  { %10317 = vmatpush.msra.mxu3 %v10316_v63  ;;  %v10322_v42 = vand.u32 4294901760, %v10321_v16  ;;  %v10327_v3 = vsub.f32 %v18974_v10, %v20588_v20  ;;  %10401 = vmatpush.msrb.mxu0 %v18983_v12  ;;  %v19014_v53 = vand.u32 4294901760, %v10193_v35  ;;  %v21265_v57 = vld [vmem:[#allocation48_spill] sm:$0xff]  ;;  %v9677_v63 = vadd.f32 %v21266_v29, %v9630_v60  ;;  %v21268_v60 = vld [vmem:[#allocation81_spill] sm:$0xff] }
 0x9be   :  { %21263 = vst [vmem:[#allocation87_spill] sm:$0xff] %v19011_v50  ;;  %v9268_v1 = vadd.f32 %v21265_v57, %v9213_v6  ;;  %v10333_v16 = vsub.f32 %v18983_v12, %v20592_v39  ;;  %v19024_v20 = vand.u32 4294901760, %v10192_v37  ;;  %10455 = vmatpush.msrb.mxu1 %v18996_v36  ;;  %10240 = vmatpush.msra.mxu2 %v18996_v36  ;;  %v10053_v39 = vpop.f32.mrf.mxu3  ;;  %v21274_v41 = vld [vmem:[#allocation72_spill] sm:$0xff] }
 0x9bf   :  { %21264 = vst [vmem:[#allocation83_spill] sm:$0xff] %v19014_v53  ;;  %v9683_v5 = vadd.f32 %v21267_v19, %v9635_v2  ;;  %10323 = vmatpush.msra.mxu3 %v10322_v42  ;;  %v10328_v7 = vand.u32 4294901760, %v10327_v3  ;;  %v19031_v6 = vsub.f32 %v10193_v35, %v19014_v53  ;;  %10404 = vmatpush.msrb.mxu0 %v19011_v50  ;;  %v21269_v2 = vld [vmem:[#allocation64_spill] sm:$0xff]  ;;  %v21270_v42 = vld [vmem:[#allocation66_spill] sm:$0xff] }
 0x9c0   :  { %v9689_v57 = vadd.f32 %v21268_v60, %v9640_v58  ;;  %v9955_v29 = vadd.f32 %v18803_v49, %v18841_v31  ;;  %v10334_v56 = vand.u32 4294901760, %v10333_v16  ;;  %v19038_v36 = vsub.f32 %v10192_v37, %v19024_v20  ;;  %10457 = vmatpush.msrb.mxu1 %v19014_v53  ;;  %10242 = vmatpush.msra.mxu2 %v19014_v53  ;;  %v21272_v37 = vld [vmem:[#allocation55_spill] sm:$0xff] }
 0x9c1   :  { %v9366_v35 = vadd.f32 %v21269_v2, %v18935_v47  ;;  %v9370_v3 = vadd.f32 %v21270_v42, %v9306_v34  ;;  %10329 = vmatpush.msra.mxu3 %v10328_v7  ;;  %v21271_v49 = vand.u32 4294901760, %v19011_v50  ;;  %10407 = vmatpush.msrb.mxu0 %v19031_v6  ;;  %v9318_v16 = vadd.f32 %v21272_v37, %v9268_v1  ;;  %v21273_v60 = vld [vmem:[#allocation67_spill] sm:$0xff]  ;;  %v21276_v7 = vld [vmem:[#allocation78_spill] sm:$0xff] }
 0x9c2   :  { %v9374_v53 = vadd.f32 %v21273_v60, %v9312_v33  ;;  %v21275_v47 = vld [vmem:[#allocation71_spill] sm:$0xff]  ;;  %v10350_v34 = vand.u32 4294901760, %v19038_v36  ;;  %10459 = vmatpush.msrb.mxu1 %v19024_v20  ;;  %10244 = vmatpush.msra.mxu2 %v19024_v20  ;;  %v9743_v42 = vadd.f32 %v21276_v7, %v9677_v63  ;;  %v10007_v37 = vadd.f32 %v18944_v55, %v9955_v29 }
 0x9c3   :  { %v18896_v14 = vpop.f32.mrf.mxu0  ;;  %v10011_v19 = vpop.f32.mrf.mxu2  ;;  %v10339_v31 = vsub.f32 %v19011_v50, %v21271_v49  ;;  %v9590_v2 = vadd.f32 %v21275_v47, %v21274_v41  ;;  %v9747_v49 = vadd.f32 %v18774_v61, %v9683_v5  ;;  %10335 = vmatpush.msra.mxu3 %v10334_v56  ;;  %v21277_v50 = vand.u32 4294901760, %v19031_v6  ;;  %10410 = vmatpush.msrb.mxu0 %v19038_v36  ;;  %v21279_v56 = vld [vmem:[#allocation63_spill] sm:$0xff] }
 0x9c4   :  { %v18902_v13 = vpop.f32.mrf.mxu1  ;;  %v9751_v41 = vadd.f32 %v18805_v21, %v9689_v57  ;;  %v10351_v63 = vsub.f32 %v19038_v36, %v10350_v34  ;;  %v21278_v61 = vand.u32 4294901760, %v18795_v45  ;;  %v9408_v5 = vadd.f32 %v21279_v56, %v9366_v35  ;;  %v21282_v57 = vld [vmem:[#allocation17_spill] sm:$0xff]  ;;  %v21285_v35 = vld [vmem:[#allocation59_spill] sm:$0xff]  ;;  %v21286_v56 = vld [vmem:[#allocation70_spill] sm:$0xff] }
 0x9c5   :  { %v10340_v58 = vand.u32 4294901760, %v10339_v31  ;;  %v10345_v1 = vsub.f32 %v19031_v6, %v21277_v50  ;;  %v9645_v33 = vadd.f32 %v18792_v25, %v9590_v2  ;;  %v21280_v31 = vld [vmem:[#allocation13_spill] sm:$0xff]  ;;  %v9959_v50 = vadd.f32 %v18852_v27, %v18896_v14 }
 0x9c6   :  { %10492 = vmatpush.msrb.mxu2 %v21278_v61  ;;  %v9412_v60 = vadd.f32 %v21280_v31, %v9370_v3  ;;  %v21281_v25 = vld [vmem:[#allocation101_spill] sm:$0xff]  ;;  %v9039_v29 = vadd.f32 %v21282_v57, %v18926_v8  ;;  %v10352_v45 = vand.u32 4294901760, %v10351_v63  ;;  %v21284_v61 = vand.u32 4294901760, %v18830_v44 }
 0x9c7   :  { %10341 = vmatpush.msra.mxu3 %v10340_v58  ;;  %v10346_v21 = vand.u32 4294901760, %v10345_v1  ;;  %v9035_v55 = vadd.f32 %v21281_v25, %v18917_v22  ;;  %v21283_v2 = vld [vmem:[#allocation29_spill] sm:$0xff]  ;;  %v9005_v3 = vadd.f32 %v21285_v35, %v18932_v54  ;;  %v9378_v27 = vadd.f32 %v21286_v56, %v9318_v16  ;;  %v21287_v22 = vld [vmem:[#allocation16_spill] sm:$0xff] }
 0x9c8   :  { %v9416_v7 = vadd.f32 %v21283_v2, %v9374_v53  ;;  %10496 = vmatpush.msrb.mxu2 %v21284_v61  ;;  %v9785_v14 = vadd.f32 %v18772_v4, %v9743_v42  ;;  %v9789_v58 = vadd.f32 %v18801_v52, %v9747_v49  ;;  %v9043_v1 = vadd.f32 %v21287_v22, %v18929_v15  ;;  %v10059_v42 = vpop.f32.mrf.mxu3  ;;  %v12752_v2 = vld [vmem:[%s20366_s6 + $0x90] sm:$0xff] }
 0x9c9   :  { %10347 = vmatpush.msra.mxu3 %v10346_v21  ;;  %v9793_v8 = vadd.f32 %v18870_v23, %v9751_v41  ;;  %v9695_v53 = vadd.f32 %v18779_v9, %v9645_v33  ;;  %v10054_v63 = vadd.f32 %v10053_v39, %v10007_v37  ;;  %v21288_v44 = vand.u32 4294901760, %v18845_v43  ;;  %v21290_v9 = vld [vmem:[#allocation46_spill] sm:$0xff]  ;;  %v21291_v43 = vld [vmem:[#allocation56_spill] sm:$0xff] }
 0x9ca   :  { %v9422_v31 = vadd.f32 %v9408_v5, %v9035_v55  ;;  %v9423_v54 = vadd.f32 %v9412_v60, %v9039_v29  ;;  %v10012_v25 = vadd.f32 %v10011_v19, %v9959_v50  ;;  %v9424_v52 = vadd.f32 %v9416_v7, %v9043_v1  ;;  %v12756_v21 = vld [vmem:[%s20366_s6 + $0xb0] sm:$0xff]  ;;  %v12753_v29 = vld [vmem:[%s20366_s6 + $0x98] sm:$0xff]  ;;  %v12751_v7 = vld [vmem:[%s20366_s6 + $0x88] sm:$0xff] }
 0x9cb   :  { %v18967_v38 = vpop.f32.mrf.mxu0  ;;  %10500 = vmatpush.msrb.mxu2 %v21288_v44  ;;  %10353 = vmatpush.msra.mxu3 %v10352_v45  ;;  %v21289_v23 = vand.u32 4294901760, %v18849_v11  ;;  %v19101_v15 = vadd.f32 %v21290_v9, %v9005_v3  ;;  %v19104_v39 = vadd.f32 %v21291_v43, %v9378_v27  ;;  %v19111_v33 = vadd.f32 %v18876_v18, %v9695_v53  ;;  %v12757_v11 = vld [vmem:[%s20366_s6 + $0xb8] sm:$0xff]  ;;  %v12750_v27 = vld [vmem:[%s20366_s6 + $0x80] sm:$0xff] }
 0x9cc   :  { %v18989_v0 = vpop.f32.mrf.mxu1  ;;  %v9963_v4 = vadd.f32 %v18902_v13, %v18967_v38  ;;  %v9799_v19 = vadd.f32 %v9785_v14, %v9422_v31  ;;  %v19106_v41 = vadd.f32 %v9789_v58, %v9423_v54  ;;  %v10016_v13 = vpop.f32.mrf.mxu2  ;;  %v19108_v38 = vadd.f32 %v9793_v8, %v9424_v52 }
 0x9cd   :  { %10559 = vmatpush.msrb.mxu3 %v18789_v46  ;;  %10504 = vmatpush.msrb.mxu2 %v21289_v23  ;;  %v19116_v46 = vld [vmem:[%s20365_s5] ss:$0 sm:$0xff]  ;;  %v21292_v5 = vand.u32 4294901760, %v18855_v26  ;;  %v10060_v60 = vadd.f32 %v10059_v42, %v10012_v25  ;;  %v19138_v57 = vand.u32 4294901760, %v12756_v21  ;;  %v19159_v35 = vand.u32 4294901760, %v12753_v29 }
 0x9ce   :  { %v10017_v50 = vadd.f32 %v10016_v13, %v9963_v4  ;;  %v12754_v26 = vld [vmem:[%s20366_s6 + $0xa0] sm:$0xff]  ;;  %v19161_v3 = vand.u32 4294901760, %v12752_v2  ;;  %v19163_v56 = vand.u32 4294901760, %v12751_v7  ;;  %v21294_v44 = vand.u32 4294901760, %v18948_v51 }
 0x9cf   :  { %10561 = vmatpush.msrb.mxu3 %v18816_v62  ;;  %10508 = vmatpush.msrb.mxu2 %v21292_v5  ;;  %v12755_v62 = vld [vmem:[%s20366_s6 + $0xa8] sm:$0xff]  ;;  %v19182_v53 = vsub.f32 %v12753_v29, %v19159_v35 }
 0x9d0   :  { %v10065_v23 = vpop.f32.mrf.mxu3  ;;  %v12747_v29 = vld [vmem:[%s20366_s6 + $0x68] sm:$0xff] }
 0x9d1   :  { %10563 = vmatpush.msrb.mxu3 %v18832_v59  ;;  %v21293_v59 = vand.u32 4294901760, %v18920_v17  ;;  %v19171_v17 = vsub.f32 %v12756_v21, %v19138_v57  ;;  %v10703_v42 = vand.u32 4294901760, %v19182_v53  ;;  %v10066_v13 = vadd.f32 %v10065_v23, %v10017_v50  ;;  %v21297_v23 = vld [vmem:[#allocation84_spill] sm:$0xff] }
 0x9d2   :  { %v21296_v21 = vand.u32 4294901760, %v18983_v12 }
 0x9d3   :  { %v19045_v28 = vpop.f32.mrf.mxu0  ;;  %10512 = vmatpush.msrb.mxu2 %v21293_v59  ;;  %10565 = vmatpush.msrb.mxu3 %v18834_v30  ;;  %v19187_v30 = vand.u32 4294901760, %v12750_v27  ;;  %v10685_v25 = vand.u32 4294901760, %v19171_v17 }
 0x9d4   :  { %v10161_v47 = vpop.f32.mrf.mxu1  ;;  %v9967_v18 = vadd.f32 %v18989_v0, %v19045_v28  ;;  %v19140_v28 = vand.u32 4294901760, %v12755_v62  ;;  %v19142_v0 = vand.u32 4294901760, %v12754_v26 }
 0x9d5   :  { %10516 = vmatpush.msrb.mxu2 %v21294_v44  ;;  %10567 = vmatpush.msrb.mxu3 %v18839_v32  ;;  %v10686_v43 = vsub.f32 %v19171_v17, %v10685_v25 }
 0x9d6   :  { %v19174_v58 = vsub.f32 %v12755_v62, %v19140_v28  ;;  %v19177_v22 = vsub.f32 %v12754_v26, %v19142_v0  ;;  %v10704_v26 = vsub.f32 %v19182_v53, %v10703_v42 }
 0x9d7   :  { %10569 = vmatpush.msrb.mxu3 %v18909_v48  ;;  %v10687_v50 = vand.u32 4294901760, %v10686_v43 }
 0x9d8   :  { %v10691_v4 = vand.u32 4294901760, %v19174_v58  ;;  %v10697_v52 = vand.u32 4294901760, %v19177_v22 }
 0x9d9   :  { %10571 = vmatpush.msrb.mxu3 %v18922_v40 }
 0x9da   :  { %v10698_v5 = vsub.f32 %v19177_v22, %v10697_v52 }
 0x9db   :  { %v10119_v16 = vpop.f32.mrf.mxu0  ;;  %10573 = vmatpush.msrb.mxu3 %v18951_v24 }
 0x9dc   :  { %v10120_v49 = vadd.f32 %v10119_v16, %v10054_v63  ;;  %v10165_v45 = vpop.f32.mrf.mxu1  ;;  %v19185_v63 = vsub.f32 %v12752_v2, %v19161_v3  ;;  %v10699_v59 = vand.u32 4294901760, %v10698_v5 }
 0x9dd   :  { %10575 = vmatpush.msrb.mxu3 %v21297_v23  ;;  %v21301_v23 = vld [vmem:[#allocation80_spill] sm:$0xff] }
 0x9de   :  { %v10162_v37 = vadd.f32 %v10161_v47, %v10120_v49  ;;  %v19126_v47 = vand.u32 4294901760, %v12757_v11  ;;  %v10709_v51 = vand.u32 4294901760, %v19185_v63  ;;  %v21295_v49 = vand.u32 4294901760, %v18974_v10 }
 0x9df   :  { %10577 = vmatpush.msrb.mxu3 %v21301_v23 }
 0x9e0   :  { %v10176_v55 = vadd.f32 %v10162_v37, %v9799_v19  ;;  %10617 = vmatpush.msra.mxu0 %v19126_v47  ;;  %v19157_v61 = vsub.f32 %v12757_v11, %v19126_v47  ;;  %10520 = vmatpush.msrb.mxu2 %v21295_v49  ;;  %v10692_v19 = vsub.f32 %v19174_v58, %v10691_v4  ;;  %v10021_v37 = vpop.f32.mrf.mxu2 }
 0x9e1   :  { %v10022_v62 = vadd.f32 %v10021_v37, %v9967_v18  ;;  %v19240_v40 = vsub.f32 %v19185_v63, %v10709_v51  ;;  %v19243_v18 = vsub.f32 %v12751_v7, %v19163_v56 }
 0x9e2   :  { %v10184_v14 = vadd.f32 %v19116_v46, %v10176_v55  ;;  %10619 = vmatpush.msra.mxu0 %v19138_v57  ;;  %v10679_v8 = vand.u32 4294901760, %v19157_v61  ;;  %10524 = vmatpush.msrb.mxu2 %v21296_v21  ;;  %v12748_v55 = vld [vmem:[%s20366_s6 + $0x70] sm:$0xff] }
 0x9e3   :  { %v10123_v1 = vpop.f32.mrf.mxu0  ;;  %v19261_v24 = vand.u32 4294901760, %v12748_v55 }
 0x9e4   :  { %v10188_v31 = vmax.f32 %v10184_v14, 0.0  ;;  %v10124_v54 = vadd.f32 %v10123_v1, %v10060_v60  ;;  %v10680_v16 = vsub.f32 %v19157_v61, %v10679_v8  ;;  %10621 = vmatpush.msra.mxu0 %v19140_v28  ;;  %v12749_v60 = vld [vmem:[%s20366_s6 + $0x78] sm:$0xff]  ;;  %v19251_v14 = vsub.f32 %v12750_v27, %v19187_v30  ;;  %v12746_v1 = vld [vmem:[%s20366_s6 + $0x60] sm:$0xff]  ;;  %v10169_v44 = vpop.f32.mrf.mxu1 }
 0x9e5   :  { %v19275_v37 = vsub.f32 %v12748_v55, %v19261_v24 }
 0x9e6   :  { %v10206_v32 = vsel %vm10204_vm7, %v10188_v31, 0  ;;  %v10166_v9 = vadd.f32 %v10165_v45, %v10124_v54  ;;  %v10681_v10 = vand.u32 4294901760, %v10680_v16  ;;  %10623 = vmatpush.msra.mxu0 %v19142_v0  ;;  %v19248_v45 = vand.u32 4294901760, %v12749_v60 }
 0x9e7   :  { %v19211_v11 = vand.u32 4294901760, %v10206_v32  ;;  %v10715_v54 = vand.u32 4294901760, %v19243_v18  ;;  %v19263_v16 = vand.u32 4294901760, %v12747_v29 }
 0x9e8   :  { %v10177_v48 = vadd.f32 %v10166_v9, %v19106_v41  ;;  %10682 = vmatpush.msra.mxu1 %v10681_v10  ;;  %v10693_v41 = vand.u32 4294901760, %v10692_v19  ;;  %10625 = vmatpush.msra.mxu0 %v19159_v35  ;;  %v19269_v9 = vsub.f32 %v12749_v60, %v19248_v45  ;;  %v10705_v19 = vand.u32 4294901760, %v10704_v26  ;;  %v21300_v26 = vld [vmem:[#allocation77_spill] sm:$0xff] }
 0x9e9   :  { %v19234_v12 = vsub.f32 %v10206_v32, %v19211_v11  ;;  %10355 = vmatmul.f32.vlgmr.msra.gmra.mxu3 %v19211_v11  ;;  %v10721_v32 = vand.u32 4294901760, %v19251_v14  ;;  %v19277_v10 = vand.u32 4294901760, %v12746_v1  ;;  %v10716_v60 = vsub.f32 %v19243_v18, %v10715_v54 }
 0x9ea   :  { %v10185_v2 = vadd.f32 %v19116_v46, %v10177_v48  ;;  %10688 = vmatpush.msra.mxu1 %v10687_v50  ;;  %10627 = vmatpush.msra.mxu0 %v19161_v3  ;;  %v10727_v50 = vand.u32 4294901760, %v19269_v9  ;;  %v9797_v55 = vadd.f32 %v21300_v26, %v19111_v33  ;;  %v10733_v33 = vand.u32 4294901760, %v19275_v37 }
 0x9eb   :  { %v10127_v31 = vpop.f32.mrf.mxu0  ;;  %10413 = vmatmul.f32.vlgmr.msrb.gmra.mxu0 %v19234_v12  ;;  %v19258_v7 = vand.u32 4294901760, %v19234_v12 }
 0x9ec   :  { %v10189_v27 = vmax.f32 %v10185_v2, 0.0  ;;  %v10128_v49 = vadd.f32 %v10127_v31, %v10066_v13  ;;  %v21298_v13 = vld [vmem:[#allocation87_spill] sm:$0xff]  ;;  %10694 = vmatpush.msra.mxu1 %v10693_v41  ;;  %10629 = vmatpush.msra.mxu0 %v19163_v56  ;;  %v10722_v41 = vsub.f32 %v19251_v14, %v10721_v32 }
 0x9ed   :  { %10463 = vmatmul.f32.vlgmr.msrb.gmra.mxu1 %v19258_v7  ;;  %v10248_v43 = vsub.f32 %v19234_v12, %v19258_v7  ;;  %v21299_v5 = vand.u32 4294901760, %v21298_v13  ;;  %v10711_v13 = vand.u32 4294901760, %v19240_v40 }
 0x9ee   :  { %v10209_v21 = vsel %vm10204_vm7, %v10189_v27, 0  ;;  %v10170_v48 = vadd.f32 %v10169_v44, %v10128_v49  ;;  %v21302_v44 = vand.u32 4294901760, %v19031_v6  ;;  %v10071_v27 = vpop.f32.mrf.mxu3  ;;  %10700 = vmatpush.msra.mxu1 %v10699_v59  ;;  %10631 = vmatpush.msra.mxu0 %v19187_v30  ;;  %v10717_v59 = vand.u32 4294901760, %v10716_v60 }
 0x9ef   :  { %10528 = vmatpush.msrb.mxu2 %v21299_v5  ;;  %v19289_v2 = vand.u32 4294901760, %v10209_v21  ;;  %v19291_v31 = vand.u32 4294901760, %v10248_v43  ;;  %v19304_v43 = vsub.f32 %v12747_v29, %v19263_v16  ;;  %v10072_v5 = vadd.f32 %v10071_v27, %v10022_v62  ;;  %v10173_v27 = vpop.f32.mrf.mxu1 }
 0x9f0   :  { %v10178_v49 = vadd.f32 %v10170_v48, %v19108_v38  ;;  %v19312_v38 = vsub.f32 %v12746_v1, %v19277_v10  ;;  %10706 = vmatpush.msra.mxu1 %v10705_v19  ;;  %10633 = vmatpush.msra.mxu0 %v19248_v45  ;;  %v10728_v62 = vsub.f32 %v19269_v9, %v10727_v50  ;;  %v10723_v26 = vand.u32 4294901760, %v10722_v41  ;;  %v21303_v19 = vld [vmem:[#allocation83_spill] sm:$0xff] }
 0x9f1   :  { %10532 = vmatpush.msrb.mxu2 %v21302_v44  ;;  %10359 = vmatmul.f32.gmra.mxu3 %v19289_v2  ;;  %v19309_v6 = vsub.f32 %v10209_v21, %v19289_v2  ;;  %v10739_v29 = vand.u32 4294901760, %v19304_v43  ;;  %v9425_v48 = vadd.f32 %v19104_v39, %v19101_v15  ;;  %v10734_v44 = vsub.f32 %v19275_v37, %v10733_v33 }
 0x9f2   :  { %10250 = vmatmul.f32.vlgmr.msra.gmra.mxu2 %v19291_v31  ;;  %v10186_v40 = vadd.f32 %v19116_v46, %v10178_v49  ;;  %10579 = vmatpush.msrb.mxu3 %v21303_v19  ;;  %v10745_v15 = vand.u32 4294901760, %v19312_v38 }
 0x9f3   :  { %v10131_v21 = vpop.f32.mrf.mxu0  ;;  %10418 = vmatmul.f32.gmra.mxu0 %v19309_v6  ;;  %v19324_v1 = vand.u32 4294901760, %v19309_v6  ;;  %10712 = vmatpush.msra.mxu1 %v10711_v13  ;;  %v9802_v39 = vadd.f32 %v9797_v55, %v9425_v48 }
 0x9f4   :  { %v10190_v60 = vmax.f32 %v10186_v40, 0.0  ;;  %v10132_v23 = vadd.f32 %v10131_v21, %v10072_v5  ;;  %10635 = vmatpush.msra.mxu0 %v19261_v24  ;;  %10581 = vmatpush.msrb.mxu3 %v19024_v20  ;;  %v10729_v5 = vand.u32 4294901760, %v10728_v62  ;;  %v10740_v40 = vsub.f32 %v19304_v43, %v10739_v29 }
 0x9f5   :  { %10469 = vmatmul.f32.gmra.mxu1 %v19324_v1  ;;  %v10256_v41 = vsub.f32 %v19309_v6, %v19324_v1  ;;  %10536 = vmatpush.msrb.mxu2 %v10350_v34  ;;  %v10735_v21 = vand.u32 4294901760, %v10734_v44 }
 0x9f6   :  { %v10212_v49 = vsel %vm10204_vm7, %v10190_v60, 0  ;;  %v10174_v13 = vadd.f32 %v10173_v27, %v10132_v23  ;;  %10718 = vmatpush.msra.mxu1 %v10717_v59  ;;  %10637 = vmatpush.msra.mxu0 %v19263_v16  ;;  %v10746_v59 = vsub.f32 %v19312_v38, %v10745_v15  ;;  %v10741_v34 = vand.u32 4294901760, %v10740_v40 }
 0x9f7   :  { %v19341_v55 = vand.u32 4294901760, %v10212_v49  ;;  %v19343_v48 = vand.u32 4294901760, %v10256_v41  ;;  %10832 = vmatpush.msra.mxu3 %v19126_v47  ;;  %10772 = vmatpush.msra.mxu2 %v19157_v61 }
 0x9f8   :  { %v10179_v20 = vadd.f32 %v10174_v13, %v9802_v39  ;;  %10724 = vmatpush.msra.mxu1 %v10723_v26  ;;  %10639 = vmatpush.msra.mxu0 %v19277_v10  ;;  %v10747_v60 = vand.u32 4294901760, %v10746_v59 }
 0x9f9   :  { %10363 = vmatmul.f32.gmra.mxu3 %v19341_v55  ;;  %v19355_v62 = vsub.f32 %v10212_v49, %v19341_v55  ;;  %10775 = vmatpush.msra.mxu2 %v19171_v17 }
 0x9fa   :  { %10258 = vmatmul.f32.gmra.mxu2 %v19343_v48  ;;  %v10187_v36 = vadd.f32 %v19116_v46, %v10179_v20  ;;  %10730 = vmatpush.msra.mxu1 %v10729_v5 }
 0x9fb   :  { %10834 = vmatpush.msra.mxu3 %v19138_v57  ;;  %10423 = vmatmul.f32.gmra.mxu0 %v19355_v62  ;;  %v19361_v26 = vand.u32 4294901760, %v19355_v62 }
 0x9fc   :  { %v10191_v19 = vmax.f32 %v10187_v36, 0.0  ;;  %10736 = vmatpush.msra.mxu1 %v10735_v21  ;;  %10887 = vmatpush.msrb.mxu0 %v10679_v8 }
 0x9fd   :  { %10475 = vmatmul.f32.gmra.mxu1 %v19361_v26  ;;  %v10264_v46 = vsub.f32 %v19355_v62, %v19361_v26  ;;  %10836 = vmatpush.msra.mxu3 %v19140_v28 }
 0x9fe   :  { %v10215_v23 = vsel %vm10204_vm7, %v10191_v19, 0  ;;  %10742 = vmatpush.msra.mxu1 %v10741_v34  ;;  %10891 = vmatpush.msrb.mxu0 %v10685_v25  ;;  %v11041_v19 = vld [vmem:[#allocation7 + $0x28] sm:$0xff] }
 0x9ff   :  { %v19373_v44 = vand.u32 4294901760, %v10215_v23  ;;  %v10265_v39 = vand.u32 4294901760, %v10264_v46  ;;  %10838 = vmatpush.msra.mxu3 %v19142_v0  ;;  %10778 = vmatpush.msra.mxu2 %v19174_v58 }
 0xa00   :  { %10748 = vmatpush.msra.mxu1 %v10747_v60  ;;  %10895 = vmatpush.msrb.mxu0 %v10691_v4  ;;  %v11079_v60 = vld [vmem:[#allocation7 + $0x50] sm:$0xff] }
 0xa01   :  { %10367 = vmatmul.f32.gmra.mxu3 %v19373_v44  ;;  %v19381_v61 = vsub.f32 %v10215_v23, %v19373_v44  ;;  %10781 = vmatpush.msra.mxu2 %v19177_v22 }
 0xa02   :  { %10266 = vmatmul.f32.gmra.mxu2 %v10265_v39  ;;  %10954 = vmatpush.msrb.mxu1 %v19126_v47 }
 0xa03   :  { %10840 = vmatpush.msra.mxu3 %v19159_v35  ;;  %10428 = vmatmul.f32.gmra.mxu0 %v19381_v61  ;;  %v19387_v8 = vand.u32 4294901760, %v19381_v61 }
 0xa04   :  { %10956 = vmatpush.msrb.mxu1 %v19138_v57  ;;  %10899 = vmatpush.msrb.mxu0 %v10697_v52 }
 0xa05   :  { %10481 = vmatmul.f32.gmra.mxu1 %v19387_v8  ;;  %v10272_v17 = vsub.f32 %v19381_v61, %v19387_v8  ;;  %10842 = vmatpush.msra.mxu3 %v19161_v3 }
 0xa06   :  { %10958 = vmatpush.msrb.mxu1 %v19140_v28  ;;  %10903 = vmatpush.msrb.mxu0 %v10703_v42 }
 0xa07   :  { %v10273_v47 = vand.u32 4294901760, %v10272_v17  ;;  %10844 = vmatpush.msra.mxu3 %v19163_v56  ;;  %10784 = vmatpush.msra.mxu2 %v19182_v53  ;;  %v11039_v17 = vld [vmem:[#allocation7 + $0x18] sm:$0xff] }
 0xa08   :  { %10960 = vmatpush.msrb.mxu1 %v19142_v0  ;;  %10907 = vmatpush.msrb.mxu0 %v10709_v51 }
 0xa09   :  { %10583 = vmatmul.f32.vlgmr.msrb.gmra.mxu3 %v19211_v11  ;;  %10787 = vmatpush.msra.mxu2 %v19185_v63 }
 0xa0a   :  { %10274 = vmatmul.f32.gmra.mxu2 %v10273_v47  ;;  %10962 = vmatpush.msrb.mxu1 %v19159_v35 }
 0xa0b   :  { %10846 = vmatpush.msra.mxu3 %v19187_v30  ;;  %10645 = vmatmul.f32.vlgmr.msra.gmra.mxu0 %v19291_v31 }
 0xa0c   :  { %10911 = vmatpush.msrb.mxu0 %v10715_v54  ;;  %10964 = vmatpush.msrb.mxu1 %v19161_v3 }
 0xa0d   :  { %10750 = vmatmul.f32.vlgmr.msra.gmra.mxu1 %v19211_v11  ;;  %10848 = vmatpush.msra.mxu3 %v19248_v45 }
 0xa0e   :  { %10915 = vmatpush.msrb.mxu0 %v10721_v32  ;;  %10966 = vmatpush.msrb.mxu1 %v19163_v56 }
 0xa0f   :  { %10850 = vmatpush.msra.mxu3 %v19261_v24  ;;  %10790 = vmatpush.msra.mxu2 %v19243_v18 }
 0xa10   :  { %10919 = vmatpush.msrb.mxu0 %v10727_v50  ;;  %10968 = vmatpush.msrb.mxu1 %v19187_v30 }
 0xa11   :  { %10587 = vmatmul.f32.gmra.mxu3 %v19289_v2  ;;  %10793 = vmatpush.msra.mxu2 %v19251_v14 }
 0xa12   :  { %10538 = vmatmul.f32.vlgmr.msrb.gmra.mxu2 %v19211_v11  ;;  %10852 = vmatpush.msra.mxu3 %v19263_v16 }
 0xa13   :  { %10653 = vmatmul.f32.gmra.mxu0 %v19343_v48  ;;  %10970 = vmatpush.msrb.mxu1 %v19248_v45 }
 0xa14   :  { %10923 = vmatpush.msrb.mxu0 %v10733_v33  ;;  %10854 = vmatpush.msra.mxu3 %v19277_v10 }
 0xa15   :  { %10754 = vmatmul.f32.gmra.mxu1 %v19289_v2  ;;  %10796 = vmatpush.msra.mxu2 %v19269_v9 }
 0xa16   :  { %10927 = vmatpush.msrb.mxu0 %v10739_v29  ;;  %10972 = vmatpush.msrb.mxu1 %v19261_v24 }
 0xa17   :  { %10799 = vmatpush.msra.mxu2 %v19275_v37 }
 0xa18   :  { %10931 = vmatpush.msrb.mxu0 %v10745_v15  ;;  %10974 = vmatpush.msrb.mxu1 %v19263_v16 }
 0xa19   :  { %10591 = vmatmul.f32.gmra.mxu3 %v19341_v55  ;;  %10802 = vmatpush.msra.mxu2 %v19304_v43 }
 0xa1a   :  { %10542 = vmatmul.f32.gmra.mxu2 %v19289_v2  ;;  %10976 = vmatpush.msrb.mxu1 %v19277_v10 }
 0xa1b   :  { %10661 = vmatmul.f32.gmra.mxu0 %v10265_v39  ;;  %10805 = vmatpush.msra.mxu2 %v19312_v38  ;;  %v19498_v39 = vand.u32 4294901760, %v11079_v60 }
 0xa1d   :  { %10758 = vmatmul.f32.gmra.mxu1 %v19341_v55 }
 0xa21   :  { %10595 = vmatmul.f32.gmra.mxu3 %v19373_v44 }
 0xa22   :  { %10546 = vmatmul.f32.gmra.mxu2 %v19341_v55 }
 0xa23   :  { %10669 = vmatmul.f32.gmra.mxu0 %v10273_v47 }
 0xa25   :  { %10762 = vmatmul.f32.gmra.mxu1 %v19373_v44 }
 0xa29   :  { %10858 = vmatmul.f32.vlgmr.msra.gmra.mxu3 %v19258_v7 }
 0xa2a   :  { %10550 = vmatmul.f32.gmra.mxu2 %v19373_v44 }
 0xa2b   :  { %10933 = vmatmul.f32.vlgmr.msrb.gmra.mxu0 %v19211_v11 }
 0xa2d   :  { %10978 = vmatmul.f32.vlgmr.msrb.gmra.mxu1 %v19211_v11 }
 0xa31   :  { %10864 = vmatmul.f32.gmra.mxu3 %v19324_v1 }
 0xa32   :  { %10808 = vmatmul.f32.vlgmr.msra.gmra.mxu2 %v19234_v12 }
 0xa33   :  { %10937 = vmatmul.f32.gmra.mxu0 %v19289_v2 }
 0xa35   :  { %10982 = vmatmul.f32.gmra.mxu1 %v19289_v2 }
 0xa39   :  { %10870 = vmatmul.f32.gmra.mxu3 %v19361_v26  ;;  %v11080_v26 = vld [vmem:[#allocation7 + $0x58] sm:$0xff] }
 0xa3a   :  { %10813 = vmatmul.f32.gmra.mxu2 %v19309_v6  ;;  %v19494_v23 = vand.u32 4294901760, %v11080_v26 }
 0xa3b   :  { %10941 = vmatmul.f32.gmra.mxu0 %v19341_v55 }
 0xa3c   :  { %11104 = vmatpush.msrb.mxu2 %v19494_v23 }
 0xa3d   :  { %10986 = vmatmul.f32.gmra.mxu1 %v19341_v55 }
 0xa3e   :  { %11106 = vmatpush.msrb.mxu2 %v19498_v39 }
 0xa41   :  { %10876 = vmatmul.f32.gmra.mxu3 %v19387_v8  ;;  %v11078_v8 = vld [vmem:[#allocation7 + $0x48] sm:$0xff] }
 0xa42   :  { %10818 = vmatmul.f32.gmra.mxu2 %v19355_v62 }
 0xa43   :  { %10945 = vmatmul.f32.gmra.mxu0 %v19373_v44 }
 0xa45   :  { %10990 = vmatmul.f32.gmra.mxu1 %v19373_v44  ;;  %v19496_v44 = vand.u32 4294901760, %v11041_v19 }
 0xa47   :  { %11324 = vmatpush.msra.mxu0 %v19496_v44 }
 0xa4a   :  { %10823 = vmatmul.f32.gmra.mxu2 %v19381_v61  ;;  %v11040_v61 = vld [vmem:[#allocation7 + $0x20] sm:$0xff] }
 0xa68   :  { %v10414_v57 = vpop.f32.mrf.mxu0 }
 0xa6a   :  { %v10464_v28 = vpop.f32.mrf.mxu1 }
 0xa6c   :  { %v10356_v0 = vpop.f32.mrf.mxu3 }
 0xa70   :  { %v10419_v35 = vpop.f32.mrf.mxu0 }
 0xa72   :  { %v10470_v3 = vpop.f32.mrf.mxu1 }
 0xa74   :  { %v10360_v58 = vpop.f32.mrf.mxu3 }
 0xa75   :  { %v10251_v56 = vpop.f32.mrf.mxu2 }
 0xa76   :  { %v10357_v2 = vadd.f32 %v10356_v0, %v10251_v56  ;;  %v19504_v0 = vand.u32 4294901760, %v11039_v17  ;;  %v19507_v56 = vsub.f32 %v11080_v26, %v19494_v23 }
 0xa78   :  { %v10424_v22 = vpop.f32.mrf.mxu0  ;;  %v10415_v43 = vadd.f32 %v10414_v57, %v10357_v2  ;;  %v19500_v57 = vand.u32 4294901760, %v11040_v61 }
 0xa7a   :  { %v10476_v53 = vpop.f32.mrf.mxu1  ;;  %v10465_v1 = vadd.f32 %v10464_v28, %v10415_v43  ;;  %v19502_v28 = vand.u32 4294901760, %v11078_v8  ;;  %11326 = vmatpush.msra.mxu0 %v19500_v57 }
 0xa7c   :  { %v10364_v30 = vpop.f32.mrf.mxu3  ;;  %11108 = vmatpush.msrb.mxu2 %v19502_v28  ;;  %11328 = vmatpush.msra.mxu0 %v19504_v0 }
 0xa7d   :  { %v10259_v63 = vpop.f32.mrf.mxu2 }
 0xa7e   :  { %v10361_v6 = vadd.f32 %v10360_v58, %v10259_v63  ;;  %v19510_v58 = vsub.f32 %v11041_v19, %v19496_v44 }
 0xa80   :  { %v19468_v25 = vpop.f32.mrf.mxu0  ;;  %v10420_v15 = vadd.f32 %v10419_v35, %v10361_v6  ;;  %v11077_v35 = vld [vmem:[#allocation7 + $0x40] sm:$0xff] }
 0xa82   :  { %v19470_v4 = vpop.f32.mrf.mxu1  ;;  %v10471_v21 = vadd.f32 %v10470_v3, %v10420_v15 }
 0xa84   :  { %v10368_v42 = vpop.f32.mrf.mxu3 }
 0xa85   :  { %v10267_v52 = vpop.f32.mrf.mxu2 }
 0xa86   :  { %v10365_v38 = vadd.f32 %v10364_v30, %v10267_v52  ;;  %v19520_v30 = vsub.f32 %v11040_v61, %v19500_v57  ;;  %v19523_v52 = vsub.f32 %v11078_v8, %v19502_v28 }
 0xa88   :  { %v10646_v51 = vpop.f32.mrf.mxu0  ;;  %v10425_v27 = vadd.f32 %v10424_v22, %v10365_v38  ;;  %v19513_v22 = vsub.f32 %v11079_v60, %v19498_v39 }
 0xa8a   :  { %v10751_v11 = vpop.f32.mrf.mxu1  ;;  %v19488_v59 = vadd.f32 %v10476_v53, %v10425_v27  ;;  %v19516_v53 = vand.u32 4294901760, %v11077_v35 }
 0xa8b   :  { %v10752_v49 = vadd.f32 %v10751_v11, %v10646_v51 }
 0xa8c   :  { %v10584_v18 = vpop.f32.mrf.mxu3  ;;  %11110 = vmatpush.msrb.mxu2 %v19516_v53 }
 0xa8d   :  { %v10275_v12 = vpop.f32.mrf.mxu2 }
 0xa8e   :  { %v19486_v48 = vadd.f32 %v10368_v42, %v10275_v12  ;;  %v19526_v42 = vsub.f32 %v11039_v17, %v19504_v0  ;;  %v20602_v12 = vand.u32 4294901760, %v19507_v56 }
 0xa90   :  { %v10654_v45 = vpop.f32.mrf.mxu0  ;;  %21304 = vst [vmem:[#allocation91_spill] sm:$0xff] %v19526_v42  ;;  %v11137_v43 = vsub.f32 %v19507_v56, %v20602_v12  ;;  %v11821_v12 = vld [vmem:[#allocation7 + $0xb0] sm:$0xff] }
 0xa92   :  { %v10755_v54 = vpop.f32.mrf.mxu1 }
 0xa93   :  { %v10756_v20 = vadd.f32 %v10755_v54, %v10654_v45  ;;  %v20601_v45 = vand.u32 4294901760, %v19513_v22 }
 0xa94   :  { %v19472_v7 = vpop.f32.mrf.mxu3 }
 0xa95   :  { %v10539_v14 = vpop.f32.mrf.mxu2  ;;  %v11143_v38 = vsub.f32 %v19513_v22, %v20601_v45 }
 0xa96   :  { %v10540_v13 = vadd.f32 %v10539_v14, %v10465_v1  ;;  %v19532_v14 = vsub.f32 %v11077_v35, %v19516_v53 }
 0xa98   :  { %v10662_v32 = vpop.f32.mrf.mxu0  ;;  %v10585_v62 = vadd.f32 %v10584_v18, %v10540_v13  ;;  %v11356_v18 = vand.u32 4294901760, %v19510_v58  ;;  %v11076_v13 = vld [vmem:[#allocation7 + $0x38] sm:$0xff] }
 0xa9a   :  { %v10759_v9 = vpop.f32.mrf.mxu1  ;;  %v11357_v6 = vsub.f32 %v19510_v58, %v11356_v18 }
 0xa9b   :  { %v19490_v36 = vadd.f32 %v10759_v9, %v10662_v32  ;;  %v11362_v32 = vand.u32 4294901760, %v19520_v30  ;;  %v20600_v9 = vand.u32 4294901760, %v19523_v52 }
 0xa9c   :  { %v19474_v16 = vpop.f32.mrf.mxu3 }
 0xa9d   :  { %v10543_v24 = vpop.f32.mrf.mxu2  ;;  %v11363_v15 = vsub.f32 %v19520_v30, %v11362_v32  ;;  %v11149_v27 = vsub.f32 %v19523_v52, %v20600_v9 }
 0xa9e   :  { %v19492_v46 = vadd.f32 %v10543_v24, %v10471_v21 }
 0xa9f   :  { %v11364_v19 = vand.u32 4294901760, %v11363_v15  ;;  %v11150_v60 = vand.u32 4294901760, %v11149_v27  ;;  %v10430_v27 = vadd.f32 %v19468_v25, %v19486_v48 }
 0xaa0   :  { %v19480_v50 = vpop.f32.mrf.mxu0 }
 0xaa2   :  { %v19482_v31 = vpop.f32.mrf.mxu1 }
 0xaa4   :  { %v19478_v10 = vpop.f32.mrf.mxu3 }
 0xaa5   :  { %v19476_v37 = vpop.f32.mrf.mxu2 }
 0xaa8   :  { %v10934_v41 = vpop.f32.mrf.mxu0 }
 0xaaa   :  { %v10979_v5 = vpop.f32.mrf.mxu1 }
 0xaac   :  { %v10859_v29 = vpop.f32.mrf.mxu3 }
 0xaad   :  { %v19484_v33 = vpop.f32.mrf.mxu2 }
 0xab0   :  { %v10938_v51 = vpop.f32.mrf.mxu0 }
 0xab2   :  { %v10983_v2 = vpop.f32.mrf.mxu1 }
 0xab4   :  { %v10865_v3 = vpop.f32.mrf.mxu3 }
 0xab5   :  { %v10809_v40 = vpop.f32.mrf.mxu2 }
 0xab6   :  { %v10810_v55 = vadd.f32 %v10809_v40, %v10752_v49  ;;  %v11038_v49 = vld [vmem:[#allocation7 + $0x10] sm:$0xff]  ;;  %v11138_v40 = vand.u32 4294901760, %v11137_v43 }
 0xab7   :  { %v19565_v17 = vand.u32 4294901760, %v11038_v49 }
 0xab8   :  { %v10860_v34 = vadd.f32 %v10859_v29, %v10810_v55  ;;  %v11368_v29 = vand.u32 4294901760, %v19526_v42  ;;  %v11358_v55 = vand.u32 4294901760, %v11357_v6  ;;  %11139 = vmatpush.msrb.mxu3 %v11138_v40  ;;  %v10548_v40 = vadd.f32 %v19476_v37, %v19488_v59 }
 0xab9   :  { %v19578_v6 = vsub.f32 %v11038_v49, %v19565_v17  ;;  %11330 = vmatpush.msra.mxu0 %v19565_v17  ;;  %v10942_v49 = vpop.f32.mrf.mxu0 }
 0xaba   :  { %v10935_v47 = vadd.f32 %v10934_v41, %v10860_v34  ;;  %v20599_v41 = vand.u32 4294901760, %v19532_v14  ;;  %v11369_v21 = vsub.f32 %v19526_v42, %v11368_v29  ;;  %v11036_v34 = vld [vmem:[#allocation7] sm:$0xff]  ;;  %11359 = vmatpush.msra.mxu1 %v11358_v55  ;;  %v10987_v25 = vpop.f32.mrf.mxu1  ;;  %v11820_v42 = vld [vmem:[#allocation7 + $0xa8] sm:$0xff] }
 0xabb   :  { %21305 = vst [vmem:[#allocation86_spill] sm:$0xff] %v19578_v6 }
 0xabc   :  { %v10980_v63 = vadd.f32 %v10979_v5, %v10935_v47  ;;  %v11037_v5 = vld [vmem:[#allocation7 + $0x8] sm:$0xff]  ;;  %v11155_v61 = vsub.f32 %v19532_v14, %v20599_v41  ;;  %v11370_v8 = vand.u32 4294901760, %v11369_v21  ;;  %v19567_v47 = vand.u32 4294901760, %v11076_v13  ;;  %11365 = vmatpush.msra.mxu1 %v11364_v19 }
 0xabd   :  { %v10814_v11 = vpop.f32.mrf.mxu2  ;;  %v19569_v35 = vand.u32 4294901760, %v11037_v5 }
 0xabe   :  { %v10994_v54 = vmax.f32 %v10585_v62, %v10980_v63  ;;  %v10815_v24 = vadd.f32 %v10814_v11, %v10756_v20  ;;  %v11144_v20 = vand.u32 4294901760, %v11143_v38  ;;  %v11075_v62 = vld [vmem:[#allocation7 + $0x30] sm:$0xff]  ;;  %v19575_v11 = vand.u32 4294901760, %v11036_v34  ;;  %11371 = vmatpush.msra.mxu1 %v11370_v8  ;;  %11112 = vmatpush.msrb.mxu2 %v19567_v47 }
 0xabf   :  { %v11156_v43 = vand.u32 4294901760, %v11155_v61  ;;  %v19581_v38 = vsub.f32 %v11076_v13, %v19567_v47  ;;  %v11374_v13 = vand.u32 4294901760, %v19578_v6  ;;  %11332 = vmatpush.msra.mxu0 %v19569_v35 }
 0xac0   :  { %10999 = vst.msk [vmem:[#allocation3] sm:$0xff] %vm10998_vm8, %v10994_v54  ;;  %v10866_v1 = vadd.f32 %v10865_v3, %v10815_v24  ;;  %v10589_v3 = vadd.f32 %v19472_v7, %v19492_v46  ;;  %v10871_v54 = vpop.f32.mrf.mxu3  ;;  %11145 = vmatpush.msrb.mxu3 %v11144_v20  ;;  %v19591_v15 = vsub.f32 %v11036_v34, %v19575_v11 }
 0xac1   :  { %v11375_v48 = vsub.f32 %v19578_v6, %v11374_v13  ;;  %11334 = vmatpush.msra.mxu0 %v19575_v11 }
 0xac2   :  { %v10939_v26 = vadd.f32 %v10938_v51, %v10866_v1  ;;  %v19573_v51 = vand.u32 4294901760, %v11075_v62  ;;  %v19584_v1 = vsub.f32 %v11037_v5, %v19569_v35  ;;  %21307 = vst [vmem:[#allocation90_spill] sm:$0xff] %v19591_v15  ;;  %11151 = vmatpush.msrb.mxu3 %v11150_v60  ;;  %v20598_v5 = vand.u32 4294901760, %v19581_v38 }
 0xac3   :  { %v11386_v21 = vand.u32 4294901760, %v19591_v15  ;;  %v10764_v60 = vadd.f32 %v19482_v31, %v19480_v50  ;;  %v11376_v61 = vand.u32 4294901760, %v11375_v48  ;;  %11471 = vmatpush.msrb.mxu0 %v11356_v18 }
 0xac4   :  { %v10984_v63 = vadd.f32 %v10983_v2, %v10939_v26  ;;  %21306 = vst [vmem:[#allocation93_spill] sm:$0xff] %v19584_v1  ;;  %v19588_v2 = vsub.f32 %v11075_v62, %v19573_v51  ;;  %11157 = vmatpush.msrb.mxu3 %v11156_v43  ;;  %v11161_v37 = vsub.f32 %v19581_v38, %v20598_v5 }
 0xac5   :  { %v10819_v24 = vpop.f32.mrf.mxu2  ;;  %v11387_v19 = vsub.f32 %v19591_v15, %v11386_v21  ;;  %11114 = vmatpush.msrb.mxu2 %v19573_v51  ;;  %11377 = vmatpush.msra.mxu1 %v11376_v61 }
 0xac6   :  { %v10995_v7 = vmax.f32 %v10589_v3, %v10984_v63  ;;  %v10820_v46 = vadd.f32 %v10819_v24, %v19490_v36  ;;  %v11380_v36 = vand.u32 4294901760, %v19584_v1  ;;  %v20597_v20 = vand.u32 4294901760, %v19588_v2  ;;  %11475 = vmatpush.msrb.mxu0 %v11362_v32 }
 0xac7   :  { %v11042_v62 = vld [vmem:[#allocation3 + $0x2] sm:$0x3]  ;;  %v11162_v8 = vand.u32 4294901760, %v11161_v37  ;;  %11187 = vmatpush.msra.mxu2 %v19507_v56  ;;  %v10593_v63 = vadd.f32 %v19474_v16, %v10548_v40  ;;  %v11388_v50 = vand.u32 4294901760, %v11387_v19  ;;  %v11003_v31 = vld [vmem:[#allocation3] sm:$0x3] }
 0xac8   :  { %11000 = vst.msk [vmem:[#allocation3 + $0x8] sm:$0xff] %vm10998_vm8, %v10995_v7  ;;  %v10872_v55 = vadd.f32 %v10871_v54, %v10820_v46  ;;  %v11381_v59 = vsub.f32 %v19584_v1, %v11380_v36  ;;  %v11167_v26 = vsub.f32 %v19588_v2, %v20597_v20  ;;  %v11046_v43 = vsel %vm11007_vm9, %v11042_v62, -inf  ;;  %v10877_v18 = vpop.f32.mrf.mxu3  ;;  %11479 = vmatpush.msrb.mxu0 %v11368_v29 }
 0xac9   :  { %v10483_v7 = vadd.f32 %v19470_v4, %v10430_v27  ;;  %11163 = vmatpush.msrb.mxu3 %v11162_v8  ;;  %11190 = vmatpush.msra.mxu2 %v19513_v22  ;;  %v11008_v37 = vsel %vm11007_vm9, %v11003_v31, -inf }
 0xaca   :  { %v10943_v34 = vadd.f32 %v10942_v49, %v10872_v55  ;;  %v11382_v3 = vand.u32 4294901760, %v11381_v59  ;;  %v11168_v24 = vand.u32 4294901760, %v11167_v26  ;;  %v10991_v26 = vpop.f32.mrf.mxu1  ;;  %11483 = vmatpush.msrb.mxu0 %v11374_v13 }
 0xacb   :  { %v10552_v16 = vadd.f32 %v19484_v33, %v10483_v7  ;;  %11193 = vmatpush.msra.mxu2 %v19523_v52  ;;  %v10946_v33 = vpop.f32.mrf.mxu0 }
 0xacc   :  { %v10988_v54 = vadd.f32 %v10987_v25, %v10943_v34  ;;  %11383 = vmatpush.msra.mxu1 %v11382_v3  ;;  %11169 = vmatpush.msrb.mxu3 %v11168_v24  ;;  %v11047_v25 = vrot.slane %v11046_v43, 4  ;;  %v11524_v24 = vld [vmem:[#allocation3 + $0x4] sm:$0x3] }
 0xacd   :  { %v10824_v46 = vpop.f32.mrf.mxu2  ;;  %11196 = vmatpush.msra.mxu2 %v19532_v14  ;;  %v10597_v61 = vadd.f32 %v19478_v10, %v10552_v16  ;;  %11487 = vmatpush.msrb.mxu0 %v11380_v36  ;;  %v11528_v36 = vsel %vm11007_vm9, %v11524_v24, -inf }
 0xace   :  { %v10996_v49 = vmax.f32 %v10593_v63, %v10988_v54  ;;  %v10825_v55 = vadd.f32 %v10824_v46, %v10764_v60  ;;  %11220 = vmatpush.msra.mxu3 %v19494_v23  ;;  %11389 = vmatpush.msra.mxu1 %v11388_v50  ;;  %v11048_v19 = vmax.f32 %v11046_v43, %v11047_v25  ;;  %v11009_v60 = vrot.slane %v11008_v37, 4 }
 0xacf   :  { %v11043_v40 = vld [vmem:[#allocation3 + $0xa] sm:$0x3]  ;;  %v11004_v4 = vld [vmem:[#allocation3 + $0x8] sm:$0x3]  ;;  %v11525_v29 = vld [vmem:[#allocation3 + $0xc] sm:$0x3]  ;;  %11199 = vmatpush.msra.mxu2 %v19581_v38  ;;  %11491 = vmatpush.msrb.mxu0 %v11386_v21 }
 0xad0   :  { %11001 = vst.msk [vmem:[#allocation3 + $0x10] sm:$0xff] %vm10998_vm8, %v10996_v49  ;;  %v10878_v27 = vadd.f32 %v10877_v18, %v10825_v55  ;;  %v11053_v48 = vsel %vm11007_vm9, %v11043_v40, -inf  ;;  %v11015_v59 = vsel %vm11007_vm9, %v11004_v4, -inf  ;;  %11508 = vmatpush.msrb.mxu1 %v19496_v44  ;;  %11222 = vmatpush.msra.mxu3 %v19498_v39  ;;  %v11049_v43 = vrot.slane %v11048_v19, 2 }
 0xad1   :  { %v11054_v62 = vrot.slane %v11053_v48, 4  ;;  %v11016_v34 = vrot.slane %v11015_v59, 4  ;;  %v11010_v46 = vmax.f32 %v11008_v37, %v11009_v60  ;;  %11202 = vmatpush.msra.mxu2 %v19588_v2  ;;  %v11535_v13 = vsel %vm11007_vm9, %v11525_v29, -inf }
 0xad2   :  { %v10947_v32 = vadd.f32 %v10946_v33, %v10878_v27  ;;  %11510 = vmatpush.msrb.mxu1 %v19500_v57  ;;  %11224 = vmatpush.msra.mxu3 %v19502_v28  ;;  %v11536_v25 = vrot.slane %v11535_v13, 4  ;;  %v11050_v27 = vmax.f32 %v11048_v19, %v11049_v43  ;;  %v11784_v33 = vld [vmem:[#allocation3 + $0x6] sm:$0x3] }
 0xad3   :  { %v11055_v63 = vmax.f32 %v11053_v48, %v11054_v62  ;;  %v11017_v54 = vmax.f32 %v11015_v59, %v11016_v34  ;;  %v11011_v37 = vrot.slane %v11010_v46, 2  ;;  %v11529_v62 = vrot.slane %v11528_v36, 4 }
 0xad4   :  { %v10992_v8 = vadd.f32 %v10991_v26, %v10947_v32  ;;  %11512 = vmatpush.msrb.mxu1 %v19504_v0  ;;  %11226 = vmatpush.msra.mxu3 %v19516_v53  ;;  %v11051_v29 = vrot.slane %v11050_v27, 1  ;;  %v19671_v19 = vsel %vm11007_vm9, %v11784_v33, -inf }
 0xad5   :  { %v11056_v18 = vrot.slane %v11055_v63, 2  ;;  %v11018_v40 = vrot.slane %v11017_v54, 2  ;;  %v11012_v24 = vmax.f32 %v11010_v46, %v11011_v37  ;;  %v11789_v37 = vrot.slane %v19671_v19, 4 }
 0xad6   :  { %v10997_v3 = vmax.f32 %v10597_v61, %v10992_v8  ;;  %11514 = vmatpush.msrb.mxu1 %v19565_v17  ;;  %11228 = vmatpush.msra.mxu3 %v19567_v47  ;;  %v11537_v61 = vmax.f32 %v11535_v13, %v11536_v25 }
 0xad7   :  { %v11044_v10 = vld [vmem:[#allocation3 + $0x12] sm:$0x3]  ;;  %v11005_v7 = vld [vmem:[#allocation3 + $0x10] sm:$0x3]  ;;  %v11526_v49 = vld [vmem:[#allocation3 + $0x14] sm:$0x3]  ;;  %v11057_v26 = vmax.f32 %v11055_v63, %v11056_v18  ;;  %v11019_v60 = vmax.f32 %v11017_v54, %v11018_v40  ;;  %v11530_v54 = vmax.f32 %v11528_v36, %v11529_v62 }
 0xad8   :  { %11002 = vst.msk [vmem:[#allocation3 + $0x18] sm:$0xff] %vm10998_vm8, %v10997_v3  ;;  %v11060_v50 = vsel %vm11007_vm9, %v11044_v10, -inf  ;;  %v11022_v31 = vsel %vm11007_vm9, %v11005_v7, -inf  ;;  %11516 = vmatpush.msrb.mxu1 %v19569_v35  ;;  %11230 = vmatpush.msra.mxu3 %v19573_v51  ;;  %v11542_v4 = vsel %vm11007_vm9, %v11526_v49, -inf  ;;  %v11538_v46 = vrot.slane %v11537_v61, 2 }
 0xad9   :  { %v11061_v55 = vrot.slane %v11060_v50, 4  ;;  %v11023_v16 = vrot.slane %v11022_v31, 4  ;;  %v11543_v34 = vrot.slane %v11542_v4, 4 }
 0xada   :  { %11518 = vmatpush.msrb.mxu1 %v19575_v11 }
 0xadb   :  { %v11062_v48 = vmax.f32 %v11060_v50, %v11061_v55  ;;  %v11024_v59 = vmax.f32 %v11022_v31, %v11023_v16  ;;  %v19675_v31 = vld [vmem:[#allocation7 + $0x88] sm:$0xff]  ;;  %v11544_v13 = vmax.f32 %v11542_v4, %v11543_v34  ;;  %v11058_v55 = vrot.slane %v11057_v26, 1 }
 0xadc   :  { %v11020_v16 = vrot.slane %v11019_v60, 1  ;;  %v19678_v25 = vand.u32 4294901760, %v19675_v31  ;;  %v11531_v34 = vrot.slane %v11530_v54, 2 }
 0xadd   :  { %v11063_v32 = vrot.slane %v11062_v48, 2  ;;  %v11025_v21 = vrot.slane %v11024_v59, 2  ;;  %v11059_v20 = vmax.f32 %v11057_v26, %v11058_v55 }
 0xade   :  { %v11532_v26 = vmax.f32 %v11530_v54, %v11531_v34  ;;  %v11790_v34 = vmax.f32 %v19671_v19, %v11789_v37 }
 0xadf   :  { %v11045_v8 = vld [vmem:[#allocation3 + $0x1a] sm:$0x3]  ;;  %v11006_v3 = vld [vmem:[#allocation3 + $0x18] sm:$0x3]  ;;  %v11064_v10 = vmax.f32 %v11062_v48, %v11063_v32  ;;  %v11026_v7 = vmax.f32 %v11024_v59, %v11025_v21  ;;  %v19680_v48 = vld [vmem:[#allocation7 + $0x80] sm:$0xff]  ;;  %v11052_v59 = vmax.f32 %v11050_v27, %v11051_v29  ;;  %v11013_v32 = vrot.slane %v11012_v24, 1 }
 0xae0   :  { %v11067_v43 = vsel %vm11007_vm9, %v11045_v8, -inf  ;;  %v11029_v50 = vsel %vm11007_vm9, %v11006_v3, -inf  ;;  %v11822_v8 = vld [vmem:[#allocation7 + $0xb8] sm:$0xff]  ;;  %v11545_v3 = vrot.slane %v11544_v13, 2 }
 0xae1   :  { %v11068_v49 = vrot.slane %v11067_v43, 4  ;;  %v11030_v63 = vrot.slane %v11029_v50, 4  ;;  %v11065_v33 = vrot.slane %v11064_v10, 1  ;;  %v11027_v21 = vrot.slane %v11026_v7, 1  ;;  %v11527_v36 = vld [vmem:[#allocation3 + $0x1c] sm:$0x3] }
 0xae2   :  { %v19686_v41 = vand.u32 4294901760, %v11822_v8  ;;  %v11549_v27 = vsel %vm11007_vm9, %v11527_v36, -inf  ;;  %v11014_v9 = vmax.f32 %v11012_v24, %v11013_v32  ;;  %v11086_v55 = vsel %vm11085_vm10, %v11059_v20, %v11052_v59 }
 0xae3   :  { %v11069_v18 = vmax.f32 %v11067_v43, %v11068_v49  ;;  %v11031_v40 = vmax.f32 %v11029_v50, %v11030_v63  ;;  %v11021_v43 = vmax.f32 %v11019_v60, %v11020_v16  ;;  %v19684_v50 = vand.u32 4294901760, %v19680_v48  ;;  %v19691_v16 = vld [vmem:[#allocation7 + $0x78] sm:$0xff] }
 0xae4   :  { %v11539_v49 = vmax.f32 %v11537_v61, %v11538_v46  ;;  %v11066_v29 = vmax.f32 %v11064_v10, %v11065_v33  ;;  %v11028_v45 = vmax.f32 %v11026_v7, %v11027_v21  ;;  %v11550_v15 = vrot.slane %v11549_v27, 4  ;;  %v19709_v33 = vld [vmem:[#allocation7 + $0x70] sm:$0xff] }
 0xae5   :  { %v11070_v4 = vrot.slane %v11069_v18, 2  ;;  %v11032_v62 = vrot.slane %v11031_v40, 2  ;;  %v11546_v60 = vmax.f32 %v11544_v13, %v11545_v3  ;;  %v11308_v61 = vsel %vm11085_vm10, %v11021_v43, %v11014_v9  ;;  %v19716_v3 = vld [vmem:[#allocation7 + $0x68] sm:$0xff] }
 0xae6   :  { %v11540_v46 = vrot.slane %v11539_v49, 1  ;;  %v19694_v24 = vsub.f32 %v11822_v8, %v19686_v41  ;;  %v19696_v10 = vand.u32 4294901760, %v11821_v12  ;;  %v11088_v7 = vsel %vm11087_vm11, %v11066_v29, %v11086_v55 }
 0xae7   :  { %v11071_v63 = vmax.f32 %v11069_v18, %v11070_v4  ;;  %v11033_v5 = vmax.f32 %v11031_v40, %v11032_v62  ;;  %v11551_v18 = vmax.f32 %v11549_v27, %v11550_v15  ;;  %v11309_v54 = vsel %vm11087_vm11, %v11028_v45, %v11308_v61  ;;  %v11819_v62 = vld [vmem:[#allocation7 + $0xa0] sm:$0xff] }
 0xae8   :  { %v19700_v13 = vand.u32 4294901760, %v11820_v42  ;;  %v19705_v15 = vand.u32 4294901760, %v19691_v16  ;;  %v11533_v32 = vrot.slane %v11532_v26, 1  ;;  %v11541_v4 = vmax.f32 %v11539_v49, %v11540_v46 }
 0xae9   :  { %v11072_v1 = vrot.slane %v11071_v63, 1  ;;  %v11034_v6 = vrot.slane %v11033_v5, 1  ;;  %v11552_v20 = vrot.slane %v11551_v18, 2  ;;  %v20607_v43 = vand.u32 4294901760, %v19694_v24 }
 0xaea   :  { %v19723_v27 = vsub.f32 %v11820_v42, %v19700_v13  ;;  %v19734_v19 = vand.u32 4294901760, %v19709_v33  ;;  %v19740_v42 = vsub.f32 %v19675_v31, %v19678_v25  ;;  %v19742_v46 = vand.u32 4294901760, %v11819_v62 }
 0xaeb   :  { %v11073_v40 = vmax.f32 %v11071_v63, %v11072_v1  ;;  %v11035_v36 = vmax.f32 %v11033_v5, %v11034_v6  ;;  %v11547_v6 = vrot.slane %v11546_v60, 1  ;;  %v11553_v21 = vmax.f32 %v11551_v18, %v11552_v20 }
 0xaec   :  { %v19720_v63 = vsub.f32 %v11821_v12, %v19696_v10  ;;  %v11534_v12 = vmax.f32 %v11532_v26, %v11533_v32  ;;  %v19758_v31 = vsub.f32 %v19694_v24, %v20607_v43 }
 0xaed   :  { %v11090_v9 = vsel %vm11089_vm12, %v11073_v40, %v11088_v7  ;;  %v11310_v59 = vsel %vm11089_vm12, %v11035_v36, %v11309_v54  ;;  %v11554_v29 = vrot.slane %v11553_v21, 1  ;;  %v11548_v37 = vmax.f32 %v11546_v60, %v11547_v6  ;;  %v11818_v60 = vld [vmem:[#allocation7 + $0x98] sm:$0xff]  ;;  %v11785_v7 = vld [vmem:[#allocation3 + $0xe] sm:$0x3]  ;;  %v11817_v6 = vld [vmem:[#allocation7 + $0x90] sm:$0xff] }
 0xaee   :  { %v11091_v1 = vsel %vm10998_vm8, %v11090_v9, 0  ;;  %v11311_v5 = vsel %vm10998_vm8, %v11310_v59, 0  ;;  %21308 = vst [vmem:[#allocation94_spill] sm:$0xff] %v19720_v63  ;;  %v19747_v36 = vand.u32 4294901760, %v19716_v3  ;;  %v20609_v26 = vand.u32 4294901760, %v19720_v63 }
 0xaef   :  { %v19711_v45 = vand.u32 4294901760, %v11091_v1  ;;  %v19713_v8 = vand.u32 4294901760, %v11311_v5  ;;  %v11555_v61 = vmax.f32 %v11553_v21, %v11554_v29  ;;  %v11567_v20 = vsel %vm11085_vm10, %v11541_v4, %v11534_v12  ;;  %v11786_v9 = vld [vmem:[#allocation3 + $0x16] sm:$0x3] }
 0xaf0   :  { %v11568_v59 = vsel %vm11087_vm11, %v11548_v37, %v11567_v20  ;;  %v19772_v21 = vsub.f32 %v11819_v62, %v19742_v46  ;;  %v19774_v4 = vand.u32 4294901760, %v11818_v60  ;;  %v11795_v29 = vsel %vm11007_vm9, %v11785_v7, -inf }
 0xaf1   :  { %v19726_v55 = vsub.f32 %v11091_v1, %v19711_v45  ;;  %11171 = vmatmul.f32.vlgmr.msrb.gmra.mxu3 %v19711_v45  ;;  %v19730_v49 = vsub.f32 %v11311_v5, %v19713_v8  ;;  %11391 = vmatmul.f32.vlgmr.msra.gmra.mxu1 %v19713_v8  ;;  %v11787_v1 = vld [vmem:[#allocation3 + $0x1e] sm:$0x3]  ;;  %v11791_v5 = vrot.slane %v11790_v34, 2  ;;  %v11569_v32 = vsel %vm11089_vm12, %v11555_v61, %v11568_v59 }
 0xaf2   :  { %11288 = vmatpush.msrb.mxu3 %v19494_v23  ;;  %11699 = vmatpush.msra.mxu1 %v19678_v25  ;;  %v19751_v23 = vsub.f32 %v19680_v48, %v19684_v50  ;;  %v11796_v37 = vrot.slane %v11795_v29, 4  ;;  %v11802_v20 = vsel %vm11007_vm9, %v11786_v9, -inf  ;;  %v19785_v62 = vand.u32 4294901760, %v11817_v6 }
 0xaf3   :  { %v11117_v18 = vand.u32 4294901760, %v19726_v55  ;;  %v20608_v40 = vand.u32 4294901760, %v19730_v49  ;;  %v11803_v61 = vrot.slane %v11802_v20, 4  ;;  %v11809_v7 = vsel %vm11007_vm9, %v11787_v1, -inf }
 0xaf4   :  { %11290 = vmatpush.msrb.mxu3 %v19498_v39  ;;  %11701 = vmatpush.msra.mxu1 %v19684_v50  ;;  %v11797_v59 = vmax.f32 %v11795_v29, %v11796_v37  ;;  %v11810_v9 = vrot.slane %v11809_v7, 4  ;;  %v21311_v29 = vand.u32 4294901760, %v19513_v22 }
 0xaf5   :  { %v11118_v48 = vsub.f32 %v19726_v55, %v11117_v18  ;;  %v11338_v39 = vsub.f32 %v19730_v49, %v20608_v40  ;;  %v19777_v40 = vld [vmem:[#allocation7 + $0x60] sm:$0xff]  ;;  %v11804_v1 = vmax.f32 %v11802_v20, %v11803_v61 }
 0xaf6   :  { %11292 = vmatpush.msrb.mxu3 %v19502_v28  ;;  %11703 = vmatpush.msra.mxu1 %v19705_v15  ;;  %v11882_v28 = vsub.f32 %v19720_v63, %v20609_v26  ;;  %v19793_v54 = vand.u32 4294901760, %v19777_v40  ;;  %v11877_v26 = vand.u32 4294901760, %v19758_v31  ;;  %v19797_v63 = vsub.f32 %v11818_v60, %v19774_v4 }
 0xaf7   :  { %v11119_v12 = vand.u32 4294901760, %v11118_v48  ;;  %v11339_v43 = vand.u32 4294901760, %v11338_v39  ;;  %v11570_v48 = vsel %vm10998_vm8, %v11569_v32, 0  ;;  %v11792_v39 = vmax.f32 %v11790_v34, %v11791_v5 }
 0xaf8   :  { %11294 = vmatpush.msrb.mxu3 %v19516_v53  ;;  %11705 = vmatpush.msra.mxu1 %v19734_v19  ;;  %v21309_v53 = vand.u32 4294901760, %v19507_v56  ;;  %v21310_v34 = vand.u32 4294901760, %v19723_v27  ;;  %v11893_v56 = vand.u32 4294901760, %v19772_v21  ;;  %v11798_v5 = vrot.slane %v11797_v59, 2 }
 0xaf9   :  { %11120 = vmatmul.f32.vlgmr.msrb.gmra.mxu2 %v11119_v12  ;;  %11234 = vmatmul.f32.vlgmr.msra.gmra.mxu3 %v11117_v18  ;;  %v19808_v60 = vsub.f32 %v19691_v16, %v19705_v15  ;;  %v19810_v31 = vand.u32 4294901760, %v11570_v48  ;;  %v11805_v32 = vrot.slane %v11804_v1, 2  ;;  %v11883_v12 = vand.u32 4294901760, %v11882_v28 }
 0xafa   :  { %11251 = vmatpush.msrb.mxu2 %v21309_v53  ;;  %11296 = vmatpush.msrb.mxu3 %v19567_v47  ;;  %v11888_v18 = vsub.f32 %v19723_v27, %v21310_v34  ;;  %v11811_v47 = vmax.f32 %v11809_v7, %v11810_v9  ;;  %v11793_v37 = vrot.slane %v11792_v39, 1  ;;  %v11799_v20 = vmax.f32 %v11797_v59, %v11798_v5 }
 0xafb   :  { %11340 = vmatmul.f32.vlgmr.msra.gmra.mxu0 %v11339_v43  ;;  %11520 = vmatmul.f32.vlgmr.msrb.gmra.mxu1 %v19713_v8  ;;  %v19813_v43 = vsub.f32 %v11817_v6, %v19785_v62  ;;  %v19822_v16 = vsub.f32 %v19709_v33, %v19734_v19  ;;  %v11899_v6 = vand.u32 4294901760, %v19797_v63  ;;  %v11806_v7 = vmax.f32 %v11804_v1, %v11805_v32 }
 0xafc   :  { %11666 = vmatpush.msra.mxu0 %v19740_v42  ;;  %11707 = vmatpush.msra.mxu1 %v19747_v36  ;;  %v11812_v61 = vrot.slane %v11811_v47, 2  ;;  %v11889_v22 = vand.u32 4294901760, %v11888_v18  ;;  %v11800_v28 = vrot.slane %v11799_v20, 1  ;;  %v21312_v9 = vand.u32 4294901760, %v19523_v52 }
 0xafd   :  { %11255 = vmatpush.msrb.mxu2 %v21311_v29  ;;  %11298 = vmatpush.msrb.mxu3 %v19573_v51  ;;  %v11894_v51 = vsub.f32 %v19772_v21, %v11893_v56  ;;  %v19833_v33 = vsub.f32 %v11570_v48, %v19810_v31  ;;  %v11905_v53 = vand.u32 4294901760, %v19813_v43  ;;  %v11807_v1 = vrot.slane %v11806_v7, 1 }
 0xafe   :  { %11669 = vmatpush.msra.mxu0 %v19751_v23  ;;  %11709 = vmatpush.msra.mxu1 %v19793_v54  ;;  %v11813_v59 = vmax.f32 %v11811_v47, %v11812_v61  ;;  %v11801_v34 = vmax.f32 %v11799_v20, %v11800_v28  ;;  %v21313_v5 = vand.u32 4294901760, %v19532_v14  ;;  %v19843_v52 = vsub.f32 %v19716_v3, %v19747_v36 }
 0xaff   :  { %11440 = vmatpush.msra.mxu3 %v19496_v44  ;;  %11259 = vmatpush.msrb.mxu2 %v21312_v9  ;;  %v11615_v44 = vand.u32 4294901760, %v19740_v42  ;;  %v11900_v48 = vsub.f32 %v19797_v63, %v11899_v6  ;;  %v19851_v47 = vsub.f32 %v19777_v40, %v19793_v54  ;;  %v11596_v3 = vand.u32 4294901760, %v19833_v33  ;;  %v21316_v9 = vld [vmem:[#allocation91_spill] sm:$0xff] }
 0xb00   :  { %11878 = vmatpush.msrb.mxu1 %v11877_v26  ;;  %11672 = vmatpush.msra.mxu0 %v19808_v60  ;;  %v11794_v26 = vmax.f32 %v11792_v39, %v11793_v37  ;;  %v11814_v18 = vrot.slane %v11813_v59, 1  ;;  %v11895_v39 = vand.u32 4294901760, %v11894_v51  ;;  %v11906_v29 = vsub.f32 %v19813_v43, %v11905_v53 }
 0xb01   :  { %11442 = vmatpush.msra.mxu3 %v19500_v57  ;;  %11263 = vmatpush.msrb.mxu2 %v21313_v5  ;;  %v11808_v57 = vmax.f32 %v11806_v7, %v11807_v1  ;;  %v21314_v40 = vand.u32 4294901760, %v19581_v38  ;;  %v11901_v20 = vand.u32 4294901760, %v11900_v48  ;;  %v11627_v38 = vand.u32 4294901760, %v19808_v60  ;;  %v21318_v5 = vld [vmem:[#allocation86_spill] sm:$0xff] }
 0xb02   :  { %11884 = vmatpush.msrb.mxu1 %v11883_v12  ;;  %11675 = vmatpush.msra.mxu0 %v19822_v16  ;;  %v11815_v14 = vmax.f32 %v11813_v59, %v11814_v18  ;;  %v11827_v32 = vsel %vm11085_vm10, %v11801_v34, %v11794_v26  ;;  %v11907_v7 = vand.u32 4294901760, %v11906_v29  ;;  %v11633_v28 = vand.u32 4294901760, %v19822_v16 }
 0xb03   :  { %11444 = vmatpush.msra.mxu3 %v19504_v0  ;;  %11205 = vmatmul.f32.vlgmr.msra.gmra.mxu2 %v19726_v55  ;;  %v11621_v0 = vand.u32 4294901760, %v19751_v23  ;;  %v11828_v12 = vsel %vm11087_vm11, %v11808_v57, %v11827_v32  ;;  %v11616_v55 = vsub.f32 %v19740_v42, %v11615_v44  ;;  %v11639_v59 = vand.u32 4294901760, %v19843_v52  ;;  %v21319_v57 = vld [vmem:[#allocation93_spill] sm:$0xff]  ;;  %v21320_v32 = vld [vmem:[#allocation90_spill] sm:$0xff]  ;;  %v12061_v42 = vld [vmem:[%s20369_s9 + $0x58] sm:$0xff] }
 0xb04   :  { %11890 = vmatpush.msrb.mxu1 %v11889_v22  ;;  %11300 = vmatmul.f32.vlgmr.msrb.gmra.mxu3 %v19711_v45  ;;  %v11829_v37 = vsel %vm11089_vm12, %v11815_v14, %v11828_v12  ;;  %v21317_v1 = vand.u32 4294901760, %v19730_v49  ;;  %v21321_v12 = vand.u32 4294901760, %v19694_v24 }
 0xb05   :  { %11267 = vmatpush.msrb.mxu2 %v21314_v40  ;;  %11493 = vmatmul.f32.vlgmr.msrb.gmra.mxu0 %v19713_v8  ;;  %v11830_v61 = vsel %vm10998_vm8, %v11829_v37, 0  ;;  %v21315_v8 = vand.u32 4294901760, %v19588_v2  ;;  %v11622_v22 = vsub.f32 %v19751_v23, %v11621_v0  ;;  %v11628_v2 = vsub.f32 %v19808_v60, %v11627_v38 }
 0xb06   :  { %11678 = vmatpush.msra.mxu0 %v19843_v52  ;;  %11713 = vmatmul.f32.vlgmr.msra.gmra.mxu1 %v11596_v3  ;;  %v19881_v51 = vand.u32 4294901760, %v11830_v61  ;;  %v11640_v34 = vsub.f32 %v19843_v52, %v11639_v59 }
 0xb07   :  { %11446 = vmatpush.msra.mxu3 %v19565_v17  ;;  %11896 = vmatpush.msrb.mxu1 %v11895_v39  ;;  %v11617_v17 = vand.u32 4294901760, %v11616_v55  ;;  %v11629_v26 = vand.u32 4294901760, %v11628_v2  ;;  %v21322_v55 = vld [vmem:[#allocation94_spill] sm:$0xff] }
 0xb08   :  { %11271 = vmatpush.msrb.mxu2 %v21315_v8  ;;  %11681 = vmatpush.msra.mxu0 %v19851_v47  ;;  %v11641_v39 = vand.u32 4294901760, %v11640_v34  ;;  %v21323_v37 = vand.u32 4294901760, %v21322_v55 }
 0xb09   :  { %11448 = vmatpush.msra.mxu3 %v19569_v35  ;;  %11902 = vmatpush.msrb.mxu1 %v11901_v20  ;;  %v19895_v35 = vsub.f32 %v11830_v61, %v19881_v51  ;;  %v21324_v20 = vand.u32 4294901760, %v19723_v27 }
 0xb0a   :  { %11407 = vmatpush.msra.mxu2 %v19510_v58  ;;  %11843 = vmatpush.msrb.mxu0 %v19686_v41  ;;  %v11623_v58 = vand.u32 4294901760, %v11622_v22  ;;  %v12056_v22 = vld [vmem:[%s20369_s9 + $0x30] sm:$0xff] }
 0xb0b   :  { %11450 = vmatpush.msra.mxu3 %v19575_v11  ;;  %11908 = vmatpush.msrb.mxu1 %v11907_v7  ;;  %v11645_v11 = vand.u32 4294901760, %v19851_v47  ;;  %v11856_v18 = vand.u32 4294901760, %v19895_v35  ;;  %v12057_v7 = vld [vmem:[%s20369_s9 + $0x38] sm:$0xff] }
 0xb0c   :  { %11410 = vmatpush.msra.mxu2 %v19520_v30  ;;  %11845 = vmatpush.msrb.mxu0 %v19696_v10  ;;  %v11634_v30 = vsub.f32 %v19822_v16, %v11633_v28  ;;  %v20087_v2 = vand.u32 4294901760, %v12057_v7 }
 0xb0d   :  { %11618 = vmatpush.msrb.mxu3 %v11617_v17  ;;  %12027 = vmatpush.msra.mxu1 %v19686_v41  ;;  %v11857_v14 = vsub.f32 %v19895_v35, %v11856_v18 }
 0xb0e   :  { %11413 = vmatpush.msra.mxu2 %v21316_v9  ;;  %11847 = vmatpush.msrb.mxu0 %v19700_v13  ;;  %v11635_v48 = vand.u32 4294901760, %v11634_v30 }
 0xb0f   :  { %11273 = vmatmul.f32.vlgmr.msrb.gmra.mxu2 %v19711_v45  ;;  %11454 = vmatmul.f32.vlgmr.msra.gmra.mxu3 %v21317_v1  ;;  %v11646_v45 = vsub.f32 %v19851_v47, %v11645_v11  ;;  %v11858_v40 = vand.u32 4294901760, %v11857_v14  ;;  %v20106_v1 = vsub.f32 %v12057_v7, %v20087_v2 }
 0xb10   :  { %11624 = vmatpush.msrb.mxu3 %v11623_v58  ;;  %11684 = vmatmul.f32.vlgmr.msra.gmra.mxu0 %v19833_v33  ;;  %v12054_v58 = vld [vmem:[%s20369_s9 + $0x20] sm:$0xff] }
 0xb11   :  { %11910 = vmatmul.f32.vlgmr.msrb.gmra.mxu1 %v19881_v51  ;;  %11416 = vmatpush.msra.mxu2 %v21318_v5  ;;  %v11647_v29 = vand.u32 4294901760, %v11646_v45  ;;  %v20111_v34 = vand.u32 4294901760, %v12054_v58  ;;  %v12158_v45 = vand.u32 4294901760, %v20106_v1 }
 0xb12   :  { %12029 = vmatpush.msra.mxu1 %v19696_v10  ;;  %11849 = vmatpush.msrb.mxu0 %v19742_v46 }
 0xb13   :  { %11630 = vmatpush.msrb.mxu3 %v11629_v26  ;;  %11419 = vmatpush.msra.mxu2 %v21319_v57 }
 0xb14   :  { %12031 = vmatpush.msra.mxu1 %v19700_v13  ;;  %11851 = vmatpush.msrb.mxu0 %v19774_v4 }
 0xb15   :  { %11636 = vmatpush.msrb.mxu3 %v11635_v48  ;;  %11422 = vmatpush.msra.mxu2 %v21320_v32 }
 0xb16   :  { %12033 = vmatpush.msra.mxu1 %v19742_v46  ;;  %11853 = vmatpush.msrb.mxu0 %v19785_v62 }
 0xb17   :  { %11583 = vmatpush.msrb.mxu2 %v19678_v25  ;;  %11642 = vmatpush.msrb.mxu3 %v11641_v39  ;;  %v20123_v39 = vsub.f32 %v12054_v58, %v20111_v34 }
 0xb18   :  { %11990 = vmatpush.msra.mxu0 %v21321_v12  ;;  %12035 = vmatpush.msra.mxu1 %v19774_v4 }
 0xb19   :  { %11425 = vmatmul.f32.vlgmr.msra.gmra.mxu2 %v19730_v49  ;;  %11648 = vmatpush.msrb.mxu3 %v11647_v29  ;;  %v11597_v49 = vsub.f32 %v19833_v33, %v11596_v3  ;;  %v12059_v3 = vld [vmem:[%s20369_s9 + $0x48] sm:$0xff] }
 0xb1a   :  { %11585 = vmatpush.msrb.mxu2 %v19684_v50  ;;  %11859 = vmatmul.f32.vlgmr.msrb.gmra.mxu0 %v11858_v40  ;;  %v12159_v40 = vsub.f32 %v20106_v1, %v12158_v45 }
 0xb1b   :  { %11994 = vmatpush.msra.mxu0 %v21323_v37  ;;  %12037 = vmatpush.msra.mxu1 %v19785_v62 }
 0xb1c   :  { %11650 = vmatmul.f32.vlgmr.msrb.gmra.mxu3 %v19810_v31  ;;  %12039 = vmatmul.f32.vlgmr.msra.gmra.mxu1 %v19881_v51 }
 0xb1d   :  { %11767 = vmatpush.msra.mxu3 %v19678_v25  ;;  %11587 = vmatpush.msrb.mxu2 %v19705_v15  ;;  %v11598_v25 = vand.u32 4294901760, %v11597_v49 }
 0xb1e   :  { %11998 = vmatpush.msra.mxu0 %v21324_v20 }
 0xb1f   :  { %11769 = vmatpush.msra.mxu3 %v19684_v50  ;;  %11589 = vmatpush.msrb.mxu2 %v19734_v19 }
 0xb20   :  { %12002 = vmatpush.msra.mxu0 %v11893_v56 }
 0xb21   :  { %11771 = vmatpush.msra.mxu3 %v19705_v15  ;;  %11591 = vmatpush.msrb.mxu2 %v19747_v36  ;;  %v12063_v15 = vld [vmem:[%s20369_s9 + $0x68] sm:$0xff] }
 0xb22   :  { %12006 = vmatpush.msra.mxu0 %v11899_v6 }
 0xb23   :  { %11773 = vmatpush.msra.mxu3 %v19734_v19  ;;  %11593 = vmatpush.msrb.mxu2 %v19793_v54  ;;  %v12062_v19 = vld [vmem:[%s20369_s9 + $0x60] sm:$0xff] }
 0xb24   :  { %12010 = vmatpush.msra.mxu0 %v11905_v53  ;;  %11599 = vmatmul.f32.vlgmr.msrb.gmra.mxu2 %v11598_v25  ;;  %v20022_v23 = vand.u32 4294901760, %v12062_v19  ;;  %v12176_v25 = vand.u32 4294901760, %v20123_v39 }
 0xb25   :  { %11730 = vmatpush.msra.mxu2 %v11615_v44  ;;  %11775 = vmatpush.msra.mxu3 %v19747_v36 }
 0xb26   :  { %12012 = vmatmul.f32.vlgmr.msra.gmra.mxu0 %v19881_v51  ;;  %v12055_v51 = vld [vmem:[%s20369_s9 + $0x28] sm:$0xff] }
 0xb27   :  { %11734 = vmatpush.msra.mxu2 %v11621_v0  ;;  %11777 = vmatpush.msra.mxu3 %v19793_v54  ;;  %v20024_v54 = vand.u32 4294901760, %v12061_v42  ;;  %v12058_v0 = vld [vmem:[%s20369_s9 + $0x40] sm:$0xff] }
 0xb28   :  { %11779 = vmatmul.f32.vlgmr.msra.gmra.mxu3 %v19810_v31  ;;  %v20075_v8 = vand.u32 4294901760, %v12058_v0 }
 0xb29   :  { %11959 = vmatpush.msrb.mxu3 %v19686_v41  ;;  %11738 = vmatpush.msra.mxu2 %v11627_v38  ;;  %v12064_v41 = vld [vmem:[%s20369_s9 + $0x70] sm:$0xff]  ;;  %v20035_v56 = vsub.f32 %v12061_v42, %v20024_v54  ;;  %v20073_v38 = vand.u32 4294901760, %v12059_v3 }
 0xb2a   :  { %v19993_v50 = vand.u32 4294901760, %v12064_v41  ;;  %v20099_v30 = vsub.f32 %v12058_v0, %v20075_v8  ;;  %v12052_v42 = vld [vmem:[%s20369_s9 + $0x10] sm:$0xff] }
 0xb2b   :  { %11961 = vmatpush.msrb.mxu3 %v19696_v10  ;;  %11742 = vmatpush.msra.mxu2 %v11633_v28  ;;  %v12134_v6 = vand.u32 4294901760, %v20035_v56 }
 0xb2c   :  { %12263 = vmatpush.msrb.mxu1 %v19993_v50  ;;  %v12152_v5 = vand.u32 4294901760, %v20099_v30 }
 0xb2d   :  { %11963 = vmatpush.msrb.mxu3 %v19700_v13  ;;  %11746 = vmatpush.msra.mxu2 %v11639_v59  ;;  %v12135_v47 = vsub.f32 %v20035_v56, %v12134_v6  ;;  %v20089_v59 = vand.u32 4294901760, %v12056_v22 }
 0xb2e   :  { %v12153_v29 = vsub.f32 %v20099_v30, %v12152_v5 }
 0xb2f   :  { %11965 = vmatpush.msrb.mxu3 %v19742_v46  ;;  %11750 = vmatpush.msra.mxu2 %v11645_v11  ;;  %v12060_v46 = vld [vmem:[%s20369_s9 + $0x50] sm:$0xff]  ;;  %v12136_v28 = vand.u32 4294901760, %v12135_v47  ;;  %v20102_v11 = vand.u32 4294901760, %v12055_v51  ;;  %v20109_v26 = vsub.f32 %v12056_v22, %v20089_v59 }
 0xb30   :  { %11752 = vmatmul.f32.vlgmr.msra.gmra.mxu2 %v19810_v31  ;;  %v12154_v20 = vand.u32 4294901760, %v12153_v29 }
 0xb31   :  { %11926 = vmatpush.msrb.mxu2 %v19694_v24  ;;  %11967 = vmatpush.msrb.mxu3 %v19774_v4  ;;  %v19996_v24 = vsub.f32 %v12064_v41, %v19993_v50  ;;  %v20116_v48 = vsub.f32 %v12055_v51, %v20102_v11  ;;  %v12164_v57 = vand.u32 4294901760, %v20109_v26  ;;  %v12160_v41 = vand.u32 4294901760, %v12159_v40 }
 0xb33   :  { %11929 = vmatpush.msrb.mxu2 %v21322_v55  ;;  %11969 = vmatpush.msrb.mxu3 %v19785_v62  ;;  %v12116_v10 = vand.u32 4294901760, %v19996_v24  ;;  %v20032_v62 = vsub.f32 %v12062_v19, %v20022_v23  ;;  %v12170_v12 = vand.u32 4294901760, %v20116_v48  ;;  %v12165_v49 = vsub.f32 %v20109_v26, %v12164_v57  ;;  %v12053_v19 = vld [vmem:[%s20369_s9 + $0x18] sm:$0xff] }
 0xb34   :  { %11973 = vmatmul.f32.vlgmr.msrb.gmra.mxu3 %v11856_v18  ;;  %12212 = vmatpush.msrb.mxu0 %v19996_v24 }
 0xb35   :  { %11932 = vmatpush.msrb.mxu2 %v19723_v27  ;;  %v12117_v13 = vsub.f32 %v19996_v24, %v12116_v10  ;;  %v20008_v27 = vand.u32 4294901760, %v12063_v15  ;;  %v12128_v16 = vand.u32 4294901760, %v20032_v62 }
 0xb37   :  { %11935 = vmatpush.msrb.mxu2 %v19772_v21  ;;  %v20020_v36 = vsub.f32 %v12063_v15, %v20008_v27  ;;  %v20026_v21 = vand.u32 4294901760, %v12060_v46  ;;  %12265 = vmatpush.msrb.mxu1 %v20008_v27  ;;  %v12129_v52 = vsub.f32 %v20032_v62, %v12128_v16  ;;  %v12166_v15 = vand.u32 4294901760, %v12165_v49 }
 0xb39   :  { %11938 = vmatpush.msrb.mxu2 %v19797_v63  ;;  %v12118_v63 = vand.u32 4294901760, %v12117_v13  ;;  %v12122_v4 = vand.u32 4294901760, %v20020_v36  ;;  %v20038_v60 = vsub.f32 %v12060_v46, %v20026_v21  ;;  %12215 = vmatpush.msrb.mxu0 %v20020_v36  ;;  %v12130_v17 = vand.u32 4294901760, %v12129_v52  ;;  %v12051_v46 = vld [vmem:[%s20369_s9 + $0x8] sm:$0xff] }
 0xb3a   :  { %12267 = vmatpush.msrb.mxu1 %v20022_v23  ;;  %v12171_v13 = vsub.f32 %v20116_v48, %v12170_v12  ;;  %v20173_v52 = vand.u32 4294901760, %v12052_v42  ;;  %v20175_v47 = vand.u32 4294901760, %v12051_v46 }
 0xb3b   :  { %11941 = vmatpush.msrb.mxu2 %v19813_v43  ;;  %12119 = vmatpush.msra.mxu3 %v12118_v63  ;;  %v12123_v43 = vsub.f32 %v20020_v36, %v12122_v4  ;;  %v12140_v53 = vand.u32 4294901760, %v20038_v60  ;;  %v12177_v63 = vsub.f32 %v20123_v39, %v12176_v25 }
 0xb3c   :  { %11944 = vmatmul.f32.vlgmr.msrb.gmra.mxu2 %v19895_v35  ;;  %12218 = vmatpush.msrb.mxu0 %v20032_v62  ;;  %v20096_v35 = vsub.f32 %v12059_v3, %v20073_v38  ;;  %v12050_v3 = vld [vmem:[%s20369_s9] sm:$0xff] }
 0xb3d   :  { %12075 = vmatpush.msra.mxu2 %v19993_v50  ;;  %12269 = vmatpush.msrb.mxu1 %v20024_v54  ;;  %v12124_v44 = vand.u32 4294901760, %v12123_v43  ;;  %v12141_v61 = vsub.f32 %v20038_v60, %v12140_v53  ;;  %v12172_v43 = vand.u32 4294901760, %v12171_v13  ;;  %v20180_v0 = vand.u32 4294901760, %v12050_v3 }
 0xb3e   :  { %12221 = vmatpush.msrb.mxu0 %v20035_v56  ;;  %v12146_v18 = vand.u32 4294901760, %v20096_v35  ;;  %v12178_v22 = vand.u32 4294901760, %v12177_v63 }
 0xb3f   :  { %12077 = vmatpush.msra.mxu2 %v20008_v27  ;;  %12271 = vmatpush.msrb.mxu1 %v20026_v21  ;;  %v12142_v9 = vand.u32 4294901760, %v12141_v61  ;;  %v20194_v58 = vsub.f32 %v12050_v3, %v20180_v0 }
 0xb40   :  { %12125 = vmatpush.msra.mxu3 %v12124_v44  ;;  %12224 = vmatpush.msrb.mxu0 %v20038_v60  ;;  %v12147_v32 = vsub.f32 %v20096_v35, %v12146_v18  ;;  %v20171_v44 = vand.u32 4294901760, %v12053_v19 }
 0xb41   :  { %12079 = vmatpush.msra.mxu2 %v20022_v23  ;;  %12273 = vmatpush.msrb.mxu1 %v20073_v38 }
 0xb42   :  { %12131 = vmatpush.msra.mxu3 %v12130_v17  ;;  %12227 = vmatpush.msrb.mxu0 %v20096_v35  ;;  %v12148_v37 = vand.u32 4294901760, %v12147_v32  ;;  %v20184_v51 = vsub.f32 %v12053_v19, %v20171_v44  ;;  %v20187_v17 = vsub.f32 %v12052_v42, %v20173_v52 }
 0xb43   :  { %12081 = vmatpush.msra.mxu2 %v20024_v54  ;;  %12275 = vmatpush.msrb.mxu1 %v20075_v8 }
 0xb44   :  { %12137 = vmatpush.msra.mxu3 %v12136_v28  ;;  %12230 = vmatpush.msrb.mxu0 %v20099_v30  ;;  %v20190_v28 = vsub.f32 %v12051_v46, %v20175_v47  ;;  %v12182_v29 = vand.u32 4294901760, %v20184_v51  ;;  %v12188_v40 = vand.u32 4294901760, %v20187_v17 }
 0xb45   :  { %12083 = vmatpush.msra.mxu2 %v20026_v21  ;;  %12277 = vmatpush.msrb.mxu1 %v20087_v2 }
 0xb46   :  { %12143 = vmatpush.msra.mxu3 %v12142_v9  ;;  %12233 = vmatpush.msrb.mxu0 %v20106_v1  ;;  %v12183_v49 = vsub.f32 %v20184_v51, %v12182_v29 }
 0xb47   :  { %12085 = vmatpush.msra.mxu2 %v20073_v38  ;;  %12279 = vmatpush.msrb.mxu1 %v20089_v59 }
 0xb48   :  { %12149 = vmatpush.msra.mxu3 %v12148_v37  ;;  %12236 = vmatpush.msrb.mxu0 %v20109_v26  ;;  %v12194_v37 = vand.u32 4294901760, %v20190_v28  ;;  %v12184_v63 = vand.u32 4294901760, %v12183_v49 }
 0xb49   :  { %12087 = vmatpush.msra.mxu2 %v20075_v8  ;;  %12281 = vmatpush.msrb.mxu1 %v20102_v11 }
 0xb4a   :  { %12155 = vmatpush.msra.mxu3 %v12154_v20  ;;  %12239 = vmatpush.msrb.mxu0 %v20116_v48  ;;  %v12200_v20 = vand.u32 4294901760, %v20194_v58  ;;  %v12195_v13 = vsub.f32 %v20190_v28, %v12194_v37 }
 0xb4b   :  { %12089 = vmatpush.msra.mxu2 %v20087_v2  ;;  %12283 = vmatpush.msrb.mxu1 %v20111_v34 }
 0xb4c   :  { %12161 = vmatpush.msra.mxu3 %v12160_v41  ;;  %12242 = vmatpush.msrb.mxu0 %v20123_v39  ;;  %v12189_v41 = vsub.f32 %v20187_v17, %v12188_v40  ;;  %v12201_v42 = vsub.f32 %v20194_v58, %v12200_v20 }
 0xb4d   :  { %12091 = vmatpush.msra.mxu2 %v20089_v59  ;;  %12285 = vmatpush.msrb.mxu1 %v20171_v44 }
 0xb4e   :  { %12167 = vmatpush.msra.mxu3 %v12166_v15  ;;  %12245 = vmatpush.msrb.mxu0 %v20184_v51  ;;  %v12190_v19 = vand.u32 4294901760, %v12189_v41  ;;  %v12202_v3 = vand.u32 4294901760, %v12201_v42  ;;  %v12406_v42 = vld [vmem:[%s20371_s11 + $0x20] sm:$0xff] }
 0xb4f   :  { %12093 = vmatpush.msra.mxu2 %v20102_v11  ;;  %12287 = vmatpush.msrb.mxu1 %v20173_v52 }
 0xb50   :  { %12173 = vmatpush.msra.mxu3 %v12172_v43  ;;  %12248 = vmatpush.msrb.mxu0 %v20187_v17 }
 0xb51   :  { %12095 = vmatpush.msra.mxu2 %v20111_v34  ;;  %12289 = vmatpush.msrb.mxu1 %v20175_v47 }
 0xb52   :  { %12179 = vmatpush.msra.mxu3 %v12178_v22  ;;  %12251 = vmatpush.msrb.mxu0 %v20190_v28  ;;  %v12408_v28 = vld [vmem:[%s20371_s11 + $0x30] sm:$0xff] }
 0xb53   :  { %12097 = vmatpush.msra.mxu2 %v20171_v44  ;;  %12291 = vmatpush.msrb.mxu1 %v20180_v0 }
 0xb54   :  { %12185 = vmatpush.msra.mxu3 %v12184_v63  ;;  %12254 = vmatpush.msrb.mxu0 %v20194_v58 }
 0xb55   :  { %12099 = vmatpush.msra.mxu2 %v20173_v52 }
 0xb56   :  { %12191 = vmatpush.msra.mxu3 %v12190_v19  ;;  %v12407_v19 = vld [vmem:[%s20371_s11 + $0x28] sm:$0xff] }
 0xb57   :  { %12101 = vmatpush.msra.mxu2 %v20175_v47 }
 0xb59   :  { %12103 = vmatpush.msra.mxu2 %v20180_v0 }
 0xb5b   :  { %12303 = vmatpush.msrb.mxu2 %v12116_v10 }
 0xb5d   :  { %12307 = vmatpush.msrb.mxu2 %v12122_v4 }
 0xb5f   :  { %12311 = vmatpush.msrb.mxu2 %v12128_v16 }
 0xb61   :  { %12315 = vmatpush.msrb.mxu2 %v12134_v6 }
 0xb63   :  { %12319 = vmatpush.msrb.mxu2 %v12140_v53 }
 0xb65   :  { %12323 = vmatpush.msrb.mxu2 %v12146_v18 }
 0xb67   :  { %12327 = vmatpush.msrb.mxu2 %v12152_v5 }
 0xb69   :  { %12331 = vmatpush.msrb.mxu2 %v12158_v45 }
 0xb6b   :  { %12335 = vmatpush.msrb.mxu2 %v12164_v57 }
 0xb6d   :  { %12339 = vmatpush.msrb.mxu2 %v12170_v12  ;;  %v12764_v12 = vld [vmem:[%s20368_s8] ss:$0 sm:$0xff] }
 0xb6e   :  { %v11392_v9 = vpop.f32.mrf.mxu1 }
 0xb6f   :  { %12343 = vmatpush.msrb.mxu2 %v12176_v25 }
 0xb71   :  { %12347 = vmatpush.msrb.mxu2 %v12182_v29 }
 0xb73   :  { %12351 = vmatpush.msrb.mxu2 %v12188_v40 }
 0xb74   :  { %v20052_v33 = vpop.f32.mrf.mxu3 }
 0xb75   :  { %12355 = vmatpush.msrb.mxu2 %v12194_v37 }
 0xb77   :  { %12359 = vmatpush.msrb.mxu2 %v12200_v20 }
 0xb78   :  { %v11341_v61 = vpop.f32.mrf.mxu0  ;;  %v11521_v22 = vpop.f32.mrf.mxu1 }
 0xb7c   :  { %v20042_v31 = vpop.f32.mrf.mxu2  ;;  %v20141_v55 = vpop.f32.mrf.mxu3 }
 0xb7d   :  { %v11173_v15 = vadd.f32 %v20052_v33, %v20042_v31  ;;  %v12196_v31 = vand.u32 4294901760, %v12195_v13 }
 0xb7f   :  { %12197 = vmatpush.msra.mxu3 %v12196_v31  ;;  %v20309_v31 = vand.u32 4294901760, %v12407_v19 }
 0xb81   :  { %12203 = vmatpush.msra.mxu3 %v12202_v3  ;;  %v12404_v3 = vld [vmem:[%s20371_s11 + $0x10] sm:$0xff] }
 0xb82   :  { %v11494_v33 = vpop.f32.mrf.mxu0 }
 0xb83   :  { %12367 = vmatpush.msrb.mxu3 %v19993_v50  ;;  %v11714_v50 = vpop.f32.mrf.mxu1 }
 0xb85   :  { %12369 = vmatpush.msrb.mxu3 %v20008_v27 }
 0xb86   :  { %v20126_v14 = vpop.f32.mrf.mxu2 }
 0xb87   :  { %v11301_v32 = vpop.f32.mrf.mxu3  ;;  %v11207_v46 = vadd.f32 %v20126_v14, %v11173_v15  ;;  %12371 = vmatpush.msrb.mxu3 %v20022_v23 }
 0xb89   :  { %v11236_v14 = vadd.f32 %v20141_v55, %v11207_v46  ;;  %12373 = vmatpush.msrb.mxu3 %v20024_v54  ;;  %v12405_v46 = vld [vmem:[%s20371_s11 + $0x18] sm:$0xff] }
 0xb8b   :  { %12375 = vmatpush.msrb.mxu3 %v20026_v21 }
 0xb8d   :  { %v11685_v36 = vpop.f32.mrf.mxu0  ;;  %12377 = vmatpush.msrb.mxu3 %v20073_v38 }
 0xb8e   :  { %v11911_v53 = vpop.f32.mrf.mxu1 }
 0xb8f   :  { %12379 = vmatpush.msrb.mxu3 %v20075_v8 }
 0xb91   :  { %12381 = vmatpush.msrb.mxu3 %v20087_v2 }
 0xb92   :  { %v11274_v7 = vpop.f32.mrf.mxu2  ;;  %v11455_v49 = vpop.f32.mrf.mxu3 }
 0xb93   :  { %v11275_v24 = vadd.f32 %v11274_v7, %v11236_v14  ;;  %12383 = vmatpush.msrb.mxu3 %v20089_v59  ;;  %v20318_v14 = vand.u32 4294901760, %v12404_v3 }
 0xb95   :  { %v11302_v10 = vadd.f32 %v11301_v32, %v11275_v24  ;;  %12385 = vmatpush.msrb.mxu3 %v20102_v11 }
 0xb97   :  { %v11342_v62 = vadd.f32 %v11341_v61, %v11302_v10  ;;  %v11860_v21 = vpop.f32.mrf.mxu0  ;;  %12387 = vmatpush.msrb.mxu3 %v20111_v34  ;;  %v20325_v10 = vsub.f32 %v12404_v3, %v20318_v14 }
 0xb98   :  { %v11912_v35 = vadd.f32 %v11911_v53, %v11860_v21  ;;  %v12403_v53 = vld [vmem:[%s20371_s11 + $0x8] sm:$0xff] }
 0xb99   :  { %v11393_v27 = vadd.f32 %v11392_v9, %v11342_v62  ;;  %12389 = vmatpush.msrb.mxu3 %v20171_v44  ;;  %v12040_v57 = vpop.f32.mrf.mxu1  ;;  %v20282_v9 = vand.u32 4294901760, %v12408_v28 }
 0xb9b   :  { %12391 = vmatpush.msrb.mxu3 %v20173_v52  ;;  %v20287_v29 = vsub.f32 %v12408_v28, %v20282_v9 }
 0xb9c   :  { %v11426_v43 = vpop.f32.mrf.mxu2 }
 0xb9d   :  { %v11427_v60 = vadd.f32 %v11426_v43, %v11393_v27  ;;  %12393 = vmatpush.msrb.mxu3 %v20175_v47  ;;  %v12470_v37 = vand.u32 4294901760, %v20287_v29  ;;  %v20313_v43 = vand.u32 4294901760, %v12405_v46 }
 0xb9f   :  { %v11651_v56 = vpop.f32.mrf.mxu3  ;;  %v11456_v38 = vadd.f32 %v11455_v49, %v11427_v60  ;;  %12395 = vmatpush.msrb.mxu3 %v20180_v0  ;;  %v12409_v0 = vld [vmem:[%s20371_s11 + $0x38] sm:$0xf]  ;;  %v12471_v41 = vsub.f32 %v20287_v29, %v12470_v37  ;;  %v12487_v24 = vsub.f32 %v12405_v46, %v20313_v43 }
 0xba0   :  { %v12419_v58 = vsel %vm180_vm0, %v12409_v0, 0 }
 0xba1   :  { %v11495_v59 = vadd.f32 %v11494_v33, %v11456_v38  ;;  %v20284_v32 = vand.u32 4294901760, %v12419_v58  ;;  %v12472_v63 = vand.u32 4294901760, %v12471_v41  ;;  %v20311_v33 = vand.u32 4294901760, %v12406_v42  ;;  %v12402_v38 = vld [vmem:[%s20371_s11] sm:$0xff] }
 0xba2   :  { %v12488_v62 = vand.u32 4294901760, %v12487_v24 }
 0xba3   :  { %v12013_v11 = vpop.f32.mrf.mxu0  ;;  %v11522_v48 = vadd.f32 %v11521_v22, %v11495_v59  ;;  %v20290_v40 = vsub.f32 %v12419_v58, %v20284_v32  ;;  %12430 = vmatpush.msra.mxu0 %v20284_v32  ;;  %v12475_v22 = vsub.f32 %v12407_v19, %v20309_v31  ;;  %v12481_v49 = vsub.f32 %v12406_v42, %v20311_v33  ;;  %v12765_v59 = vld [vmem:[%s20370_s10] ss:$0 sm:$0xff] }
 0xba5   :  { %v12464_v20 = vand.u32 4294901760, %v20290_v40  ;;  %12432 = vmatpush.msra.mxu0 %v20282_v9 }
 0xba7   :  { %v11600_v4 = vpop.f32.mrf.mxu2  ;;  %v12465_v13 = vsub.f32 %v20290_v40, %v12464_v20  ;;  %12434 = vmatpush.msra.mxu0 %v20309_v31 }
 0xba8   :  { %v11652_v23 = vadd.f32 %v11651_v56, %v11600_v4  ;;  %v12482_v4 = vand.u32 4294901760, %v12481_v49 }
 0xba9   :  { %v12466_v15 = vand.u32 4294901760, %v12465_v13  ;;  %12436 = vmatpush.msra.mxu0 %v20311_v33 }
 0xbaa   :  { %v11686_v16 = vadd.f32 %v11685_v36, %v11652_v23  ;;  %v12476_v36 = vand.u32 4294901760, %v12475_v22  ;;  %v12483_v27 = vsub.f32 %v12481_v49, %v12482_v4  ;;  %v12489_v23 = vsub.f32 %v12487_v24, %v12488_v62 }
 0xbab   :  { %v11780_v6 = vpop.f32.mrf.mxu3  ;;  %12467 = vmatpush.msra.mxu1 %v12466_v15  ;;  %12438 = vmatpush.msra.mxu0 %v20313_v43 }
 0xbac   :  { %v11715_v8 = vadd.f32 %v11714_v50, %v11686_v16  ;;  %v12494_v50 = vand.u32 4294901760, %v20325_v10  ;;  %v12477_v56 = vsub.f32 %v12475_v22, %v12476_v36  ;;  %v12484_v60 = vand.u32 4294901760, %v12483_v27 }
 0xbad   :  { %12473 = vmatpush.msra.mxu1 %v12472_v63  ;;  %12440 = vmatpush.msra.mxu0 %v20318_v14  ;;  %v12490_v21 = vand.u32 4294901760, %v12489_v23 }
 0xbae   :  { %v12495_v16 = vsub.f32 %v20325_v10, %v12494_v50 }
 0xbb3   :  { %v11753_v54 = vpop.f32.mrf.mxu2 }
 0xbb4   :  { %v11754_v2 = vadd.f32 %v11753_v54, %v11715_v8  ;;  %v12478_v54 = vand.u32 4294901760, %v12477_v56  ;;  %v12441_v8 = vand.u32 4294901760, %v12403_v53 }
 0xbb6   :  { %v11781_v18 = vadd.f32 %v11780_v6, %v11754_v2  ;;  %12479 = vmatpush.msra.mxu1 %v12478_v54  ;;  %v12496_v6 = vand.u32 4294901760, %v12495_v16  ;;  %v12499_v2 = vsub.f32 %v12403_v53, %v12441_v8  ;;  %12442 = vmatpush.msra.mxu0 %v12441_v8 }
 0xbb7   :  { %v11974_v26 = vpop.f32.mrf.mxu3 }
 0xbb8   :  { %v11783_v34 = vadd.f32 %v11781_v18, %v11522_v48  ;;  %12485 = vmatpush.msra.mxu1 %v12484_v60 }
 0xbba   :  { %12491 = vmatpush.msra.mxu1 %v12490_v21 }
 0xbbc   :  { %12497 = vmatpush.msra.mxu1 %v12496_v6 }
 0xbbf   :  { %v11945_v30 = vpop.f32.mrf.mxu2 }
 0xbc0   :  { %v11946_v1 = vadd.f32 %v11945_v30, %v11912_v35  ;;  %v12443_v35 = vand.u32 4294901760, %v12402_v38 }
 0xbc2   :  { %v11975_v5 = vadd.f32 %v11974_v26, %v11946_v1  ;;  %v12505_v30 = vsub.f32 %v12402_v38, %v12443_v35  ;;  %v12500_v1 = vand.u32 4294901760, %v12499_v2  ;;  %12444 = vmatpush.msra.mxu0 %v12443_v35 }
 0xbc4   :  { %v12014_v45 = vadd.f32 %v12013_v11, %v11975_v5  ;;  %v12506_v26 = vand.u32 4294901760, %v12505_v30  ;;  %v12501_v18 = vsub.f32 %v12499_v2, %v12500_v1 }
 0xbc6   :  { %v12041_v39 = vadd.f32 %v12040_v57, %v12014_v45  ;;  %v12507_v5 = vsub.f32 %v12505_v30, %v12506_v26  ;;  %v12502_v57 = vand.u32 4294901760, %v12501_v18 }
 0xbc8   :  { %v12043_v55 = vadd.f32 %v12041_v39, %v11783_v34  ;;  %v12508_v34 = vand.u32 4294901760, %v12507_v5  ;;  %12503 = vmatpush.msra.mxu1 %v12502_v57 }
 0xbca   :  { %v12048_v25 = vadd.f32 %v12764_v12, %v12043_v55  ;;  %12509 = vmatpush.msra.mxu1 %v12508_v34 }
 0xbcc   :  { %v12049_v44 = vmax.f32 %v12048_v25, 0.0 }
 0xbce   :  { %v12071_v61 = vsel %vm12069_vm13, %v12049_v44, 0 }
 0xbcf   :  { %v12104_v52 = vand.u32 4294901760, %v12071_v61 }
 0xbd1   :  { %12205 = vmatmul.f32.vlgmr.msra.gmra.mxu3 %v12104_v52  ;;  %v12105_v7 = vsub.f32 %v12071_v61, %v12104_v52 }
 0xbd2   :  { %12638 = vmatpush.msra.mxu3 %v20284_v32 }
 0xbd3   :  { %12257 = vmatmul.f32.vlgmr.msrb.gmra.mxu0 %v12105_v7  ;;  %v12106_v51 = vand.u32 4294901760, %v12105_v7 }
 0xbd4   :  { %12640 = vmatpush.msra.mxu3 %v20282_v9  ;;  %12525 = vmatpush.msrb.mxu0 %v20290_v40 }
 0xbd5   :  { %12295 = vmatmul.f32.vlgmr.msrb.gmra.mxu1 %v12106_v51  ;;  %v12107_v47 = vsub.f32 %v12105_v7, %v12106_v51 }
 0xbd6   :  { %12642 = vmatpush.msra.mxu3 %v20309_v31  ;;  %12528 = vmatpush.msrb.mxu0 %v20287_v29  ;;  %v12766_v29 = vld [vmem:[%s20372_s12] ss:$0 sm:$0xff] }
 0xbd7   :  { %v12108_v17 = vand.u32 4294901760, %v12107_v47  ;;  %12562 = vmatpush.msrb.mxu1 %v20284_v32 }
 0xbd8   :  { %12644 = vmatpush.msra.mxu3 %v20311_v33  ;;  %12531 = vmatpush.msrb.mxu0 %v12475_v22 }
 0xbd9   :  { %12109 = vmatmul.f32.vlgmr.msra.gmra.mxu2 %v12108_v17  ;;  %12397 = vmatmul.f32.vlgmr.msrb.gmra.mxu3 %v12104_v52 }
 0xbda   :  { %12595 = vmatpush.msra.mxu2 %v12464_v20  ;;  %12646 = vmatpush.msra.mxu3 %v20313_v43 }
 0xbdb   :  { %12534 = vmatpush.msrb.mxu0 %v12481_v49  ;;  %12564 = vmatpush.msrb.mxu1 %v20282_v9 }
 0xbdc   :  { %12599 = vmatpush.msra.mxu2 %v12470_v37  ;;  %12648 = vmatpush.msra.mxu3 %v20318_v14 }
 0xbdd   :  { %12537 = vmatpush.msrb.mxu0 %v12487_v24  ;;  %12566 = vmatpush.msrb.mxu1 %v20309_v31 }
 0xbde   :  { %12603 = vmatpush.msra.mxu2 %v12476_v36  ;;  %12650 = vmatpush.msra.mxu3 %v12441_v8 }
 0xbdf   :  { %12540 = vmatpush.msrb.mxu0 %v20325_v10  ;;  %12568 = vmatpush.msrb.mxu1 %v20311_v33 }
 0xbe0   :  { %12607 = vmatpush.msra.mxu2 %v12482_v4  ;;  %12652 = vmatpush.msra.mxu3 %v12443_v35 }
 0xbe1   :  { %12361 = vmatmul.f32.vlgmr.msrb.gmra.mxu2 %v12104_v52  ;;  %12543 = vmatpush.msrb.mxu0 %v12499_v2 }
 0xbe2   :  { %12611 = vmatpush.msra.mxu2 %v12488_v62  ;;  %12570 = vmatpush.msrb.mxu1 %v20313_v43 }
 0xbe3   :  { %12546 = vmatpush.msrb.mxu0 %v12505_v30 }
 0xbe4   :  { %12615 = vmatpush.msra.mxu2 %v12494_v50  ;;  %12572 = vmatpush.msrb.mxu1 %v20318_v14 }
 0xbe6   :  { %12619 = vmatpush.msra.mxu2 %v12500_v1  ;;  %12574 = vmatpush.msrb.mxu1 %v12441_v8 }
 0xbe8   :  { %12623 = vmatpush.msra.mxu2 %v12506_v26  ;;  %12576 = vmatpush.msrb.mxu1 %v12443_v35 }
 0xc50   :  { %v12258_v12 = vpop.f32.mrf.mxu0 }
 0xc52   :  { %v12296_v25 = vpop.f32.mrf.mxu1 }
 0xc54   :  { %v12206_v11 = vpop.f32.mrf.mxu3 }
 0xc5c   :  { %v12110_v48 = vpop.f32.mrf.mxu2  ;;  %v12398_v7 = vpop.f32.mrf.mxu3 }
 0xc5d   :  { %v12111_v45 = vadd.f32 %v12765_v59, %v12110_v48 }
 0xc5f   :  { %v12207_v39 = vadd.f32 %v12206_v11, %v12111_v45 }
 0xc61   :  { %v12259_v55 = vadd.f32 %v12258_v12, %v12207_v39 }
 0xc63   :  { %v12297_v44 = vadd.f32 %v12296_v25, %v12259_v55 }
 0xc64   :  { %v12362_v61 = vpop.f32.mrf.mxu2 }
 0xc65   :  { %v12363_v52 = vadd.f32 %v12362_v61, %v12297_v44 }
 0xc67   :  { %v12399_v51 = vadd.f32 %v12398_v7, %v12363_v52 }
 0xc69   :  { %v12401_v47 = vmax.f32 %v12399_v51, 0.0 }
 0xc6b   :  { %v12416_v17 = vsel %vm12414_vm14, %v12401_v47, 0 }
 0xc6c   :  { %v12445_v0 = vand.u32 4294901760, %v12416_v17 }
 0xc6e   :  { %v12446_v28 = vsub.f32 %v12416_v17, %v12445_v0  ;;  %12511 = vmatmul.f32.vlgmr.msra.gmra.mxu1 %v12445_v0  ;;  %12625 = vmatmul.f32.vlgmr.msra.gmra.mxu2 %v12445_v0 }
 0xc6f   :  { %12654 = vmatmul.f32.vlgmr.msra.gmra.mxu3 %v12445_v0 }
 0xc70   :  { %v12447_v58 = vand.u32 4294901760, %v12446_v28 }
 0xc72   :  { %v12448_v9 = vsub.f32 %v12446_v28, %v12447_v58 }
 0xc74   :  { %v12449_v32 = vand.u32 4294901760, %v12448_v9 }
 0xc76   :  { %12450 = vmatmul.f32.vlgmr.msra.gmra.mxu0 %v12449_v32  ;;  %12580 = vmatmul.f32.vlgmr.msrb.gmra.mxu1 %v12447_v58 }
 0xc7e   :  { %12549 = vmatmul.f32.vlgmr.msrb.gmra.mxu0 %v12446_v28 }
 0xceb   :  { %v12512_v40 = vpop.f32.mrf.mxu1 }
 0xcf1   :  { %v12626_v42 = vpop.f32.mrf.mxu2 }
 0xcf2   :  { %v12655_v31 = vpop.f32.mrf.mxu3 }
 0xcf3   :  { %v12451_v37 = vpop.f32.mrf.mxu0  ;;  %v12581_v63 = vpop.f32.mrf.mxu1 }
 0xcf4   :  { %v12452_v20 = vadd.f32 %v12766_v29, %v12451_v37 }
 0xcf6   :  { %v12513_v41 = vadd.f32 %v12512_v40, %v12452_v20 }
 0xcfb   :  { %v12550_v13 = vpop.f32.mrf.mxu0 }
 0xcfc   :  { %v12551_v15 = vadd.f32 %v12550_v13, %v12513_v41 }
 0xcfe   :  { %v12582_v19 = vadd.f32 %v12581_v63, %v12551_v15 }
 0xd00   :  { %v12627_v46 = vadd.f32 %v12626_v42, %v12582_v19 }
 0xd02   :  { %v12656_v33 = vadd.f32 %v12655_v31, %v12627_v46 }
 0xd04   :  { %12659 = vst.msk [vmem:[#allocation9] sm:$0xf] %vm12658_vm15, %v12656_v33 }
 0xd05   :  { %12670 = dma.vmem_to_hbm [thread:$0]  %s12666_s3, 64, %s12668_s21, [#allocation6]  }
 0xd06   :  { %12900 = dma.done.wait [#allocation6], 64  }
 0xd07   :  { %12901 = vsyncadd [#allocation6], 4294967232 }
 0xd08   :  { %12675 = vsyncpa [#allocation5], 1 }
 0xd09   :  { %12676 = vsyncpa [#allocation8], 1 }
 0xd0a   :  { %12677 = vsyncpa [#allocation6], 1 }

</bundles_post_ra>
